<compile_context>
chip_gen: v5e
topology: v5e:2x2
jax: 0.10.0
libtpu: 0.0.40
codegen_flags: <defaults>
</compile_context>

<pallas_src>
import jax
import jax.numpy as jnp
from jax.experimental import pallas as pl
from jax.experimental.pallas import tpu as pltpu


# ----------------------------------------------------------------------------
# Fused trainable head: one grid step == one image.
#   emb_features : (nef, C6) @ (C6, HW6) -> (nef, HW6)        (1x1 conv, no bias)
#   emb_cnn_code : lane-reduce avg pool, then (1, C7) x (nef, C7)^T + b -> (1, nef)
# ----------------------------------------------------------------------------
def _cnn_encoder_head_kernel(x6e_ref, w_feat_ref, x7c_ref, w_code_ref, b_ref,
                             feat_ref, code_ref):
    # x6e_ref : (1, C6, HW6)   Mixed_6e map (channels contracted, HW on lanes)
    # w_feat  : (nef, C6)      emb_features weight, resident across grid steps
    # x7c_ref : (1, C7, HW7)   Mixed_7c map
    # w_code  : (nef, C7)      emb_cnn_code Linear weight, PyTorch (out, in) layout
    # b_ref   : (1, nef)       emb_cnn_code bias
    # feat_ref: (1, nef, HW6)  lane-dense feature output
    # code_ref: (1, 1, nef)    lane-dense code output

    # emb_features: 1x1 conv == single full-depth MXU matmul.
    feat_ref[0] = jnp.dot(
        w_feat_ref[...], x6e_ref[0],
        preferred_element_type=jnp.float32).astype(feat_ref.dtype)

    # emb_cnn_code: avg_pool2d(k=8) == lane reduce (XLU), then Linear == MXU matmul
    # contracting the LAST axis of both operands (pooled @ W.T) -> no transposed
    # weight copy is materialized anywhere.
    inv_hw = 1.0 / x7c_ref.shape[-1]                       # static Python float
    pooled = jnp.sum(x7c_ref[...], axis=-1) * inv_hw       # (1, C7)
    code = jax.lax.dot_general(
        pooled, w_code_ref[...],
        dimension_numbers=(((1,), (1,)), ((), ())),        # contract C7 with C7
        preferred_element_type=jnp.float32)                # (1, nef)
    code_ref[0] = (code + b_ref[...]).astype(code_ref.dtype)


def cnn_encoder_head(mixed_6e, mixed_7c, emb_features_w, emb_cnn_code_w,
                     emb_cnn_code_b):
    """Tail of CNN_ENCODER.forward: returns (features, cnn_code).

    mixed_6e        : (N, 768, 17, 17)   backbone Mixed_6e output
    mixed_7c        : (N, 2048, 8, 8)    backbone Mixed_7c output
    emb_features_w  : (nef, 768, 1, 1)   PyTorch conv1x1 weight (no bias)
    emb_cnn_code_w  : (nef, 2048)        PyTorch Linear weight
    emb_cnn_code_b  : (nef,)             PyTorch Linear bias
    """
    N, C6, H6, W6 = mixed_6e.shape
    N7, C7, H7, W7 = mixed_7c.shape
    assert N7 == N
    nef = emb_features_w.shape[0]
    HW6, HW7 = H6 * W6, H7 * W7

    # Contiguous reshapes only (no transpose / pad HBM round trips).
    x6e = mixed_6e.reshape(N, C6, HW6)
    x7c = mixed_7c.reshape(N, C7, HW7)
    w_feat = emb_features_w.reshape(nef, C6)
    w_code = emb_cnn_code_w                     # kept in PyTorch (out, in) layout
    b2 = emb_cnn_code_b.reshape(1, nef)

    feat, code = pl.pallas_call(
        _cnn_encoder_head_kernel,
        out_shape=(
            jax.ShapeDtypeStruct((N, nef, HW6), mixed_6e.dtype),
            jax.ShapeDtypeStruct((N, 1, nef), mixed_7c.dtype),
        ),
        grid_spec=pltpu.PrefetchScalarGridSpec(
            num_scalar_prefetch=0,
            grid=(N,),
            in_specs=[
                pl.BlockSpec((1, C6, HW6), lambda n: (n, 0, 0)),
                pl.BlockSpec((nef, C6), lambda n: (0, 0)),      # resident weight
                pl.BlockSpec((1, C7, HW7), lambda n: (n, 0, 0)),
                pl.BlockSpec((nef, C7), lambda n: (0, 0)),      # resident weight
                pl.BlockSpec((1, nef), lambda n: (0, 0)),       # resident bias
            ],
            out_specs=[
                pl.BlockSpec((1, nef, HW6), lambda n: (n, 0, 0)),
                pl.BlockSpec((1, 1, nef), lambda n: (n, 0, 0)),
            ],
        ),
        compiler_params=pltpu.CompilerParams(
            dimension_semantics=("parallel",)),
    )(x6e, w_feat, x7c, w_code, b2)

    return feat.reshape(N, nef, H6, W6), code.reshape(N, nef)


if __name__ == "__main__":
    key = jax.random.PRNGKey(0)
    N, nef = 2, 256
    k1, k2, k3, k4, k5 = jax.random.split(key, 5)

    # Synthetic stand-ins for the frozen Inception-v3 feature maps:
    #   Mixed_6e output -> (N, 768, 17, 17)  (input of emb_features)
    #   Mixed_7c output -> (N, 2048, 8, 8)   (input of avg_pool + emb_cnn_code)
    mixed_6e = jax.random.normal(k1, (N, 768, 17, 17), dtype=jnp.float32)
    mixed_7c = jax.random.normal(k2, (N, 2048, 8, 8), dtype=jnp.float32)

    # Trainable head weights, PyTorch layouts, uniform(-0.1, 0.1) like the module init.
    w_feat = jax.random.uniform(k3, (nef, 768, 1, 1), jnp.float32, -0.1, 0.1)
    w_code = jax.random.uniform(k4, (nef, 2048), jnp.float32, -0.1, 0.1)
    b_code = jax.random.uniform(k5, (nef,), jnp.float32, -0.1, 0.1)

    head = jax.jit(cnn_encoder_head)
    features, cnn_code = head(mixed_6e, mixed_7c, w_feat, w_code, b_code)
    features = jax.block_until_ready(features)
    cnn_code = jax.block_until_ready(cnn_code)

    assert features.shape == (N, nef, 17, 17)
    assert cnn_code.shape == (N, nef)

    # Reference: same semantics via XLA.
    ref_feat = jax.lax.conv_general_dilated(
        mixed_6e, w_feat, window_strides=(1, 1), padding="VALID",
        dimension_numbers=("NCHW", "OIHW", "NCHW"),
        precision=jax.lax.Precision.HIGHEST)
    pooled = jnp.mean(mixed_7c.reshape(N, 2048, -1), axis=-1)
    ref_code = jnp.dot(pooled, w_code.T,
                       precision=jax.lax.Precision.HIGHEST) + b_code

    assert jnp.allclose(features, ref_feat, atol=1e-3, rtol=1e-3)
    assert jnp.allclose(cnn_code, ref_code, atol=1e-3, rtol=1e-3)

    print("KERNEL_OK")
</pallas_src>

<mosaic_0001>
module attributes {stable_mosaic.version = 11 : i64} {
  func.func @_cnn_encoder_head_kernel(%arg0: i32, %arg1: memref<1x768x289xf32, #tpu.memory_space<vmem>>, %arg2: memref<256x768xf32, #tpu.memory_space<vmem>>, %arg3: memref<1x2048x64xf32, #tpu.memory_space<vmem>>, %arg4: memref<256x2048xf32, #tpu.memory_space<vmem>>, %arg5: memref<1x256xf32, #tpu.memory_space<vmem>>, %arg6: memref<1x256x289xf32, #tpu.memory_space<vmem>>, %arg7: memref<1x1x256xf32, #tpu.memory_space<vmem>>) attributes {dimension_semantics = [#tpu.dimension_semantics<parallel>], iteration_bounds = array<i64: 2>, scalar_prefetch = 0 : i64, scratch_operands = 0 : i64, tpu.core_type = #tpu.core_type<tc>, window_params = [{transform_indices = @transform_0, window_bounds = array<i64: 1, 768, 289>}, {pipeline_mode = #tpu.pipeline_mode<synchronous>, transform_indices = @transform_1, window_bounds = array<i64: 256, 768>}, {transform_indices = @transform_2, window_bounds = array<i64: 1, 2048, 64>}, {pipeline_mode = #tpu.pipeline_mode<synchronous>, transform_indices = @transform_3, window_bounds = array<i64: 256, 2048>}, {pipeline_mode = #tpu.pipeline_mode<synchronous>, transform_indices = @transform_4, window_bounds = array<i64: 1, 256>}, {transform_indices = @transform_5, window_bounds = array<i64: 1, 256, 289>}, {transform_indices = @transform_6, window_bounds = array<i64: 1, 1, 256>}]} {
    %c0 = arith.constant 0 : index
    %c0_0 = arith.constant 0 : index
    %0 = vector.load %arg2[%c0, %c0_0] : memref<256x768xf32, #tpu.memory_space<vmem>>, vector<256x768xf32>
    %c0_1 = arith.constant 0 : index
    %c0_2 = arith.constant 0 : index
    %c0_3 = arith.constant 0 : index
    %1 = vector.load %arg1[%c0_1, %c0_2, %c0_3] : memref<1x768x289xf32, #tpu.memory_space<vmem>>, vector<1x768x289xf32>
    %2 = vector.shape_cast %1 : vector<1x768x289xf32> to vector<768x289xf32>
    %cst = arith.constant dense<0.000000e+00> : vector<256x289xf32>
    %3 = tpu.matmul %0, %2, %cst {dimension_numbers = #tpu.dot_dimension_numbers<[1], [0], [0], [1], [0, 0, 1, 1], [], []>} : vector<256x768xf32>, vector<768x289xf32>, vector<256x289xf32> -> vector<256x289xf32>
    %c0_4 = arith.constant 0 : index
    %c0_5 = arith.constant 0 : index
    %c0_6 = arith.constant 0 : index
    %4 = vector.load %arg6[%c0_4, %c0_5, %c0_6] : memref<1x256x289xf32, #tpu.memory_space<vmem>>, vector<1x256x289xf32>
    %5 = vector.shape_cast %4 : vector<1x256x289xf32> to vector<256x289xf32>
    %6 = vector.shape_cast %3 : vector<256x289xf32> to vector<1x256x289xf32>
    tpu.vector_store %arg6[%c0_4, %c0_5, %c0_6], %6 {strides = array<i32>} : memref<1x256x289xf32, #tpu.memory_space<vmem>>, vector<1x256x289xf32>,
    %c0_7 = arith.constant 0 : index
    %c0_8 = arith.constant 0 : index
    %c0_9 = arith.constant 0 : index
    %7 = vector.load %arg3[%c0_7, %c0_8, %c0_9] : memref<1x2048x64xf32, #tpu.memory_space<vmem>>, vector<1x2048x64xf32>
    %cst_10 = arith.constant dense<0.000000e+00> : vector<1x2048xf32>
    %8 = vector.multi_reduction <add>, %7, %cst_10 [2] : vector<1x2048x64xf32> to vector<1x2048xf32>
    %cst_11 = arith.constant 1.562500e-02 : f32
    %9 = vector.broadcast %cst_11 : f32 to vector<1x2048xf32>
    %10 = arith.mulf %8, %9 : vector<1x2048xf32>
    %c0_12 = arith.constant 0 : index
    %c0_13 = arith.constant 0 : index
    %11 = vector.load %arg4[%c0_12, %c0_13] : memref<256x2048xf32, #tpu.memory_space<vmem>>, vector<256x2048xf32>
    %cst_14 = arith.constant dense<0.000000e+00> : vector<1x256xf32>
    %12 = tpu.matmul %10, %11, %cst_14 {dimension_numbers = #tpu.dot_dimension_numbers<[1], [1], [0], [0], [0, 0, 1, 0], [], []>} : vector<1x2048xf32>, vector<256x2048xf32>, vector<1x256xf32> -> vector<1x256xf32>
    %c0_15 = arith.constant 0 : index
    %c0_16 = arith.constant 0 : index
    %13 = vector.load %arg5[%c0_15, %c0_16] : memref<1x256xf32, #tpu.memory_space<vmem>>, vector<1x256xf32>
    %14 = arith.addf %12, %13 : vector<1x256xf32>
    %c0_17 = arith.constant 0 : index
    %c0_18 = arith.constant 0 : index
    %c0_19 = arith.constant 0 : index
    %15 = vector.load %arg7[%c0_17, %c0_18, %c0_19] : memref<1x1x256xf32, #tpu.memory_space<vmem>>, vector<1x1x256xf32>
    %16 = vector.shape_cast %15 : vector<1x1x256xf32> to vector<1x256xf32>
    %17 = vector.shape_cast %14 : vector<1x256xf32> to vector<1x1x256xf32>
    tpu.vector_store %arg7[%c0_17, %c0_18, %c0_19], %17 {strides = array<i32>} : memref<1x1x256xf32, #tpu.memory_space<vmem>>, vector<1x1x256xf32>,
    return
  }
  func.func @transform_0(%arg0: i32) -> (i32, i32, i32) {
    %c0_i32 = arith.constant 0 : i32
    %c0_i32_0 = arith.constant 0 : i32
    %c0_i32_1 = arith.constant 0 : i32
    return %arg0, %c0_i32, %c0_i32_0 : i32, i32, i32
  }
  func.func @transform_1(%arg0: i32) -> (i32, i32) {
    %c0_i32 = arith.constant 0 : i32
    %c0_i32_0 = arith.constant 0 : i32
    %c0_i32_1 = arith.constant 0 : i32
    return %c0_i32, %c0_i32_0 : i32, i32
  }
  func.func @transform_2(%arg0: i32) -> (i32, i32, i32) {
    %c0_i32 = arith.constant 0 : i32
    %c0_i32_0 = arith.constant 0 : i32
    %c0_i32_1 = arith.constant 0 : i32
    return %arg0, %c0_i32, %c0_i32_0 : i32, i32, i32
  }
  func.func @transform_3(%arg0: i32) -> (i32, i32) {
    %c0_i32 = arith.constant 0 : i32
    %c0_i32_0 = arith.constant 0 : i32
    %c0_i32_1 = arith.constant 0 : i32
    return %c0_i32, %c0_i32_0 : i32, i32
  }
  func.func @transform_4(%arg0: i32) -> (i32, i32) {
    %c0_i32 = arith.constant 0 : i32
    %c0_i32_0 = arith.constant 0 : i32
    %c0_i32_1 = arith.constant 0 : i32
    return %c0_i32, %c0_i32_0 : i32, i32
  }
  func.func @transform_5(%arg0: i32) -> (i32, i32, i32) {
    %c0_i32 = arith.constant 0 : i32
    %c0_i32_0 = arith.constant 0 : i32
    %c0_i32_1 = arith.constant 0 : i32
    return %arg0, %c0_i32, %c0_i32_0 : i32, i32, i32
  }
  func.func @transform_6(%arg0: i32) -> (i32, i32, i32) {
    %c0_i32 = arith.constant 0 : i32
    %c0_i32_0 = arith.constant 0 : i32
    %c0_i32_1 = arith.constant 0 : i32
    return %arg0, %c0_i32, %c0_i32_0 : i32, i32, i32
  }
}

</mosaic_0001>

<bundles_post_ra>
// kernel: cnn_encoder_head.1
= control target key start
LH: loop header
LB: loop body
LE: loop exit
PB: predicated region body
PF: predicated region fallthrough
CT: control target
= control target key end

     0   :  { %s6688_s21 = smov 0   ;;  %s12746_s0 = inlined_call_operand.vmem [shape: f32[2,768,289], index: 0, kind: input, shape index: {}]   ;;  %s12747_s1 = inlined_call_operand.vmem [shape: f32[256,768], index: 1, kind: input, shape index: {}]   ;;  %s12748_s2 = inlined_call_operand.vmem [shape: f32[2,2048,64], index: 2, kind: input, shape index: {}]   ;;  %s12749_s3 = inlined_call_operand.vmem [shape: f32[256,2048], index: 3, kind: input, shape index: {}]   ;;  %s12750_s4 = inlined_call_operand.vmem [shape: f32[1,256], index: 4, kind: input, shape index: {}]   ;;  %s12751_s5 = inlined_call_operand.vmem [shape: f32[2,256,289], index: 5, kind: output, shape index: {0}]   ;;  %s12752_s6 = inlined_call_operand.vmem [shape: f32[2,1,256], index: 6, kind: output, shape index: {1}]  }
   0x1 LB: > { %s6242_s22 = sadd.s32 4294967295, %s6651_s21   ;;  %p6246_p0 = scmp.ge.s32.totalorder %s6651_s21, 1  ;;  %s6651_s21 = sphi %s6688_s21, %s17_s21  }
   0x2   : > { %p225_p1 = scmp.lt.s32.totalorder %s6651_s21, 3 }
   0x4   : > { %p226_p2 = pnand %p6246_p0, %p225_p1 }
   0x6   : > { %229 = sbr.rel (%p226_p2) target bundleno = 1734 (0x6c6), region = 40 }
   0xb   : > { %p264_p3 = scmp.lt.s32.totalorder %s6242_s22, 1  ;;  %vm3150_vm0 = vcmask 523264   ;;  %vm4949_vm1 = vcmask 130112   ;;  %vm4953_vm2 = vcmask 195712   ;;  %vm4957_vm3 = vcmask 261312  }
   0xc   : > { %vm4961_vm4 = vcmask 326912   ;;  %vm4965_vm5 = vcmask 392512   ;;  %vm4969_vm6 = vcmask 458112   ;;  %vm4973_vm7 = vcmask 523712  }
   0xd   : > { %s13078_s22 = smov (!%p264_p3, %s6242_s22), 1  ;;  %vm4977_vm8 = vcmask 589312   ;;  %vm4981_vm9 = vcmask 654912   ;;  %vm4985_vm10 = vcmask 720512   ;;  %vm4989_vm11 = vcmask 786112  }
   0xe   : > { %s6255_s23 = smul.u32 2304, %s13078_s22  ;;  %s6254_s9 = sshll.u32 %s13078_s22, 11  ;;  %vm4993_vm12 = vcmask 851712   ;;  %vm4997_vm13 = vcmask 917312   ;;  %vm5001_vm14 = vcmask 982912   ;;  %vm5005_vm15 = vcmask 1048512  }
   0xf   : > { %s7346_s12 = scalar_lea.vmem %s12748_s2, %s6254_s9  ;;  %s6256_s8 = smul.u32 768, %s13078_s22 }
  0x10   : > { %s6702_s26 = scalar_lea.vmem %s12746_s0, %s6255_s23  ;;  %s6251_s29 = sshll.u32 %s13078_s22, 1 }
  0x11   : > { %v520_v0 = vld [vmem:[%s6702_s26 + $0x168] sm:$0xff]  ;;  %v517_v4 = vld [vmem:[%s6702_s26 + $0x150] sm:$0xff]  ;;  %v514_v8 = vld [vmem:[%s6702_s26 + $0x138] sm:$0xff]  ;;  %s7551_s16 = scalar_lea.vmem %s12751_s5, %s6256_s8  ;;  %s282_s8 = scalar_lea.vmem %s12752_s6, %s6251_s29 }
  0x12   : > { %v568_v1 = vld [vmem:[%s6702_s26 + $0x2e8] sm:$0xff]  ;;  %763 = vmatpush.msra.mxu0 %v520_v0  ;;  %v565_v5 = vld [vmem:[%s6702_s26 + $0x2d0] sm:$0xff]  ;;  %v562_v9 = vld [vmem:[%s6702_s26 + $0x2b8] sm:$0xff] }
  0x13   : > { %v616_v2 = vld [vmem:[%s6702_s26 + $0x468] sm:$0xff]  ;;  %876 = vmatpush.msra.mxu1 %v568_v1  ;;  %v613_v6 = vld [vmem:[%s6702_s26 + $0x450] sm:$0xff]  ;;  %v610_v10 = vld [vmem:[%s6702_s26 + $0x438] sm:$0xff] }
  0x14   : > { %v664_v3 = vld [vmem:[%s6702_s26 + $0x5e8] sm:$0xff]  ;;  %989 = vmatpush.msra.mxu2 %v616_v2  ;;  %v661_v7 = vld [vmem:[%s6702_s26 + $0x5d0] sm:$0xff]  ;;  %764 = vmatpush.msra.mxu0 %v517_v4  ;;  %v658_v11 = vld [vmem:[%s6702_s26 + $0x5b8] sm:$0xff] }
  0x15   : > { %1102 = vmatpush.msra.mxu3 %v664_v3  ;;  %877 = vmatpush.msra.mxu1 %v565_v5  ;;  %v511_v12 = vld [vmem:[%s6702_s26 + $0x120] sm:$0xff]  ;;  %v508_v16 = vld [vmem:[%s6702_s26 + $0x108] sm:$0xff]  ;;  %v505_v20 = vld [vmem:[%s6702_s26 + $0xf0] sm:$0xff] }
  0x16   : > { %990 = vmatpush.msra.mxu2 %v613_v6  ;;  %v559_v13 = vld [vmem:[%s6702_s26 + $0x2a0] sm:$0xff]  ;;  %765 = vmatpush.msra.mxu0 %v514_v8  ;;  %v556_v17 = vld [vmem:[%s6702_s26 + $0x288] sm:$0xff]  ;;  %v553_v21 = vld [vmem:[%s6702_s26 + $0x270] sm:$0xff] }
  0x17   : > { %1103 = vmatpush.msra.mxu3 %v661_v7  ;;  %878 = vmatpush.msra.mxu1 %v562_v9  ;;  %v607_v14 = vld [vmem:[%s6702_s26 + $0x420] sm:$0xff]  ;;  %v604_v18 = vld [vmem:[%s6702_s26 + $0x408] sm:$0xff]  ;;  %v601_v22 = vld [vmem:[%s6702_s26 + $0x3f0] sm:$0xff] }
  0x18   : > { %v655_v15 = vld [vmem:[%s6702_s26 + $0x5a0] sm:$0xff]  ;;  %991 = vmatpush.msra.mxu2 %v610_v10  ;;  %766 = vmatpush.msra.mxu0 %v511_v12  ;;  %v652_v19 = vld [vmem:[%s6702_s26 + $0x588] sm:$0xff]  ;;  %v649_v23 = vld [vmem:[%s6702_s26 + $0x570] sm:$0xff] }
  0x19   : > { %1104 = vmatpush.msra.mxu3 %v658_v11  ;;  %879 = vmatpush.msra.mxu1 %v559_v13  ;;  %v502_v24 = vld [vmem:[%s6702_s26 + $0xd8] sm:$0xff]  ;;  %v499_v28 = vld [vmem:[%s6702_s26 + $0xc0] sm:$0xff]  ;;  %v496_v32 = vld [vmem:[%s6702_s26 + $0xa8] sm:$0xff] }
  0x1a   : > { %992 = vmatpush.msra.mxu2 %v607_v14  ;;  %767 = vmatpush.msra.mxu0 %v508_v16  ;;  %v550_v25 = vld [vmem:[%s6702_s26 + $0x258] sm:$0xff]  ;;  %v547_v29 = vld [vmem:[%s6702_s26 + $0x240] sm:$0xff]  ;;  %v544_v33 = vld [vmem:[%s6702_s26 + $0x228] sm:$0xff] }
  0x1b   : > { %1105 = vmatpush.msra.mxu3 %v655_v15  ;;  %880 = vmatpush.msra.mxu1 %v556_v17  ;;  %v598_v26 = vld [vmem:[%s6702_s26 + $0x3d8] sm:$0xff]  ;;  %v595_v30 = vld [vmem:[%s6702_s26 + $0x3c0] sm:$0xff]  ;;  %v592_v34 = vld [vmem:[%s6702_s26 + $0x3a8] sm:$0xff] }
  0x1c   : > { %993 = vmatpush.msra.mxu2 %v604_v18  ;;  %768 = vmatpush.msra.mxu0 %v505_v20  ;;  %v646_v27 = vld [vmem:[%s6702_s26 + $0x558] sm:$0xff]  ;;  %v643_v31 = vld [vmem:[%s6702_s26 + $0x540] sm:$0xff]  ;;  %v640_v35 = vld [vmem:[%s6702_s26 + $0x528] sm:$0xff] }
  0x1d   : > { %1106 = vmatpush.msra.mxu3 %v652_v19  ;;  %881 = vmatpush.msra.mxu1 %v553_v21  ;;  %v493_v36 = vld [vmem:[%s6702_s26 + $0x90] sm:$0xff]  ;;  %v490_v40 = vld [vmem:[%s6702_s26 + $0x78] sm:$0xff]  ;;  %v487_v44 = vld [vmem:[%s6702_s26 + $0x60] sm:$0xff] }
  0x1e   : > { %994 = vmatpush.msra.mxu2 %v601_v22  ;;  %769 = vmatpush.msra.mxu0 %v502_v24  ;;  %v541_v37 = vld [vmem:[%s6702_s26 + $0x210] sm:$0xff]  ;;  %v538_v41 = vld [vmem:[%s6702_s26 + $0x1f8] sm:$0xff]  ;;  %v535_v45 = vld [vmem:[%s6702_s26 + $0x1e0] sm:$0xff] }
  0x1f   : > { %1107 = vmatpush.msra.mxu3 %v649_v23  ;;  %882 = vmatpush.msra.mxu1 %v550_v25  ;;  %v589_v38 = vld [vmem:[%s6702_s26 + $0x390] sm:$0xff]  ;;  %v586_v42 = vld [vmem:[%s6702_s26 + $0x378] sm:$0xff]  ;;  %v583_v46 = vld [vmem:[%s6702_s26 + $0x360] sm:$0xff] }
  0x20   : > { %995 = vmatpush.msra.mxu2 %v598_v26  ;;  %770 = vmatpush.msra.mxu0 %v499_v28  ;;  %v637_v39 = vld [vmem:[%s6702_s26 + $0x510] sm:$0xff]  ;;  %v634_v43 = vld [vmem:[%s6702_s26 + $0x4f8] sm:$0xff]  ;;  %v631_v47 = vld [vmem:[%s6702_s26 + $0x4e0] sm:$0xff] }
  0x21   : > { %1108 = vmatpush.msra.mxu3 %v646_v27  ;;  %883 = vmatpush.msra.mxu1 %v547_v29  ;;  %v484_v48 = vld [vmem:[%s6702_s26 + $0x48] sm:$0xff]  ;;  %v481_v52 = vld [vmem:[%s6702_s26 + $0x30] sm:$0xff]  ;;  %v478_v56 = vld [vmem:[%s6702_s26 + $0x18] sm:$0xff] }
  0x22   : > { %996 = vmatpush.msra.mxu2 %v595_v30  ;;  %771 = vmatpush.msra.mxu0 %v496_v32  ;;  %v532_v49 = vld [vmem:[%s6702_s26 + $0x1c8] sm:$0xff]  ;;  %v529_v53 = vld [vmem:[%s6702_s26 + $0x1b0] sm:$0xff]  ;;  %v526_v57 = vld [vmem:[%s6702_s26 + $0x198] sm:$0xff] }
  0x23   : > { %1109 = vmatpush.msra.mxu3 %v643_v31  ;;  %884 = vmatpush.msra.mxu1 %v544_v33  ;;  %v580_v50 = vld [vmem:[%s6702_s26 + $0x348] sm:$0xff]  ;;  %v577_v54 = vld [vmem:[%s6702_s26 + $0x330] sm:$0xff]  ;;  %v574_v58 = vld [vmem:[%s6702_s26 + $0x318] sm:$0xff] }
  0x24   : > { %997 = vmatpush.msra.mxu2 %v592_v34  ;;  %772 = vmatpush.msra.mxu0 %v493_v36  ;;  %v628_v51 = vld [vmem:[%s6702_s26 + $0x4c8] sm:$0xff]  ;;  %v625_v55 = vld [vmem:[%s6702_s26 + $0x4b0] sm:$0xff]  ;;  %v622_v59 = vld [vmem:[%s6702_s26 + $0x498] sm:$0xff] }
  0x25   : > { %1110 = vmatpush.msra.mxu3 %v640_v35  ;;  %885 = vmatpush.msra.mxu1 %v541_v37  ;;  %v475_v60 = vld [vmem:[%s6702_s26] sm:$0xff]  ;;  %v6776_v1 = vld [vmem:[%s12747_s1 + $0x8] sm:$0xff]  ;;  %v285_v2 = vld [vmem:[%s12747_s1 + $0x10] sm:$0xff] }
  0x26   : > { %998 = vmatpush.msra.mxu2 %v589_v38  ;;  %773 = vmatpush.msra.mxu0 %v490_v40  ;;  %v523_v61 = vld [vmem:[%s6702_s26 + $0x180] sm:$0xff]  ;;  %v286_v3 = vld [vmem:[%s12747_s1 + $0x18] sm:$0xff]  ;;  %v6789_v4 = vld [vmem:[%s12747_s1 + $0x30] sm:$0xff] }
  0x27   : > { %1111 = vmatpush.msra.mxu3 %v637_v39  ;;  %886 = vmatpush.msra.mxu1 %v538_v41  ;;  %v571_v62 = vld [vmem:[%s6702_s26 + $0x300] sm:$0xff]  ;;  %v6794_v5 = vld [vmem:[%s12747_s1 + $0x38] sm:$0xff]  ;;  %v292_v7 = vld [vmem:[%s12747_s1 + $0x48] sm:$0xff] }
  0x28   : > { %999 = vmatpush.msra.mxu2 %v586_v42  ;;  %774 = vmatpush.msra.mxu0 %v487_v44  ;;  %v619_v63 = vld [vmem:[%s6702_s26 + $0x480] sm:$0xff]  ;;  %v296_v9 = vld [vmem:[%s12747_s1 + $0x68] sm:$0xff]  ;;  %v297_v10 = vld [vmem:[%s12747_s1 + $0x70] sm:$0xff] }
  0x29   : > { %1112 = vmatpush.msra.mxu3 %v634_v43  ;;  %887 = vmatpush.msra.mxu1 %v535_v45  ;;  %v6771_v0 = vld [vmem:[%s12747_s1] sm:$0xff]  ;;  %v298_v11 = vld [vmem:[%s12747_s1 + $0x78] sm:$0xff]  ;;  %v301_v12 = vld [vmem:[%s12747_s1 + $0x90] sm:$0xff] }
  0x2a   : > { %1000 = vmatpush.msra.mxu2 %v583_v46  ;;  %775 = vmatpush.msra.mxu0 %v484_v48  ;;  %v291_v6 = vld [vmem:[%s12747_s1 + $0x40] sm:$0xff]  ;;  %v302_v13 = vld [vmem:[%s12747_s1 + $0x98] sm:$0xff]  ;;  %v304_v15 = vld [vmem:[%s12747_s1 + $0xa8] sm:$0xff] }
  0x2b   : > { %1113 = vmatpush.msra.mxu3 %v631_v47  ;;  %888 = vmatpush.msra.mxu1 %v532_v49  ;;  %v295_v8 = vld [vmem:[%s12747_s1 + $0x60] sm:$0xff]  ;;  %v308_v17 = vld [vmem:[%s12747_s1 + $0xc8] sm:$0xff]  ;;  %v309_v18 = vld [vmem:[%s12747_s1 + $0xd0] sm:$0xff] }
  0x2c   : > { %1001 = vmatpush.msra.mxu2 %v580_v50  ;;  %776 = vmatpush.msra.mxu0 %v481_v52  ;;  %v303_v14 = vld [vmem:[%s12747_s1 + $0xa0] sm:$0xff]  ;;  %v310_v19 = vld [vmem:[%s12747_s1 + $0xd8] sm:$0xff]  ;;  %v313_v20 = vld [vmem:[%s12747_s1 + $0xf0] sm:$0xff] }
  0x2d   : > { %1114 = vmatpush.msra.mxu3 %v628_v51  ;;  %889 = vmatpush.msra.mxu1 %v529_v53  ;;  %v307_v16 = vld [vmem:[%s12747_s1 + $0xc0] sm:$0xff]  ;;  %v314_v21 = vld [vmem:[%s12747_s1 + $0xf8] sm:$0xff]  ;;  %v316_v23 = vld [vmem:[%s12747_s1 + $0x108] sm:$0xff] }
  0x2e   : > { %1002 = vmatpush.msra.mxu2 %v577_v54  ;;  %777 = vmatpush.msra.mxu0 %v478_v56  ;;  %v315_v22 = vld [vmem:[%s12747_s1 + $0x100] sm:$0xff]  ;;  %v320_v25 = vld [vmem:[%s12747_s1 + $0x128] sm:$0xff]  ;;  %v321_v26 = vld [vmem:[%s12747_s1 + $0x130] sm:$0xff] }
  0x2f   : > { %1115 = vmatpush.msra.mxu3 %v625_v55  ;;  %890 = vmatpush.msra.mxu1 %v526_v57  ;;  %v319_v24 = vld [vmem:[%s12747_s1 + $0x120] sm:$0xff]  ;;  %v322_v27 = vld [vmem:[%s12747_s1 + $0x138] sm:$0xff]  ;;  %v325_v28 = vld [vmem:[%s12747_s1 + $0x150] sm:$0xff] }
  0x30   : > { %1003 = vmatpush.msra.mxu2 %v574_v58  ;;  %778 = vmatpush.msra.mxu0 %v475_v60  ;;  %v326_v29 = vld [vmem:[%s12747_s1 + $0x158] sm:$0xff]  ;;  %v327_v30 = vld [vmem:[%s12747_s1 + $0x160] sm:$0xff]  ;;  %v328_v31 = vld [vmem:[%s12747_s1 + $0x168] sm:$0xff] }
  0x31   : > { %1116 = vmatpush.msra.mxu3 %v622_v59  ;;  %891 = vmatpush.msra.mxu1 %v523_v61  ;;  %v331_v32 = vld [vmem:[%s12747_s1 + $0x180] sm:$0xff]  ;;  %v332_v33 = vld [vmem:[%s12747_s1 + $0x188] sm:$0xff]  ;;  %v333_v34 = vld [vmem:[%s12747_s1 + $0x190] sm:$0xff] }
  0x32   : > { %1004 = vmatpush.msra.mxu2 %v571_v62  ;;  %779 = vmatmul.f32.vlgmr.msra.gmra.mxu0 %v6771_v0  ;;  %v334_v35 = vld [vmem:[%s12747_s1 + $0x198] sm:$0xff]  ;;  %v337_v36 = vld [vmem:[%s12747_s1 + $0x1b0] sm:$0xff]  ;;  %v339_v38 = vld [vmem:[%s12747_s1 + $0x1c0] sm:$0xff] }
  0x33   : > { %1117 = vmatpush.msra.mxu3 %v619_v63  ;;  %892 = vmatmul.f32.vlgmr.msra.gmra.mxu1 %v6776_v1  ;;  %v338_v37 = vld [vmem:[%s12747_s1 + $0x1b8] sm:$0xff]  ;;  %v340_v39 = vld [vmem:[%s12747_s1 + $0x1c8] sm:$0xff]  ;;  %v343_v41 = vld [vmem:[%s12747_s1 + $0x1e0] sm:$0xff] }
  0x34   : > { %1005 = vmatmul.f32.vlgmr.msra.gmra.mxu2 %v285_v2  ;;  %1118 = vmatmul.f32.vlgmr.msra.gmra.mxu3 %v286_v3  ;;  %v712_v40 = vld [vmem:[%s6702_s26 + $0x768] sm:$0xff]  ;;  %v345_v43 = vld [vmem:[%s12747_s1 + $0x1f0] sm:$0xff]  ;;  %v346_v44 = vld [vmem:[%s12747_s1 + $0x1f8] sm:$0xff] }
  0x35   : > { %1215 = vmatpush.msrb.mxu0 %v712_v40  ;;  %v344_v42 = vld [vmem:[%s12747_s1 + $0x1e8] sm:$0xff]  ;;  %v349_v46 = vld [vmem:[%s12747_s1 + $0x210] sm:$0xff]  ;;  %v350_v47 = vld [vmem:[%s12747_s1 + $0x218] sm:$0xff] }
  0x36   : > { %v760_v45 = vld [vmem:[%s6702_s26 + $0x8e8] sm:$0xff]  ;;  %v351_v48 = vld [vmem:[%s12747_s1 + $0x220] sm:$0xff]  ;;  %v357_v52 = vld [vmem:[%s12747_s1 + $0x250] sm:$0xff] }
  0x37   : > { %1328 = vmatpush.msrb.mxu1 %v760_v45  ;;  %v352_v49 = vld [vmem:[%s12747_s1 + $0x228] sm:$0xff]  ;;  %v355_v50 = vld [vmem:[%s12747_s1 + $0x240] sm:$0xff]  ;;  %v358_v53 = vld [vmem:[%s12747_s1 + $0x258] sm:$0xff] }
  0x38   : > { %v356_v51 = vld [vmem:[%s12747_s1 + $0x248] sm:$0xff]  ;;  %v709_v54 = vld [vmem:[%s6702_s26 + $0x750] sm:$0xff]  ;;  %v362_v57 = vld [vmem:[%s12747_s1 + $0x278] sm:$0xff] }
  0x39   : > { %1216 = vmatpush.msrb.mxu0 %v709_v54  ;;  %v757_v55 = vld [vmem:[%s6702_s26 + $0x8d0] sm:$0xff]  ;;  %v363_v58 = vld [vmem:[%s12747_s1 + $0x280] sm:$0xff]  ;;  %v364_v59 = vld [vmem:[%s12747_s1 + $0x288] sm:$0xff] }
  0x3a   : > { %782 = vmatmul.f32.gmra.mxu0 %v6789_v4  ;;  %1329 = vmatpush.msrb.mxu1 %v757_v55  ;;  %v361_v56 = vld [vmem:[%s12747_s1 + $0x270] sm:$0xff]  ;;  %v367_v60 = vld [vmem:[%s12747_s1 + $0x2a0] sm:$0xff]  ;;  %v368_v61 = vld [vmem:[%s12747_s1 + $0x2a8] sm:$0xff] }
  0x3b   : > { %895 = vmatmul.f32.gmra.mxu1 %v6794_v5  ;;  %v369_v62 = vld [vmem:[%s12747_s1 + $0x2b0] sm:$0xff]  ;;  %v370_v63 = vld [vmem:[%s12747_s1 + $0x2b8] sm:$0xff]  ;;  %v700_v40 = vld [vmem:[%s6702_s26 + $0x708] sm:$0xff] }
  0x3c   : > { %1008 = vmatmul.f32.gmra.mxu2 %v291_v6  ;;  %1121 = vmatmul.f32.gmra.mxu3 %v292_v7  ;;  %v706_v2 = vld [vmem:[%s6702_s26 + $0x738] sm:$0xff]  ;;  %v373_v6 = vld [vmem:[%s12747_s1 + $0x2d0] sm:$0xff] }
  0x3d   : > { %v754_v3 = vld [vmem:[%s6702_s26 + $0x8b8] sm:$0xff]  ;;  %1217 = vmatpush.msrb.mxu0 %v706_v2  ;;  %v697_v2 = vld [vmem:[%s6702_s26 + $0x6f0] sm:$0xff] }
  0x3e   : > { %1330 = vmatpush.msrb.mxu1 %v754_v3  ;;  %v374_v7 = vld [vmem:[%s12747_s1 + $0x2d8] sm:$0xff]  ;;  %v745_v3 = vld [vmem:[%s6702_s26 + $0x870] sm:$0xff] }
  0x42   : > { %785 = vmatmul.f32.gmra.mxu0 %v295_v8  ;;  %v375_v8 = vld [vmem:[%s12747_s1 + $0x2e0] sm:$0xff] }
  0x43   : > { %898 = vmatmul.f32.gmra.mxu1 %v296_v9  ;;  %v376_v9 = vld [vmem:[%s12747_s1 + $0x2e8] sm:$0xff] }
  0x44   : > { %1011 = vmatmul.f32.gmra.mxu2 %v297_v10  ;;  %1124 = vmatmul.f32.gmra.mxu3 %v298_v11 }
  0x4a   : > { %788 = vmatmul.f32.gmra.mxu0 %v301_v12  ;;  %v379_v12 = vld [vmem:[%s12747_s1 + $0x300] sm:$0xff] }
  0x4b   : > { %901 = vmatmul.f32.gmra.mxu1 %v302_v13  ;;  %v380_v13 = vld [vmem:[%s12747_s1 + $0x308] sm:$0xff] }
  0x4c   : > { %1014 = vmatmul.f32.gmra.mxu2 %v303_v14  ;;  %1127 = vmatmul.f32.gmra.mxu3 %v304_v15  ;;  %v381_v14 = vld [vmem:[%s12747_s1 + $0x310] sm:$0xff]  ;;  %v382_v15 = vld [vmem:[%s12747_s1 + $0x318] sm:$0xff] }
  0x52   : > { %791 = vmatmul.f32.gmra.mxu0 %v307_v16  ;;  %v703_v16 = vld [vmem:[%s6702_s26 + $0x720] sm:$0xff] }
  0x53   : > { %904 = vmatmul.f32.gmra.mxu1 %v308_v17  ;;  %v751_v17 = vld [vmem:[%s6702_s26 + $0x8a0] sm:$0xff]  ;;  %1218 = vmatpush.msrb.mxu0 %v703_v16 }
  0x54   : > { %1017 = vmatmul.f32.gmra.mxu2 %v309_v18  ;;  %1130 = vmatmul.f32.gmra.mxu3 %v310_v19 }
  0x55   : > { %1331 = vmatpush.msrb.mxu1 %v751_v17  ;;  %1219 = vmatpush.msrb.mxu0 %v700_v40  ;;  %v423_v40 = vld [vmem:[%s12747_s1 + $0x460] sm:$0xff] }
  0x57   : > { %1220 = vmatpush.msrb.mxu0 %v697_v2 }
  0x5a   : > { %794 = vmatmul.f32.gmra.mxu0 %v313_v20 }
  0x5b   : > { %907 = vmatmul.f32.gmra.mxu1 %v314_v21 }
  0x5c   : > { %1020 = vmatmul.f32.gmra.mxu2 %v315_v22  ;;  %1133 = vmatmul.f32.gmra.mxu3 %v316_v23 }
  0x62   : > { %797 = vmatmul.f32.gmra.mxu0 %v319_v24  ;;  %v385_v24 = vld [vmem:[%s12747_s1 + $0x330] sm:$0xff] }
  0x63   : > { %910 = vmatmul.f32.gmra.mxu1 %v320_v25  ;;  %v386_v25 = vld [vmem:[%s12747_s1 + $0x338] sm:$0xff] }
  0x64   : > { %1023 = vmatmul.f32.gmra.mxu2 %v321_v26  ;;  %1136 = vmatmul.f32.gmra.mxu3 %v322_v27  ;;  %v387_v26 = vld [vmem:[%s12747_s1 + $0x340] sm:$0xff]  ;;  %v388_v27 = vld [vmem:[%s12747_s1 + $0x348] sm:$0xff] }
  0x6a   : > { %800 = vmatmul.f32.gmra.mxu0 %v325_v28 }
  0x6b   : > { %913 = vmatmul.f32.gmra.mxu1 %v326_v29 }
  0x6c   : > { %1026 = vmatmul.f32.gmra.mxu2 %v327_v30  ;;  %1139 = vmatmul.f32.gmra.mxu3 %v328_v31 }
  0x72   : > { %803 = vmatmul.f32.gmra.mxu0 %v331_v32 }
  0x73   : > { %916 = vmatmul.f32.gmra.mxu1 %v332_v33 }
  0x74   : > { %1029 = vmatmul.f32.gmra.mxu2 %v333_v34  ;;  %1142 = vmatmul.f32.gmra.mxu3 %v334_v35  ;;  %v391_v35 = vld [vmem:[%s12747_s1 + $0x360] sm:$0xff] }
  0x7a   : > { %806 = vmatmul.f32.gmra.mxu0 %v337_v36  ;;  %v392_v36 = vld [vmem:[%s12747_s1 + $0x368] sm:$0xff] }
  0x7b   : > { %919 = vmatmul.f32.gmra.mxu1 %v338_v37  ;;  %v393_v37 = vld [vmem:[%s12747_s1 + $0x370] sm:$0xff] }
  0x7c   : > { %1032 = vmatmul.f32.gmra.mxu2 %v339_v38  ;;  %1145 = vmatmul.f32.gmra.mxu3 %v340_v39  ;;  %v394_v38 = vld [vmem:[%s12747_s1 + $0x378] sm:$0xff] }
  0x82   : > { %809 = vmatmul.f32.gmra.mxu0 %v343_v41  ;;  %v748_v41 = vld [vmem:[%s6702_s26 + $0x888] sm:$0xff] }
  0x83   : > { %922 = vmatmul.f32.gmra.mxu1 %v344_v42 }
  0x84   : > { %1035 = vmatmul.f32.gmra.mxu2 %v345_v43  ;;  %1148 = vmatmul.f32.gmra.mxu3 %v346_v44 }
  0x85   : > { %1332 = vmatpush.msrb.mxu1 %v748_v41  ;;  %v424_v41 = vld [vmem:[%s12747_s1 + $0x468] sm:$0xff] }
  0x87   : > { %1333 = vmatpush.msrb.mxu1 %v745_v3  ;;  %v433_v3 = vld [vmem:[%s12747_s1 + $0x4b0] sm:$0xff] }
  0x8a   : > { %812 = vmatmul.f32.gmra.mxu0 %v349_v46 }
  0x8b   : > { %925 = vmatmul.f32.gmra.mxu1 %v350_v47 }
  0x8c   : > { %1038 = vmatmul.f32.gmra.mxu2 %v351_v48  ;;  %1151 = vmatmul.f32.gmra.mxu3 %v352_v49  ;;  %v397_v48 = vld [vmem:[%s12747_s1 + $0x390] sm:$0xff]  ;;  %v398_v49 = vld [vmem:[%s12747_s1 + $0x398] sm:$0xff] }
  0x92   : > { %815 = vmatmul.f32.gmra.mxu0 %v355_v50  ;;  %v399_v50 = vld [vmem:[%s12747_s1 + $0x3a0] sm:$0xff] }
  0x93   : > { %928 = vmatmul.f32.gmra.mxu1 %v356_v51  ;;  %v400_v51 = vld [vmem:[%s12747_s1 + $0x3a8] sm:$0xff] }
  0x94   : > { %1041 = vmatmul.f32.gmra.mxu2 %v357_v52  ;;  %1154 = vmatmul.f32.gmra.mxu3 %v358_v53 }
  0x9a   : > { %818 = vmatmul.f32.gmra.mxu0 %v361_v56 }
  0x9b   : > { %931 = vmatmul.f32.gmra.mxu1 %v362_v57 }
  0x9c   : > { %1044 = vmatmul.f32.gmra.mxu2 %v363_v58  ;;  %1157 = vmatmul.f32.gmra.mxu3 %v364_v59  ;;  %v403_v59 = vld [vmem:[%s12747_s1 + $0x3c0] sm:$0xff] }
  0xa2   : > { %821 = vmatmul.f32.gmra.mxu0 %v367_v60  ;;  %v404_v60 = vld [vmem:[%s12747_s1 + $0x3c8] sm:$0xff] }
  0xa3   : > { %934 = vmatmul.f32.gmra.mxu1 %v368_v61  ;;  %v405_v61 = vld [vmem:[%s12747_s1 + $0x3d0] sm:$0xff] }
  0xa4   : > { %1047 = vmatmul.f32.gmra.mxu2 %v369_v62  ;;  %1160 = vmatmul.f32.gmra.mxu3 %v370_v63  ;;  %v406_v62 = vld [vmem:[%s12747_s1 + $0x3d8] sm:$0xff] }
  0xaa   : > { %824 = vmatmul.f32.gmra.mxu0 %v373_v6 }
  0xab   : > { %937 = vmatmul.f32.gmra.mxu1 %v374_v7 }
  0xac   : > { %1050 = vmatmul.f32.gmra.mxu2 %v375_v8  ;;  %1163 = vmatmul.f32.gmra.mxu3 %v376_v9 }
  0xaf   : > { %v780_v10 = vpop.f32.mrf.mxu0 }
  0xb0   : > { %v893_v11 = vpop.f32.mrf.mxu1 }
  0xb1   : > { %v894_v18 = vadd.f32 %v893_v11, %v780_v10 }
  0xb2   : > { %827 = vmatmul.f32.gmra.mxu0 %v379_v12  ;;  %v409_v12 = vld [vmem:[%s12747_s1 + $0x3f0] sm:$0xff] }
  0xb3   : > { %940 = vmatmul.f32.gmra.mxu1 %v380_v13  ;;  %v410_v13 = vld [vmem:[%s12747_s1 + $0x3f8] sm:$0xff] }
  0xb4   : > { %1053 = vmatmul.f32.gmra.mxu2 %v381_v14  ;;  %1166 = vmatmul.f32.gmra.mxu3 %v382_v15  ;;  %v411_v14 = vld [vmem:[%s12747_s1 + $0x400] sm:$0xff]  ;;  %v412_v15 = vld [vmem:[%s12747_s1 + $0x408] sm:$0xff] }
  0xb7   : > { %v1006_v19 = vpop.f32.mrf.mxu2  ;;  %v1119_v20 = vpop.f32.mrf.mxu3 }
  0xb8   : > { %v1007_v21 = vadd.f32 %v1006_v19, %v894_v18  ;;  %v783_v22 = vpop.f32.mrf.mxu0  ;;  %v896_v23 = vpop.f32.mrf.mxu1 }
  0xb9   : > { %v897_v29 = vadd.f32 %v896_v23, %v783_v22  ;;  %v415_v23 = vld [vmem:[%s12747_s1 + $0x420] sm:$0xff] }
  0xba   : > { %v7004_v28 = vadd.f32 %v1119_v20, %v1007_v21  ;;  %830 = vmatmul.f32.gmra.mxu0 %v385_v24  ;;  %v416_v24 = vld [vmem:[%s12747_s1 + $0x428] sm:$0xff] }
  0xbb   : > { %943 = vmatmul.f32.gmra.mxu1 %v386_v25  ;;  %v417_v25 = vld [vmem:[%s12747_s1 + $0x430] sm:$0xff] }
  0xbc   : > { %1056 = vmatmul.f32.gmra.mxu2 %v387_v26  ;;  %1169 = vmatmul.f32.gmra.mxu3 %v388_v27  ;;  %v418_v26 = vld [vmem:[%s12747_s1 + $0x438] sm:$0xff] }
  0xbf   : > { %v1009_v30 = vpop.f32.mrf.mxu2  ;;  %v1122_v31 = vpop.f32.mrf.mxu3 }
  0xc0   : > { %v1010_v32 = vadd.f32 %v1009_v30, %v897_v29  ;;  %v786_v33 = vpop.f32.mrf.mxu0  ;;  %v899_v34 = vpop.f32.mrf.mxu1  ;;  %v694_v29 = vld [vmem:[%s6702_s26 + $0x6d8] sm:$0xff] }
  0xc1   : > { %v900_v42 = vadd.f32 %v899_v34, %v786_v33  ;;  %v742_v30 = vld [vmem:[%s6702_s26 + $0x858] sm:$0xff]  ;;  %1221 = vmatpush.msrb.mxu0 %v694_v29 }
  0xc2   : > { %v7018_v39 = vadd.f32 %v1122_v31, %v1010_v32  ;;  %833 = vmatmul.f32.gmra.mxu0 %v391_v35  ;;  %1334 = vmatpush.msrb.mxu1 %v742_v30  ;;  %v439_v30 = vld [vmem:[%s12747_s1 + $0x4e0] sm:$0xff] }
  0xc3   : > { %946 = vmatmul.f32.gmra.mxu1 %v392_v36 }
  0xc4   : > { %1059 = vmatmul.f32.gmra.mxu2 %v393_v37  ;;  %1172 = vmatmul.f32.gmra.mxu3 %v394_v38  ;;  %v421_v37 = vld [vmem:[%s12747_s1 + $0x450] sm:$0xff]  ;;  %v422_v38 = vld [vmem:[%s12747_s1 + $0x458] sm:$0xff] }
  0xc7   : > { %v1012_v43 = vpop.f32.mrf.mxu2  ;;  %v1125_v44 = vpop.f32.mrf.mxu3 }
  0xc8   : > { %v1013_v45 = vadd.f32 %v1012_v43, %v900_v42  ;;  %v789_v46 = vpop.f32.mrf.mxu0  ;;  %v902_v47 = vpop.f32.mrf.mxu1 }
  0xc9   : > { %v903_v53 = vadd.f32 %v902_v47, %v789_v46 }
  0xca   : > { %v7034_v52 = vadd.f32 %v1125_v44, %v1013_v45  ;;  %836 = vmatmul.f32.gmra.mxu0 %v397_v48 }
  0xcb   : > { %949 = vmatmul.f32.gmra.mxu1 %v398_v49  ;;  %v427_v49 = vld [vmem:[%s12747_s1 + $0x480] sm:$0xff] }
  0xcc   : > { %1062 = vmatmul.f32.gmra.mxu2 %v399_v50  ;;  %1175 = vmatmul.f32.gmra.mxu3 %v400_v51  ;;  %v428_v50 = vld [vmem:[%s12747_s1 + $0x488] sm:$0xff]  ;;  %v429_v51 = vld [vmem:[%s12747_s1 + $0x490] sm:$0xff] }
  0xcf   : > { %v1015_v54 = vpop.f32.mrf.mxu2  ;;  %v1128_v55 = vpop.f32.mrf.mxu3 }
  0xd0   : > { %v1016_v56 = vadd.f32 %v1015_v54, %v903_v53  ;;  %v792_v57 = vpop.f32.mrf.mxu0  ;;  %v905_v58 = vpop.f32.mrf.mxu1  ;;  %v430_v53 = vld [vmem:[%s12747_s1 + $0x498] sm:$0xff] }
  0xd1   : > { %v906_v6 = vadd.f32 %v905_v58, %v792_v57  ;;  %v521_v57 = vld [vmem:[%s6702_s26 + $0x170] sm:$0xff] }
  0xd2   : > { %v7048_v63 = vadd.f32 %v1128_v55, %v1016_v56  ;;  %839 = vmatmul.f32.gmra.mxu0 %v403_v59  ;;  %v691_v55 = vld [vmem:[%s6702_s26 + $0x6c0] sm:$0xff]  ;;  %v569_v58 = vld [vmem:[%s6702_s26 + $0x2f0] sm:$0xff]  ;;  %1441 = vmatpush.msrb.mxu2 %v521_v57  ;;  %v682_v57 = vld [vmem:[%s6702_s26 + $0x678] sm:$0xff] }
  0xd3   : > { %952 = vmatmul.f32.gmra.mxu1 %v404_v60  ;;  %v739_v56 = vld [vmem:[%s6702_s26 + $0x840] sm:$0xff]  ;;  %1222 = vmatpush.msrb.mxu0 %v691_v55  ;;  %v518_v60 = vld [vmem:[%s6702_s26 + $0x158] sm:$0xff] }
  0xd4   : > { %1065 = vmatmul.f32.gmra.mxu2 %v405_v61  ;;  %1178 = vmatmul.f32.gmra.mxu3 %v406_v62  ;;  %v566_v61 = vld [vmem:[%s6702_s26 + $0x2d8] sm:$0xff] }
  0xd5   : > { %1335 = vmatpush.msrb.mxu1 %v739_v56  ;;  %1554 = vmatpush.msrb.mxu3 %v569_v58  ;;  %v446_v56 = vld [vmem:[%s12747_s1 + $0x518] sm:$0xff] }
  0xd6   : > { %1442 = vmatpush.msrb.mxu2 %v518_v60  ;;  %v730_v58 = vld [vmem:[%s6702_s26 + $0x7f8] sm:$0xff]  ;;  %v448_v60 = vld [vmem:[%s12747_s1 + $0x528] sm:$0xff] }
  0xd7   : > { %v1018_v7 = vpop.f32.mrf.mxu2  ;;  %v1131_v8 = vpop.f32.mrf.mxu3  ;;  %1555 = vmatpush.msrb.mxu3 %v566_v61 }
  0xd8   : > { %v1019_v9 = vadd.f32 %v1018_v7, %v906_v6  ;;  %v795_v10 = vpop.f32.mrf.mxu0  ;;  %v908_v11 = vpop.f32.mrf.mxu1 }
  0xd9   : > { %v909_v17 = vadd.f32 %v908_v11, %v795_v10  ;;  %v515_v10 = vld [vmem:[%s6702_s26 + $0x140] sm:$0xff] }
  0xda   : > { %v7064_v16 = vadd.f32 %v1131_v8, %v1019_v9  ;;  %842 = vmatmul.f32.gmra.mxu0 %v409_v12  ;;  %v434_v9 = vld [vmem:[%s12747_s1 + $0x4b8] sm:$0xff]  ;;  %v563_v11 = vld [vmem:[%s6702_s26 + $0x2c0] sm:$0xff]  ;;  %1443 = vmatpush.msrb.mxu2 %v515_v10  ;;  %v724_v10 = vld [vmem:[%s6702_s26 + $0x7c8] sm:$0xff] }
  0xdb   : > { %955 = vmatmul.f32.gmra.mxu1 %v410_v13  ;;  %v435_v12 = vld [vmem:[%s12747_s1 + $0x4c0] sm:$0xff]  ;;  %v436_v13 = vld [vmem:[%s12747_s1 + $0x4c8] sm:$0xff]  ;;  %1556 = vmatpush.msrb.mxu3 %v563_v11 }
  0xdc   : > { %1068 = vmatmul.f32.gmra.mxu2 %v411_v14  ;;  %1181 = vmatmul.f32.gmra.mxu3 %v412_v15  ;;  %v512_v15 = vld [vmem:[%s6702_s26 + $0x128] sm:$0xff] }
  0xdd   : > { %1444 = vmatpush.msrb.mxu2 %v512_v15 }
  0xdf   : > { %v1021_v18 = vpop.f32.mrf.mxu2  ;;  %v1134_v19 = vpop.f32.mrf.mxu3 }
  0xe0   : > { %v1022_v20 = vadd.f32 %v1021_v18, %v909_v17  ;;  %v798_v21 = vpop.f32.mrf.mxu0  ;;  %v911_v22 = vpop.f32.mrf.mxu1  ;;  %v560_v17 = vld [vmem:[%s6702_s26 + $0x2a8] sm:$0xff]  ;;  %v509_v18 = vld [vmem:[%s6702_s26 + $0x110] sm:$0xff] }
  0xe1   : > { %v912_v31 = vadd.f32 %v911_v22, %v798_v21  ;;  %1557 = vmatpush.msrb.mxu3 %v560_v17  ;;  %v506_v21 = vld [vmem:[%s6702_s26 + $0xf8] sm:$0xff]  ;;  %1445 = vmatpush.msrb.mxu2 %v509_v18  ;;  %v673_v18 = vld [vmem:[%s6702_s26 + $0x630] sm:$0xff] }
  0xe2   : > { %v7078_v27 = vadd.f32 %v1134_v19, %v1022_v20  ;;  %845 = vmatmul.f32.gmra.mxu0 %v415_v23  ;;  %v557_v19 = vld [vmem:[%s6702_s26 + $0x290] sm:$0xff]  ;;  %v554_v22 = vld [vmem:[%s6702_s26 + $0x278] sm:$0xff] }
  0xe3   : > { %958 = vmatmul.f32.gmra.mxu1 %v416_v24  ;;  %1558 = vmatpush.msrb.mxu3 %v557_v19  ;;  %v721_v19 = vld [vmem:[%s6702_s26 + $0x7b0] sm:$0xff] }
  0xe4   : > { %1071 = vmatmul.f32.gmra.mxu2 %v417_v25  ;;  %1184 = vmatmul.f32.gmra.mxu3 %v418_v26 }
  0xe5   : > { %1446 = vmatpush.msrb.mxu2 %v506_v21  ;;  %1559 = vmatpush.msrb.mxu3 %v554_v22 }
  0xe7   : > { %v1024_v32 = vpop.f32.mrf.mxu2  ;;  %v1137_v33 = vpop.f32.mrf.mxu3 }
  0xe8   : > { %v1025_v34 = vadd.f32 %v1024_v32, %v912_v31  ;;  %v801_v35 = vpop.f32.mrf.mxu0  ;;  %v914_v36 = vpop.f32.mrf.mxu1  ;;  %v440_v31 = vld [vmem:[%s12747_s1 + $0x4e8] sm:$0xff]  ;;  %v441_v32 = vld [vmem:[%s12747_s1 + $0x4f0] sm:$0xff] }
  0xe9   : > { %v915_v43 = vadd.f32 %v914_v36, %v801_v35  ;;  %v503_v35 = vld [vmem:[%s6702_s26 + $0xe0] sm:$0xff] }
  0xea   : > { %v7094_v42 = vadd.f32 %v1137_v33, %v1025_v34  ;;  %848 = vmatmul.f32.gmra.mxu0 %v421_v37  ;;  %v442_v33 = vld [vmem:[%s12747_s1 + $0x4f8] sm:$0xff]  ;;  %v551_v36 = vld [vmem:[%s6702_s26 + $0x260] sm:$0xff]  ;;  %v688_v37 = vld [vmem:[%s6702_s26 + $0x6a8] sm:$0xff]  ;;  %1447 = vmatpush.msrb.mxu2 %v503_v35 }
  0xeb   : > { %961 = vmatmul.f32.gmra.mxu1 %v422_v38  ;;  %v500_v38 = vld [vmem:[%s6702_s26 + $0xc8] sm:$0xff]  ;;  %1560 = vmatpush.msrb.mxu3 %v551_v36  ;;  %v482_v35 = vld [vmem:[%s6702_s26 + $0x38] sm:$0xff] }
  0xec   : > { %1074 = vmatmul.f32.gmra.mxu2 %v423_v40  ;;  %1187 = vmatmul.f32.gmra.mxu3 %v424_v41  ;;  %v548_v40 = vld [vmem:[%s6702_s26 + $0x248] sm:$0xff]  ;;  %v530_v36 = vld [vmem:[%s6702_s26 + $0x1b8] sm:$0xff] }
  0xed   : > { %v736_v41 = vld [vmem:[%s6702_s26 + $0x828] sm:$0xff]  ;;  %1223 = vmatpush.msrb.mxu0 %v688_v37  ;;  %1448 = vmatpush.msrb.mxu2 %v500_v38  ;;  %v667_v37 = vld [vmem:[%s6702_s26 + $0x600] sm:$0xff] }
  0xee   : > { %1336 = vmatpush.msrb.mxu1 %v736_v41  ;;  %1561 = vmatpush.msrb.mxu3 %v548_v40  ;;  %v715_v38 = vld [vmem:[%s6702_s26 + $0x780] sm:$0xff] }
  0xef   : > { %v1027_v44 = vpop.f32.mrf.mxu2  ;;  %v1140_v45 = vpop.f32.mrf.mxu3  ;;  %v479_v41 = vld [vmem:[%s6702_s26 + $0x20] sm:$0xff] }
  0xf0   : > { %v1028_v46 = vadd.f32 %v1027_v44, %v915_v43  ;;  %v804_v47 = vpop.f32.mrf.mxu0  ;;  %v917_v48 = vpop.f32.mrf.mxu1  ;;  %v497_v43 = vld [vmem:[%s6702_s26 + $0xb0] sm:$0xff] }
  0xf1   : > { %v918_v59 = vadd.f32 %v917_v48, %v804_v47  ;;  %v733_v47 = vld [vmem:[%s6702_s26 + $0x810] sm:$0xff]  ;;  %1449 = vmatpush.msrb.mxu2 %v497_v43  ;;  %v527_v43 = vld [vmem:[%s6702_s26 + $0x1a0] sm:$0xff] }
  0xf2   : > { %v7108_v54 = vadd.f32 %v1140_v45, %v1028_v46  ;;  %851 = vmatmul.f32.gmra.mxu0 %v427_v49  ;;  %v545_v45 = vld [vmem:[%s6702_s26 + $0x230] sm:$0xff]  ;;  %1337 = vmatpush.msrb.mxu1 %v733_v47 }
  0xf3   : > { %964 = vmatmul.f32.gmra.mxu1 %v428_v50  ;;  %v685_v46 = vld [vmem:[%s6702_s26 + $0x690] sm:$0xff]  ;;  %1562 = vmatpush.msrb.mxu3 %v545_v45 }
  0xf4   : > { %1077 = vmatmul.f32.gmra.mxu2 %v429_v51  ;;  %1190 = vmatmul.f32.gmra.mxu3 %v430_v53  ;;  %v445_v50 = vld [vmem:[%s12747_s1 + $0x510] sm:$0xff] }
  0xf5   : > { %1224 = vmatpush.msrb.mxu0 %v685_v46  ;;  %1338 = vmatpush.msrb.mxu1 %v730_v58 }
  0xf7   : > { %v1030_v62 = vpop.f32.mrf.mxu2  ;;  %v1143_v2 = vpop.f32.mrf.mxu3  ;;  %1225 = vmatpush.msrb.mxu0 %v682_v57  ;;  %v524_v57 = vld [vmem:[%s6702_s26 + $0x188] sm:$0xff] }
  0xf8   : > { %v1031_v6 = vadd.f32 %v1030_v62, %v918_v59  ;;  %v807_v7 = vpop.f32.mrf.mxu0  ;;  %v920_v8 = vpop.f32.mrf.mxu1  ;;  %v447_v59 = vld [vmem:[%s12747_s1 + $0x520] sm:$0xff]  ;;  %v494_v62 = vld [vmem:[%s6702_s26 + $0x98] sm:$0xff] }
  0xf9   : > { %v921_v20 = vadd.f32 %v920_v8, %v807_v7  ;;  %v491_v7 = vld [vmem:[%s6702_s26 + $0x80] sm:$0xff]  ;;  %1450 = vmatpush.msrb.mxu2 %v494_v62 }
  0xfa   : > { %v7130_v14 = vadd.f32 %v1143_v2, %v1031_v6  ;;  %854 = vmatmul.f32.gmra.mxu0 %v433_v3  ;;  %v542_v2 = vld [vmem:[%s6702_s26 + $0x218] sm:$0xff]  ;;  %v679_v3 = vld [vmem:[%s6702_s26 + $0x660] sm:$0xff] }
  0xfb   : > { %967 = vmatmul.f32.gmra.mxu1 %v434_v9  ;;  %v727_v6 = vld [vmem:[%s6702_s26 + $0x7e0] sm:$0xff]  ;;  %1563 = vmatpush.msrb.mxu3 %v542_v2  ;;  %v676_v9 = vld [vmem:[%s6702_s26 + $0x648] sm:$0xff] }
  0xfc   : > { %1080 = vmatmul.f32.gmra.mxu2 %v435_v12  ;;  %1193 = vmatmul.f32.gmra.mxu3 %v436_v13  ;;  %v539_v8 = vld [vmem:[%s6702_s26 + $0x200] sm:$0xff]  ;;  %v488_v12 = vld [vmem:[%s6702_s26 + $0x68] sm:$0xff] }
  0xfd   : > { %1226 = vmatpush.msrb.mxu0 %v679_v3  ;;  %1339 = vmatpush.msrb.mxu1 %v727_v6  ;;  %v536_v13 = vld [vmem:[%s6702_s26 + $0x1e8] sm:$0xff]  ;;  %v463_v6 = vld [vmem:[%s12747_s1 + $0x5a0] sm:$0xff] }
  0xfe   : > { %1451 = vmatpush.msrb.mxu2 %v491_v7  ;;  %1564 = vmatpush.msrb.mxu3 %v539_v8  ;;  %v464_v7 = vld [vmem:[%s12747_s1 + $0x5a8] sm:$0xff]  ;;  %v465_v8 = vld [vmem:[%s12747_s1 + $0x5b0] sm:$0xff] }
  0xff   : > { %v1033_v23 = vpop.f32.mrf.mxu2  ;;  %v1146_v24 = vpop.f32.mrf.mxu3  ;;  %1227 = vmatpush.msrb.mxu0 %v676_v9  ;;  %1340 = vmatpush.msrb.mxu1 %v724_v10  ;;  %v466_v9 = vld [vmem:[%s12747_s1 + $0x5b8] sm:$0xff] }
 0x100   : > { %v1034_v25 = vadd.f32 %v1033_v23, %v921_v20  ;;  %v810_v26 = vpop.f32.mrf.mxu0  ;;  %v923_v29 = vpop.f32.mrf.mxu1  ;;  %v451_v23 = vld [vmem:[%s12747_s1 + $0x540] sm:$0xff]  ;;  %1452 = vmatpush.msrb.mxu2 %v488_v12  ;;  %1565 = vmatpush.msrb.mxu3 %v536_v13 }
 0x101   : > { %v924_v44 = vadd.f32 %v923_v29, %v810_v26  ;;  %v454_v26 = vld [vmem:[%s12747_s1 + $0x558] sm:$0xff]  ;;  %1228 = vmatpush.msrb.mxu0 %v673_v18  ;;  %1341 = vmatpush.msrb.mxu1 %v721_v19  ;;  %v469_v19 = vld [vmem:[%s12747_s1 + $0x5d0] sm:$0xff] }
 0x102   : > { %v7150_v34 = vadd.f32 %v1146_v24, %v1034_v25  ;;  %857 = vmatmul.f32.gmra.mxu0 %v439_v30  ;;  %v452_v24 = vld [vmem:[%s12747_s1 + $0x548] sm:$0xff]  ;;  %v453_v25 = vld [vmem:[%s12747_s1 + $0x550] sm:$0xff] }
 0x103   : > { %970 = vmatmul.f32.gmra.mxu1 %v440_v31  ;;  %v485_v30 = vld [vmem:[%s6702_s26 + $0x50] sm:$0xff] }
 0x104   : > { %1083 = vmatmul.f32.gmra.mxu2 %v441_v32  ;;  %1196 = vmatmul.f32.gmra.mxu3 %v442_v33  ;;  %v533_v31 = vld [vmem:[%s6702_s26 + $0x1d0] sm:$0xff]  ;;  %v670_v32 = vld [vmem:[%s6702_s26 + $0x618] sm:$0xff] }
 0x105   : > { %v718_v33 = vld [vmem:[%s6702_s26 + $0x798] sm:$0xff]  ;;  %1453 = vmatpush.msrb.mxu2 %v485_v30  ;;  %1566 = vmatpush.msrb.mxu3 %v533_v31 }
 0x106   : > { %1229 = vmatpush.msrb.mxu0 %v670_v32  ;;  %1342 = vmatpush.msrb.mxu1 %v718_v33  ;;  %v287_v33 = vld [vmem:[%s12747_s1 + $0x20] sm:$0xff] }
 0x107   : > { %v1036_v48 = vpop.f32.mrf.mxu2  ;;  %v1149_v49 = vpop.f32.mrf.mxu3  ;;  %1454 = vmatpush.msrb.mxu2 %v482_v35  ;;  %1567 = vmatpush.msrb.mxu3 %v530_v36  ;;  %v288_v35 = vld [vmem:[%s12747_s1 + $0x28] sm:$0xff] }
 0x108   : > { %v1037_v51 = vadd.f32 %v1036_v48, %v924_v44  ;;  %v813_v53 = vpop.f32.mrf.mxu0  ;;  %v926_v55 = vpop.f32.mrf.mxu1  ;;  %1230 = vmatpush.msrb.mxu0 %v667_v37  ;;  %1343 = vmatpush.msrb.mxu1 %v715_v38 }
 0x109   : > { %v927_v11 = vadd.f32 %v926_v55, %v813_v53  ;;  %v460_v53 = vld [vmem:[%s12747_s1 + $0x588] sm:$0xff]  ;;  %1455 = vmatpush.msrb.mxu2 %v479_v41  ;;  %1568 = vmatpush.msrb.mxu3 %v527_v43 }
 0x10a   : > { %v7176_v61 = vadd.f32 %v1149_v49, %v1037_v51  ;;  %860 = vmatmul.f32.gmra.mxu0 %v445_v50  ;;  %v457_v49 = vld [vmem:[%s12747_s1 + $0x570] sm:$0xff]  ;;  %v458_v50 = vld [vmem:[%s12747_s1 + $0x578] sm:$0xff]  ;;  %v459_v51 = vld [vmem:[%s12747_s1 + $0x580] sm:$0xff] }
 0x10b   : > { %973 = vmatmul.f32.gmra.mxu1 %v446_v56  ;;  %v476_v56 = vld [vmem:[%s6702_s26 + $0x8] sm:$0xff]  ;;  %1569 = vmatpush.msrb.mxu3 %v524_v57 }
 0x10c   : > { %1086 = vmatmul.f32.gmra.mxu2 %v447_v59  ;;  %1199 = vmatmul.f32.gmra.mxu3 %v448_v60 }
 0x10d   : > { %1456 = vmatpush.msrb.mxu2 %v476_v56  ;;  %v300_v56 = vld [vmem:[%s12747_s1 + $0x88] sm:$0xff] }
 0x10f   : > { %v1039_v15 = vpop.f32.mrf.mxu2  ;;  %v1152_v17 = vpop.f32.mrf.mxu3 }
 0x110   : > { %v1040_v20 = vadd.f32 %v1039_v15, %v927_v11  ;;  %v816_v21 = vpop.f32.mrf.mxu0  ;;  %v929_v22 = vpop.f32.mrf.mxu1 }
 0x111   : > { %v930_v40 = vadd.f32 %v929_v22, %v816_v21  ;;  %v471_v21 = vld [vmem:[%s12747_s1 + $0x5e0] sm:$0xff]  ;;  %v472_v22 = vld [vmem:[%s12747_s1 + $0x5e8] sm:$0xff] }
 0x112   : > { %v7202_v29 = vadd.f32 %v1152_v17, %v1040_v20  ;;  %863 = vmatmul.f32.gmra.mxu0 %v451_v23  ;;  %v470_v20 = vld [vmem:[%s12747_s1 + $0x5d8] sm:$0xff] }
 0x113   : > { %976 = vmatmul.f32.gmra.mxu1 %v452_v24 }
 0x114   : > { %1089 = vmatmul.f32.gmra.mxu2 %v453_v25  ;;  %1202 = vmatmul.f32.gmra.mxu3 %v454_v26 }
 0x117   : > { %v1042_v44 = vpop.f32.mrf.mxu2  ;;  %v1155_v45 = vpop.f32.mrf.mxu3 }
 0x118   : > { %v1043_v46 = vadd.f32 %v1042_v44, %v930_v40  ;;  %v819_v47 = vpop.f32.mrf.mxu0  ;;  %v932_v48 = vpop.f32.mrf.mxu1 }
 0x119   : > { %v933_v58 = vadd.f32 %v932_v48, %v819_v47 }
 0x11a   : > { %v7226_v55 = vadd.f32 %v1155_v45, %v1043_v46  ;;  %866 = vmatmul.f32.gmra.mxu0 %v457_v49  ;;  %v293_v45 = vld [vmem:[%s12747_s1 + $0x50] sm:$0xff]  ;;  %v294_v46 = vld [vmem:[%s12747_s1 + $0x58] sm:$0xff] }
 0x11b   : > { %979 = vmatmul.f32.gmra.mxu1 %v458_v50 }
 0x11c   : > { %1092 = vmatmul.f32.gmra.mxu2 %v459_v51  ;;  %1205 = vmatmul.f32.gmra.mxu3 %v460_v53  ;;  %v299_v53 = vld [vmem:[%s12747_s1 + $0x80] sm:$0xff] }
 0x11f   : > { %v1045_v59 = vpop.f32.mrf.mxu2  ;;  %v1158_v60 = vpop.f32.mrf.mxu3 }
 0x120   : > { %v1046_v62 = vadd.f32 %v1045_v59, %v933_v58  ;;  %v822_v2 = vpop.f32.mrf.mxu0  ;;  %v935_v3 = vpop.f32.mrf.mxu1 }
 0x121   : > { %v936_v11 = vadd.f32 %v935_v3, %v822_v2 }
 0x122   : > { %v7242_v10 = vadd.f32 %v1158_v60, %v1046_v62  ;;  %869 = vmatmul.f32.gmra.mxu0 %v463_v6  ;;  %v305_v6 = vld [vmem:[%s12747_s1 + $0xb0] sm:$0xff] }
 0x123   : > { %982 = vmatmul.f32.gmra.mxu1 %v464_v7  ;;  %v306_v7 = vld [vmem:[%s12747_s1 + $0xb8] sm:$0xff] }
 0x124   : > { %1095 = vmatmul.f32.gmra.mxu2 %v465_v8  ;;  %1208 = vmatmul.f32.gmra.mxu3 %v466_v9  ;;  %v6267_v9 = vld [vmem:[%s12747_s1 + $0x90] sm:$0xff] }
 0x127   : > { %v1048_v12 = vpop.f32.mrf.mxu2  ;;  %v1161_v13 = vpop.f32.mrf.mxu3 }
 0x128   : > { %v1049_v15 = vadd.f32 %v1048_v12, %v936_v11  ;;  %v825_v17 = vpop.f32.mrf.mxu0  ;;  %v938_v18 = vpop.f32.mrf.mxu1  ;;  %v6268_v11 = vld [vmem:[%s12747_s1 + $0x98] sm:$0xff] }
 0x129   : > { %v939_v24 = vadd.f32 %v938_v18, %v825_v17 }
 0x12a   : > { %v7256_v23 = vadd.f32 %v1161_v13, %v1049_v15  ;;  %872 = vmatmul.f32.gmra.mxu0 %v469_v19 }
 0x12b   : > { %985 = vmatmul.f32.gmra.mxu1 %v470_v20  ;;  %v311_v20 = vld [vmem:[%s12747_s1 + $0xe0] sm:$0xff] }
 0x12c   : > { %1098 = vmatmul.f32.gmra.mxu2 %v471_v21  ;;  %1211 = vmatmul.f32.gmra.mxu3 %v472_v22  ;;  %v312_v21 = vld [vmem:[%s12747_s1 + $0xe8] sm:$0xff] }
 0x12f   : > { %v1051_v25 = vpop.f32.mrf.mxu2  ;;  %v1164_v26 = vpop.f32.mrf.mxu3 }
 0x130   : > { %v1052_v30 = vadd.f32 %v1051_v25, %v939_v24  ;;  %v828_v31 = vpop.f32.mrf.mxu0  ;;  %v941_v32 = vpop.f32.mrf.mxu1  ;;  %v6269_v24 = vld [vmem:[%s12747_s1 + $0xc0] sm:$0xff]  ;;  %v6270_v25 = vld [vmem:[%s12747_s1 + $0xc8] sm:$0xff] }
 0x131   : > { %v942_v37 = vadd.f32 %v941_v32, %v828_v31 }
 0x132   : > { %v7264_v36 = vadd.f32 %v1164_v26, %v1052_v30  ;;  %1231 = vmatmul.f32.vlgmr.msrb.gmra.mxu0 %v287_v33 }
 0x133   : > { %1344 = vmatmul.f32.vlgmr.msrb.gmra.mxu1 %v288_v35 }
 0x134   : > { %1457 = vmatmul.f32.vlgmr.msrb.gmra.mxu2 %v6771_v0  ;;  %1570 = vmatmul.f32.vlgmr.msrb.gmra.mxu3 %v6776_v1 }
 0x137   : > { %v1054_v38 = vpop.f32.mrf.mxu2  ;;  %v1167_v40 = vpop.f32.mrf.mxu3 }
 0x138   : > { %v1055_v41 = vadd.f32 %v1054_v38, %v942_v37  ;;  %v831_v43 = vpop.f32.mrf.mxu0  ;;  %v944_v44 = vpop.f32.mrf.mxu1  ;;  %v317_v37 = vld [vmem:[%s12747_s1 + $0x110] sm:$0xff]  ;;  %v318_v38 = vld [vmem:[%s12747_s1 + $0x118] sm:$0xff] }
 0x139   : > { %v945_v0 = vadd.f32 %v944_v44, %v831_v43  ;;  %v6272_v43 = vld [vmem:[%s12747_s1 + $0xf8] sm:$0xff] }
 0x13a   : > { %v7274_v47 = vadd.f32 %v1167_v40, %v1055_v41  ;;  %1234 = vmatmul.f32.gmra.mxu0 %v293_v45  ;;  %v6271_v41 = vld [vmem:[%s12747_s1 + $0xf0] sm:$0xff] }
 0x13b   : > { %1347 = vmatmul.f32.gmra.mxu1 %v294_v46 }
 0x13c   : > { %1460 = vmatmul.f32.gmra.mxu2 %v6789_v4  ;;  %1573 = vmatmul.f32.gmra.mxu3 %v6794_v5  ;;  %v6265_v4 = vld [vmem:[%s12747_s1 + $0x60] sm:$0xff]  ;;  %v6266_v5 = vld [vmem:[%s12747_s1 + $0x68] sm:$0xff] }
 0x13f   : > { %v1057_v1 = vpop.f32.mrf.mxu2  ;;  %v1170_v48 = vpop.f32.mrf.mxu3 }
 0x140   : > { %v1058_v49 = vadd.f32 %v1057_v1, %v945_v0  ;;  %v834_v50 = vpop.f32.mrf.mxu0  ;;  %v947_v51 = vpop.f32.mrf.mxu1 }
 0x141   : > { %v948_v58 = vadd.f32 %v947_v51, %v834_v50  ;;  %v324_v50 = vld [vmem:[%s12747_s1 + $0x148] sm:$0xff] }
 0x142   : > { %v7284_v57 = vadd.f32 %v1170_v48, %v1058_v49  ;;  %1237 = vmatmul.f32.gmra.mxu0 %v299_v53  ;;  %v323_v49 = vld [vmem:[%s12747_s1 + $0x140] sm:$0xff] }
 0x143   : > { %1350 = vmatmul.f32.gmra.mxu1 %v300_v56  ;;  %v6273_v53 = vld [vmem:[%s12747_s1 + $0x120] sm:$0xff]  ;;  %v6274_v56 = vld [vmem:[%s12747_s1 + $0x128] sm:$0xff] }
 0x144   : > { %1463 = vmatmul.f32.gmra.mxu2 %v6265_v4  ;;  %1576 = vmatmul.f32.gmra.mxu3 %v6266_v5  ;;  %v2898_v5 = vld [vmem:[%s7346_s12 + $0x20] sm:$0xff] }
 0x147   : > { %v1060_v59 = vpop.f32.mrf.mxu2  ;;  %v1173_v60 = vpop.f32.mrf.mxu3 }
 0x148   : > { %v1061_v62 = vadd.f32 %v1060_v59, %v948_v58  ;;  %v837_v2 = vpop.f32.mrf.mxu0  ;;  %v950_v3 = vpop.f32.mrf.mxu1 }
 0x149   : > { %v951_v12 = vadd.f32 %v950_v3, %v837_v2 }
 0x14a   : > { %v7298_v8 = vadd.f32 %v1173_v60, %v1061_v62  ;;  %1240 = vmatmul.f32.gmra.mxu0 %v305_v6  ;;  %v3163_v60 = vsel %vm3150_vm0, %v2898_v5, 0.0  ;;  %v329_v6 = vld [vmem:[%s12747_s1 + $0x170] sm:$0xff] }
 0x14b   : > { %1353 = vmatmul.f32.gmra.mxu1 %v306_v7  ;;  %v330_v7 = vld [vmem:[%s12747_s1 + $0x178] sm:$0xff]  ;;  %3164 = vadd.xlane.f32.xlu2 %v3163_v60  ;;  %v2900_v5 = vld [vmem:[%s7346_s12 + $0x30] sm:$0xff] }
 0x14c   : > { %1466 = vmatmul.f32.gmra.mxu2 %v6267_v9  ;;  %1579 = vmatmul.f32.gmra.mxu3 %v6268_v11  ;;  %v6275_v11 = vld [vmem:[%s12747_s1 + $0x150] sm:$0xff]  ;;  %v2905_v60 = vld [vmem:[%s7346_s12 + $0x58] sm:$0xff] }
 0x14f   : > { %v1063_v13 = vpop.f32.mrf.mxu2  ;;  %v1176_v15 = vpop.f32.mrf.mxu3 }
 0x150   : > { %v1064_v17 = vadd.f32 %v1063_v13, %v951_v12  ;;  %v840_v18 = vpop.f32.mrf.mxu0  ;;  %v953_v19 = vpop.f32.mrf.mxu1  ;;  %v6276_v12 = vld [vmem:[%s12747_s1 + $0x158] sm:$0xff]  ;;  %v2894_v13 = vld [vmem:[%s7346_s12] sm:$0xff] }
 0x151   : > { %v954_v26 = vadd.f32 %v953_v19, %v840_v18  ;;  %v2899_v18 = vld [vmem:[%s7346_s12 + $0x28] sm:$0xff] }
 0x152   : > { %v7312_v22 = vadd.f32 %v1176_v15, %v1064_v17  ;;  %1243 = vmatmul.f32.gmra.mxu0 %v311_v20  ;;  %v3151_v15 = vsel %vm3150_vm0, %v2894_v13, 0.0 }
 0x153   : > { %1356 = vmatmul.f32.gmra.mxu1 %v312_v21  ;;  %3152 = vadd.xlane.f32.xlu0 %v3151_v15  ;;  %v3166_v21 = vsel %vm3150_vm0, %v2899_v18, 0.0  ;;  %v347_v15 = vld [vmem:[%s12747_s1 + $0x200] sm:$0xff] }
 0x154   : > { %1469 = vmatmul.f32.gmra.mxu2 %v6269_v24  ;;  %1582 = vmatmul.f32.gmra.mxu3 %v6270_v25 }
 0x155   : > { %3167 = vadd.xlane.f32.xlu2 %v3166_v21  ;;  %v6282_v21 = vld [vmem:[%s12747_s1 + $0x1e8] sm:$0xff] }
 0x157   : > { %v1066_v30 = vpop.f32.mrf.mxu2  ;;  %v1179_v31 = vpop.f32.mrf.mxu3 }
 0x158   : > { %v1067_v32 = vadd.f32 %v1066_v30, %v954_v26  ;;  %v843_v33 = vpop.f32.mrf.mxu0  ;;  %v956_v35 = vpop.f32.mrf.mxu1  ;;  %v335_v30 = vld [vmem:[%s12747_s1 + $0x1a0] sm:$0xff] }
 0x159   : > { %v957_v44 = vadd.f32 %v956_v35, %v843_v33  ;;  %v6277_v33 = vld [vmem:[%s12747_s1 + $0x180] sm:$0xff]  ;;  %v6278_v35 = vld [vmem:[%s12747_s1 + $0x188] sm:$0xff] }
 0x15a   : > { %v7326_v40 = vadd.f32 %v1179_v31, %v1067_v32  ;;  %1246 = vmatmul.f32.gmra.mxu0 %v317_v37  ;;  %v336_v31 = vld [vmem:[%s12747_s1 + $0x1a8] sm:$0xff] }
 0x15b   : > { %1359 = vmatmul.f32.gmra.mxu1 %v318_v38  ;;  %v2895_v37 = vld [vmem:[%s7346_s12 + $0x8] sm:$0xff] }
 0x15c   : > { %1472 = vmatmul.f32.gmra.mxu2 %v6271_v41  ;;  %1585 = vmatmul.f32.gmra.mxu3 %v6272_v43  ;;  %v3154_v38 = vsel %vm3150_vm0, %v2895_v37, 0.0  ;;  %v2902_v43 = vld [vmem:[%s7346_s12 + $0x40] sm:$0xff] }
 0x15d   : > { %3155 = vadd.xlane.f32.xlu0 %v3154_v38 }
 0x15f   : > { %v1069_v45 = vpop.f32.mrf.mxu2  ;;  %v1182_v46 = vpop.f32.mrf.mxu3 }
 0x160   : > { %v1070_v0 = vadd.f32 %v1069_v45, %v957_v44  ;;  %v846_v1 = vpop.f32.mrf.mxu0  ;;  %v959_v48 = vpop.f32.mrf.mxu1 }
 0x161   : > { %v960_v4 = vadd.f32 %v959_v48, %v846_v1 }
 0x162   : > { %v7341_v51 = vadd.f32 %v1182_v46, %v1070_v0  ;;  %1249 = vmatmul.f32.gmra.mxu0 %v323_v49  ;;  %v3175_v46 = vsel %vm3150_vm0, %v2902_v43, 0.0  ;;  %v341_v49 = vld [vmem:[%s12747_s1 + $0x1d0] sm:$0xff] }
 0x163   : > { %1362 = vmatmul.f32.gmra.mxu1 %v324_v50  ;;  %v342_v50 = vld [vmem:[%s12747_s1 + $0x1d8] sm:$0xff]  ;;  %3176 = vadd.xlane.f32.xlu2 %v3175_v46  ;;  %v353_v46 = vld [vmem:[%s12747_s1 + $0x230] sm:$0xff] }
 0x164   : > { %1475 = vmatmul.f32.gmra.mxu2 %v6273_v53  ;;  %1588 = vmatmul.f32.gmra.mxu3 %v6274_v56  ;;  %v6279_v56 = vld [vmem:[%s12747_s1 + $0x1b0] sm:$0xff] }
 0x167   : > { %v1072_v58 = vpop.f32.mrf.mxu2  ;;  %v1185_v59 = vpop.f32.mrf.mxu3 }
 0x168   : > { %v1073_v62 = vadd.f32 %v1072_v58, %v960_v4  ;;  %v849_v2 = vpop.f32.mrf.mxu0  ;;  %v962_v3 = vpop.f32.mrf.mxu1  ;;  %v6280_v4 = vld [vmem:[%s12747_s1 + $0x1b8] sm:$0xff]  ;;  %v3169_v58 = vsel %vm3150_vm0, %v2900_v5, 0.0  ;;  %v2911_v5 = vld [vmem:[%s7346_s12 + $0x88] sm:$0xff] }
 0x169   : > { %v963_v17 = vadd.f32 %v962_v3, %v849_v2  ;;  %3170 = vadd.xlane.f32.xlu0 %v3169_v58  ;;  %v2901_v58 = vld [vmem:[%s7346_s12 + $0x38] sm:$0xff] }
 0x16a   : > { %v7362_v9 = vadd.f32 %v1185_v59, %v1073_v62  ;;  %1252 = vmatmul.f32.gmra.mxu0 %v329_v6  ;;  %v2896_v62 = vld [vmem:[%s7346_s12 + $0x10] sm:$0xff]  ;;  %v3184_v6 = vsel %vm3150_vm0, %v2905_v60, 0.0 }
 0x16b   : > { %1365 = vmatmul.f32.gmra.mxu1 %v330_v7  ;;  %v3157_v7 = vsel %vm3150_vm0, %v2896_v62, 0.0  ;;  %3185 = vadd.xlane.f32.xlu2 %v3184_v6  ;;  %v3202_v62 = vsel %vm3150_vm0, %v2911_v5, 0.0  ;;  %v2907_v5 = vld [vmem:[%s7346_s12 + $0x68] sm:$0xff] }
 0x16c   : > { %1478 = vmatmul.f32.gmra.mxu2 %v6275_v11  ;;  %1591 = vmatmul.f32.gmra.mxu3 %v6276_v12 }
 0x16d   : > { %3158 = vadd.xlane.f32.xlu1 %v3157_v7 }
 0x16f   : > { %v1075_v19 = vpop.f32.mrf.mxu2  ;;  %v1188_v20 = vpop.f32.mrf.mxu3 }
 0x170   : > { %v1076_v24 = vadd.f32 %v1075_v19, %v963_v17  ;;  %v852_v25 = vpop.f32.mrf.mxu0  ;;  %v965_v26 = vpop.f32.mrf.mxu1  ;;  %v348_v17 = vld [vmem:[%s12747_s1 + $0x208] sm:$0xff]  ;;  %v617_v19 = vld [vmem:[%s6702_s26 + $0x470] sm:$0xff] }
 0x171   : > { %v966_v41 = vadd.f32 %v965_v26, %v852_v25  ;;  %v2903_v25 = vld [vmem:[%s7346_s12 + $0x48] sm:$0xff]  ;;  %1667 = vmatpush.msra.mxu0 %v617_v19  ;;  %v614_v19 = vld [vmem:[%s6702_s26 + $0x458] sm:$0xff] }
 0x172   : > { %v7380_v32 = vadd.f32 %v1188_v20, %v1076_v24  ;;  %1255 = vmatmul.f32.gmra.mxu0 %v335_v30  ;;  %v6281_v20 = vld [vmem:[%s12747_s1 + $0x1e0] sm:$0xff]  ;;  %v665_v24 = vld [vmem:[%s6702_s26 + $0x5f0] sm:$0xff]  ;;  %v3178_v26 = vsel %vm3150_vm0, %v2903_v25, 0.0 }
 0x173   : > { %1368 = vmatmul.f32.gmra.mxu1 %v336_v31  ;;  %3179 = vadd.xlane.f32.xlu0 %v3178_v26  ;;  %v2908_v31 = vld [vmem:[%s7346_s12 + $0x70] sm:$0xff]  ;;  %v2914_v26 = vld [vmem:[%s7346_s12 + $0xa0] sm:$0xff] }
 0x174   : > { %1481 = vmatmul.f32.gmra.mxu2 %v6277_v33  ;;  %1594 = vmatmul.f32.gmra.mxu3 %v6278_v35  ;;  %v2897_v33 = vld [vmem:[%s7346_s12 + $0x18] sm:$0xff]  ;;  %v3193_v38 = vsel %vm3150_vm0, %v2908_v31, 0.0 }
 0x175   : > { %1780 = vmatpush.msra.mxu1 %v665_v24  ;;  %3194 = vadd.xlane.f32.xlu2 %v3193_v38 }
 0x176   : > { %1668 = vmatpush.msra.mxu0 %v614_v19  ;;  %v611_v19 = vld [vmem:[%s6702_s26 + $0x440] sm:$0xff] }
 0x177   : > { %v1078_v44 = vpop.f32.mrf.mxu2  ;;  %v1191_v45 = vpop.f32.mrf.mxu3 }
 0x178   : > { %v1079_v0 = vadd.f32 %v1078_v44, %v966_v41  ;;  %v855_v1 = vpop.f32.mrf.mxu0  ;;  %v968_v48 = vpop.f32.mrf.mxu1  ;;  %v3160_v41 = vsel %vm3150_vm0, %v2897_v33, 0.0  ;;  %1669 = vmatpush.msra.mxu0 %v611_v19 }
 0x179   : > { %v969_v59 = vadd.f32 %v968_v48, %v855_v1  ;;  %3161 = vadd.xlane.f32.xlu1 %v3160_v41  ;;  %v6283_v48 = vld [vmem:[%s12747_s1 + $0x210] sm:$0xff] }
 0x17a   : > { %v7398_v53 = vadd.f32 %v1191_v45, %v1079_v0  ;;  %1258 = vmatmul.f32.gmra.mxu0 %v341_v49  ;;  %v354_v0 = vld [vmem:[%s12747_s1 + $0x238] sm:$0xff] }
 0x17b   : > { %1371 = vmatmul.f32.gmra.mxu1 %v342_v50  ;;  %v6284_v49 = vld [vmem:[%s12747_s1 + $0x218] sm:$0xff]  ;;  %v2906_v50 = vld [vmem:[%s7346_s12 + $0x60] sm:$0xff] }
 0x17c   : > { %1484 = vmatmul.f32.gmra.mxu2 %v6279_v56  ;;  %1597 = vmatmul.f32.gmra.mxu3 %v6280_v4  ;;  %v3187_v56 = vsel %vm3150_vm0, %v2906_v50, 0.0 }
 0x17d   : > { %3188 = vadd.xlane.f32.xlu0 %v3187_v56  ;;  %3203 = vadd.xlane.f32.xlu2 %v3202_v62  ;;  %v3190_v62 = vsel %vm3150_vm0, %v2907_v5, 0.0  ;;  %v2923_v5 = vld [vmem:[%s7346_s12 + $0xe8] sm:$0xff] }
 0x17f   : > { %v1081_v2 = vpop.f32.mrf.mxu2  ;;  %v1194_v3 = vpop.f32.mrf.mxu3 }
 0x180   : > { %v1082_v11 = vadd.f32 %v1081_v2, %v969_v59  ;;  %v858_v12 = vpop.f32.mrf.mxu0  ;;  %v971_v13 = vpop.f32.mrf.mxu1  ;;  %v3172_v2 = vsel %vm3150_vm0, %v2901_v58, 0.0 }
 0x181   : > { %v972_v30 = vadd.f32 %v971_v13, %v858_v12  ;;  %v360_v12 = vld [vmem:[%s12747_s1 + $0x268] sm:$0xff]  ;;  %3173 = vadd.xlane.f32.xlu1 %v3172_v2 }
 0x182   : > { %v7418_v18 = vadd.f32 %v1194_v3, %v1082_v11  ;;  %1261 = vmatmul.f32.gmra.mxu0 %v347_v15  ;;  %v359_v11 = vld [vmem:[%s12747_s1 + $0x260] sm:$0xff] }
 0x183   : > { %1374 = vmatmul.f32.gmra.mxu1 %v348_v17  ;;  %v6285_v15 = vld [vmem:[%s12747_s1 + $0x240] sm:$0xff]  ;;  %v6286_v17 = vld [vmem:[%s12747_s1 + $0x248] sm:$0xff] }
 0x184   : > { %1487 = vmatmul.f32.gmra.mxu2 %v6281_v20  ;;  %1600 = vmatmul.f32.gmra.mxu3 %v6282_v21  ;;  %v662_v20 = vld [vmem:[%s6702_s26 + $0x5d8] sm:$0xff] }
 0x185   : > { %v2909_v21 = vld [vmem:[%s7346_s12 + $0x78] sm:$0xff]  ;;  %1781 = vmatpush.msra.mxu1 %v662_v20  ;;  %v659_v20 = vld [vmem:[%s6702_s26 + $0x5c0] sm:$0xff] }
 0x186   : > { %v3196_v25 = vsel %vm3150_vm0, %v2909_v21, 0.0  ;;  %v2915_v21 = vld [vmem:[%s7346_s12 + $0xa8] sm:$0xff] }
 0x187   : > { %v1084_v35 = vpop.f32.mrf.mxu2  ;;  %v1197_v37 = vpop.f32.mrf.mxu3  ;;  %3197 = vadd.xlane.f32.xlu0 %v3196_v25  ;;  %1782 = vmatpush.msra.mxu1 %v659_v20  ;;  %v3214_v25 = vsel %vm3150_vm0, %v2915_v21, 0.0  ;;  %v6293_v21 = vld [vmem:[%s12747_s1 + $0x300] sm:$0xff] }
 0x188   : > { %v1085_v43 = vadd.f32 %v1084_v35, %v972_v30  ;;  %v861_v44 = vpop.f32.mrf.mxu0  ;;  %v974_v45 = vpop.f32.mrf.mxu1  ;;  %v2904_v30 = vld [vmem:[%s7346_s12 + $0x50] sm:$0xff]  ;;  %v3211_v35 = vsel %vm3150_vm0, %v2914_v26, 0.0 }
 0x189   : > { %v975_v4 = vadd.f32 %v974_v45, %v861_v44  ;;  %v365_v44 = vld [vmem:[%s12747_s1 + $0x290] sm:$0xff]  ;;  %v366_v45 = vld [vmem:[%s12747_s1 + $0x298] sm:$0xff]  ;;  %3212 = vadd.xlane.f32.xlu2 %v3211_v35 }
 0x18a   : > { %v7440_v1 = vadd.f32 %v1197_v37, %v1085_v43  ;;  %1264 = vmatmul.f32.gmra.mxu0 %v353_v46  ;;  %v3181_v37 = vsel %vm3150_vm0, %v2904_v30, 0.0  ;;  %v2920_v26 = vld [vmem:[%s7346_s12 + $0xd0] sm:$0xff]  ;;  %v2910_v30 = vld [vmem:[%s7346_s12 + $0x80] sm:$0xff] }
 0x18b   : > { %1377 = vmatmul.f32.gmra.mxu1 %v354_v0  ;;  %3182 = vadd.xlane.f32.xlu1 %v3181_v37  ;;  %v6287_v0 = vld [vmem:[%s12747_s1 + $0x270] sm:$0xff]  ;;  %v3229_v35 = vsel %vm3150_vm0, %v2920_v26, 0.0  ;;  %v3199_v37 = vsel %vm3150_vm0, %v2910_v30, 0.0  ;;  %v2921_v26 = vld [vmem:[%s7346_s12 + $0xd8] sm:$0xff] }
 0x18c   : > { %1490 = vmatmul.f32.gmra.mxu2 %v6283_v48  ;;  %1603 = vmatmul.f32.gmra.mxu3 %v6284_v49  ;;  %v6288_v48 = vld [vmem:[%s12747_s1 + $0x278] sm:$0xff]  ;;  %v2912_v49 = vld [vmem:[%s7346_s12 + $0x90] sm:$0xff]  ;;  %v3232_v30 = vsel %vm3150_vm0, %v2921_v26, 0.0 }
 0x18d   : > { %v3205_v56 = vsel %vm3150_vm0, %v2912_v49, 0.0  ;;  %v6292_v49 = vld [vmem:[%s12747_s1 + $0x2d8] sm:$0xff]  ;;  %v605_v26 = vld [vmem:[%s6702_s26 + $0x410] sm:$0xff] }
 0x18f   : > { %v1087_v59 = vpop.f32.mrf.mxu2  ;;  %v1200_v60 = vpop.f32.mrf.mxu3  ;;  %3206 = vadd.xlane.f32.xlu0 %v3205_v56 }
 0x190   : > { %v1088_v3 = vadd.f32 %v1087_v59, %v975_v4  ;;  %v864_v6 = vpop.f32.mrf.mxu0  ;;  %v977_v7 = vpop.f32.mrf.mxu1  ;;  %v2917_v4 = vld [vmem:[%s7346_s12 + $0xb8] sm:$0xff] }
 0x191   : > { %v978_v24 = vadd.f32 %v977_v7, %v864_v6  ;;  %v371_v7 = vld [vmem:[%s12747_s1 + $0x2c0] sm:$0xff] }
 0x192   : > { %v7460_v13 = vadd.f32 %v1200_v60, %v1088_v3  ;;  %1267 = vmatmul.f32.gmra.mxu0 %v359_v11  ;;  %v3220_v60 = vsel %vm3150_vm0, %v2917_v4, 0.0  ;;  %v372_v11 = vld [vmem:[%s12747_s1 + $0x2c8] sm:$0xff] }
 0x193   : > { %1380 = vmatmul.f32.gmra.mxu1 %v360_v12  ;;  %3221 = vadd.xlane.f32.xlu2 %v3220_v60 }
 0x194   : > { %1493 = vmatmul.f32.gmra.mxu2 %v6285_v15  ;;  %1606 = vmatmul.f32.gmra.mxu3 %v6286_v17  ;;  %v6289_v15 = vld [vmem:[%s12747_s1 + $0x2a0] sm:$0xff]  ;;  %v6290_v17 = vld [vmem:[%s12747_s1 + $0x2a8] sm:$0xff] }
 0x195   : > { %3191 = vadd.xlane.f32.xlu1 %v3190_v62  ;;  %v3238_v62 = vsel %vm3150_vm0, %v2923_v5, 0.0  ;;  %v6296_v5 = vld [vmem:[%s12747_s1 + $0x338] sm:$0xff] }
 0x197   : > { %v1090_v31 = vpop.f32.mrf.mxu2  ;;  %v1203_v33 = vpop.f32.mrf.mxu3  ;;  %3215 = vadd.xlane.f32.xlu0 %v3214_v25  ;;  %v656_v25 = vld [vmem:[%s6702_s26 + $0x5a8] sm:$0xff] }
 0x198   : > { %v1091_v38 = vadd.f32 %v1090_v31, %v978_v24  ;;  %v867_v41 = vpop.f32.mrf.mxu0  ;;  %v980_v43 = vpop.f32.mrf.mxu1  ;;  %1783 = vmatpush.msra.mxu1 %v656_v25  ;;  %v6298_v25 = vld [vmem:[%s12747_s1 + $0x368] sm:$0xff] }
 0x199   : > { %v981_v50 = vadd.f32 %v980_v43, %v867_v41 }
 0x19a   : > { %v7482_v46 = vadd.f32 %v1203_v33, %v1091_v38  ;;  %1270 = vmatmul.f32.gmra.mxu0 %v365_v44  ;;  %v377_v44 = vld [vmem:[%s12747_s1 + $0x2f0] sm:$0xff] }
 0x19b   : > { %1383 = vmatmul.f32.gmra.mxu1 %v366_v45  ;;  %v378_v45 = vld [vmem:[%s12747_s1 + $0x2f8] sm:$0xff]  ;;  %3230 = vadd.xlane.f32.xlu2 %v3229_v35 }
 0x19c   : > { %1496 = vmatmul.f32.gmra.mxu2 %v6287_v0  ;;  %1609 = vmatmul.f32.gmra.mxu3 %v6288_v48  ;;  %v6291_v48 = vld [vmem:[%s12747_s1 + $0x2d0] sm:$0xff] }
 0x19d   : > { %3200 = vadd.xlane.f32.xlu1 %v3199_v37 }
 0x19f   : > { %v1093_v58 = vpop.f32.mrf.mxu2  ;;  %v1206_v59 = vpop.f32.mrf.mxu3 }
 0x1a0   : > { %v1094_v2 = vadd.f32 %v1093_v58, %v981_v50  ;;  %v870_v3 = vpop.f32.mrf.mxu0  ;;  %v983_v6 = vpop.f32.mrf.mxu1  ;;  %v2918_v50 = vld [vmem:[%s7346_s12 + $0xc0] sm:$0xff]  ;;  %v2913_v58 = vld [vmem:[%s7346_s12 + $0x98] sm:$0xff] }
 0x1a1   : > { %v984_v24 = vadd.f32 %v983_v6, %v870_v3  ;;  %v3223_v4 = vsel %vm3150_vm0, %v2918_v50, 0.0 }
 0x1a2   : > { %v7502_v12 = vadd.f32 %v1206_v59, %v1094_v2  ;;  %1273 = vmatmul.f32.gmra.mxu0 %v371_v7  ;;  %3224 = vadd.xlane.f32.xlu0 %v3223_v4  ;;  %v3208_v2 = vsel %vm3150_vm0, %v2913_v58, 0.0  ;;  %v6295_v4 = vld [vmem:[%s12747_s1 + $0x330] sm:$0xff] }
 0x1a3   : > { %1386 = vmatmul.f32.gmra.mxu1 %v372_v11  ;;  %v383_v11 = vld [vmem:[%s12747_s1 + $0x320] sm:$0xff]  ;;  %3239 = vadd.xlane.f32.xlu2 %v3238_v62  ;;  %v2924_v58 = vld [vmem:[%s7346_s12 + $0xf0] sm:$0xff]  ;;  %v2919_v62 = vld [vmem:[%s7346_s12 + $0xc8] sm:$0xff] }
 0x1a4   : > { %1499 = vmatmul.f32.gmra.mxu2 %v6289_v15  ;;  %1612 = vmatmul.f32.gmra.mxu3 %v6290_v17  ;;  %v384_v15 = vld [vmem:[%s12747_s1 + $0x328] sm:$0xff] }
 0x1a5   : > { %3209 = vadd.xlane.f32.xlu1 %v3208_v2 }
 0x1a7   : > { %v1096_v31 = vpop.f32.mrf.mxu2  ;;  %v1209_v33 = vpop.f32.mrf.mxu3 }
 0x1a8   : > { %v1097_v38 = vadd.f32 %v1096_v31, %v984_v24  ;;  %v873_v41 = vpop.f32.mrf.mxu0  ;;  %v986_v43 = vpop.f32.mrf.mxu1  ;;  %v608_v24 = vld [vmem:[%s6702_s26 + $0x428] sm:$0xff]  ;;  %v2926_v31 = vld [vmem:[%s7346_s12 + $0x100] sm:$0xff] }
 0x1a9   : > { %v987_v56 = vadd.f32 %v986_v43, %v873_v41  ;;  %1670 = vmatpush.msra.mxu0 %v608_v24  ;;  %v6297_v24 = vld [vmem:[%s12747_s1 + $0x360] sm:$0xff] }
 0x1aa   : > { %v7524_v0 = vadd.f32 %v1209_v33, %v1097_v38  ;;  %1276 = vmatmul.f32.gmra.mxu0 %v377_v44  ;;  %v2916_v33 = vld [vmem:[%s7346_s12 + $0xb0] sm:$0xff]  ;;  %3233 = vadd.xlane.f32.xlu0 %v3232_v30  ;;  %v3247_v38 = vsel %vm3150_vm0, %v2926_v31, 0.0  ;;  %v2927_v31 = vld [vmem:[%s7346_s12 + $0x108] sm:$0xff] }
 0x1ab   : > { %1389 = vmatmul.f32.gmra.mxu1 %v378_v45  ;;  %v3217_v41 = vsel %vm3150_vm0, %v2916_v33, 0.0  ;;  %3248 = vadd.xlane.f32.xlu2 %v3247_v38  ;;  %v653_v30 = vld [vmem:[%s6702_s26 + $0x590] sm:$0xff] }
 0x1ac   : > { %1502 = vmatmul.f32.gmra.mxu2 %v6291_v48  ;;  %1615 = vmatmul.f32.gmra.mxu3 %v6292_v49  ;;  %v389_v48 = vld [vmem:[%s12747_s1 + $0x350] sm:$0xff]  ;;  %v390_v49 = vld [vmem:[%s12747_s1 + $0x358] sm:$0xff] }
 0x1ad   : > { %3218 = vadd.xlane.f32.xlu1 %v3217_v41  ;;  %1671 = vmatpush.msra.mxu0 %v605_v26  ;;  %v2932_v33 = vld [vmem:[%s7346_s12 + $0x130] sm:$0xff]  ;;  %v6301_v26 = vld [vmem:[%s12747_s1 + $0x3c0] sm:$0xff] }
 0x1ae   : > { %1784 = vmatpush.msra.mxu1 %v653_v30  ;;  %v3265_v41 = vsel %vm3150_vm0, %v2932_v33, 0.0  ;;  %v6302_v30 = vld [vmem:[%s12747_s1 + $0x3c8] sm:$0xff]  ;;  %v2933_v33 = vld [vmem:[%s7346_s12 + $0x138] sm:$0xff] }
 0x1af   : > { %v1099_v59 = vpop.f32.mrf.mxu2  ;;  %v1212_v60 = vpop.f32.mrf.mxu3 }
 0x1b0   : > { %v1100_v3 = vadd.f32 %v1099_v59, %v987_v56  ;;  %v1232_v6 = vpop.f32.mrf.mxu0  ;;  %v1345_v7 = vpop.f32.mrf.mxu1  ;;  %v3241_v59 = vsel %vm3150_vm0, %v2924_v58, 0.0  ;;  %v6299_v58 = vld [vmem:[%s12747_s1 + $0x390] sm:$0xff] }
 0x1b1   : > { %v1233_v17 = vadd.f32 %v1232_v6, %v7004_v28  ;;  %v6294_v28 = vld [vmem:[%s12747_s1 + $0x308] sm:$0xff]  ;;  %v3226_v6 = vsel %vm3150_vm0, %v2919_v62, 0.0 }
 0x1b2   : > { %v7546_v19 = vadd.f32 %v1212_v60, %v1100_v3  ;;  %1279 = vmatmul.f32.gmra.mxu0 %v383_v11  ;;  %v2929_v60 = vld [vmem:[%s7346_s12 + $0x118] sm:$0xff]  ;;  %3242 = vadd.xlane.f32.xlu0 %v3241_v59 }
 0x1b3   : > { %v1346_v20 = vadd.f32 %v1345_v7, %v1233_v17  ;;  %1392 = vmatmul.f32.gmra.mxu1 %v384_v15  ;;  %v3256_v3 = vsel %vm3150_vm0, %v2929_v60, 0.0  ;;  %v395_v17 = vld [vmem:[%s12747_s1 + $0x380] sm:$0xff]  ;;  %v6300_v59 = vld [vmem:[%s12747_s1 + $0x398] sm:$0xff] }
 0x1b4   : > { %1505 = vmatmul.f32.gmra.mxu2 %v6293_v21  ;;  %1618 = vmatmul.f32.gmra.mxu3 %v6294_v28  ;;  %v2930_v60 = vld [vmem:[%s7346_s12 + $0x120] sm:$0xff] }
 0x1b5   : > { %2797 = vst [vmem:[%s7551_s16] sm:$0xff] %v1346_v20  ;;  %v396_v20 = vld [vmem:[%s12747_s1 + $0x388] sm:$0xff]  ;;  %3257 = vadd.xlane.f32.xlu2 %v3256_v3  ;;  %3227 = vadd.xlane.f32.xlu1 %v3226_v6  ;;  %v3259_v62 = vsel %vm3150_vm0, %v2930_v60, 0.0 }
 0x1b7   : > { %v1458_v35 = vpop.f32.mrf.mxu2  ;;  %v1571_v37 = vpop.f32.mrf.mxu3 }
 0x1b8   : > { %v7568_v43 = vadd.f32 %v1571_v37, %v1458_v35  ;;  %v1235_v44 = vpop.f32.mrf.mxu0  ;;  %v1348_v45 = vpop.f32.mrf.mxu1  ;;  %v2922_v35 = vld [vmem:[%s7346_s12 + $0xe0] sm:$0xff] }
 0x1b9   : > { %v1236_v50 = vadd.f32 %v1235_v44, %v7018_v39  ;;  %v3235_v44 = vsel %vm3150_vm0, %v2922_v35, 0.0  ;;  %v2938_v35 = vld [vmem:[%s7346_s12 + $0x160] sm:$0xff] }
 0x1ba   : > { %1282 = vmatmul.f32.gmra.mxu0 %v389_v48 }
 0x1bb   : > { %v1349_v56 = vadd.f32 %v1348_v45, %v1236_v50  ;;  %1395 = vmatmul.f32.gmra.mxu1 %v390_v49  ;;  %v401_v50 = vld [vmem:[%s12747_s1 + $0x3b0] sm:$0xff] }
 0x1bc   : > { %1508 = vmatmul.f32.gmra.mxu2 %v6295_v4  ;;  %1621 = vmatmul.f32.gmra.mxu3 %v6296_v5 }
 0x1bd   : > { %2801 = vst [vmem:[%s7551_s16 + $0x18] sm:$0xff] %v1349_v56  ;;  %v402_v56 = vld [vmem:[%s12747_s1 + $0x3b8] sm:$0xff]  ;;  %3266 = vadd.xlane.f32.xlu2 %v3265_v41  ;;  %3236 = vadd.xlane.f32.xlu1 %v3235_v44  ;;  %v3283_v44 = vsel %vm3150_vm0, %v2938_v35, 0.0  ;;  %v6306_v35 = vld [vmem:[%s12747_s1 + $0x428] sm:$0xff] }
 0x1be   : > { %v7669_v60 = vpop.xlane.xlu2 %3164 }
 0x1bf   : > { %v1461_v39 = vpop.f32.mrf.mxu2  ;;  %v1574_v2 = vpop.f32.mrf.mxu3  ;;  %12765 = vst [vmem:[#allocation2_spill] sm:$0xff] %v7669_v60 }
 0x1c0   : > { %v7590_v7 = vadd.f32 %v1574_v2, %v1461_v39  ;;  %v1238_v11 = vpop.f32.mrf.mxu0  ;;  %v1351_v15 = vpop.f32.mrf.mxu1  ;;  %v2935_v39 = vld [vmem:[%s7346_s12 + $0x148] sm:$0xff]  ;;  %v2925_v2 = vld [vmem:[%s7346_s12 + $0xf8] sm:$0xff] }
 0x1c1   : > { %v1239_v21 = vadd.f32 %v1238_v11, %v7034_v52  ;;  %v3250_v52 = vsel %vm3150_vm0, %v2927_v31, 0.0  ;;  %v3274_v6 = vsel %vm3150_vm0, %v2935_v39, 0.0  ;;  %v3244_v11 = vsel %vm3150_vm0, %v2925_v2, 0.0  ;;  %v602_v31 = vld [vmem:[%s6702_s26 + $0x3f8] sm:$0xff]  ;;  %v2936_v2 = vld [vmem:[%s7346_s12 + $0x150] sm:$0xff] }
 0x1c2   : > { %1285 = vmatmul.f32.gmra.mxu0 %v395_v17  ;;  %3251 = vadd.xlane.f32.xlu0 %v3250_v52  ;;  %v650_v52 = vld [vmem:[%s6702_s26 + $0x578] sm:$0xff] }
 0x1c3   : > { %v1352_v28 = vadd.f32 %v1351_v15, %v1239_v21  ;;  %1398 = vmatmul.f32.gmra.mxu1 %v396_v20  ;;  %v407_v21 = vld [vmem:[%s12747_s1 + $0x3e0] sm:$0xff]  ;;  %1672 = vmatpush.msra.mxu0 %v602_v31  ;;  %v6304_v39 = vld [vmem:[%s12747_s1 + $0x3f8] sm:$0xff] }
 0x1c4   : > { %1511 = vmatmul.f32.gmra.mxu2 %v6297_v24  ;;  %1624 = vmatmul.f32.gmra.mxu3 %v6298_v25 }
 0x1c5   : > { %2804 = vst [vmem:[%s7551_s16 + $0x30] sm:$0xff] %v1352_v28  ;;  %v408_v28 = vld [vmem:[%s12747_s1 + $0x3e8] sm:$0xff]  ;;  %3275 = vadd.xlane.f32.xlu2 %v3274_v6  ;;  %3245 = vadd.xlane.f32.xlu1 %v3244_v11 }
 0x1c6   : > { %1785 = vmatpush.msra.mxu1 %v650_v52  ;;  %v7693_v31 = vpop.xlane.xlu0 %3152 }
 0x1c7   : > { %v1464_v37 = vpop.f32.mrf.mxu2  ;;  %v1577_v38 = vpop.f32.mrf.mxu3  ;;  %12766 = vst [vmem:[#allocation3_spill] sm:$0xff] %v7693_v31 }
 0x1c8   : > { %v7614_v45 = vadd.f32 %v1577_v38, %v1464_v37  ;;  %v1241_v48 = vpop.f32.mrf.mxu0  ;;  %v1354_v49 = vpop.f32.mrf.mxu1  ;;  %v2928_v37 = vld [vmem:[%s7346_s12 + $0x110] sm:$0xff] }
 0x1c9   : > { %v1242_v4 = vadd.f32 %v1241_v48, %v7048_v63  ;;  %v3253_v48 = vsel %vm3150_vm0, %v2928_v37, 0.0  ;;  %v647_v37 = vld [vmem:[%s6702_s26 + $0x560] sm:$0xff] }
 0x1ca   : > { %1288 = vmatmul.f32.gmra.mxu0 %v401_v50  ;;  %3260 = vadd.xlane.f32.xlu0 %v3259_v62  ;;  %v6303_v62 = vld [vmem:[%s12747_s1 + $0x3f0] sm:$0xff] }
 0x1cb   : > { %v1355_v5 = vadd.f32 %v1354_v49, %v1242_v4  ;;  %1401 = vmatmul.f32.gmra.mxu1 %v402_v56  ;;  %v413_v4 = vld [vmem:[%s12747_s1 + $0x410] sm:$0xff] }
 0x1cc   : > { %1514 = vmatmul.f32.gmra.mxu2 %v6299_v58  ;;  %1627 = vmatmul.f32.gmra.mxu3 %v6300_v59 }
 0x1cd   : > { %2807 = vst [vmem:[%s7551_s16 + $0x48] sm:$0xff] %v1355_v5  ;;  %v414_v5 = vld [vmem:[%s12747_s1 + $0x418] sm:$0xff]  ;;  %3284 = vadd.xlane.f32.xlu2 %v3283_v44  ;;  %3254 = vadd.xlane.f32.xlu1 %v3253_v48  ;;  %v2934_v44 = vld [vmem:[%s7346_s12 + $0x140] sm:$0xff] }
 0x1ce   : > { %1786 = vmatpush.msra.mxu1 %v647_v37  ;;  %v431_v37 = vld [vmem:[%s12747_s1 + $0x4a0] sm:$0xff] }
 0x1cf   : > { %v1467_v63 = vpop.f32.mrf.mxu2  ;;  %v1580_v3 = vpop.f32.mrf.mxu3 }
 0x1d0   : > { %v7636_v15 = vadd.f32 %v1580_v3, %v1467_v63  ;;  %v1244_v17 = vpop.f32.mrf.mxu0  ;;  %v1357_v20 = vpop.f32.mrf.mxu1  ;;  %v3277_v63 = vsel %vm3150_vm0, %v2936_v2, 0.0  ;;  %v2931_v3 = vld [vmem:[%s7346_s12 + $0x128] sm:$0xff]  ;;  %v3271_v2 = vsel %vm3150_vm0, %v2934_v44, 0.0 }
 0x1d1   : > { %v1245_v24 = vadd.f32 %v1244_v17, %v7064_v16  ;;  %v3268_v16 = vsel %vm3150_vm0, %v2933_v33, 0.0  ;;  %v7695_v33 = vpop.xlane.xlu2 %3167 }
 0x1d2   : > { %1291 = vmatmul.f32.gmra.mxu0 %v407_v21  ;;  %3269 = vadd.xlane.f32.xlu0 %v3268_v16  ;;  %12767 = vst [vmem:[#allocation4_spill] sm:$0xff] %v7695_v33  ;;  %v6305_v16 = vld [vmem:[%s12747_s1 + $0x420] sm:$0xff] }
 0x1d3   : > { %v1358_v25 = vadd.f32 %v1357_v20, %v1245_v24  ;;  %1404 = vmatmul.f32.gmra.mxu1 %v408_v28  ;;  %v3262_v20 = vsel %vm3150_vm0, %v2931_v3, 0.0 }
 0x1d4   : > { %1517 = vmatmul.f32.gmra.mxu2 %v6301_v26  ;;  %1630 = vmatmul.f32.gmra.mxu3 %v6302_v30  ;;  %v420_v26 = vld [vmem:[%s12747_s1 + $0x448] sm:$0xff] }
 0x1d5   : > { %2810 = vst [vmem:[%s7551_s16 + $0x60] sm:$0xff] %v1358_v25  ;;  %v419_v25 = vld [vmem:[%s12747_s1 + $0x440] sm:$0xff]  ;;  %3263 = vadd.xlane.f32.xlu1 %v3262_v20 }
 0x1d7   : > { %v1470_v38 = vpop.f32.mrf.mxu2  ;;  %v1583_v41 = vpop.f32.mrf.mxu3 }
 0x1d8   : > { %v7660_v49 = vadd.f32 %v1583_v41, %v1470_v38  ;;  %v1247_v50 = vpop.f32.mrf.mxu0  ;;  %v1360_v56 = vpop.f32.mrf.mxu1  ;;  %v2939_v38 = vld [vmem:[%s7346_s12 + $0x168] sm:$0xff]  ;;  %v2944_v41 = vld [vmem:[%s7346_s12 + $0x190] sm:$0xff] }
 0x1d9   : > { %v1248_v58 = vadd.f32 %v1247_v50, %v7078_v27  ;;  %v2941_v27 = vld [vmem:[%s7346_s12 + $0x178] sm:$0xff] }
 0x1da   : > { %1294 = vmatmul.f32.gmra.mxu0 %v413_v4  ;;  %3278 = vadd.xlane.f32.xlu0 %v3277_v63  ;;  %v3292_v17 = vsel %vm3150_vm0, %v2941_v27, 0.0  ;;  %v3301_v4 = vsel %vm3150_vm0, %v2944_v41, 0.0  ;;  %v7721_v27 = vpop.xlane.xlu0 %3155 }
 0x1db   : > { %v1361_v59 = vadd.f32 %v1360_v56, %v1248_v58  ;;  %1407 = vmatmul.f32.gmra.mxu1 %v414_v5  ;;  %3293 = vadd.xlane.f32.xlu2 %v3292_v17  ;;  %v3286_v56 = vsel %vm3150_vm0, %v2939_v38, 0.0  ;;  %12768 = vst [vmem:[#allocation5_spill] sm:$0xff] %v7721_v27  ;;  %v6308_v17 = vld [vmem:[%s12747_s1 + $0x458] sm:$0xff]  ;;  %v432_v38 = vld [vmem:[%s12747_s1 + $0x4a8] sm:$0xff] }
 0x1dc   : > { %1520 = vmatmul.f32.gmra.mxu2 %v6303_v62  ;;  %1633 = vmatmul.f32.gmra.mxu3 %v6304_v39  ;;  %v425_v62 = vld [vmem:[%s12747_s1 + $0x470] sm:$0xff]  ;;  %v426_v39 = vld [vmem:[%s12747_s1 + $0x478] sm:$0xff] }
 0x1dd   : > { %2813 = vst [vmem:[%s7551_s16 + $0x78] sm:$0xff] %v1361_v59  ;;  %3272 = vadd.xlane.f32.xlu1 %v3271_v2  ;;  %v644_v2 = vld [vmem:[%s6702_s26 + $0x548] sm:$0xff] }
 0x1de   : > { %1787 = vmatpush.msra.mxu1 %v644_v2  ;;  %v6312_v2 = vld [vmem:[%s12747_s1 + $0x4b8] sm:$0xff] }
 0x1df   : > { %v1473_v6 = vpop.f32.mrf.mxu2  ;;  %v1586_v11 = vpop.f32.mrf.mxu3 }
 0x1e0   : > { %v7684_v21 = vadd.f32 %v1586_v11, %v1473_v6  ;;  %v1250_v28 = vpop.f32.mrf.mxu0  ;;  %v1363_v24 = vpop.f32.mrf.mxu1  ;;  %v6307_v11 = vld [vmem:[%s12747_s1 + $0x450] sm:$0xff] }
 0x1e1   : > { %v1251_v30 = vadd.f32 %v1250_v28, %v7094_v42  ;;  %v599_v42 = vld [vmem:[%s6702_s26 + $0x3e0] sm:$0xff]  ;;  %v7723_v6 = vpop.xlane.xlu2 %3176  ;;  %v2947_v28 = vld [vmem:[%s7346_s12 + $0x1a8] sm:$0xff] }
 0x1e2   : > { %1297 = vmatmul.f32.gmra.mxu0 %v419_v25  ;;  %3287 = vadd.xlane.f32.xlu0 %v3286_v56  ;;  %12769 = vst [vmem:[#allocation6_spill] sm:$0xff] %v7723_v6  ;;  %v7747_v44 = vpop.xlane.xlu0 %3170  ;;  %v7751_v56 = vpop.xlane.xlu1 %3158  ;;  %v3058_v6 = vld [vmem:[%s7346_s12 + $0x520] sm:$0xff] }
 0x1e3   : > { %v1364_v52 = vadd.f32 %v1363_v24, %v1251_v30  ;;  %1410 = vmatmul.f32.gmra.mxu1 %v420_v26  ;;  %1673 = vmatpush.msra.mxu0 %v599_v42  ;;  %v2937_v24 = vld [vmem:[%s7346_s12 + $0x158] sm:$0xff]  ;;  %v3310_v30 = vsel %vm3150_vm0, %v2947_v28, 0.0  ;;  %12770 = vst [vmem:[#allocation7_spill] sm:$0xff] %v7747_v44  ;;  %v2950_v28 = vld [vmem:[%s7346_s12 + $0x1c0] sm:$0xff] }
 0x1e4   : > { %1523 = vmatmul.f32.gmra.mxu2 %v6305_v16  ;;  %1636 = vmatmul.f32.gmra.mxu3 %v6306_v35  ;;  %12772 = vst [vmem:[#allocation9_spill] sm:$0xff] %v7751_v56 }
 0x1e5   : > { %2816 = vst [vmem:[%s7551_s16 + $0x90] sm:$0xff] %v1364_v52  ;;  %3302 = vadd.xlane.f32.xlu2 %v3301_v4  ;;  %v3280_v52 = vsel %vm3150_vm0, %v2937_v24, 0.0  ;;  %v6309_v4 = vld [vmem:[%s12747_s1 + $0x480] sm:$0xff]  ;;  %v2940_v24 = vld [vmem:[%s7346_s12 + $0x170] sm:$0xff] }
 0x1e6   : > { %3281 = vadd.xlane.f32.xlu1 %v3280_v52  ;;  %v438_v52 = vld [vmem:[%s12747_s1 + $0x4d8] sm:$0xff] }
 0x1e7   : > { %v1476_v48 = vpop.f32.mrf.mxu2  ;;  %v1589_v50 = vpop.f32.mrf.mxu3 }
 0x1e8   : > { %v7711_v5 = vadd.f32 %v1589_v50, %v1476_v48  ;;  %v1253_v58 = vpop.f32.mrf.mxu0  ;;  %v1366_v59 = vpop.f32.mrf.mxu1 }
 0x1e9   : > { %v1254_v63 = vadd.f32 %v1253_v58, %v7108_v54  ;;  %v2942_v54 = vld [vmem:[%s7346_s12 + $0x180] sm:$0xff]  ;;  %v7749_v50 = vpop.xlane.xlu2 %3185  ;;  %v713_v58 = vld [vmem:[%s6702_s26 + $0x770] sm:$0xff] }
 0x1ea   : > { %1300 = vmatmul.f32.gmra.mxu0 %v425_v62  ;;  %v3295_v20 = vsel %vm3150_vm0, %v2942_v54, 0.0  ;;  %12771 = vst [vmem:[#allocation8_spill] sm:$0xff] %v7749_v50  ;;  %v596_v62 = vld [vmem:[%s6702_s26 + $0x3c8] sm:$0xff]  ;;  %1893 = vmatpush.msra.mxu2 %v713_v58 }
 0x1eb   : > { %v1367_v3 = vadd.f32 %v1366_v59, %v1254_v63  ;;  %1413 = vmatmul.f32.gmra.mxu1 %v426_v39  ;;  %3296 = vadd.xlane.f32.xlu0 %v3295_v20  ;;  %v761_v59 = vld [vmem:[%s6702_s26 + $0x8f0] sm:$0xff]  ;;  %v2945_v63 = vld [vmem:[%s7346_s12 + $0x198] sm:$0xff] }
 0x1ec   : > { %1526 = vmatmul.f32.gmra.mxu2 %v6307_v11  ;;  %1639 = vmatmul.f32.gmra.mxu3 %v6308_v17  ;;  %v437_v39 = vld [vmem:[%s12747_s1 + $0x4d0] sm:$0xff]  ;;  %v3304_v54 = vsel %vm3150_vm0, %v2945_v63, 0.0  ;;  %v758_v20 = vld [vmem:[%s6702_s26 + $0x8d8] sm:$0xff] }
 0x1ed   : > { %2819 = vst [vmem:[%s7551_s16 + $0xa8] sm:$0xff] %v1367_v3  ;;  %3311 = vadd.xlane.f32.xlu2 %v3310_v30  ;;  %2006 = vmatpush.msra.mxu3 %v761_v59  ;;  %v710_v3 = vld [vmem:[%s6702_s26 + $0x758] sm:$0xff]  ;;  %v701_v63 = vld [vmem:[%s6702_s26 + $0x710] sm:$0xff] }
 0x1ee   : > { %1674 = vmatpush.msra.mxu0 %v596_v62  ;;  %1894 = vmatpush.msra.mxu2 %v710_v3  ;;  %v6311_v62 = vld [vmem:[%s12747_s1 + $0x4b0] sm:$0xff] }
 0x1ef   : > { %v1479_v25 = vpop.f32.mrf.mxu2  ;;  %v1592_v26 = vpop.f32.mrf.mxu3  ;;  %2007 = vmatpush.msra.mxu3 %v758_v20  ;;  %v749_v3 = vld [vmem:[%s6702_s26 + $0x890] sm:$0xff] }
 0x1f0   : > { %v7738_v16 = vadd.f32 %v1592_v26, %v1479_v25  ;;  %v1256_v35 = vpop.f32.mrf.mxu0  ;;  %v1369_v42 = vpop.f32.mrf.mxu1 }
 0x1f1   : > { %v1257_v41 = vadd.f32 %v1256_v35, %v7130_v14  ;;  %v6310_v14 = vld [vmem:[%s12747_s1 + $0x488] sm:$0xff]  ;;  %v3319_v35 = vsel %vm3150_vm0, %v2950_v28, 0.0  ;;  %v7787_v59 = vpop.xlane.xlu2 %3194 }
 0x1f2   : > { %1303 = vmatmul.f32.gmra.mxu0 %v431_v37  ;;  %v707_v37 = vld [vmem:[%s6702_s26 + $0x740] sm:$0xff]  ;;  %12774 = vst [vmem:[#allocation11_spill] sm:$0xff] %v7787_v59 }
 0x1f3   : > { %v1370_v48 = vadd.f32 %v1369_v42, %v1257_v41  ;;  %1416 = vmatmul.f32.gmra.mxu1 %v432_v38  ;;  %3305 = vadd.xlane.f32.xlu0 %v3304_v54  ;;  %v3289_v42 = vsel %vm3150_vm0, %v2940_v24, 0.0  ;;  %v755_v38 = vld [vmem:[%s6702_s26 + $0x8c0] sm:$0xff]  ;;  %v2953_v24 = vld [vmem:[%s7346_s12 + $0x1d8] sm:$0xff] }
 0x1f4   : > { %1529 = vmatmul.f32.gmra.mxu2 %v6309_v4  ;;  %1642 = vmatmul.f32.gmra.mxu3 %v6310_v14  ;;  %v704_v4 = vld [vmem:[%s6702_s26 + $0x728] sm:$0xff]  ;;  %v623_v59 = vld [vmem:[%s6702_s26 + $0x4a0] sm:$0xff] }
 0x1f5   : > { %2822 = vst [vmem:[%s7551_s16 + $0xc0] sm:$0xff] %v1370_v48  ;;  %3320 = vadd.xlane.f32.xlu2 %v3319_v35  ;;  %3290 = vadd.xlane.f32.xlu1 %v3289_v42  ;;  %v7783_v48 = vpop.xlane.xlu0 %3179  ;;  %v752_v14 = vld [vmem:[%s6702_s26 + $0x8a8] sm:$0xff]  ;;  %v443_v42 = vld [vmem:[%s12747_s1 + $0x500] sm:$0xff] }
 0x1f6   : > { %1895 = vmatpush.msra.mxu2 %v707_v37  ;;  %2008 = vmatpush.msra.mxu3 %v755_v38  ;;  %12773 = vst [vmem:[#allocation10_spill] sm:$0xff] %v7783_v48  ;;  %v444_v37 = vld [vmem:[%s12747_s1 + $0x508] sm:$0xff]  ;;  %v3328_v38 = vsel %vm3150_vm0, %v2953_v24, 0.0  ;;  %v737_v24 = vld [vmem:[%s6702_s26 + $0x830] sm:$0xff] }
 0x1f7   : > { %v1482_v11 = vpop.f32.mrf.mxu2  ;;  %v1595_v17 = vpop.f32.mrf.mxu3  ;;  %v3075_v48 = vld [vmem:[%s7346_s12 + $0x5a8] sm:$0xff] }
 0x1f8   : > { %v7773_v25 = vadd.f32 %v1595_v17, %v1482_v11  ;;  %v1259_v26 = vpop.f32.mrf.mxu0  ;;  %v1372_v30 = vpop.f32.mrf.mxu1  ;;  %1896 = vmatpush.msra.mxu2 %v704_v4  ;;  %2009 = vmatpush.msra.mxu3 %v752_v14  ;;  %v698_v11 = vld [vmem:[%s6702_s26 + $0x6f8] sm:$0xff]  ;;  %v695_v14 = vld [vmem:[%s6702_s26 + $0x6e0] sm:$0xff] }
 0x1f9   : > { %v1260_v41 = vadd.f32 %v1259_v26, %v7150_v34  ;;  %v7789_v34 = vpop.xlane.xlu1 %3161  ;;  %v746_v17 = vld [vmem:[%s6702_s26 + $0x878] sm:$0xff]  ;;  %v2943_v26 = vld [vmem:[%s7346_s12 + $0x188] sm:$0xff] }
 0x1fa   : > { %1306 = vmatmul.f32.gmra.mxu0 %v437_v39  ;;  %12775 = vst [vmem:[#allocation12_spill] sm:$0xff] %v7789_v34  ;;  %v2948_v39 = vld [vmem:[%s7346_s12 + $0x1b0] sm:$0xff]  ;;  %1897 = vmatpush.msra.mxu2 %v701_v63  ;;  %v7821_v63 = vpop.xlane.xlu2 %3203 }
 0x1fb   : > { %v1373_v58 = vadd.f32 %v1372_v30, %v1260_v41  ;;  %1419 = vmatmul.f32.gmra.mxu1 %v438_v52  ;;  %2010 = vmatpush.msra.mxu3 %v749_v3  ;;  %v3313_v28 = vsel %vm3150_vm0, %v2948_v39, 0.0  ;;  %v3298_v41 = vsel %vm3150_vm0, %v2943_v26, 0.0  ;;  %12777 = vst [vmem:[#allocation14_spill] sm:$0xff] %v7821_v63  ;;  %v692_v3 = vld [vmem:[%s6702_s26 + $0x6c8] sm:$0xff]  ;;  %v6313_v39 = vld [vmem:[%s12747_s1 + $0x4e0] sm:$0xff] }
 0x1fc   : > { %1532 = vmatmul.f32.gmra.mxu2 %v6311_v62  ;;  %1645 = vmatmul.f32.gmra.mxu3 %v6312_v2  ;;  %v2951_v26 = vld [vmem:[%s7346_s12 + $0x1c8] sm:$0xff] }
 0x1fd   : > { %2825 = vst [vmem:[%s7551_s16 + $0xd8] sm:$0xff] %v1373_v58  ;;  %3314 = vadd.xlane.f32.xlu0 %v3313_v28  ;;  %1898 = vmatpush.msra.mxu2 %v698_v11  ;;  %v743_v58 = vld [vmem:[%s6702_s26 + $0x860] sm:$0xff]  ;;  %v7819_v62 = vpop.xlane.xlu0 %3188  ;;  %v6314_v11 = vld [vmem:[%s12747_s1 + $0x4e8] sm:$0xff]  ;;  %v689_v28 = vld [vmem:[%s6702_s26 + $0x6b0] sm:$0xff] }
 0x1fe   : > { %2011 = vmatpush.msra.mxu3 %v746_v17  ;;  %3329 = vadd.xlane.f32.xlu2 %v3328_v38  ;;  %12776 = vst [vmem:[#allocation13_spill] sm:$0xff] %v7819_v62  ;;  %v593_v17 = vld [vmem:[%s6702_s26 + $0x3b0] sm:$0xff]  ;;  %v638_v38 = vld [vmem:[%s6702_s26 + $0x518] sm:$0xff] }
 0x1ff   : > { %v1485_v54 = vpop.f32.mrf.mxu2  ;;  %v1598_v20 = vpop.f32.mrf.mxu3  ;;  %3299 = vadd.xlane.f32.xlu1 %v3298_v41  ;;  %1899 = vmatpush.msra.mxu2 %v695_v14 }
 0x200   : > { %v7806_v30 = vadd.f32 %v1598_v20, %v1485_v54  ;;  %v1262_v52 = vpop.f32.mrf.mxu0  ;;  %v1375_v35 = vpop.f32.mrf.mxu1  ;;  %v740_v54 = vld [vmem:[%s6702_s26 + $0x848] sm:$0xff]  ;;  %v641_v20 = vld [vmem:[%s6702_s26 + $0x530] sm:$0xff]  ;;  %2012 = vmatpush.msra.mxu3 %v743_v58  ;;  %1675 = vmatpush.msra.mxu0 %v593_v17  ;;  %v450_v58 = vld [vmem:[%s12747_s1 + $0x538] sm:$0xff] }
 0x201   : > { %v1263_v4 = vadd.f32 %v1262_v52, %v7176_v61  ;;  %v7823_v61 = vpop.xlane.xlu1 %3173  ;;  %1788 = vmatpush.msra.mxu1 %v641_v20  ;;  %v590_v52 = vld [vmem:[%s6702_s26 + $0x398] sm:$0xff]  ;;  %1900 = vmatpush.msra.mxu2 %v692_v3 }
 0x202   : > { %1309 = vmatmul.f32.gmra.mxu0 %v443_v42  ;;  %12778 = vst [vmem:[#allocation15_spill] sm:$0xff] %v7823_v61  ;;  %2013 = vmatpush.msra.mxu3 %v740_v54  ;;  %v686_v54 = vld [vmem:[%s6702_s26 + $0x698] sm:$0xff] }
 0x203   : > { %v1376_v2 = vadd.f32 %v1375_v35, %v1263_v4  ;;  %1422 = vmatmul.f32.gmra.mxu1 %v444_v37  ;;  %v449_v37 = vld [vmem:[%s12747_s1 + $0x530] sm:$0xff]  ;;  %1676 = vmatpush.msra.mxu0 %v590_v52  ;;  %v734_v20 = vld [vmem:[%s6702_s26 + $0x818] sm:$0xff] }
 0x204   : > { %1535 = vmatmul.f32.gmra.mxu2 %v6313_v39  ;;  %1648 = vmatmul.f32.gmra.mxu3 %v6314_v11  ;;  %v2956_v39 = vld [vmem:[%s7346_s12 + $0x1f0] sm:$0xff]  ;;  %v2946_v11 = vld [vmem:[%s7346_s12 + $0x1a0] sm:$0xff] }
 0x205   : > { %2828 = vst [vmem:[%s7551_s16 + $0xf0] sm:$0xff] %v1376_v2  ;;  %v3322_v2 = vsel %vm3150_vm0, %v2951_v26, 0.0  ;;  %1789 = vmatpush.msra.mxu1 %v638_v38  ;;  %1901 = vmatpush.msra.mxu2 %v689_v28  ;;  %v3337_v17 = vsel %vm3150_vm0, %v2956_v39, 0.0  ;;  %v587_v28 = vld [vmem:[%s6702_s26 + $0x380] sm:$0xff]  ;;  %v680_v39 = vld [vmem:[%s6702_s26 + $0x668] sm:$0xff] }
 0x206   : > { %2014 = vmatpush.msra.mxu3 %v737_v24  ;;  %3323 = vadd.xlane.f32.xlu0 %v3322_v2  ;;  %v7860_v24 = vpop.xlane.xlu2 %3212  ;;  %v635_v38 = vld [vmem:[%s6702_s26 + $0x500] sm:$0xff]  ;;  %v632_v2 = vld [vmem:[%s6702_s26 + $0x4e8] sm:$0xff] }
 0x207   : > { %v1488_v35 = vpop.f32.mrf.mxu2  ;;  %v1601_v42 = vpop.f32.mrf.mxu3  ;;  %3338 = vadd.xlane.f32.xlu2 %v3337_v17  ;;  %12780 = vst [vmem:[#allocation17_spill] sm:$0xff] %v7860_v24  ;;  %1902 = vmatpush.msra.mxu2 %v686_v54  ;;  %v728_v17 = vld [vmem:[%s6702_s26 + $0x7e8] sm:$0xff]  ;;  %v2952_v24 = vld [vmem:[%s7346_s12 + $0x1d0] sm:$0xff] }
 0x208   : > { %v7844_v41 = vadd.f32 %v1601_v42, %v1488_v35  ;;  %v1265_v4 = vpop.f32.mrf.mxu0  ;;  %v1378_v14 = vpop.f32.mrf.mxu1  ;;  %v6315_v42 = vld [vmem:[%s12747_s1 + $0x510] sm:$0xff]  ;;  %2015 = vmatpush.msra.mxu3 %v734_v20  ;;  %1677 = vmatpush.msra.mxu0 %v587_v28  ;;  %v455_v20 = vld [vmem:[%s12747_s1 + $0x560] sm:$0xff] }
 0x209   : > { %v1266_v3 = vadd.f32 %v1265_v4, %v7202_v29  ;;  %v7856_v35 = vpop.xlane.xlu0 %3197  ;;  %v3307_v29 = vsel %vm3150_vm0, %v2946_v11, 0.0  ;;  %v7862_v52 = vpop.xlane.xlu1 %3182  ;;  %v683_v4 = vld [vmem:[%s6702_s26 + $0x680] sm:$0xff]  ;;  %1790 = vmatpush.msra.mxu1 %v635_v38 }
 0x20a   : > { %12779 = vst [vmem:[#allocation16_spill] sm:$0xff] %v7856_v35  ;;  %1312 = vmatmul.f32.gmra.mxu0 %v449_v37  ;;  %v6316_v37 = vld [vmem:[%s12747_s1 + $0x518] sm:$0xff]  ;;  %3308 = vadd.xlane.f32.xlu1 %v3307_v29  ;;  %v456_v29 = vld [vmem:[%s12747_s1 + $0x568] sm:$0xff]  ;;  %v2954_v28 = vld [vmem:[%s7346_s12 + $0x1e0] sm:$0xff] }
 0x20b   : > { %v1379_v26 = vadd.f32 %v1378_v14, %v1266_v3  ;;  %1425 = vmatmul.f32.gmra.mxu1 %v450_v58  ;;  %12781 = vst [vmem:[#allocation18_spill] sm:$0xff] %v7862_v52  ;;  %v731_v14 = vld [vmem:[%s6702_s26 + $0x800] sm:$0xff]  ;;  %v584_v58 = vld [vmem:[%s6702_s26 + $0x368] sm:$0xff]  ;;  %1903 = vmatpush.msra.mxu2 %v683_v4  ;;  %v629_v4 = vld [vmem:[%s6702_s26 + $0x4d0] sm:$0xff] }
 0x20c   : > { %1538 = vmatmul.f32.gmra.mxu2 %v6315_v42  ;;  %1651 = vmatmul.f32.gmra.mxu3 %v6316_v37  ;;  %v581_v42 = vld [vmem:[%s6702_s26 + $0x350] sm:$0xff] }
 0x20d   : > { %2831 = vst [vmem:[%s7551_s16 + $0x108] sm:$0xff] %v1379_v26  ;;  %2016 = vmatpush.msra.mxu3 %v731_v14  ;;  %1678 = vmatpush.msra.mxu0 %v584_v58  ;;  %v725_v14 = vld [vmem:[%s6702_s26 + $0x7d0] sm:$0xff]  ;;  %v3331_v58 = vsel %vm3150_vm0, %v2954_v28, 0.0  ;;  %v722_v28 = vld [vmem:[%s6702_s26 + $0x7b8] sm:$0xff] }
 0x20e   : > { %1791 = vmatpush.msra.mxu1 %v632_v2  ;;  %1904 = vmatpush.msra.mxu2 %v680_v39  ;;  %v2949_v2 = vld [vmem:[%s7346_s12 + $0x1b8] sm:$0xff]  ;;  %v7897_v39 = vpop.xlane.xlu2 %3221  ;;  %v645_v52 = vld [vmem:[%s6702_s26 + $0x550] sm:$0xff] }
 0x20f   : > { %v1491_v11 = vpop.f32.mrf.mxu2  ;;  %v1604_v3 = vpop.f32.mrf.mxu3  ;;  %2017 = vmatpush.msra.mxu3 %v728_v17  ;;  %1679 = vmatpush.msra.mxu0 %v581_v42  ;;  %12783 = vst [vmem:[#allocation20_spill] sm:$0xff] %v7897_v39  ;;  %v6317_v42 = vld [vmem:[%s12747_s1 + $0x540] sm:$0xff] }
 0x210   : > { %v7879_v37 = vadd.f32 %v1604_v3, %v1491_v11  ;;  %v1268_v26 = vpop.f32.mrf.mxu0  ;;  %v1381_v54 = vpop.f32.mrf.mxu1  ;;  %v677_v11 = vld [vmem:[%s6702_s26 + $0x650] sm:$0xff]  ;;  %1792 = vmatpush.msra.mxu1 %v629_v4  ;;  %3332 = vadd.xlane.f32.xlu0 %v3331_v58  ;;  %v462_v58 = vld [vmem:[%s12747_s1 + $0x598] sm:$0xff] }
 0x211   : > { %v1269_v38 = vadd.f32 %v1268_v26, %v7226_v55  ;;  %v7891_v3 = vpop.xlane.xlu0 %3206  ;;  %v2959_v55 = vld [vmem:[%s7346_s12 + $0x208] sm:$0xff]  ;;  %v7899_v17 = vpop.xlane.xlu1 %3191  ;;  %1905 = vmatpush.msra.mxu2 %v677_v11  ;;  %2018 = vmatpush.msra.mxu3 %v725_v14  ;;  %v461_v14 = vld [vmem:[%s12747_s1 + $0x590] sm:$0xff] }
 0x212   : > { %12782 = vst [vmem:[#allocation19_spill] sm:$0xff] %v7891_v3  ;;  %1315 = vmatmul.f32.gmra.mxu0 %v455_v20  ;;  %v6318_v26 = vld [vmem:[%s12747_s1 + $0x548] sm:$0xff]  ;;  %v626_v20 = vld [vmem:[%s6702_s26 + $0x4b8] sm:$0xff] }
 0x213   : > { %v1382_v35 = vadd.f32 %v1381_v54, %v1269_v38  ;;  %1428 = vmatmul.f32.gmra.mxu1 %v456_v29  ;;  %12784 = vst [vmem:[#allocation21_spill] sm:$0xff] %v7899_v17  ;;  %v578_v54 = vld [vmem:[%s6702_s26 + $0x338] sm:$0xff]  ;;  %v3346_v38 = vsel %vm3150_vm0, %v2959_v55, 0.0  ;;  %2019 = vmatpush.msra.mxu3 %v722_v28  ;;  %v2962_v28 = vld [vmem:[%s7346_s12 + $0x220] sm:$0xff] }
 0x214   : > { %1541 = vmatmul.f32.gmra.mxu2 %v6317_v42  ;;  %1654 = vmatmul.f32.gmra.mxu3 %v6318_v26  ;;  %v674_v29 = vld [vmem:[%s6702_s26 + $0x638] sm:$0xff]  ;;  %v3316_v42 = vsel %vm3150_vm0, %v2949_v2, 0.0  ;;  %v575_v26 = vld [vmem:[%s6702_s26 + $0x320] sm:$0xff] }
 0x215   : > { %2834 = vst [vmem:[%s7551_s16 + $0x120] sm:$0xff] %v1382_v35  ;;  %1680 = vmatpush.msra.mxu0 %v578_v54  ;;  %1793 = vmatpush.msra.mxu1 %v626_v20  ;;  %v671_v2 = vld [vmem:[%s6702_s26 + $0x620] sm:$0xff]  ;;  %v2957_v54 = vld [vmem:[%s7346_s12 + $0x1f8] sm:$0xff] }
 0x216   : > { %1906 = vmatpush.msra.mxu2 %v674_v29  ;;  %3347 = vadd.xlane.f32.xlu2 %v3346_v38  ;;  %v620_v29 = vld [vmem:[%s6702_s26 + $0x488] sm:$0xff] }
 0x217   : > { %v1494_v17 = vpop.f32.mrf.mxu2  ;;  %v1607_v39 = vpop.f32.mrf.mxu3  ;;  %3317 = vadd.xlane.f32.xlu1 %v3316_v42  ;;  %1681 = vmatpush.msra.mxu0 %v575_v26  ;;  %v6320_v42 = vld [vmem:[%s12747_s1 + $0x578] sm:$0xff]  ;;  %v668_v26 = vld [vmem:[%s6702_s26 + $0x608] sm:$0xff] }
 0x218   : > { %v7916_v35 = vadd.f32 %v1607_v39, %v1494_v17  ;;  %v1271_v4 = vpop.f32.mrf.mxu0  ;;  %v1384_v11 = vpop.f32.mrf.mxu1  ;;  %1794 = vmatpush.msra.mxu1 %v623_v59  ;;  %v719_v39 = vld [vmem:[%s6702_s26 + $0x7a0] sm:$0xff]  ;;  %v572_v17 = vld [vmem:[%s6702_s26 + $0x308] sm:$0xff]  ;;  %v6319_v59 = vld [vmem:[%s12747_s1 + $0x570] sm:$0xff]  ;;  %1907 = vmatpush.msra.mxu2 %v671_v2 }
 0x219   : > { %v1272_v55 = vadd.f32 %v1271_v4, %v7242_v10  ;;  %v7929_v20 = vpop.xlane.xlu0 %3215  ;;  %v7934_v10 = vpop.xlane.xlu2 %3230  ;;  %v716_v4 = vld [vmem:[%s6702_s26 + $0x788] sm:$0xff]  ;;  %2020 = vmatpush.msra.mxu3 %v719_v39  ;;  %1682 = vmatpush.msra.mxu0 %v572_v17  ;;  %v467_v39 = vld [vmem:[%s12747_s1 + $0x5c0] sm:$0xff] }
 0x21a   : > { %12785 = vst [vmem:[#allocation22_spill] sm:$0xff] %v7929_v20  ;;  %1318 = vmatmul.f32.gmra.mxu0 %v461_v14  ;;  %v7936_v38 = vpop.xlane.xlu1 %3200  ;;  %1795 = vmatpush.msra.mxu1 %v620_v29  ;;  %v3355_v14 = vsel %vm3150_vm0, %v2962_v28, 0.0  ;;  %v468_v17 = vld [vmem:[%s12747_s1 + $0x5c8] sm:$0xff] }
 0x21b   : > { %v1385_v62 = vadd.f32 %v1384_v11, %v1272_v55  ;;  %1431 = vmatmul.f32.gmra.mxu1 %v462_v58  ;;  %12786 = vst [vmem:[#allocation23_spill] sm:$0xff] %v7934_v10  ;;  %v3340_v11 = vsel %vm3150_vm0, %v2957_v54, 0.0  ;;  %v3325_v58 = vsel %vm3150_vm0, %v2952_v24, 0.0  ;;  %1908 = vmatpush.msra.mxu2 %v668_v26  ;;  %v2960_v54 = vld [vmem:[%s7346_s12 + $0x210] sm:$0xff]  ;;  %v2965_v26 = vld [vmem:[%s7346_s12 + $0x238] sm:$0xff] }
 0x21c   : > { %12787 = vst [vmem:[#allocation24_spill] sm:$0xff] %v7936_v38  ;;  %1544 = vmatmul.f32.gmra.mxu2 %v6319_v59  ;;  %1657 = vmatmul.f32.gmra.mxu3 %v6320_v42  ;;  %v636_v38 = vld [vmem:[%s6702_s26 + $0x508] sm:$0xff] }
 0x21d   : > { %2837 = vst [vmem:[%s7551_s16 + $0x138] sm:$0xff] %v1385_v62  ;;  %2021 = vmatpush.msra.mxu3 %v716_v4  ;;  %3341 = vadd.xlane.f32.xlu0 %v3340_v11  ;;  %v2955_v4 = vld [vmem:[%s7346_s12 + $0x1e8] sm:$0xff]  ;;  %v6321_v11 = vld [vmem:[%s12747_s1 + $0x5a0] sm:$0xff] }
 0x21e   : > { %3356 = vadd.xlane.f32.xlu2 %v3355_v14  ;;  %v3349_v14 = vsel %vm3150_vm0, %v2960_v54, 0.0  ;;  %v474_v54 = vld [vmem:[%s12747_s1 + $0x5f8] sm:$0xff] }
 0x21f   : > { %v1497_v55 = vpop.f32.mrf.mxu2  ;;  %v1610_v59 = vpop.f32.mrf.mxu3  ;;  %3326 = vadd.xlane.f32.xlu1 %v3325_v58  ;;  %v3364_v58 = vsel %vm3150_vm0, %v2965_v26, 0.0  ;;  %v2963_v26 = vld [vmem:[%s7346_s12 + $0x228] sm:$0xff] }
 0x220   : > { %v7950_v42 = vadd.f32 %v1610_v59, %v1497_v55  ;;  %v1274_v62 = vpop.f32.mrf.mxu0  ;;  %v1387_v2 = vpop.f32.mrf.mxu1 }
 0x221   : > { %v1275_v24 = vadd.f32 %v1274_v62, %v7256_v23  ;;  %v7960_v29 = vpop.xlane.xlu0 %3224  ;;  %v7964_v55 = vpop.xlane.xlu2 %3239  ;;  %v6322_v23 = vld [vmem:[%s12747_s1 + $0x5a8] sm:$0xff]  ;;  %v3334_v62 = vsel %vm3150_vm0, %v2955_v4, 0.0 }
 0x222   : > { %12788 = vst [vmem:[#allocation25_spill] sm:$0xff] %v7960_v29  ;;  %1321 = vmatmul.f32.gmra.mxu0 %v467_v39  ;;  %v7966_v59 = vpop.xlane.xlu1 %3209 }
 0x223   : > { %v1388_v28 = vadd.f32 %v1387_v2, %v1275_v24  ;;  %1434 = vmatmul.f32.gmra.mxu1 %v468_v17  ;;  %12789 = vst [vmem:[#allocation26_spill] sm:$0xff] %v7964_v55  ;;  %v2958_v55 = vld [vmem:[%s7346_s12 + $0x200] sm:$0xff] }
 0x224   : > { %12790 = vst [vmem:[#allocation27_spill] sm:$0xff] %v7966_v59  ;;  %1547 = vmatmul.f32.gmra.mxu2 %v6321_v11  ;;  %1660 = vmatmul.f32.gmra.mxu3 %v6322_v23  ;;  %v473_v23 = vld [vmem:[%s12747_s1 + $0x5f0] sm:$0xff] }
 0x225   : > { %2840 = vst [vmem:[%s7551_s16 + $0x150] sm:$0xff] %v1388_v28  ;;  %3350 = vadd.xlane.f32.xlu0 %v3349_v14  ;;  %v6323_v14 = vld [vmem:[%s12747_s1 + $0x5d0] sm:$0xff] }
 0x226   : > { %3365 = vadd.xlane.f32.xlu2 %v3364_v58  ;;  %v3358_v58 = vsel %vm3150_vm0, %v2963_v26, 0.0 }
 0x227   : > { %v1500_v2 = vpop.f32.mrf.mxu2  ;;  %v1613_v39 = vpop.f32.mrf.mxu3  ;;  %3335 = vadd.xlane.f32.xlu1 %v3334_v62 }
 0x228   : > { %v7978_v17 = vadd.f32 %v1613_v39, %v1500_v2  ;;  %v1277_v24 = vpop.f32.mrf.mxu0  ;;  %v1390_v11 = vpop.f32.mrf.mxu1  ;;  %v2968_v39 = vld [vmem:[%s7346_s12 + $0x250] sm:$0xff] }
 0x229   : > { %v1278_v28 = vadd.f32 %v1277_v24, %v7264_v36  ;;  %v7988_v4 = vpop.xlane.xlu0 %3233  ;;  %v7992_v10 = vpop.xlane.xlu2 %3248  ;;  %v6324_v36 = vld [vmem:[%s12747_s1 + $0x5d8] sm:$0xff]  ;;  %v3373_v62 = vsel %vm3150_vm0, %v2968_v39, 0.0  ;;  %v3343_v24 = vsel %vm3150_vm0, %v2958_v55, 0.0  ;;  %v6325_v55 = vld [vmem:[%s12747_s1 + $0x10] sm:$0xff] }
 0x22a   : > { %12791 = vst [vmem:[#allocation28_spill] sm:$0xff] %v7988_v4  ;;  %1324 = vmatmul.f32.gmra.mxu0 %v473_v23  ;;  %v7994_v29 = vpop.xlane.xlu1 %3218 }
 0x22b   : > { %v1391_v2 = vadd.f32 %v1390_v11, %v1278_v28  ;;  %1437 = vmatmul.f32.gmra.mxu1 %v474_v54  ;;  %12792 = vst [vmem:[#allocation29_spill] sm:$0xff] %v7992_v10 }
 0x22c   : > { %12793 = vst [vmem:[#allocation30_spill] sm:$0xff] %v7994_v29  ;;  %1550 = vmatmul.f32.gmra.mxu2 %v6323_v14  ;;  %1663 = vmatmul.f32.gmra.mxu3 %v6324_v36  ;;  %v6326_v36 = vld [vmem:[%s12747_s1 + $0x18] sm:$0xff] }
 0x22d   : > { %2843 = vst [vmem:[%s7551_s16 + $0x168] sm:$0xff] %v1391_v2  ;;  %3359 = vadd.xlane.f32.xlu0 %v3358_v58  ;;  %v2966_v2 = vld [vmem:[%s7346_s12 + $0x240] sm:$0xff]  ;;  %v2971_v58 = vld [vmem:[%s7346_s12 + $0x268] sm:$0xff] }
 0x22e   : > { %3374 = vadd.xlane.f32.xlu2 %v3373_v62 }
 0x22f   : > { %v1503_v11 = vpop.f32.mrf.mxu2  ;;  %v1616_v23 = vpop.f32.mrf.mxu3  ;;  %3344 = vadd.xlane.f32.xlu1 %v3343_v24  ;;  %v6328_v24 = vld [vmem:[%s12747_s1 + $0x28] sm:$0xff] }
 0x230   : > { %v8006_v54 = vadd.f32 %v1616_v23, %v1503_v11  ;;  %v1280_v28 = vpop.f32.mrf.mxu0  ;;  %v1393_v14 = vpop.f32.mrf.mxu1  ;;  %v2961_v11 = vld [vmem:[%s7346_s12 + $0x218] sm:$0xff]  ;;  %v3367_v23 = vsel %vm3150_vm0, %v2966_v2, 0.0 }
 0x231   : > { %v1281_v4 = vadd.f32 %v1280_v28, %v7274_v47  ;;  %v8010_v26 = vpop.xlane.xlu0 %3242  ;;  %v8020_v47 = vpop.xlane.xlu2 %3257  ;;  %v3382_v28 = vsel %vm3150_vm0, %v2971_v58, 0.0 }
 0x232   : > { %12794 = vst [vmem:[#allocation31_spill] sm:$0xff] %v8010_v26  ;;  %1683 = vmatmul.f32.vlgmr.msra.gmra.mxu0 %v6325_v55  ;;  %v8022_v62 = vpop.xlane.xlu1 %3227 }
 0x233   : > { %v1394_v39 = vadd.f32 %v1393_v14, %v1281_v4  ;;  %1796 = vmatmul.f32.vlgmr.msra.gmra.mxu1 %v6326_v36  ;;  %12795 = vst [vmem:[#allocation32_spill] sm:$0xff] %v8020_v47  ;;  %v6327_v4 = vld [vmem:[%s12747_s1 + $0x20] sm:$0xff]  ;;  %v3352_v14 = vsel %vm3150_vm0, %v2961_v11, 0.0 }
 0x234   : > { %12796 = vst [vmem:[#allocation33_spill] sm:$0xff] %v8022_v62  ;;  %1909 = vmatmul.f32.vlgmr.msra.gmra.mxu2 %v6327_v4  ;;  %2022 = vmatmul.f32.vlgmr.msra.gmra.mxu3 %v6328_v24  ;;  %v6329_v11 = vld [vmem:[%s12747_s1 + $0x40] sm:$0xff]  ;;  %v6330_v24 = vld [vmem:[%s12747_s1 + $0x48] sm:$0xff] }
 0x235   : > { %2846 = vst [vmem:[%s7551_s16 + $0x180] sm:$0xff] %v1394_v39  ;;  %3368 = vadd.xlane.f32.xlu0 %v3367_v23  ;;  %v2969_v39 = vld [vmem:[%s7346_s12 + $0x258] sm:$0xff]  ;;  %v2974_v23 = vld [vmem:[%s7346_s12 + $0x280] sm:$0xff] }
 0x236   : > { %3383 = vadd.xlane.f32.xlu2 %v3382_v28 }
 0x237   : > { %v1506_v55 = vpop.f32.mrf.mxu2  ;;  %v1619_v36 = vpop.f32.mrf.mxu3  ;;  %3353 = vadd.xlane.f32.xlu1 %v3352_v14  ;;  %v3376_v14 = vsel %vm3150_vm0, %v2969_v39, 0.0 }
 0x238   : > { %v8034_v26 = vadd.f32 %v1619_v36, %v1506_v55  ;;  %v1283_v4 = vpop.f32.mrf.mxu0  ;;  %v1396_v62 = vpop.f32.mrf.mxu1  ;;  %v2964_v55 = vld [vmem:[%s7346_s12 + $0x230] sm:$0xff]  ;;  %v3391_v36 = vsel %vm3150_vm0, %v2974_v23, 0.0 }
 0x239   : > { %v1284_v47 = vadd.f32 %v1283_v4, %v7284_v57  ;;  %v8038_v2 = vpop.xlane.xlu0 %3251  ;;  %v8048_v57 = vpop.xlane.xlu2 %3266  ;;  %v3361_v4 = vsel %vm3150_vm0, %v2964_v55, 0.0  ;;  %v6333_v55 = vld [vmem:[%s12747_s1 + $0x70] sm:$0xff] }
 0x23a   : > { %12797 = vst [vmem:[#allocation34_spill] sm:$0xff] %v8038_v2  ;;  %1686 = vmatmul.f32.gmra.mxu0 %v6329_v11  ;;  %v8050_v28 = vpop.xlane.xlu1 %3236 }
 0x23b   : > { %v1397_v58 = vadd.f32 %v1396_v62, %v1284_v47  ;;  %1799 = vmatmul.f32.gmra.mxu1 %v6330_v24  ;;  %12798 = vst [vmem:[#allocation35_spill] sm:$0xff] %v8048_v57  ;;  %v6331_v47 = vld [vmem:[%s12747_s1 + $0x50] sm:$0xff]  ;;  %v6332_v62 = vld [vmem:[%s12747_s1 + $0x58] sm:$0xff] }
 0x23c   : > { %12799 = vst [vmem:[#allocation36_spill] sm:$0xff] %v8050_v28  ;;  %1912 = vmatmul.f32.gmra.mxu2 %v6331_v47  ;;  %2025 = vmatmul.f32.gmra.mxu3 %v6332_v62  ;;  %v6334_v62 = vld [vmem:[%s12747_s1 + $0x78] sm:$0xff] }
 0x23d   : > { %2849 = vst [vmem:[%s7551_s16 + $0x198] sm:$0xff] %v1397_v58  ;;  %3377 = vadd.xlane.f32.xlu0 %v3376_v14  ;;  %v2972_v58 = vld [vmem:[%s7346_s12 + $0x270] sm:$0xff]  ;;  %v2977_v14 = vld [vmem:[%s7346_s12 + $0x298] sm:$0xff] }
 0x23e   : > { %3392 = vadd.xlane.f32.xlu2 %v3391_v36 }
 0x23f   : > { %v1509_v11 = vpop.f32.mrf.mxu2  ;;  %v1622_v24 = vpop.f32.mrf.mxu3  ;;  %3362 = vadd.xlane.f32.xlu1 %v3361_v4  ;;  %v3385_v4 = vsel %vm3150_vm0, %v2972_v58, 0.0 }
 0x240   : > { %v8062_v28 = vadd.f32 %v1622_v24, %v1509_v11  ;;  %v1286_v47 = vpop.f32.mrf.mxu0  ;;  %v1399_v57 = vpop.f32.mrf.mxu1  ;;  %v2967_v11 = vld [vmem:[%s7346_s12 + $0x248] sm:$0xff]  ;;  %v3400_v24 = vsel %vm3150_vm0, %v2977_v14, 0.0 }
 0x241   : > { %v1287_v2 = vadd.f32 %v1286_v47, %v7298_v8  ;;  %v8066_v39 = vpop.xlane.xlu0 %3260  ;;  %v8076_v8 = vpop.xlane.xlu2 %3275  ;;  %v3370_v47 = vsel %vm3150_vm0, %v2967_v11, 0.0  ;;  %v6337_v11 = vld [vmem:[%s12747_s1 + $0xa0] sm:$0xff] }
 0x242   : > { %12800 = vst [vmem:[#allocation37_spill] sm:$0xff] %v8066_v39  ;;  %1689 = vmatmul.f32.gmra.mxu0 %v6333_v55  ;;  %v8078_v36 = vpop.xlane.xlu1 %3245 }
 0x243   : > { %v1400_v23 = vadd.f32 %v1399_v57, %v1287_v2  ;;  %1802 = vmatmul.f32.gmra.mxu1 %v6334_v62  ;;  %12801 = vst [vmem:[#allocation38_spill] sm:$0xff] %v8076_v8  ;;  %v6335_v2 = vld [vmem:[%s12747_s1 + $0x80] sm:$0xff]  ;;  %v6336_v57 = vld [vmem:[%s12747_s1 + $0x88] sm:$0xff] }
 0x244   : > { %12802 = vst [vmem:[#allocation39_spill] sm:$0xff] %v8078_v36  ;;  %1915 = vmatmul.f32.gmra.mxu2 %v6335_v2  ;;  %2028 = vmatmul.f32.gmra.mxu3 %v6336_v57  ;;  %v6338_v57 = vld [vmem:[%s12747_s1 + $0xa8] sm:$0xff] }
 0x245   : > { %2852 = vst [vmem:[%s7551_s16 + $0x1b0] sm:$0xff] %v1400_v23  ;;  %3386 = vadd.xlane.f32.xlu0 %v3385_v4  ;;  %v2975_v23 = vld [vmem:[%s7346_s12 + $0x288] sm:$0xff]  ;;  %v2980_v4 = vld [vmem:[%s7346_s12 + $0x2b0] sm:$0xff] }
 0x246   : > { %3401 = vadd.xlane.f32.xlu2 %v3400_v24 }
 0x247   : > { %v1512_v55 = vpop.f32.mrf.mxu2  ;;  %v1625_v62 = vpop.f32.mrf.mxu3  ;;  %3371 = vadd.xlane.f32.xlu1 %v3370_v47  ;;  %v3394_v47 = vsel %vm3150_vm0, %v2975_v23, 0.0 }
 0x248   : > { %v8090_v36 = vadd.f32 %v1625_v62, %v1512_v55  ;;  %v1289_v2 = vpop.f32.mrf.mxu0  ;;  %v1402_v8 = vpop.f32.mrf.mxu1  ;;  %v2970_v55 = vld [vmem:[%s7346_s12 + $0x260] sm:$0xff]  ;;  %v3409_v62 = vsel %vm3150_vm0, %v2980_v4, 0.0 }
 0x249   : > { %v1290_v39 = vadd.f32 %v1289_v2, %v7312_v22  ;;  %v8094_v58 = vpop.xlane.xlu0 %3269  ;;  %v8104_v22 = vpop.xlane.xlu2 %3284  ;;  %v3379_v2 = vsel %vm3150_vm0, %v2970_v55, 0.0  ;;  %v6341_v55 = vld [vmem:[%s12747_s1 + $0xd0] sm:$0xff] }
 0x24a   : > { %12803 = vst [vmem:[#allocation40_spill] sm:$0xff] %v8094_v58  ;;  %1692 = vmatmul.f32.gmra.mxu0 %v6337_v11  ;;  %v8106_v24 = vpop.xlane.xlu1 %3254 }
 0x24b   : > { %v1403_v14 = vadd.f32 %v1402_v8, %v1290_v39  ;;  %1805 = vmatmul.f32.gmra.mxu1 %v6338_v57  ;;  %12804 = vst [vmem:[#allocation41_spill] sm:$0xff] %v8104_v22  ;;  %v6339_v39 = vld [vmem:[%s12747_s1 + $0xb0] sm:$0xff]  ;;  %v6340_v8 = vld [vmem:[%s12747_s1 + $0xb8] sm:$0xff] }
 0x24c   : > { %12805 = vst [vmem:[#allocation42_spill] sm:$0xff] %v8106_v24  ;;  %1918 = vmatmul.f32.gmra.mxu2 %v6339_v39  ;;  %2031 = vmatmul.f32.gmra.mxu3 %v6340_v8  ;;  %v6342_v8 = vld [vmem:[%s12747_s1 + $0xd8] sm:$0xff] }
 0x24d   : > { %2855 = vst [vmem:[%s7551_s16 + $0x1c8] sm:$0xff] %v1403_v14  ;;  %3395 = vadd.xlane.f32.xlu0 %v3394_v47  ;;  %v2978_v14 = vld [vmem:[%s7346_s12 + $0x2a0] sm:$0xff]  ;;  %v2983_v47 = vld [vmem:[%s7346_s12 + $0x2c8] sm:$0xff] }
 0x24e   : > { %3410 = vadd.xlane.f32.xlu2 %v3409_v62 }
 0x24f   : > { %v1515_v11 = vpop.f32.mrf.mxu2  ;;  %v1628_v57 = vpop.f32.mrf.mxu3  ;;  %3380 = vadd.xlane.f32.xlu1 %v3379_v2  ;;  %v3403_v2 = vsel %vm3150_vm0, %v2978_v14, 0.0 }
 0x250   : > { %v8118_v22 = vadd.f32 %v1628_v57, %v1515_v11  ;;  %v1292_v39 = vpop.f32.mrf.mxu0  ;;  %v1405_v58 = vpop.f32.mrf.mxu1  ;;  %v2973_v11 = vld [vmem:[%s7346_s12 + $0x278] sm:$0xff]  ;;  %v3418_v57 = vsel %vm3150_vm0, %v2983_v47, 0.0  ;;  %v6345_v47 = vld [vmem:[%s12747_s1 + $0x100] sm:$0xff] }
 0x251   : > { %v1293_v24 = vadd.f32 %v1292_v39, %v7326_v40  ;;  %v8122_v23 = vpop.xlane.xlu0 %3278  ;;  %v8132_v40 = vpop.xlane.xlu2 %3293  ;;  %v3388_v39 = vsel %vm3150_vm0, %v2973_v11, 0.0  ;;  %v6346_v11 = vld [vmem:[%s12747_s1 + $0x108] sm:$0xff] }
 0x252   : > { %12806 = vst [vmem:[#allocation43_spill] sm:$0xff] %v8122_v23  ;;  %1695 = vmatmul.f32.gmra.mxu0 %v6341_v55  ;;  %v8134_v62 = vpop.xlane.xlu1 %3263 }
 0x253   : > { %v1406_v4 = vadd.f32 %v1405_v58, %v1293_v24  ;;  %1808 = vmatmul.f32.gmra.mxu1 %v6342_v8  ;;  %12807 = vst [vmem:[#allocation44_spill] sm:$0xff] %v8132_v40  ;;  %v6343_v58 = vld [vmem:[%s12747_s1 + $0xe0] sm:$0xff]  ;;  %v6344_v24 = vld [vmem:[%s12747_s1 + $0xe8] sm:$0xff] }
 0x254   : > { %12808 = vst [vmem:[#allocation45_spill] sm:$0xff] %v8134_v62  ;;  %1921 = vmatmul.f32.gmra.mxu2 %v6343_v58  ;;  %2034 = vmatmul.f32.gmra.mxu3 %v6344_v24  ;;  %v2986_v24 = vld [vmem:[%s7346_s12 + $0x2e0] sm:$0xff] }
 0x255   : > { %2858 = vst [vmem:[%s7551_s16 + $0x1e0] sm:$0xff] %v1406_v4  ;;  %3404 = vadd.xlane.f32.xlu0 %v3403_v2  ;;  %v2981_v4 = vld [vmem:[%s7346_s12 + $0x2b8] sm:$0xff] }
 0x256   : > { %3419 = vadd.xlane.f32.xlu2 %v3418_v57 }
 0x257   : > { %v1518_v55 = vpop.f32.mrf.mxu2  ;;  %v1631_v8 = vpop.f32.mrf.mxu3  ;;  %3389 = vadd.xlane.f32.xlu1 %v3388_v39  ;;  %v3412_v39 = vsel %vm3150_vm0, %v2981_v4, 0.0 }
 0x258   : > { %v8146_v40 = vadd.f32 %v1631_v8, %v1518_v55  ;;  %v1295_v58 = vpop.f32.mrf.mxu0  ;;  %v1408_v23 = vpop.f32.mrf.mxu1  ;;  %v2976_v55 = vld [vmem:[%s7346_s12 + $0x290] sm:$0xff]  ;;  %v3427_v8 = vsel %vm3150_vm0, %v2986_v24, 0.0 }
 0x259   : > { %v1296_v62 = vadd.f32 %v1295_v58, %v7341_v51  ;;  %v8158_v2 = vpop.xlane.xlu0 %3287  ;;  %v8160_v51 = vpop.xlane.xlu2 %3302  ;;  %v3397_v58 = vsel %vm3150_vm0, %v2976_v55, 0.0  ;;  %v6349_v24 = vld [vmem:[%s12747_s1 + $0x130] sm:$0xff]  ;;  %v6350_v55 = vld [vmem:[%s12747_s1 + $0x138] sm:$0xff] }
 0x25a   : > { %1698 = vmatmul.f32.gmra.mxu0 %v6345_v47  ;;  %12809 = vst [vmem:[#allocation46_spill] sm:$0xff] %v8158_v2  ;;  %v8168_v57 = vpop.xlane.xlu1 %3272 }
 0x25b   : > { %v1409_v14 = vadd.f32 %v1408_v23, %v1296_v62  ;;  %1811 = vmatmul.f32.gmra.mxu1 %v6346_v11  ;;  %12810 = vst [vmem:[#allocation47_spill] sm:$0xff] %v8160_v51  ;;  %v6347_v23 = vld [vmem:[%s12747_s1 + $0x110] sm:$0xff]  ;;  %v6348_v62 = vld [vmem:[%s12747_s1 + $0x118] sm:$0xff] }
 0x25c   : > { %1924 = vmatmul.f32.gmra.mxu2 %v6347_v23  ;;  %2037 = vmatmul.f32.gmra.mxu3 %v6348_v62  ;;  %12811 = vst [vmem:[#allocation48_spill] sm:$0xff] %v8168_v57 }
 0x25d   : > { %2861 = vst [vmem:[%s7551_s16 + $0x1f8] sm:$0xff] %v1409_v14  ;;  %3413 = vadd.xlane.f32.xlu0 %v3412_v39  ;;  %v2984_v14 = vld [vmem:[%s7346_s12 + $0x2d0] sm:$0xff] }
 0x25e   : > { %3428 = vadd.xlane.f32.xlu2 %v3427_v8 }
 0x25f   : > { %v1521_v47 = vpop.f32.mrf.mxu2  ;;  %v1634_v11 = vpop.f32.mrf.mxu3  ;;  %3398 = vadd.xlane.f32.xlu1 %v3397_v58  ;;  %v3421_v58 = vsel %vm3150_vm0, %v2984_v14, 0.0 }
 0x260   : > { %v8174_v23 = vadd.f32 %v1634_v11, %v1521_v47  ;;  %v1298_v2 = vpop.f32.mrf.mxu0  ;;  %v1411_v51 = vpop.f32.mrf.mxu1  ;;  %v2989_v47 = vld [vmem:[%s7346_s12 + $0x2f8] sm:$0xff]  ;;  %v2979_v11 = vld [vmem:[%s7346_s12 + $0x2a8] sm:$0xff] }
 0x261   : > { %v1299_v62 = vadd.f32 %v1298_v2, %v7362_v9  ;;  %v8186_v39 = vpop.xlane.xlu0 %3296  ;;  %v8188_v9 = vpop.xlane.xlu2 %3311  ;;  %v6351_v2 = vld [vmem:[%s12747_s1 + $0x140] sm:$0xff] }
 0x262   : > { %1701 = vmatmul.f32.gmra.mxu0 %v6349_v24  ;;  %12812 = vst [vmem:[#allocation49_spill] sm:$0xff] %v8186_v39  ;;  %v8196_v8 = vpop.xlane.xlu1 %3281  ;;  %v3406_v24 = vsel %vm3150_vm0, %v2979_v11, 0.0  ;;  %v2992_v11 = vld [vmem:[%s7346_s12 + $0x310] sm:$0xff] }
 0x263   : > { %v1412_v4 = vadd.f32 %v1411_v51, %v1299_v62  ;;  %1814 = vmatmul.f32.gmra.mxu1 %v6350_v55  ;;  %12813 = vst [vmem:[#allocation50_spill] sm:$0xff] %v8188_v9  ;;  %v6352_v51 = vld [vmem:[%s12747_s1 + $0x148] sm:$0xff]  ;;  %v3436_v62 = vsel %vm3150_vm0, %v2989_v47, 0.0  ;;  %v6353_v47 = vld [vmem:[%s12747_s1 + $0x160] sm:$0xff] }
 0x264   : > { %1927 = vmatmul.f32.gmra.mxu2 %v6351_v2  ;;  %2040 = vmatmul.f32.gmra.mxu3 %v6352_v51  ;;  %12814 = vst [vmem:[#allocation51_spill] sm:$0xff] %v8196_v8 }
 0x265   : > { %2864 = vst [vmem:[%s7551_s16 + $0x210] sm:$0xff] %v1412_v4  ;;  %3422 = vadd.xlane.f32.xlu0 %v3421_v58  ;;  %v2987_v4 = vld [vmem:[%s7346_s12 + $0x2e8] sm:$0xff] }
 0x266   : > { %3437 = vadd.xlane.f32.xlu2 %v3436_v62 }
 0x267   : > { %v1524_v55 = vpop.f32.mrf.mxu2  ;;  %v1637_v57 = vpop.f32.mrf.mxu3  ;;  %3407 = vadd.xlane.f32.xlu1 %v3406_v24  ;;  %v3430_v24 = vsel %vm3150_vm0, %v2987_v4, 0.0 }
 0x268   : > { %v8202_v2 = vadd.f32 %v1637_v57, %v1524_v55  ;;  %v1301_v9 = vpop.f32.mrf.mxu0  ;;  %v1414_v39 = vpop.f32.mrf.mxu1  ;;  %v6354_v57 = vld [vmem:[%s12747_s1 + $0x168] sm:$0xff]  ;;  %v2982_v55 = vld [vmem:[%s7346_s12 + $0x2c0] sm:$0xff] }
 0x269   : > { %v1302_v51 = vadd.f32 %v1301_v9, %v7380_v32  ;;  %v8214_v58 = vpop.xlane.xlu0 %3305  ;;  %v6355_v32 = vld [vmem:[%s12747_s1 + $0x170] sm:$0xff]  ;;  %v8222_v9 = vpop.xlane.xlu2 %3320 }
 0x26a   : > { %1704 = vmatmul.f32.gmra.mxu0 %v6353_v47  ;;  %12815 = vst [vmem:[#allocation52_spill] sm:$0xff] %v8214_v58  ;;  %v8224_v62 = vpop.xlane.xlu1 %3290  ;;  %v3415_v47 = vsel %vm3150_vm0, %v2982_v55, 0.0  ;;  %v6358_v55 = vld [vmem:[%s12747_s1 + $0x198] sm:$0xff] }
 0x26b   : > { %v1415_v14 = vadd.f32 %v1414_v39, %v1302_v51  ;;  %1817 = vmatmul.f32.gmra.mxu1 %v6354_v57  ;;  %v6356_v39 = vld [vmem:[%s12747_s1 + $0x178] sm:$0xff]  ;;  %12816 = vst [vmem:[#allocation53_spill] sm:$0xff] %v8222_v9  ;;  %v3445_v51 = vsel %vm3150_vm0, %v2992_v11, 0.0  ;;  %v6357_v11 = vld [vmem:[%s12747_s1 + $0x190] sm:$0xff] }
 0x26c   : > { %1930 = vmatmul.f32.gmra.mxu2 %v6355_v32  ;;  %2043 = vmatmul.f32.gmra.mxu3 %v6356_v39  ;;  %12817 = vst [vmem:[#allocation54_spill] sm:$0xff] %v8224_v62 }
 0x26d   : > { %2867 = vst [vmem:[%s7551_s16 + $0x228] sm:$0xff] %v1415_v14  ;;  %3431 = vadd.xlane.f32.xlu0 %v3430_v24  ;;  %v2990_v14 = vld [vmem:[%s7346_s12 + $0x300] sm:$0xff] }
 0x26e   : > { %3446 = vadd.xlane.f32.xlu2 %v3445_v51  ;;  %v3439_v24 = vsel %vm3150_vm0, %v2990_v14, 0.0 }
 0x26f   : > { %v1527_v57 = vpop.f32.mrf.mxu2  ;;  %v1640_v32 = vpop.f32.mrf.mxu3  ;;  %3416 = vadd.xlane.f32.xlu1 %v3415_v47 }
 0x270   : > { %v8230_v8 = vadd.f32 %v1640_v32, %v1527_v57  ;;  %v1304_v58 = vpop.f32.mrf.mxu0  ;;  %v1417_v39 = vpop.f32.mrf.mxu1  ;;  %v2995_v57 = vld [vmem:[%s7346_s12 + $0x328] sm:$0xff]  ;;  %v2985_v32 = vld [vmem:[%s7346_s12 + $0x2d8] sm:$0xff] }
 0x271   : > { %v1305_v9 = vadd.f32 %v1304_v58, %v7398_v53  ;;  %v6359_v53 = vld [vmem:[%s12747_s1 + $0x1a0] sm:$0xff]  ;;  %v6360_v58 = vld [vmem:[%s12747_s1 + $0x1a8] sm:$0xff]  ;;  %v3454_v51 = vsel %vm3150_vm0, %v2995_v57, 0.0  ;;  %v3424_v47 = vsel %vm3150_vm0, %v2985_v32, 0.0 }
 0x272   : > { %1707 = vmatmul.f32.gmra.mxu0 %v6357_v11  ;;  %v8256_v11 = vpop.xlane.xlu1 %3299  ;;  %v6361_v32 = vld [vmem:[%s12747_s1 + $0x1c0] sm:$0xff] }
 0x273   : > { %v1418_v4 = vadd.f32 %v1417_v39, %v1305_v9  ;;  %1820 = vmatmul.f32.gmra.mxu1 %v6358_v55  ;;  %v8248_v9 = vpop.xlane.xlu0 %3314  ;;  %v8254_v39 = vpop.xlane.xlu2 %3329  ;;  %12820 = vst [vmem:[#allocation57_spill] sm:$0xff] %v8256_v11 }
 0x274   : > { %1933 = vmatmul.f32.gmra.mxu2 %v6359_v53  ;;  %2046 = vmatmul.f32.gmra.mxu3 %v6360_v58  ;;  %12818 = vst [vmem:[#allocation55_spill] sm:$0xff] %v8248_v9 }
 0x275   : > { %2870 = vst [vmem:[%s7551_s16 + $0x240] sm:$0xff] %v1418_v4  ;;  %3440 = vadd.xlane.f32.xlu0 %v3439_v24  ;;  %v2993_v4 = vld [vmem:[%s7346_s12 + $0x318] sm:$0xff] }
 0x276   : > { %12819 = vst [vmem:[#allocation56_spill] sm:$0xff] %v8254_v39  ;;  %3455 = vadd.xlane.f32.xlu2 %v3454_v51  ;;  %v2988_v39 = vld [vmem:[%s7346_s12 + $0x2f0] sm:$0xff]  ;;  %v3448_v24 = vsel %vm3150_vm0, %v2993_v4, 0.0 }
 0x277   : > { %v1530_v55 = vpop.f32.mrf.mxu2  ;;  %v1643_v53 = vpop.f32.mrf.mxu3  ;;  %3425 = vadd.xlane.f32.xlu1 %v3424_v47  ;;  %v3433_v47 = vsel %vm3150_vm0, %v2988_v39, 0.0 }
 0x278   : > { %v8258_v62 = vadd.f32 %v1643_v53, %v1530_v55  ;;  %v1307_v58 = vpop.f32.mrf.mxu0  ;;  %v1420_v9 = vpop.f32.mrf.mxu1  ;;  %v6362_v55 = vld [vmem:[%s12747_s1 + $0x1c8] sm:$0xff]  ;;  %v2998_v53 = vld [vmem:[%s7346_s12 + $0x340] sm:$0xff] }
 0x279   : > { %v1308_v14 = vadd.f32 %v1307_v58, %v7418_v18  ;;  %v6363_v18 = vld [vmem:[%s12747_s1 + $0x1d0] sm:$0xff]  ;;  %v3463_v51 = vsel %vm3150_vm0, %v2998_v53, 0.0 }
 0x27a   : > { %1710 = vmatmul.f32.gmra.mxu0 %v6361_v32  ;;  %v2996_v53 = vld [vmem:[%s7346_s12 + $0x330] sm:$0xff] }
 0x27b   : > { %v1421_v57 = vadd.f32 %v1420_v9, %v1308_v14  ;;  %1823 = vmatmul.f32.gmra.mxu1 %v6362_v55  ;;  %v6364_v9 = vld [vmem:[%s12747_s1 + $0x1d8] sm:$0xff]  ;;  %v8280_v58 = vpop.xlane.xlu0 %3323  ;;  %v8285_v4 = vpop.xlane.xlu2 %3338 }
 0x27c   : > { %1936 = vmatmul.f32.gmra.mxu2 %v6363_v18  ;;  %2049 = vmatmul.f32.gmra.mxu3 %v6364_v9  ;;  %12821 = vst [vmem:[#allocation58_spill] sm:$0xff] %v8280_v58 }
 0x27d   : > { %2873 = vst [vmem:[%s7551_s16 + $0x258] sm:$0xff] %v1421_v57  ;;  %3449 = vadd.xlane.f32.xlu0 %v3448_v24  ;;  %v8287_v39 = vpop.xlane.xlu1 %3308  ;;  %v3001_v24 = vld [vmem:[%s7346_s12 + $0x358] sm:$0xff] }
 0x27e   : > { %3464 = vadd.xlane.f32.xlu2 %v3463_v51  ;;  %12822 = vst [vmem:[#allocation59_spill] sm:$0xff] %v8285_v4  ;;  %v2991_v51 = vld [vmem:[%s7346_s12 + $0x308] sm:$0xff] }
 0x27f   : > { %v1533_v14 = vpop.f32.mrf.mxu2  ;;  %v1646_v32 = vpop.f32.mrf.mxu3  ;;  %3434 = vadd.xlane.f32.xlu1 %v3433_v47  ;;  %12823 = vst [vmem:[#allocation60_spill] sm:$0xff] %v8287_v39  ;;  %v6367_v47 = vld [vmem:[%s12747_s1 + $0x200] sm:$0xff] }
 0x280   : > { %v8282_v55 = vadd.f32 %v1646_v32, %v1533_v14  ;;  %v1310_v18 = vpop.f32.mrf.mxu0  ;;  %v1423_v11 = vpop.f32.mrf.mxu1  ;;  %v6365_v14 = vld [vmem:[%s12747_s1 + $0x1f0] sm:$0xff]  ;;  %v3457_v32 = vsel %vm3150_vm0, %v2996_v53, 0.0 }
 0x281   : > { %v1311_v57 = vadd.f32 %v1310_v18, %v7440_v1  ;;  %v6366_v1 = vld [vmem:[%s12747_s1 + $0x1f8] sm:$0xff] }
 0x282   : > { %1713 = vmatmul.f32.gmra.mxu0 %v6365_v14  ;;  %v522_v18 = vld [vmem:[%s6702_s26 + $0x178] sm:$0xff]  ;;  %v3472_v14 = vsel %vm3150_vm0, %v3001_v24, 0.0  ;;  %v2999_v24 = vld [vmem:[%s7346_s12 + $0x348] sm:$0xff] }
 0x283   : > { %v1424_v9 = vadd.f32 %v1423_v11, %v1311_v57  ;;  %1826 = vmatmul.f32.gmra.mxu1 %v6366_v1  ;;  %v6368_v11 = vld [vmem:[%s12747_s1 + $0x208] sm:$0xff]  ;;  %v570_v57 = vld [vmem:[%s6702_s26 + $0x2f8] sm:$0xff]  ;;  %v3442_v1 = vsel %vm3150_vm0, %v2991_v51, 0.0  ;;  %2119 = vmatpush.msrb.mxu0 %v522_v18  ;;  %v6369_v18 = vld [vmem:[%s12747_s1 + $0x220] sm:$0xff] }
 0x284   : > { %1939 = vmatmul.f32.gmra.mxu2 %v6367_v47  ;;  %2052 = vmatmul.f32.gmra.mxu3 %v6368_v11 }
 0x285   : > { %2876 = vst [vmem:[%s7551_s16 + $0x270] sm:$0xff] %v1424_v9  ;;  %2232 = vmatpush.msrb.mxu1 %v570_v57  ;;  %3458 = vadd.xlane.f32.xlu0 %v3457_v32  ;;  %v8313_v9 = vpop.xlane.xlu0 %3332  ;;  %v3004_v32 = vld [vmem:[%s7346_s12 + $0x370] sm:$0xff]  ;;  %v2994_v57 = vld [vmem:[%s7346_s12 + $0x320] sm:$0xff] }
 0x286   : > { %3473 = vadd.xlane.f32.xlu2 %v3472_v14  ;;  %12824 = vst [vmem:[#allocation61_spill] sm:$0xff] %v8313_v9 }
 0x287   : > { %v1536_v4 = vpop.f32.mrf.mxu2  ;;  %v1649_v47 = vpop.f32.mrf.mxu3  ;;  %3443 = vadd.xlane.f32.xlu1 %v3442_v1 }
 0x288   : > { %v8310_v58 = vadd.f32 %v1649_v47, %v1536_v4  ;;  %v1313_v39 = vpop.f32.mrf.mxu0  ;;  %v1426_v11 = vpop.f32.mrf.mxu1  ;;  %v6370_v4 = vld [vmem:[%s12747_s1 + $0x228] sm:$0xff]  ;;  %v3466_v47 = vsel %vm3150_vm0, %v2999_v24, 0.0 }
 0x289   : > { %v1314_v53 = vadd.f32 %v1313_v39, %v7460_v13  ;;  %v6371_v13 = vld [vmem:[%s12747_s1 + $0x230] sm:$0xff]  ;;  %v6372_v39 = vld [vmem:[%s12747_s1 + $0x238] sm:$0xff]  ;;  %v8330_v14 = vpop.xlane.xlu2 %3347 }
 0x28a   : > { %1716 = vmatmul.f32.gmra.mxu0 %v6369_v18  ;;  %12825 = vst [vmem:[#allocation62_spill] sm:$0xff] %v8330_v14  ;;  %v8332_v1 = vpop.xlane.xlu1 %3317 }
 0x28b   : > { %v1427_v51 = vadd.f32 %v1426_v11, %v1314_v53  ;;  %1829 = vmatmul.f32.gmra.mxu1 %v6370_v4  ;;  %12826 = vst [vmem:[#allocation63_spill] sm:$0xff] %v8332_v1  ;;  %v3481_v11 = vsel %vm3150_vm0, %v3004_v32, 0.0  ;;  %v3451_v53 = vsel %vm3150_vm0, %v2994_v57, 0.0  ;;  %v6373_v32 = vld [vmem:[%s12747_s1 + $0x250] sm:$0xff]  ;;  %v6374_v57 = vld [vmem:[%s12747_s1 + $0x258] sm:$0xff] }
 0x28c   : > { %1942 = vmatmul.f32.gmra.mxu2 %v6371_v13  ;;  %2055 = vmatmul.f32.gmra.mxu3 %v6372_v39 }
 0x28d   : > { %2879 = vst [vmem:[%s7551_s16 + $0x288] sm:$0xff] %v1427_v51  ;;  %3467 = vadd.xlane.f32.xlu0 %v3466_v47  ;;  %v3002_v51 = vld [vmem:[%s7346_s12 + $0x360] sm:$0xff]  ;;  %v3007_v47 = vld [vmem:[%s7346_s12 + $0x388] sm:$0xff] }
 0x28e   : > { %3482 = vadd.xlane.f32.xlu2 %v3481_v11  ;;  %v519_v11 = vld [vmem:[%s6702_s26 + $0x160] sm:$0xff] }
 0x28f   : > { %v1539_v18 = vpop.f32.mrf.mxu2  ;;  %v1652_v4 = vpop.f32.mrf.mxu3  ;;  %3452 = vadd.xlane.f32.xlu1 %v3451_v53  ;;  %2120 = vmatpush.msrb.mxu0 %v519_v11  ;;  %v3000_v11 = vld [vmem:[%s7346_s12 + $0x350] sm:$0xff] }
 0x290   : > { %v8338_v13 = vadd.f32 %v1652_v4, %v1539_v18  ;;  %v1316_v39 = vpop.f32.mrf.mxu0  ;;  %v1429_v9 = vpop.f32.mrf.mxu1 }
 0x291   : > { %v1317_v14 = vadd.f32 %v1316_v39, %v7482_v46  ;;  %v8348_v18 = vpop.xlane.xlu0 %3341  ;;  %v2997_v46 = vld [vmem:[%s7346_s12 + $0x338] sm:$0xff]  ;;  %v8359_v53 = vpop.xlane.xlu2 %3356  ;;  %v567_v39 = vld [vmem:[%s6702_s26 + $0x2e0] sm:$0xff] }
 0x292   : > { %1719 = vmatmul.f32.gmra.mxu0 %v6373_v32  ;;  %12827 = vst [vmem:[#allocation64_spill] sm:$0xff] %v8348_v18  ;;  %v8361_v4 = vpop.xlane.xlu1 %3326  ;;  %v3475_v32 = vsel %vm3150_vm0, %v3002_v51, 0.0  ;;  %2233 = vmatpush.msrb.mxu1 %v567_v39  ;;  %v3005_v51 = vld [vmem:[%s7346_s12 + $0x378] sm:$0xff] }
 0x293   : > { %v1430_v24 = vadd.f32 %v1429_v9, %v1317_v14  ;;  %1832 = vmatmul.f32.gmra.mxu1 %v6374_v57  ;;  %v6375_v9 = vld [vmem:[%s12747_s1 + $0x260] sm:$0xff]  ;;  %v6376_v14 = vld [vmem:[%s12747_s1 + $0x268] sm:$0xff]  ;;  %12828 = vst [vmem:[#allocation65_spill] sm:$0xff] %v8359_v53  ;;  %v3490_v57 = vsel %vm3150_vm0, %v3007_v47, 0.0  ;;  %v3484_v39 = vsel %vm3150_vm0, %v3005_v51, 0.0 }
 0x294   : > { %1945 = vmatmul.f32.gmra.mxu2 %v6375_v9  ;;  %2058 = vmatmul.f32.gmra.mxu3 %v6376_v14  ;;  %12829 = vst [vmem:[#allocation66_spill] sm:$0xff] %v8361_v4  ;;  %v3460_v9 = vsel %vm3150_vm0, %v2997_v46, 0.0  ;;  %v6377_v47 = vld [vmem:[%s12747_s1 + $0x280] sm:$0xff] }
 0x295   : > { %2882 = vst [vmem:[%s7551_s16 + $0x2a0] sm:$0xff] %v1430_v24  ;;  %3476 = vadd.xlane.f32.xlu0 %v3475_v32  ;;  %v3010_v46 = vld [vmem:[%s7346_s12 + $0x3a0] sm:$0xff] }
 0x296   : > { %3491 = vadd.xlane.f32.xlu2 %v3490_v57  ;;  %v3499_v32 = vsel %vm3150_vm0, %v3010_v46, 0.0  ;;  %v3469_v57 = vsel %vm3150_vm0, %v3000_v11, 0.0  ;;  %v6381_v46 = vld [vmem:[%s12747_s1 + $0x2b0] sm:$0xff]  ;;  %v6382_v11 = vld [vmem:[%s12747_s1 + $0x2b8] sm:$0xff] }
 0x297   : > { %v1542_v18 = vpop.f32.mrf.mxu2  ;;  %v1655_v1 = vpop.f32.mrf.mxu3  ;;  %3461 = vadd.xlane.f32.xlu1 %v3460_v9 }
 0x298   : > { %v8368_v14 = vadd.f32 %v1655_v1, %v1542_v18  ;;  %v1319_v53 = vpop.f32.mrf.mxu0  ;;  %v1432_v10 = vpop.f32.mrf.mxu1  ;;  %v6378_v1 = vld [vmem:[%s12747_s1 + $0x288] sm:$0xff] }
 0x299   : > { %v1320_v4 = vadd.f32 %v1319_v53, %v7502_v12  ;;  %v8378_v18 = vpop.xlane.xlu0 %3350  ;;  %v6379_v12 = vld [vmem:[%s12747_s1 + $0x290] sm:$0xff]  ;;  %v8388_v53 = vpop.xlane.xlu2 %3365 }
 0x29a   : > { %1722 = vmatmul.f32.gmra.mxu0 %v6377_v47  ;;  %12830 = vst [vmem:[#allocation67_spill] sm:$0xff] %v8378_v18 }
 0x29b   : > { %v1433_v24 = vadd.f32 %v1432_v10, %v1320_v4  ;;  %1835 = vmatmul.f32.gmra.mxu1 %v6378_v1  ;;  %v6380_v10 = vld [vmem:[%s12747_s1 + $0x298] sm:$0xff]  ;;  %12831 = vst [vmem:[#allocation68_spill] sm:$0xff] %v8388_v53  ;;  %v8390_v4 = vpop.xlane.xlu1 %3335 }
 0x29c   : > { %1948 = vmatmul.f32.gmra.mxu2 %v6379_v12  ;;  %2061 = vmatmul.f32.gmra.mxu3 %v6380_v10  ;;  %12832 = vst [vmem:[#allocation69_spill] sm:$0xff] %v8390_v4 }
 0x29d   : > { %2885 = vst [vmem:[%s7551_s16 + $0x2b8] sm:$0xff] %v1433_v24  ;;  %3485 = vadd.xlane.f32.xlu0 %v3484_v39  ;;  %v3008_v24 = vld [vmem:[%s7346_s12 + $0x390] sm:$0xff] }
 0x29e   : > { %3500 = vadd.xlane.f32.xlu2 %v3499_v32  ;;  %v3003_v32 = vld [vmem:[%s7346_s12 + $0x368] sm:$0xff] }
 0x29f   : > { %v1545_v9 = vpop.f32.mrf.mxu2  ;;  %v1658_v47 = vpop.f32.mrf.mxu3  ;;  %3470 = vadd.xlane.f32.xlu1 %v3469_v57  ;;  %v6383_v57 = vld [vmem:[%s12747_s1 + $0x2c0] sm:$0xff] }
 0x2a0   : > { %v8396_v1 = vadd.f32 %v1658_v47, %v1545_v9  ;;  %v1322_v12 = vpop.f32.mrf.mxu0  ;;  %v1435_v10 = vpop.f32.mrf.mxu1 }
 0x2a1   : > { %v1323_v53 = vadd.f32 %v1322_v12, %v7524_v0  ;;  %v8406_v39 = vpop.xlane.xlu0 %3359  ;;  %v3013_v0 = vld [vmem:[%s7346_s12 + $0x3b8] sm:$0xff]  ;;  %v8416_v9 = vpop.xlane.xlu2 %3374  ;;  %v516_v12 = vld [vmem:[%s6702_s26 + $0x148] sm:$0xff] }
 0x2a2   : > { %1725 = vmatmul.f32.gmra.mxu0 %v6381_v46  ;;  %12833 = vst [vmem:[#allocation70_spill] sm:$0xff] %v8406_v39  ;;  %v3493_v46 = vsel %vm3150_vm0, %v3008_v24, 0.0  ;;  %v3011_v24 = vld [vmem:[%s7346_s12 + $0x3a8] sm:$0xff] }
 0x2a3   : > { %v1436_v51 = vadd.f32 %v1435_v10, %v1323_v53  ;;  %1838 = vmatmul.f32.gmra.mxu1 %v6382_v11  ;;  %v6384_v53 = vld [vmem:[%s12747_s1 + $0x2c8] sm:$0xff]  ;;  %12834 = vst [vmem:[#allocation71_spill] sm:$0xff] %v8416_v9  ;;  %v8418_v47 = vpop.xlane.xlu1 %3344  ;;  %2121 = vmatpush.msrb.mxu0 %v516_v12  ;;  %v3508_v11 = vsel %vm3150_vm0, %v3013_v0, 0.0  ;;  %v6385_v0 = vld [vmem:[%s12747_s1 + $0x2e0] sm:$0xff] }
 0x2a4   : > { %1951 = vmatmul.f32.gmra.mxu2 %v6383_v57  ;;  %2064 = vmatmul.f32.gmra.mxu3 %v6384_v53  ;;  %12835 = vst [vmem:[#allocation72_spill] sm:$0xff] %v8418_v47  ;;  %v564_v10 = vld [vmem:[%s6702_s26 + $0x2c8] sm:$0xff]  ;;  %v3478_v57 = vsel %vm3150_vm0, %v3003_v32, 0.0  ;;  %v3016_v32 = vld [vmem:[%s7346_s12 + $0x3d0] sm:$0xff]  ;;  %v3006_v12 = vld [vmem:[%s7346_s12 + $0x380] sm:$0xff] }
 0x2a5   : > { %2888 = vst [vmem:[%s7551_s16 + $0x2d0] sm:$0xff] %v1436_v51  ;;  %2234 = vmatpush.msrb.mxu1 %v564_v10  ;;  %3494 = vadd.xlane.f32.xlu0 %v3493_v46  ;;  %v3502_v10 = vsel %vm3150_vm0, %v3011_v24, 0.0  ;;  %v3517_v46 = vsel %vm3150_vm0, %v3016_v32, 0.0  ;;  %v3014_v24 = vld [vmem:[%s7346_s12 + $0x3c0] sm:$0xff]  ;;  %v6389_v32 = vld [vmem:[%s12747_s1 + $0x310] sm:$0xff] }
 0x2a6   : > { %3509 = vadd.xlane.f32.xlu2 %v3508_v11  ;;  %v3487_v11 = vsel %vm3150_vm0, %v3006_v12, 0.0  ;;  %v6390_v12 = vld [vmem:[%s12747_s1 + $0x318] sm:$0xff] }
 0x2a7   : > { %v1548_v39 = vpop.f32.mrf.mxu2  ;;  %v1661_v18 = vpop.f32.mrf.mxu3  ;;  %3479 = vadd.xlane.f32.xlu1 %v3478_v57 }
 0x2a8   : > { %v8426_v53 = vadd.f32 %v1661_v18, %v1548_v39  ;;  %v1325_v9 = vpop.f32.mrf.mxu0  ;;  %v1438_v47 = vpop.f32.mrf.mxu1  ;;  %v6386_v18 = vld [vmem:[%s12747_s1 + $0x2e8] sm:$0xff] }
 0x2a9   : > { %v1326_v4 = vadd.f32 %v1325_v9, %v7546_v19  ;;  %v8436_v39 = vpop.xlane.xlu0 %3368  ;;  %v6387_v19 = vld [vmem:[%s12747_s1 + $0x2f0] sm:$0xff]  ;;  %v8446_v9 = vpop.xlane.xlu2 %3383 }
 0x2aa   : > { %1728 = vmatmul.f32.gmra.mxu0 %v6385_v0  ;;  %12836 = vst [vmem:[#allocation73_spill] sm:$0xff] %v8436_v39 }
 0x2ab   : > { %v1439_v51 = vadd.f32 %v1438_v47, %v1326_v4  ;;  %1841 = vmatmul.f32.gmra.mxu1 %v6386_v18  ;;  %v6388_v4 = vld [vmem:[%s12747_s1 + $0x2f8] sm:$0xff]  ;;  %12837 = vst [vmem:[#allocation74_spill] sm:$0xff] %v8446_v9  ;;  %v8448_v47 = vpop.xlane.xlu1 %3353  ;;  %v3511_v9 = vsel %vm3150_vm0, %v3014_v24, 0.0 }
 0x2ac   : > { %1954 = vmatmul.f32.gmra.mxu2 %v6387_v19  ;;  %2067 = vmatmul.f32.gmra.mxu3 %v6388_v4  ;;  %12838 = vst [vmem:[#allocation75_spill] sm:$0xff] %v8448_v47 }
 0x2ad   : > { %2891 = vst [vmem:[%s7551_s16 + $0x2e8] sm:$0xff] %v1439_v51  ;;  %3503 = vadd.xlane.f32.xlu0 %v3502_v10  ;;  %v3019_v10 = vld [vmem:[%s7346_s12 + $0x3e8] sm:$0xff] }
 0x2ae   : > { %3518 = vadd.xlane.f32.xlu2 %v3517_v46  ;;  %v3009_v46 = vld [vmem:[%s7346_s12 + $0x398] sm:$0xff]  ;;  %v3526_v39 = vsel %vm3150_vm0, %v3019_v10, 0.0 }
 0x2af   : > { %v1551_v57 = vpop.f32.mrf.mxu2  ;;  %v1664_v0 = vpop.f32.mrf.mxu3  ;;  %3488 = vadd.xlane.f32.xlu1 %v3487_v11  ;;  %v6392_v11 = vld [vmem:[%s12747_s1 + $0x328] sm:$0xff] }
 0x2b0   : > { %v8454_v18 = vadd.f32 %v1664_v0, %v1551_v57  ;;  %v1684_v19 = vpop.f32.mrf.mxu0  ;;  %v1797_v4 = vpop.f32.mrf.mxu1 }
 0x2b1   : > { %v1685_v51 = vadd.f32 %v1684_v19, %v7568_v43  ;;  %v8464_v57 = vpop.xlane.xlu0 %3377  ;;  %v6391_v43 = vld [vmem:[%s12747_s1 + $0x320] sm:$0xff]  ;;  %v8474_v0 = vpop.xlane.xlu2 %3392 }
 0x2b2   : > { %1731 = vmatmul.f32.gmra.mxu0 %v6389_v32  ;;  %12839 = vst [vmem:[#allocation76_spill] sm:$0xff] %v8464_v57  ;;  %v513_v32 = vld [vmem:[%s6702_s26 + $0x130] sm:$0xff] }
 0x2b3   : > { %1844 = vmatmul.f32.gmra.mxu1 %v6390_v12  ;;  %12840 = vst [vmem:[#allocation77_spill] sm:$0xff] %v8474_v0  ;;  %v8476_v19 = vpop.xlane.xlu1 %3362  ;;  %v561_v12 = vld [vmem:[%s6702_s26 + $0x2b0] sm:$0xff]  ;;  %2122 = vmatpush.msrb.mxu0 %v513_v32  ;;  %v1798_v57 = vadd.f32 %v1797_v4, %v1685_v51  ;;  %v6393_v4 = vld [vmem:[%s12747_s1 + $0x340] sm:$0xff]  ;;  %v6394_v51 = vld [vmem:[%s12747_s1 + $0x348] sm:$0xff] }
 0x2b4   : > { %1957 = vmatmul.f32.gmra.mxu2 %v6391_v43  ;;  %2070 = vmatmul.f32.gmra.mxu3 %v6392_v11  ;;  %12841 = vst [vmem:[#allocation78_spill] sm:$0xff] %v8476_v19  ;;  %v3496_v43 = vsel %vm3150_vm0, %v3009_v46, 0.0 }
 0x2b5   : > { %2235 = vmatpush.msrb.mxu1 %v561_v12  ;;  %3512 = vadd.xlane.f32.xlu0 %v3511_v9  ;;  %v3017_v12 = vld [vmem:[%s7346_s12 + $0x3d8] sm:$0xff]  ;;  %v3012_v9 = vld [vmem:[%s7346_s12 + $0x3b0] sm:$0xff] }
 0x2b6   : > { %3527 = vadd.xlane.f32.xlu2 %v3526_v39  ;;  %v3520_v46 = vsel %vm3150_vm0, %v3017_v12, 0.0  ;;  %v6398_v12 = vld [vmem:[%s12747_s1 + $0x378] sm:$0xff] }
 0x2b7   : > { %v1910_v47 = vpop.f32.mrf.mxu2  ;;  %v2023_v29 = vpop.f32.mrf.mxu3  ;;  %3497 = vadd.xlane.f32.xlu1 %v3496_v43 }
 0x2b8   : > { %v1911_v11 = vadd.f32 %v1910_v47, %v1798_v57  ;;  %v1687_v0 = vpop.f32.mrf.mxu0  ;;  %v1800_v19 = vpop.f32.mrf.mxu1  ;;  %v3022_v57 = vld [vmem:[%s7346_s12 + $0x400] sm:$0xff] }
 0x2b9   : > { %v1688_v32 = vadd.f32 %v1687_v0, %v7590_v7  ;;  %v8491_v47 = vpop.xlane.xlu0 %3386  ;;  %v6395_v7 = vld [vmem:[%s12747_s1 + $0x350] sm:$0xff]  ;;  %v8502_v39 = vpop.xlane.xlu2 %3401  ;;  %v3535_v43 = vsel %vm3150_vm0, %v3022_v57, 0.0 }
 0x2ba   : > { %v2024_v24 = vadd.f32 %v2023_v29, %v1911_v11  ;;  %1734 = vmatmul.f32.gmra.mxu0 %v6393_v4  ;;  %12842 = vst [vmem:[#allocation79_spill] sm:$0xff] %v8491_v47  ;;  %v6396_v29 = vld [vmem:[%s12747_s1 + $0x358] sm:$0xff]  ;;  %v3505_v11 = vsel %vm3150_vm0, %v3012_v9, 0.0 }
 0x2bb   : > { %1847 = vmatmul.f32.gmra.mxu1 %v6394_v51  ;;  %12843 = vst [vmem:[#allocation80_spill] sm:$0xff] %v8502_v39  ;;  %v8504_v10 = vpop.xlane.xlu1 %3371  ;;  %v1801_v0 = vadd.f32 %v1800_v19, %v1688_v32  ;;  %v3020_v19 = vld [vmem:[%s7346_s12 + $0x3f0] sm:$0xff]  ;;  %v3025_v9 = vld [vmem:[%s7346_s12 + $0x418] sm:$0xff]  ;;  %v663_v39 = vld [vmem:[%s6702_s26 + $0x5e0] sm:$0xff] }
 0x2bc   : > { %2798 = vst [vmem:[%s7551_s16 + $0x8] sm:$0xff] %v2024_v24  ;;  %1960 = vmatmul.f32.gmra.mxu2 %v6395_v7  ;;  %2073 = vmatmul.f32.gmra.mxu3 %v6396_v29  ;;  %v6397_v32 = vld [vmem:[%s12747_s1 + $0x370] sm:$0xff] }
 0x2bd   : > { %12844 = vst [vmem:[#allocation81_spill] sm:$0xff] %v8504_v10  ;;  %3521 = vadd.xlane.f32.xlu0 %v3520_v46  ;;  %v3015_v46 = vld [vmem:[%s7346_s12 + $0x3c8] sm:$0xff] }
 0x2be   : > { %3536 = vadd.xlane.f32.xlu2 %v3535_v43 }
 0x2bf   : > { %v1913_v24 = vpop.f32.mrf.mxu2  ;;  %v2026_v4 = vpop.f32.mrf.mxu3  ;;  %3506 = vadd.xlane.f32.xlu1 %v3505_v11 }
 0x2c0   : > { %v1914_v51 = vadd.f32 %v1913_v24, %v1801_v0  ;;  %v1690_v7 = vpop.f32.mrf.mxu0  ;;  %v1803_v29 = vpop.f32.mrf.mxu1  ;;  %v6400_v0 = vld [vmem:[%s12747_s1 + $0x388] sm:$0xff]  ;;  %v510_v24 = vld [vmem:[%s6702_s26 + $0x118] sm:$0xff] }
 0x2c1   : > { %v1691_v10 = vadd.f32 %v1690_v7, %v7614_v45  ;;  %v8517_v57 = vpop.xlane.xlu0 %3395  ;;  %v6399_v45 = vld [vmem:[%s12747_s1 + $0x380] sm:$0xff]  ;;  %v8528_v43 = vpop.xlane.xlu2 %3410  ;;  %2123 = vmatpush.msrb.mxu0 %v510_v24  ;;  %v3544_v7 = vsel %vm3150_vm0, %v3025_v9, 0.0 }
 0x2c2   : > { %v2027_v47 = vadd.f32 %v2026_v4, %v1914_v51  ;;  %1737 = vmatmul.f32.gmra.mxu0 %v6397_v32  ;;  %12845 = vst [vmem:[#allocation82_spill] sm:$0xff] %v8517_v57  ;;  %v558_v4 = vld [vmem:[%s6702_s26 + $0x298] sm:$0xff]  ;;  %v3529_v51 = vsel %vm3150_vm0, %v3020_v19, 0.0  ;;  %v3514_v32 = vsel %vm3150_vm0, %v3015_v46, 0.0  ;;  %v3028_v46 = vld [vmem:[%s7346_s12 + $0x430] sm:$0xff]  ;;  %v603_v57 = vld [vmem:[%s6702_s26 + $0x400] sm:$0xff] }
 0x2c3   : > { %1850 = vmatmul.f32.gmra.mxu1 %v6398_v12  ;;  %12846 = vst [vmem:[#allocation83_spill] sm:$0xff] %v8528_v43  ;;  %v8530_v11 = vpop.xlane.xlu1 %3380 }
 0x2c4   : > { %2802 = vst [vmem:[%s7551_s16 + $0x20] sm:$0xff] %v2027_v47  ;;  %1963 = vmatmul.f32.gmra.mxu2 %v6399_v45  ;;  %2076 = vmatmul.f32.gmra.mxu3 %v6400_v0  ;;  %v1804_v47 = vadd.f32 %v1803_v29, %v1691_v10  ;;  %v6401_v10 = vld [vmem:[%s12747_s1 + $0x3a0] sm:$0xff]  ;;  %v6402_v29 = vld [vmem:[%s12747_s1 + $0x3a8] sm:$0xff] }
 0x2c5   : > { %12847 = vst [vmem:[#allocation84_spill] sm:$0xff] %v8530_v11  ;;  %2236 = vmatpush.msrb.mxu1 %v558_v4  ;;  %3530 = vadd.xlane.f32.xlu0 %v3529_v51  ;;  %v3023_v4 = vld [vmem:[%s7346_s12 + $0x408] sm:$0xff]  ;;  %v3018_v51 = vld [vmem:[%s7346_s12 + $0x3e0] sm:$0xff] }
 0x2c6   : > { %3545 = vadd.xlane.f32.xlu2 %v3544_v7 }
 0x2c7   : > { %v1916_v12 = vpop.f32.mrf.mxu2  ;;  %v2029_v45 = vpop.f32.mrf.mxu3  ;;  %3515 = vadd.xlane.f32.xlu1 %v3514_v32  ;;  %v3538_v32 = vsel %vm3150_vm0, %v3023_v4, 0.0  ;;  %v6406_v4 = vld [vmem:[%s12747_s1 + $0x3d8] sm:$0xff] }
 0x2c8   : > { %v1917_v0 = vadd.f32 %v1916_v12, %v1804_v47  ;;  %v1693_v43 = vpop.f32.mrf.mxu0  ;;  %v1806_v11 = vpop.f32.mrf.mxu1 }
 0x2c9   : > { %v1694_v24 = vadd.f32 %v1693_v43, %v7636_v15  ;;  %v8545_v9 = vpop.xlane.xlu0 %3404  ;;  %v6403_v15 = vld [vmem:[%s12747_s1 + $0x3b0] sm:$0xff]  ;;  %v6404_v43 = vld [vmem:[%s12747_s1 + $0x3b8] sm:$0xff]  ;;  %v8556_v47 = vpop.xlane.xlu2 %3419 }
 0x2ca   : > { %v2030_v19 = vadd.f32 %v2029_v45, %v1917_v0  ;;  %1740 = vmatmul.f32.gmra.mxu0 %v6401_v10  ;;  %12848 = vst [vmem:[#allocation85_spill] sm:$0xff] %v8545_v9  ;;  %v3553_v45 = vsel %vm3150_vm0, %v3028_v46, 0.0  ;;  %v3523_v0 = vsel %vm3150_vm0, %v3018_v51, 0.0  ;;  %v3031_v51 = vld [vmem:[%s7346_s12 + $0x448] sm:$0xff] }
 0x2cb   : > { %1853 = vmatmul.f32.gmra.mxu1 %v6402_v29  ;;  %12849 = vst [vmem:[#allocation86_spill] sm:$0xff] %v8556_v47  ;;  %v8558_v7 = vpop.xlane.xlu1 %3389  ;;  %v1807_v12 = vadd.f32 %v1806_v11, %v1694_v24  ;;  %v3026_v11 = vld [vmem:[%s7346_s12 + $0x420] sm:$0xff]  ;;  %v6405_v24 = vld [vmem:[%s12747_s1 + $0x3d0] sm:$0xff] }
 0x2cc   : > { %2805 = vst [vmem:[%s7551_s16 + $0x38] sm:$0xff] %v2030_v19  ;;  %1966 = vmatmul.f32.gmra.mxu2 %v6403_v15  ;;  %2079 = vmatmul.f32.gmra.mxu3 %v6404_v43 }
 0x2cd   : > { %12850 = vst [vmem:[#allocation87_spill] sm:$0xff] %v8558_v7  ;;  %3539 = vadd.xlane.f32.xlu0 %v3538_v32  ;;  %v3021_v32 = vld [vmem:[%s7346_s12 + $0x3f8] sm:$0xff] }
 0x2ce   : > { %3554 = vadd.xlane.f32.xlu2 %v3553_v45 }
 0x2cf   : > { %v1919_v19 = vpop.f32.mrf.mxu2  ;;  %v2032_v10 = vpop.f32.mrf.mxu3  ;;  %3524 = vadd.xlane.f32.xlu1 %v3523_v0 }
 0x2d0   : > { %v1920_v29 = vadd.f32 %v1919_v19, %v1807_v12  ;;  %v1696_v15 = vpop.f32.mrf.mxu0  ;;  %v1809_v43 = vpop.f32.mrf.mxu1  ;;  %v6408_v12 = vld [vmem:[%s12747_s1 + $0x3e8] sm:$0xff]  ;;  %v507_v19 = vld [vmem:[%s6702_s26 + $0x100] sm:$0xff] }
 0x2d1   : > { %v1697_v7 = vadd.f32 %v1696_v15, %v7660_v49  ;;  %v8571_v46 = vpop.xlane.xlu0 %3413  ;;  %v6407_v49 = vld [vmem:[%s12747_s1 + $0x3e0] sm:$0xff]  ;;  %v8582_v45 = vpop.xlane.xlu2 %3428  ;;  %2124 = vmatpush.msrb.mxu0 %v507_v19  ;;  %v3562_v15 = vsel %vm3150_vm0, %v3031_v51, 0.0 }
 0x2d2   : > { %v2033_v47 = vadd.f32 %v2032_v10, %v1920_v29  ;;  %1743 = vmatmul.f32.gmra.mxu0 %v6405_v24  ;;  %12851 = vst [vmem:[#allocation88_spill] sm:$0xff] %v8571_v46  ;;  %v555_v10 = vld [vmem:[%s6702_s26 + $0x280] sm:$0xff]  ;;  %v3547_v29 = vsel %vm3150_vm0, %v3026_v11, 0.0  ;;  %v3532_v24 = vsel %vm3150_vm0, %v3021_v32, 0.0 }
 0x2d3   : > { %1856 = vmatmul.f32.gmra.mxu1 %v6406_v4  ;;  %12852 = vst [vmem:[#allocation89_spill] sm:$0xff] %v8582_v45  ;;  %v8584_v0 = vpop.xlane.xlu1 %3398  ;;  %v3034_v32 = vld [vmem:[%s7346_s12 + $0x460] sm:$0xff] }
 0x2d4   : > { %2808 = vst [vmem:[%s7551_s16 + $0x50] sm:$0xff] %v2033_v47  ;;  %1969 = vmatmul.f32.gmra.mxu2 %v6407_v49  ;;  %2082 = vmatmul.f32.gmra.mxu3 %v6408_v12  ;;  %v1810_v47 = vadd.f32 %v1809_v43, %v1697_v7  ;;  %v6409_v7 = vld [vmem:[%s12747_s1 + $0x400] sm:$0xff]  ;;  %v6410_v43 = vld [vmem:[%s12747_s1 + $0x408] sm:$0xff] }
 0x2d5   : > { %12853 = vst [vmem:[#allocation90_spill] sm:$0xff] %v8584_v0  ;;  %2237 = vmatpush.msrb.mxu1 %v555_v10  ;;  %3548 = vadd.xlane.f32.xlu0 %v3547_v29  ;;  %v3029_v10 = vld [vmem:[%s7346_s12 + $0x438] sm:$0xff]  ;;  %v3024_v29 = vld [vmem:[%s7346_s12 + $0x410] sm:$0xff] }
 0x2d6   : > { %3563 = vadd.xlane.f32.xlu2 %v3562_v15 }
 0x2d7   : > { %v1922_v4 = vpop.f32.mrf.mxu2  ;;  %v2035_v49 = vpop.f32.mrf.mxu3  ;;  %3533 = vadd.xlane.f32.xlu1 %v3532_v24  ;;  %v3556_v24 = vsel %vm3150_vm0, %v3029_v10, 0.0  ;;  %v6414_v10 = vld [vmem:[%s12747_s1 + $0x438] sm:$0xff] }
 0x2d8   : > { %v1923_v12 = vadd.f32 %v1922_v4, %v1810_v47  ;;  %v1699_v45 = vpop.f32.mrf.mxu0  ;;  %v1812_v46 = vpop.f32.mrf.mxu1 }
 0x2d9   : > { %v1700_v19 = vadd.f32 %v1699_v45, %v7684_v21  ;;  %v8599_v51 = vpop.xlane.xlu0 %3422  ;;  %v6411_v21 = vld [vmem:[%s12747_s1 + $0x410] sm:$0xff]  ;;  %v6412_v45 = vld [vmem:[%s12747_s1 + $0x418] sm:$0xff]  ;;  %v8610_v47 = vpop.xlane.xlu2 %3437 }
 0x2da   : > { %v2036_v11 = vadd.f32 %v2035_v49, %v1923_v12  ;;  %1746 = vmatmul.f32.gmra.mxu0 %v6409_v7  ;;  %12854 = vst [vmem:[#allocation91_spill] sm:$0xff] %v8599_v51  ;;  %v3571_v49 = vsel %vm3150_vm0, %v3034_v32, 0.0  ;;  %v3541_v12 = vsel %vm3150_vm0, %v3024_v29, 0.0  ;;  %v3037_v29 = vld [vmem:[%s7346_s12 + $0x478] sm:$0xff] }
 0x2db   : > { %1859 = vmatmul.f32.gmra.mxu1 %v6410_v43  ;;  %12855 = vst [vmem:[#allocation92_spill] sm:$0xff] %v8610_v47  ;;  %v8612_v15 = vpop.xlane.xlu1 %3407  ;;  %v1813_v4 = vadd.f32 %v1812_v46, %v1700_v19  ;;  %v3032_v46 = vld [vmem:[%s7346_s12 + $0x450] sm:$0xff] }
 0x2dc   : > { %2811 = vst [vmem:[%s7551_s16 + $0x68] sm:$0xff] %v2036_v11  ;;  %1972 = vmatmul.f32.gmra.mxu2 %v6411_v21  ;;  %2085 = vmatmul.f32.gmra.mxu3 %v6412_v45  ;;  %v6413_v19 = vld [vmem:[%s12747_s1 + $0x430] sm:$0xff] }
 0x2dd   : > { %12856 = vst [vmem:[#allocation93_spill] sm:$0xff] %v8612_v15  ;;  %3557 = vadd.xlane.f32.xlu0 %v3556_v24  ;;  %v3027_v24 = vld [vmem:[%s7346_s12 + $0x428] sm:$0xff] }
 0x2de   : > { %3572 = vadd.xlane.f32.xlu2 %v3571_v49 }
 0x2df   : > { %v1925_v11 = vpop.f32.mrf.mxu2  ;;  %v2038_v7 = vpop.f32.mrf.mxu3  ;;  %3542 = vadd.xlane.f32.xlu1 %v3541_v12 }
 0x2e0   : > { %v1926_v43 = vadd.f32 %v1925_v11, %v1813_v4  ;;  %v1702_v21 = vpop.f32.mrf.mxu0  ;;  %v1815_v45 = vpop.f32.mrf.mxu1  ;;  %v6416_v4 = vld [vmem:[%s12747_s1 + $0x448] sm:$0xff] }
 0x2e1   : > { %v1703_v51 = vadd.f32 %v1702_v21, %v7711_v5  ;;  %v8625_v32 = vpop.xlane.xlu0 %3431  ;;  %v6415_v5 = vld [vmem:[%s12747_s1 + $0x440] sm:$0xff]  ;;  %v8636_v49 = vpop.xlane.xlu2 %3446  ;;  %v504_v11 = vld [vmem:[%s6702_s26 + $0xe8] sm:$0xff]  ;;  %v3580_v21 = vsel %vm3150_vm0, %v3037_v29, 0.0 }
 0x2e2   : > { %v2039_v47 = vadd.f32 %v2038_v7, %v1926_v43  ;;  %1749 = vmatmul.f32.gmra.mxu0 %v6413_v19  ;;  %12857 = vst [vmem:[#allocation94_spill] sm:$0xff] %v8625_v32  ;;  %v552_v7 = vld [vmem:[%s6702_s26 + $0x268] sm:$0xff]  ;;  %v3565_v43 = vsel %vm3150_vm0, %v3032_v46, 0.0  ;;  %v3550_v19 = vsel %vm3150_vm0, %v3027_v24, 0.0 }
 0x2e3   : > { %1862 = vmatmul.f32.gmra.mxu1 %v6414_v10  ;;  %v8638_v12 = vpop.xlane.xlu1 %3416  ;;  %2125 = vmatpush.msrb.mxu0 %v504_v11  ;;  %v3055_v24 = vld [vmem:[%s7346_s12 + $0x508] sm:$0xff] }
 0x2e4   : > { %2814 = vst [vmem:[%s7551_s16 + $0x80] sm:$0xff] %v2039_v47  ;;  %1975 = vmatmul.f32.gmra.mxu2 %v6415_v5  ;;  %2088 = vmatmul.f32.gmra.mxu3 %v6416_v4  ;;  %v1816_v47 = vadd.f32 %v1815_v45, %v1703_v51  ;;  %v6417_v51 = vld [vmem:[%s12747_s1 + $0x460] sm:$0xff]  ;;  %v6418_v45 = vld [vmem:[%s12747_s1 + $0x468] sm:$0xff] }
 0x2e5   : > { %12858 = vst [vmem:[#allocation95_spill] sm:$0xff] %v8638_v12  ;;  %2238 = vmatpush.msrb.mxu1 %v552_v7  ;;  %3566 = vadd.xlane.f32.xlu0 %v3565_v43  ;;  %v3035_v7 = vld [vmem:[%s7346_s12 + $0x468] sm:$0xff]  ;;  %v3030_v43 = vld [vmem:[%s7346_s12 + $0x440] sm:$0xff] }
 0x2e6   : > { %3581 = vadd.xlane.f32.xlu2 %v3580_v21 }
 0x2e7   : > { %v1928_v10 = vpop.f32.mrf.mxu2  ;;  %v2041_v5 = vpop.f32.mrf.mxu3  ;;  %3551 = vadd.xlane.f32.xlu1 %v3550_v19  ;;  %v3574_v19 = vsel %vm3150_vm0, %v3035_v7, 0.0  ;;  %v6422_v7 = vld [vmem:[%s12747_s1 + $0x498] sm:$0xff] }
 0x2e8   : > { %v1929_v4 = vadd.f32 %v1928_v10, %v1816_v47  ;;  %v1705_v32 = vpop.f32.mrf.mxu0  ;;  %v1818_v12 = vpop.f32.mrf.mxu1 }
 0x2e9   : > { %v1706_v11 = vadd.f32 %v1705_v32, %v7738_v16  ;;  %v8653_v29 = vpop.xlane.xlu0 %3440  ;;  %v6419_v16 = vld [vmem:[%s12747_s1 + $0x470] sm:$0xff]  ;;  %v6420_v32 = vld [vmem:[%s12747_s1 + $0x478] sm:$0xff]  ;;  %v8664_v47 = vpop.xlane.xlu2 %3455 }
 0x2ea   : > { %v2042_v46 = vadd.f32 %v2041_v5, %v1929_v4  ;;  %1752 = vmatmul.f32.gmra.mxu0 %v6417_v51  ;;  %v3634_v5 = vsel %vm3150_vm0, %v3055_v24, 0.0  ;;  %v3559_v4 = vsel %vm3150_vm0, %v3030_v43, 0.0  ;;  %v3070_v43 = vld [vmem:[%s7346_s12 + $0x580] sm:$0xff] }
 0x2eb   : > { %1865 = vmatmul.f32.gmra.mxu1 %v6418_v45  ;;  %v8666_v21 = vpop.xlane.xlu1 %3425  ;;  %v1819_v10 = vadd.f32 %v1818_v12, %v1706_v11  ;;  %v3038_v12 = vld [vmem:[%s7346_s12 + $0x480] sm:$0xff]  ;;  %v6421_v11 = vld [vmem:[%s12747_s1 + $0x490] sm:$0xff] }
 0x2ec   : > { %2817 = vst [vmem:[%s7551_s16 + $0x98] sm:$0xff] %v2042_v46  ;;  %1978 = vmatmul.f32.gmra.mxu2 %v6419_v16  ;;  %2091 = vmatmul.f32.gmra.mxu3 %v6420_v32 }
 0x2ed   : > { %12859 = vst [vmem:[#allocation96_spill] sm:$0xff] %v8666_v21  ;;  %3575 = vadd.xlane.f32.xlu0 %v3574_v19  ;;  %v3033_v19 = vld [vmem:[%s7346_s12 + $0x458] sm:$0xff] }
 0x2ee   : > { %3635 = vadd.xlane.f32.xlu2 %v3634_v5 }
 0x2ef   : > { %v1931_v46 = vpop.f32.mrf.mxu2  ;;  %v2044_v51 = vpop.f32.mrf.mxu3  ;;  %3560 = vadd.xlane.f32.xlu1 %v3559_v4 }
 0x2f0   : > { %v1932_v45 = vadd.f32 %v1931_v46, %v1819_v10  ;;  %v1708_v16 = vpop.f32.mrf.mxu0  ;;  %v1821_v32 = vpop.f32.mrf.mxu1  ;;  %v6424_v10 = vld [vmem:[%s12747_s1 + $0x4a8] sm:$0xff]  ;;  %v501_v46 = vld [vmem:[%s6702_s26 + $0xd0] sm:$0xff] }
 0x2f1   : > { %v1709_v21 = vadd.f32 %v1708_v16, %v7773_v25  ;;  %v8679_v24 = vpop.xlane.xlu0 %3449  ;;  %v6423_v25 = vld [vmem:[%s12747_s1 + $0x4a0] sm:$0xff]  ;;  %v8690_v5 = vpop.xlane.xlu2 %3464  ;;  %2126 = vmatpush.msrb.mxu0 %v501_v46  ;;  %v666_v16 = vld [vmem:[%s6702_s26 + $0x5f8] sm:$0xff] }
 0x2f2   : > { %v2045_v15 = vadd.f32 %v2044_v51, %v1932_v45  ;;  %1755 = vmatmul.f32.gmra.mxu0 %v6421_v11  ;;  %v549_v51 = vld [vmem:[%s6702_s26 + $0x250] sm:$0xff]  ;;  %v618_v45 = vld [vmem:[%s6702_s26 + $0x478] sm:$0xff]  ;;  %2458 = vmatpush.msrb.mxu3 %v666_v16 }
 0x2f3   : > { %1868 = vmatmul.f32.gmra.mxu1 %v6422_v7  ;;  %v8692_v4 = vpop.xlane.xlu1 %3434  ;;  %v1822_v11 = vadd.f32 %v1821_v32, %v1709_v21  ;;  %v3679_v7 = vsel %vm3150_vm0, %v3070_v43, 0.0  ;;  %2345 = vmatpush.msrb.mxu2 %v618_v45  ;;  %v612_v21 = vld [vmem:[%s6702_s26 + $0x448] sm:$0xff]  ;;  %v609_v45 = vld [vmem:[%s6702_s26 + $0x430] sm:$0xff]  ;;  %v6428_v16 = vld [vmem:[%s12747_s1 + $0x4d8] sm:$0xff] }
 0x2f4   : > { %2820 = vst [vmem:[%s7551_s16 + $0xb0] sm:$0xff] %v2045_v15  ;;  %1981 = vmatmul.f32.gmra.mxu2 %v6423_v25  ;;  %2094 = vmatmul.f32.gmra.mxu3 %v6424_v10  ;;  %v3583_v15 = vsel %vm3150_vm0, %v3038_v12, 0.0  ;;  %v3568_v25 = vsel %vm3150_vm0, %v3033_v19, 0.0  ;;  %v615_v10 = vld [vmem:[%s6702_s26 + $0x460] sm:$0xff]  ;;  %v3056_v19 = vld [vmem:[%s7346_s12 + $0x510] sm:$0xff] }
 0x2f5   : > { %12860 = vst [vmem:[#allocation97_spill] sm:$0xff] %v8692_v4  ;;  %2239 = vmatpush.msrb.mxu1 %v549_v51  ;;  %3584 = vadd.xlane.f32.xlu0 %v3583_v15  ;;  %v660_v51 = vld [vmem:[%s6702_s26 + $0x5c8] sm:$0xff] }
 0x2f6   : > { %2346 = vmatpush.msrb.mxu2 %v615_v10  ;;  %3680 = vadd.xlane.f32.xlu2 %v3679_v7  ;;  %v6426_v15 = vld [vmem:[%s12747_s1 + $0x4c8] sm:$0xff]  ;;  %v606_v10 = vld [vmem:[%s6702_s26 + $0x418] sm:$0xff] }
 0x2f7   : > { %v1934_v4 = vpop.f32.mrf.mxu2  ;;  %v2047_v9 = vpop.f32.mrf.mxu3  ;;  %3569 = vadd.xlane.f32.xlu1 %v3568_v25  ;;  %2459 = vmatpush.msrb.mxu3 %v663_v39  ;;  %v6427_v39 = vld [vmem:[%s12747_s1 + $0x4d0] sm:$0xff] }
 0x2f8   : > { %v1935_v0 = vadd.f32 %v1934_v4, %v1822_v11  ;;  %v1711_v12 = vpop.f32.mrf.mxu0  ;;  %v1824_v46 = vpop.f32.mrf.mxu1  ;;  %2347 = vmatpush.msrb.mxu2 %v612_v21  ;;  %v6425_v4 = vld [vmem:[%s12747_s1 + $0x4c0] sm:$0xff]  ;;  %v657_v25 = vld [vmem:[%s6702_s26 + $0x5b0] sm:$0xff] }
 0x2f9   : > { %v1712_v43 = vadd.f32 %v1711_v12, %v7806_v30  ;;  %v3072_v30 = vld [vmem:[%s7346_s12 + $0x590] sm:$0xff]  ;;  %v8725_v11 = vpop.xlane.xlu2 %3473  ;;  %v3637_v12 = vsel %vm3150_vm0, %v3056_v19, 0.0  ;;  %2460 = vmatpush.msrb.mxu3 %v660_v51  ;;  %v3071_v19 = vld [vmem:[%s7346_s12 + $0x588] sm:$0xff]  ;;  %v651_v51 = vld [vmem:[%s6702_s26 + $0x580] sm:$0xff] }
 0x2fa   : > { %v2048_v32 = vadd.f32 %v2047_v9, %v1935_v0  ;;  %1758 = vmatmul.f32.gmra.mxu0 %v6425_v4  ;;  %v8714_v9 = vpop.xlane.xlu0 %3458  ;;  %v3036_v0 = vld [vmem:[%s7346_s12 + $0x470] sm:$0xff]  ;;  %2348 = vmatpush.msrb.mxu2 %v609_v45  ;;  %v600_v45 = vld [vmem:[%s6702_s26 + $0x3e8] sm:$0xff] }
 0x2fb   : > { %1871 = vmatmul.f32.gmra.mxu1 %v6426_v15  ;;  %v8727_v7 = vpop.xlane.xlu1 %3443  ;;  %v1825_v21 = vadd.f32 %v1824_v46, %v1712_v43  ;;  %v3577_v4 = vsel %vm3150_vm0, %v3036_v0, 0.0  ;;  %2461 = vmatpush.msrb.mxu3 %v657_v25  ;;  %v6430_v0 = vld [vmem:[%s12747_s1 + $0x4f8] sm:$0xff]  ;;  %v6431_v25 = vld [vmem:[%s12747_s1 + $0x500] sm:$0xff] }
 0x2fc   : > { %2823 = vst [vmem:[%s7551_s16 + $0xc8] sm:$0xff] %v2048_v32  ;;  %1984 = vmatmul.f32.gmra.mxu2 %v6427_v39  ;;  %2097 = vmatmul.f32.gmra.mxu3 %v6428_v16  ;;  %v3685_v32 = vsel %vm3150_vm0, %v3072_v30, 0.0  ;;  %v654_v16 = vld [vmem:[%s6702_s26 + $0x598] sm:$0xff]  ;;  %v6429_v30 = vld [vmem:[%s12747_s1 + $0x4f0] sm:$0xff] }
 0x2fd   : > { %2349 = vmatpush.msrb.mxu2 %v606_v10  ;;  %3638 = vadd.xlane.f32.xlu0 %v3637_v12  ;;  %v6432_v10 = vld [vmem:[%s12747_s1 + $0x508] sm:$0xff] }
 0x2fe   : > { %3686 = vadd.xlane.f32.xlu2 %v3685_v32  ;;  %2462 = vmatpush.msrb.mxu3 %v654_v16  ;;  %v498_v32 = vld [vmem:[%s6702_s26 + $0xb8] sm:$0xff] }
 0x2ff   : > { %v1937_v15 = vpop.f32.mrf.mxu2  ;;  %v2050_v39 = vpop.f32.mrf.mxu3  ;;  %3578 = vadd.xlane.f32.xlu1 %v3577_v4  ;;  %2350 = vmatpush.msrb.mxu2 %v603_v57  ;;  %v648_v57 = vld [vmem:[%s6702_s26 + $0x568] sm:$0xff]  ;;  %v597_v4 = vld [vmem:[%s6702_s26 + $0x3d0] sm:$0xff] }
 0x300   : > { %v1938_v20 = vadd.f32 %v1937_v15, %v1825_v21  ;;  %v1714_v50 = vpop.f32.mrf.mxu0  ;;  %v1827_v59 = vpop.f32.mrf.mxu1  ;;  %v546_v15 = vld [vmem:[%s6702_s26 + $0x238] sm:$0xff]  ;;  %2463 = vmatpush.msrb.mxu3 %v651_v51  ;;  %2127 = vmatpush.msrb.mxu0 %v498_v32  ;;  %v543_v32 = vld [vmem:[%s6702_s26 + $0x220] sm:$0xff] }
 0x301   : > { %v1715_v43 = vadd.f32 %v1714_v50, %v7844_v41  ;;  %v3073_v50 = vld [vmem:[%s7346_s12 + $0x598] sm:$0xff]  ;;  %v3054_v41 = vld [vmem:[%s7346_s12 + $0x500] sm:$0xff]  ;;  %v8758_v12 = vpop.xlane.xlu2 %3482  ;;  %2351 = vmatpush.msrb.mxu2 %v600_v45  ;;  %2240 = vmatpush.msrb.mxu1 %v546_v15 }
 0x302   : > { %v2051_v46 = vadd.f32 %v2050_v39, %v1938_v20  ;;  %1761 = vmatmul.f32.gmra.mxu0 %v6429_v30  ;;  %v8746_v20 = vpop.xlane.xlu0 %3467  ;;  %12861 = vst [vmem:[#allocation98_spill] sm:$0xff] %v8758_v12  ;;  %v3682_v39 = vsel %vm3150_vm0, %v3071_v19, 0.0  ;;  %v3631_v30 = vsel %vm3150_vm0, %v3054_v41, 0.0  ;;  %2464 = vmatpush.msrb.mxu3 %v648_v57  ;;  %v594_v19 = vld [vmem:[%s6702_s26 + $0x3b8] sm:$0xff]  ;;  %v3039_v57 = vld [vmem:[%s7346_s12 + $0x488] sm:$0xff]  ;;  %v6433_v15 = vld [vmem:[%s12747_s1 + $0x520] sm:$0xff] }
 0x303   : > { %1874 = vmatmul.f32.gmra.mxu1 %v6430_v0  ;;  %v8760_v21 = vpop.xlane.xlu1 %3452  ;;  %v1828_v16 = vadd.f32 %v1827_v59, %v1715_v43  ;;  %v495_v0 = vld [vmem:[%s6702_s26 + $0xa0] sm:$0xff]  ;;  %2352 = vmatpush.msrb.mxu2 %v597_v4  ;;  %v642_v43 = vld [vmem:[%s6702_s26 + $0x538] sm:$0xff] }
 0x304   : > { %2826 = vst [vmem:[%s7551_s16 + $0xe0] sm:$0xff] %v2051_v46  ;;  %1987 = vmatmul.f32.gmra.mxu2 %v6431_v25  ;;  %2100 = vmatmul.f32.gmra.mxu3 %v6432_v10  ;;  %v3688_v46 = vsel %vm3150_vm0, %v3073_v50, 0.0  ;;  %v591_v4 = vld [vmem:[%s6702_s26 + $0x3a0] sm:$0xff] }
 0x305   : > { %3683 = vadd.xlane.f32.xlu0 %v3682_v39  ;;  %2128 = vmatpush.msrb.mxu0 %v495_v0  ;;  %v6434_v39 = vld [vmem:[%s12747_s1 + $0x528] sm:$0xff]  ;;  %v6436_v0 = vld [vmem:[%s12747_s1 + $0x538] sm:$0xff] }
 0x306   : > { %3689 = vadd.xlane.f32.xlu2 %v3688_v46  ;;  %2465 = vmatpush.msrb.mxu3 %v645_v52  ;;  %v3074_v52 = vld [vmem:[%s7346_s12 + $0x5a0] sm:$0xff]  ;;  %v492_v46 = vld [vmem:[%s6702_s26 + $0x88] sm:$0xff] }
 0x307   : > { %v1940_v25 = vpop.f32.mrf.mxu2  ;;  %v2053_v10 = vpop.f32.mrf.mxu3  ;;  %3632 = vadd.xlane.f32.xlu1 %v3631_v30  ;;  %2353 = vmatpush.msrb.mxu2 %v594_v19  ;;  %v6435_v30 = vld [vmem:[%s12747_s1 + $0x530] sm:$0xff]  ;;  %v639_v19 = vld [vmem:[%s6702_s26 + $0x520] sm:$0xff] }
 0x308   : > { %v1941_v51 = vadd.f32 %v1940_v25, %v1828_v16  ;;  %v1717_v45 = vpop.f32.mrf.mxu0  ;;  %v1830_v59 = vpop.f32.mrf.mxu1  ;;  %2466 = vmatpush.msrb.mxu3 %v642_v43  ;;  %2241 = vmatpush.msrb.mxu1 %v543_v32  ;;  %v489_v43 = vld [vmem:[%s6702_s26 + $0x70] sm:$0xff] }
 0x309   : > { %v1718_v41 = vadd.f32 %v1717_v45, %v7879_v37  ;;  %v3057_v37 = vld [vmem:[%s7346_s12 + $0x518] sm:$0xff]  ;;  %v8794_v25 = vpop.xlane.xlu2 %3491  ;;  %v3586_v45 = vsel %vm3150_vm0, %v3039_v57, 0.0  ;;  %2354 = vmatpush.msrb.mxu2 %v591_v4  ;;  %2129 = vmatpush.msrb.mxu0 %v492_v46  ;;  %v537_v4 = vld [vmem:[%s6702_s26 + $0x1f0] sm:$0xff] }
 0x30a   : > { %v2054_v50 = vadd.f32 %v2053_v10, %v1941_v51  ;;  %1764 = vmatmul.f32.gmra.mxu0 %v6433_v15  ;;  %v8782_v16 = vpop.xlane.xlu0 %3476  ;;  %v540_v51 = vld [vmem:[%s6702_s26 + $0x208] sm:$0xff]  ;;  %2467 = vmatpush.msrb.mxu3 %v639_v19  ;;  %v6437_v46 = vld [vmem:[%s12747_s1 + $0x550] sm:$0xff]  ;;  %v6438_v19 = vld [vmem:[%s12747_s1 + $0x558] sm:$0xff] }
 0x30b   : > { %1877 = vmatmul.f32.gmra.mxu1 %v6434_v39  ;;  %v8796_v10 = vpop.xlane.xlu1 %3461  ;;  %v1831_v15 = vadd.f32 %v1830_v59, %v1718_v41  ;;  %v3691_v39 = vsel %vm3150_vm0, %v3074_v52, 0.0  ;;  %2130 = vmatpush.msrb.mxu0 %v489_v43  ;;  %v585_v52 = vld [vmem:[%s6702_s26 + $0x370] sm:$0xff] }
 0x30c   : > { %2829 = vst [vmem:[%s7551_s16 + $0xf8] sm:$0xff] %v2054_v50  ;;  %1990 = vmatmul.f32.gmra.mxu2 %v6435_v30  ;;  %2103 = vmatmul.f32.gmra.mxu3 %v6436_v0  ;;  %v588_v50 = vld [vmem:[%s6702_s26 + $0x388] sm:$0xff]  ;;  %v3640_v30 = vsel %vm3150_vm0, %v3057_v37, 0.0  ;;  %v3040_v37 = vld [vmem:[%s7346_s12 + $0x490] sm:$0xff] }
 0x30d   : > { %2242 = vmatpush.msrb.mxu1 %v540_v51  ;;  %3587 = vadd.xlane.f32.xlu0 %v3586_v45  ;;  %v6440_v51 = vld [vmem:[%s12747_s1 + $0x568] sm:$0xff] }
 0x30e   : > { %2355 = vmatpush.msrb.mxu2 %v588_v50  ;;  %3692 = vadd.xlane.f32.xlu2 %v3691_v39  ;;  %v582_v39 = vld [vmem:[%s6702_s26 + $0x358] sm:$0xff] }
 0x30f   : > { %v1943_v0 = vpop.f32.mrf.mxu2  ;;  %v2056_v3 = vpop.f32.mrf.mxu3  ;;  %3641 = vadd.xlane.f32.xlu1 %v3640_v30  ;;  %2468 = vmatpush.msrb.mxu3 %v636_v38  ;;  %v6439_v38 = vld [vmem:[%s12747_s1 + $0x560] sm:$0xff]  ;;  %v630_v30 = vld [vmem:[%s6702_s26 + $0x4d8] sm:$0xff] }
 0x310   : > { %v1944_v63 = vadd.f32 %v1943_v0, %v1831_v15  ;;  %v1720_v57 = vpop.f32.mrf.mxu0  ;;  %v1833_v32 = vpop.f32.mrf.mxu1  ;;  %v534_v15 = vld [vmem:[%s6702_s26 + $0x1d8] sm:$0xff]  ;;  %2243 = vmatpush.msrb.mxu1 %v537_v4  ;;  %2356 = vmatpush.msrb.mxu2 %v585_v52  ;;  %v3589_v0 = vsel %vm3150_vm0, %v3040_v37, 0.0  ;;  %v3694_v52 = vsel %vm3150_vm0, %v3075_v48, 0.0  ;;  %v3643_v37 = vsel %vm3150_vm0, %v3058_v6, 0.0  ;;  %v6443_v6 = vld [vmem:[%s12747_s1 + $0x590] sm:$0xff] }
 0x311   : > { %v1721_v41 = vadd.f32 %v1720_v57, %v7916_v35  ;;  %v486_v35 = vld [vmem:[%s6702_s26 + $0x58] sm:$0xff]  ;;  %v8827_v45 = vpop.xlane.xlu2 %3500  ;;  %v483_v57 = vld [vmem:[%s6702_s26 + $0x40] sm:$0xff] }
 0x312   : > { %v2057_v59 = vadd.f32 %v2056_v3, %v1944_v63  ;;  %1767 = vmatmul.f32.gmra.mxu0 %v6437_v46  ;;  %v8816_v63 = vpop.xlane.xlu0 %3485  ;;  %v633_v3 = vld [vmem:[%s6702_s26 + $0x4f0] sm:$0xff]  ;;  %v579_v46 = vld [vmem:[%s6702_s26 + $0x340] sm:$0xff]  ;;  %2244 = vmatpush.msrb.mxu1 %v534_v15  ;;  %v528_v15 = vld [vmem:[%s6702_s26 + $0x1a8] sm:$0xff] }
 0x313   : > { %1880 = vmatmul.f32.gmra.mxu1 %v6438_v19  ;;  %12862 = vst [vmem:[#allocation99_spill] sm:$0xff] %v8816_v63  ;;  %v8829_v50 = vpop.xlane.xlu1 %3470  ;;  %v1834_v43 = vadd.f32 %v1833_v32, %v1721_v41  ;;  %2469 = vmatpush.msrb.mxu3 %v633_v3  ;;  %v12753_v3 = vlaneseq }
 0x314   : > { %2832 = vst [vmem:[%s7551_s16 + $0x110] sm:$0xff] %v2057_v59  ;;  %1993 = vmatmul.f32.gmra.mxu2 %v6439_v38  ;;  %2106 = vmatmul.f32.gmra.mxu3 %v6440_v51  ;;  %v531_v59 = vld [vmem:[%s6702_s26 + $0x1c0] sm:$0xff] }
 0x315   : > { %2131 = vmatpush.msrb.mxu0 %v486_v35  ;;  %2357 = vmatpush.msrb.mxu2 %v582_v39  ;;  %v627_v51 = vld [vmem:[%s6702_s26 + $0x4c0] sm:$0xff]  ;;  %v6444_v39 = vld [vmem:[%s12747_s1 + $0x598] sm:$0xff] }
 0x316   : > { %2470 = vmatpush.msrb.mxu3 %v630_v30  ;;  %3590 = vadd.xlane.f32.xlu0 %v3589_v0  ;;  %v6441_v35 = vld [vmem:[%s12747_s1 + $0x580] sm:$0xff]  ;;  %v576_v30 = vld [vmem:[%s6702_s26 + $0x328] sm:$0xff] }
 0x317   : > { %v1946_v19 = vpop.f32.mrf.mxu2  ;;  %v2059_v38 = vpop.f32.mrf.mxu3  ;;  %2132 = vmatpush.msrb.mxu0 %v483_v57  ;;  %2245 = vmatpush.msrb.mxu1 %v531_v59  ;;  %v624_v0 = vld [vmem:[%s6702_s26 + $0x4a8] sm:$0xff]  ;;  %v3041_v59 = vld [vmem:[%s7346_s12 + $0x498] sm:$0xff] }
 0x318   : > { %v1947_v61 = vadd.f32 %v1946_v19, %v1834_v43  ;;  %v1723_v4 = vpop.f32.mrf.mxu0  ;;  %v1836_v44 = vpop.f32.mrf.mxu1  ;;  %2358 = vmatpush.msrb.mxu2 %v579_v46  ;;  %2471 = vmatpush.msrb.mxu3 %v627_v51  ;;  %v477_v46 = vld [vmem:[%s6702_s26 + $0x10] sm:$0xff] }
 0x319   : > { %v1724_v41 = vadd.f32 %v1723_v4, %v7950_v42  ;;  %v480_v42 = vld [vmem:[%s6702_s26 + $0x28] sm:$0xff]  ;;  %v8861_v43 = vpop.xlane.xlu2 %3509  ;;  %3695 = vadd.xlane.f32.xlu2 %v3694_v52  ;;  %3644 = vadd.xlane.f32.xlu1 %v3643_v37  ;;  %v525_v19 = vld [vmem:[%s6702_s26 + $0x190] sm:$0xff] }
 0x31a   : > { %v2060_v32 = vadd.f32 %v2059_v38, %v1947_v61  ;;  %1770 = vmatmul.f32.gmra.mxu0 %v6441_v35  ;;  %v6442_v61 = vld [vmem:[%s12747_s1 + $0x588] sm:$0xff]  ;;  %v3495_v48 = vpop.xlane.xlu0 %3494  ;;  %2246 = vmatpush.msrb.mxu1 %v528_v15  ;;  %v573_v51 = vld [vmem:[%s6702_s26 + $0x310] sm:$0xff]  ;;  %v8872_v35 = vand.u32 127, %v12753_v3 }
 0x31b   : > { %1883 = vmatmul.f32.gmra.mxu1 %v6442_v61  ;;  %v8863_v57 = vpop.xlane.xlu1 %3479  ;;  %v1837_v38 = vadd.f32 %v1836_v44, %v1724_v41  ;;  %2133 = vmatpush.msrb.mxu0 %v480_v42  ;;  %v621_v4 = vld [vmem:[%s6702_s26 + $0x490] sm:$0xff]  ;;  %v3059_v52 = vld [vmem:[%s7346_s12 + $0x528] sm:$0xff]  ;;  %v4032_v44 = vmul.f32 0.015625, %v8794_v25 }
 0x31c   : > { %2835 = vst [vmem:[%s7551_s16 + $0x128] sm:$0xff] %v2060_v32  ;;  %1996 = vmatmul.f32.gmra.mxu2 %v6443_v6  ;;  %2109 = vmatmul.f32.gmra.mxu3 %v6444_v39  ;;  %v3076_v32 = vld [vmem:[%s7346_s12 + $0x5b0] sm:$0xff]  ;;  %v3592_v39 = vsel %vm3150_vm0, %v3041_v59, 0.0  ;;  %v8881_v59 = vadd.s32 4294967288, %v8872_v35 }
 0x31d   : > { %12863 = vst [vmem:[#allocation100_spill] sm:$0xff] %v8863_v57  ;;  %2359 = vmatpush.msrb.mxu2 %v576_v30  ;;  %2472 = vmatpush.msrb.mxu3 %v624_v0  ;;  %v3697_v41 = vsel %vm3150_vm0, %v3076_v32, 0.0  ;;  %v4033_v30 = vmul.f32 0.015625, %v3495_v48  ;;  %v3646_v0 = vsel %vm3150_vm0, %v3059_v52, 0.0  ;;  %v6445_v25 = vld [vmem:[%s12747_s1 + $0x5b0] sm:$0xff]  ;;  %v6447_v48 = vld [vmem:[%s12747_s1 + $0x5c0] sm:$0xff] }
 0x31e   : > { %2134 = vmatpush.msrb.mxu0 %v477_v46  ;;  %2247 = vmatpush.msrb.mxu1 %v525_v19  ;;  %v6446_v46 = vld [vmem:[%s12747_s1 + $0x5b8] sm:$0xff]  ;;  %v6448_v19 = vld [vmem:[%s12747_s1 + $0x5c8] sm:$0xff]  ;;  %v5194_v32 = vperm.slane %v4032_v44, %v8881_v59  ;;  %v4035_v44 = vmul.f32 0.015625, %v8827_v45 }
 0x31f   : > { %v1949_v61 = vpop.f32.mrf.mxu2  ;;  %v2062_v6 = vpop.f32.mrf.mxu3  ;;  %2360 = vmatpush.msrb.mxu2 %v573_v51  ;;  %2473 = vmatpush.msrb.mxu3 %v621_v4  ;;  %v3042_v4 = vld [vmem:[%s7346_s12 + $0x4a0] sm:$0xff]  ;;  %v3077_v52 = vld [vmem:[%s7346_s12 + $0x5b8] sm:$0xff]  ;;  %v6450_v45 = vld [vmem:[%s12747_s1 + $0x5e8] sm:$0xff] }
 0x320   : > { %v1950_v33 = vadd.f32 %v1949_v61, %v1837_v38  ;;  %v1726_v37 = vpop.f32.mrf.mxu0  ;;  %v1839_v60 = vpop.f32.mrf.mxu1  ;;  %3593 = vadd.xlane.f32.xlu0 %v3592_v39 }
 0x321   : > { %v1727_v15 = vadd.f32 %v1726_v37, %v7978_v17  ;;  %v8890_v17 = vadd.s32 4294967280, %v8872_v35  ;;  %v8899_v38 = vpop.xlane.xlu2 %3518  ;;  %3698 = vadd.xlane.f32.xlu2 %v3697_v41  ;;  %3647 = vadd.xlane.f32.xlu1 %v3646_v0  ;;  %v3700_v41 = vsel %vm3150_vm0, %v3077_v52, 0.0  ;;  %v3043_v52 = vld [vmem:[%s7346_s12 + $0x4a8] sm:$0xff] }
 0x322   : > { %v2063_v42 = vadd.f32 %v2062_v6, %v1950_v33  ;;  %1773 = vmatmul.f32.gmra.mxu0 %v6445_v25  ;;  %v3504_v33 = vpop.xlane.xlu0 %3503 }
 0x323   : > { %1886 = vmatmul.f32.gmra.mxu1 %v6446_v46  ;;  %v3489_v51 = vpop.xlane.xlu1 %3488  ;;  %v1840_v6 = vadd.f32 %v1839_v60, %v1727_v15  ;;  %v5196_v39 = vperm.slane %v4033_v30, %v8890_v17  ;;  %v3595_v46 = vsel %vm3150_vm0, %v3042_v4, 0.0  ;;  %v6449_v4 = vld [vmem:[%s12747_s1 + $0x5e0] sm:$0xff] }
 0x324   : > { %2838 = vst [vmem:[%s7551_s16 + $0x140] sm:$0xff] %v2063_v42  ;;  %1999 = vmatmul.f32.gmra.mxu2 %v6447_v48  ;;  %2112 = vmatmul.f32.gmra.mxu3 %v6448_v19  ;;  %v4031_v61 = vmul.f32 0.015625, %v3489_v51  ;;  %v3060_v48 = vld [vmem:[%s7346_s12 + $0x530] sm:$0xff] }
 0x325   : > { %v3649_v0 = vsel %vm3150_vm0, %v3060_v48, 0.0 }
 0x326   : > { %v5193_v25 = vperm.slane %v4031_v61, %v8872_v35 }
 0x327   : > { %v1952_v37 = vpop.f32.mrf.mxu2  ;;  %v2065_v42 = vpop.f32.mrf.mxu3 }
 0x328   : > { %v1953_v19 = vadd.f32 %v1952_v37, %v1840_v6  ;;  %v1729_v3 = vpop.f32.mrf.mxu0  ;;  %v1842_v34 = vpop.f32.mrf.mxu1  ;;  %v5195_v60 = vsel %vm4949_vm1, %v5194_v32, %v5193_v25  ;;  %3596 = vadd.xlane.f32.xlu0 %v3595_v46  ;;  %v4036_v32 = vmul.f32 0.015625, %v3504_v33  ;;  %v6452_v6 = vld [vmem:[%s12747_s1 + $0x5f8] sm:$0xff]  ;;  %v8934_v37 = vadd.s32 4294967256, %v8872_v35 }
 0x329   : > { %v1730_v30 = vadd.f32 %v1729_v3, %v8006_v54  ;;  %v5197_v51 = vsel %vm4953_vm2, %v5196_v39, %v5195_v60  ;;  %v8921_v54 = vadd.s32 4294967264, %v8872_v35  ;;  %v6451_v3 = vld [vmem:[%s12747_s1 + $0x5f0] sm:$0xff]  ;;  %v8930_v39 = vpop.xlane.xlu2 %3527  ;;  %3701 = vadd.xlane.f32.xlu2 %v3700_v41  ;;  %3650 = vadd.xlane.f32.xlu1 %v3649_v0 }
 0x32a   : > { %v2066_v15 = vadd.f32 %v2065_v42, %v1953_v19  ;;  %1776 = vmatmul.f32.gmra.mxu0 %v6449_v4  ;;  %v3513_v61 = vpop.xlane.xlu0 %3512  ;;  %v8937_v42 = vadd.s32 4294967272, %v8872_v35  ;;  %v3044_v19 = vld [vmem:[%s7346_s12 + $0x4b0] sm:$0xff]  ;;  %v5202_v4 = vperm.slane %v4036_v32, %v8934_v37 }
 0x32b   : > { %1889 = vmatmul.f32.gmra.mxu1 %v6450_v45  ;;  %v3498_v33 = vpop.xlane.xlu1 %3497  ;;  %v1843_v46 = vadd.f32 %v1842_v34, %v1730_v30  ;;  %v5200_v48 = vperm.slane %v4035_v44, %v8921_v54  ;;  %v4038_v34 = vmul.f32 0.015625, %v8861_v43  ;;  %v3601_v30 = vsel %vm3150_vm0, %v3044_v19, 0.0  ;;  %v6454_v43 = vld [vmem:[%s12747_s1 + $0x8] sm:$0xff] }
 0x32c   : > { %2841 = vst [vmem:[%s7551_s16 + $0x158] sm:$0xff] %v2066_v15  ;;  %2002 = vmatmul.f32.gmra.mxu2 %v6451_v3  ;;  %2115 = vmatmul.f32.gmra.mxu3 %v6452_v6  ;;  %v4034_v25 = vmul.f32 0.015625, %v3498_v33  ;;  %v3598_v3 = vsel %vm3150_vm0, %v3043_v52, 0.0  ;;  %v3061_v6 = vld [vmem:[%s7346_s12 + $0x538] sm:$0xff] }
 0x32d   : > { %v3652_v52 = vsel %vm3150_vm0, %v3061_v6, 0.0 }
 0x32e   : > { %v5198_v45 = vperm.slane %v4034_v25, %v8937_v42  ;;  %v6453_v25 = vld [vmem:[%s12747_s1] sm:$0xff] }
 0x32f   : > { %v1955_v60 = vpop.f32.mrf.mxu2  ;;  %v2068_v15 = vpop.f32.mrf.mxu3 }
 0x330   : > { %v1956_v56 = vadd.f32 %v1955_v60, %v1843_v46  ;;  %v1732_v27 = vpop.f32.mrf.mxu0  ;;  %v1845_v41 = vpop.f32.mrf.mxu1  ;;  %v5199_v44 = vsel %vm4957_vm3, %v5198_v45, %v5197_v51  ;;  %3599 = vadd.xlane.f32.xlu0 %v3598_v3  ;;  %v4039_v51 = vmul.f32 0.015625, %v3513_v61  ;;  %v6455_v46 = vld [vmem:[%s12747_s1 + $0x10] sm:$0xff]  ;;  %v3118_v60 = vld [vmem:[%s7346_s12 + $0x700] sm:$0xff] }
 0x331   : > { %v1733_v32 = vadd.f32 %v1732_v27, %v8034_v26  ;;  %v5201_v33 = vsel %vm4961_vm4, %v5200_v48, %v5199_v44  ;;  %v8959_v26 = vadd.s32 4294967240, %v8872_v35  ;;  %v6456_v48 = vld [vmem:[%s12747_s1 + $0x18] sm:$0xff]  ;;  %v8968_v19 = vpop.xlane.xlu2 %3536  ;;  %3602 = vadd.xlane.f32.xlu2 %v3601_v30  ;;  %3653 = vadd.xlane.f32.xlu1 %v3652_v52  ;;  %v3120_v44 = vld [vmem:[%s7346_s12 + $0x710] sm:$0xff] }
 0x332   : > { %v2069_v0 = vadd.f32 %v2068_v15, %v1956_v56  ;;  %2135 = vmatmul.f32.vlgmr.msrb.gmra.mxu0 %v6453_v25  ;;  %v3522_v56 = vpop.xlane.xlu0 %3521  ;;  %v5203_v27 = vsel %vm4965_vm5, %v5202_v4, %v5201_v33  ;;  %v8972_v15 = vadd.s32 4294967232, %v8872_v35  ;;  %v8975_v4 = vadd.s32 4294967248, %v8872_v35 }
 0x333   : > { %2248 = vmatmul.f32.vlgmr.msrb.gmra.mxu1 %v6454_v43  ;;  %v3507_v61 = vpop.xlane.xlu1 %3506  ;;  %v1846_v3 = vadd.f32 %v1845_v41, %v1733_v32  ;;  %v5206_v6 = vperm.slane %v4038_v34, %v8959_v26  ;;  %v4041_v41 = vmul.f32 0.015625, %v8899_v38  ;;  %v3829_v32 = vsel %vm3150_vm0, %v3120_v44, 0.0  ;;  %v6458_v38 = vld [vmem:[%s12747_s1 + $0x38] sm:$0xff] }
 0x334   : > { %2844 = vst [vmem:[%s7551_s16 + $0x170] sm:$0xff] %v2069_v0  ;;  %2361 = vmatmul.f32.vlgmr.msrb.gmra.mxu2 %v6455_v46  ;;  %2474 = vmatmul.f32.vlgmr.msrb.gmra.mxu3 %v6456_v48  ;;  %v4037_v45 = vmul.f32 0.015625, %v3507_v61  ;;  %v5208_v25 = vperm.slane %v4039_v51, %v8972_v15  ;;  %v3823_v46 = vsel %vm3150_vm0, %v3118_v60, 0.0  ;;  %v3062_v48 = vld [vmem:[%s7346_s12 + $0x540] sm:$0xff] }
 0x335   : > { %v3655_v60 = vsel %vm3150_vm0, %v3062_v48, 0.0 }
 0x336   : > { %v5204_v43 = vperm.slane %v4037_v45, %v8975_v4  ;;  %v6457_v45 = vld [vmem:[%s12747_s1 + $0x30] sm:$0xff] }
 0x337   : > { %v1958_v0 = vpop.f32.mrf.mxu2  ;;  %v2071_v33 = vpop.f32.mrf.mxu3 }
 0x338   : > { %v1959_v31 = vadd.f32 %v1958_v0, %v1846_v3  ;;  %v1735_v63 = vpop.f32.mrf.mxu0  ;;  %v1848_v30 = vpop.f32.mrf.mxu1  ;;  %v5205_v34 = vsel %vm4969_vm6, %v5204_v43, %v5203_v27  ;;  %3824 = vadd.xlane.f32.xlu0 %v3823_v46  ;;  %v4042_v27 = vmul.f32 0.015625, %v3522_v56  ;;  %v6459_v3 = vld [vmem:[%s12747_s1 + $0x40] sm:$0xff]  ;;  %v3064_v0 = vld [vmem:[%s7346_s12 + $0x550] sm:$0xff] }
 0x339   : > { %v1736_v51 = vadd.f32 %v1735_v63, %v8062_v28  ;;  %v5207_v61 = vsel %vm4973_vm7, %v5206_v6, %v5205_v34  ;;  %v8999_v63 = vadd.s32 4294967216, %v8872_v35  ;;  %v6460_v6 = vld [vmem:[%s12747_s1 + $0x48] sm:$0xff]  ;;  %v9008_v56 = vpop.xlane.xlu2 %3545  ;;  %3830 = vadd.xlane.f32.xlu2 %v3829_v32  ;;  %3656 = vadd.xlane.f32.xlu1 %v3655_v60  ;;  %v4047_v60 = vmul.f32 0.015625, %v8968_v19  ;;  %v6461_v19 = vld [vmem:[%s12747_s1 + $0x60] sm:$0xff] }
 0x33a   : > { %v2072_v52 = vadd.f32 %v2071_v33, %v1959_v31  ;;  %2138 = vmatmul.f32.gmra.mxu0 %v6457_v45  ;;  %v8995_v31 = vpop.xlane.xlu0 %3530  ;;  %v5209_v28 = vsel %vm4977_vm8, %v5208_v25, %v5207_v61  ;;  %v9012_v33 = vadd.s32 4294967208, %v8872_v35  ;;  %v9015_v25 = vadd.s32 4294967224, %v8872_v35  ;;  %v3079_v34 = vld [vmem:[%s7346_s12 + $0x5c8] sm:$0xff] }
 0x33b   : > { %2251 = vmatmul.f32.gmra.mxu1 %v6458_v38  ;;  %12864 = vst [vmem:[#allocation101_spill] sm:$0xff] %v8995_v31  ;;  %v3516_v44 = vpop.xlane.xlu1 %3515  ;;  %v1849_v46 = vadd.f32 %v1848_v30, %v1736_v51  ;;  %v5212_v48 = vperm.slane %v4041_v41, %v8999_v63  ;;  %v4044_v30 = vmul.f32 0.015625, %v8930_v39  ;;  %v3706_v51 = vsel %vm3150_vm0, %v3079_v34, 0.0  ;;  %v6462_v39 = vld [vmem:[%s12747_s1 + $0x68] sm:$0xff] }
 0x33c   : > { %2847 = vst [vmem:[%s7551_s16 + $0x188] sm:$0xff] %v2072_v52  ;;  %2364 = vmatmul.f32.gmra.mxu2 %v6459_v3  ;;  %2477 = vmatmul.f32.gmra.mxu3 %v6460_v6  ;;  %v4040_v43 = vmul.f32 0.015625, %v3516_v44  ;;  %v5214_v45 = vperm.slane %v4042_v27, %v9012_v33  ;;  %v3661_v3 = vsel %vm3150_vm0, %v3064_v0, 0.0  ;;  %v3063_v6 = vld [vmem:[%s7346_s12 + $0x548] sm:$0xff] }
 0x33e   : > { %v5210_v38 = vperm.slane %v4040_v43, %v9015_v25  ;;  %v3658_v43 = vsel %vm3150_vm0, %v3063_v6, 0.0 }
 0x33f   : > { %v1961_v52 = vpop.f32.mrf.mxu2  ;;  %v2074_v61 = vpop.f32.mrf.mxu3 }
 0x340   : > { %v1962_v31 = vadd.f32 %v1961_v52, %v1849_v46  ;;  %v1738_v12 = vpop.f32.mrf.mxu0  ;;  %v1851_v32 = vpop.f32.mrf.mxu1  ;;  %v5211_v41 = vsel %vm4981_vm9, %v5210_v38, %v5209_v28  ;;  %3662 = vadd.xlane.f32.xlu0 %v3661_v3  ;;  %v6464_v46 = vld [vmem:[%s12747_s1 + $0x78] sm:$0xff]  ;;  %v9052_v38 = vadd.s32 4294967200, %v8872_v35 }
 0x341   : > { %v1739_v44 = vadd.f32 %v1738_v12, %v8090_v36  ;;  %v5213_v0 = vsel %vm4985_vm10, %v5212_v48, %v5211_v41  ;;  %v9038_v36 = vadd.s32 4294967192, %v8872_v35  ;;  %v6463_v12 = vld [vmem:[%s12747_s1 + $0x70] sm:$0xff]  ;;  %v5224_v48 = vperm.slane %v4047_v60, %v8872_v35  ;;  %v9048_v52 = vpop.xlane.xlu2 %3554  ;;  %3707 = vadd.xlane.f32.xlu2 %v3706_v51  ;;  %3659 = vadd.xlane.f32.xlu1 %v3658_v43 }
 0x342   : > { %v2075_v27 = vadd.f32 %v2074_v61, %v1962_v31  ;;  %2141 = vmatmul.f32.gmra.mxu0 %v6461_v19  ;;  %v3540_v28 = vpop.xlane.xlu0 %3539  ;;  %v5215_v31 = vsel %vm4989_vm11, %v5214_v45, %v5213_v0  ;;  %v3045_v45 = vld [vmem:[%s7346_s12 + $0x4b8] sm:$0xff] }
 0x343   : > { %2254 = vmatmul.f32.gmra.mxu1 %v6462_v39  ;;  %v4048_v34 = vmul.f32 0.015625, %v3540_v28  ;;  %v3525_v61 = vpop.xlane.xlu1 %3524  ;;  %v1852_v6 = vadd.f32 %v1851_v32, %v1739_v44  ;;  %v5218_v41 = vperm.slane %v4044_v30, %v9038_v36  ;;  %v3121_v0 = vld [vmem:[%s7346_s12 + $0x718] sm:$0xff]  ;;  %v3604_v28 = vsel %vm3150_vm0, %v3045_v45, 0.0 }
 0x344   : > { %2850 = vst [vmem:[%s7551_s16 + $0x1a0] sm:$0xff] %v2075_v27  ;;  %2367 = vmatmul.f32.gmra.mxu2 %v6463_v12  ;;  %2480 = vmatmul.f32.gmra.mxu3 %v6464_v46  ;;  %v4043_v3 = vmul.f32 0.015625, %v3525_v61  ;;  %v3119_v12 = vld [vmem:[%s7346_s12 + $0x708] sm:$0xff]  ;;  %v3832_v30 = vsel %vm3150_vm0, %v3121_v0, 0.0 }
 0x345   : > { %v5225_v27 = vperm.slane %v4048_v34, %v8881_v59  ;;  %v3826_v45 = vsel %vm3150_vm0, %v3119_v12, 0.0  ;;  %v3078_v12 = vld [vmem:[%s7346_s12 + $0x5c0] sm:$0xff] }
 0x346   : > { %v5216_v39 = vperm.slane %v4043_v3, %v9052_v38 }
 0x347   : > { %v1964_v19 = vpop.f32.mrf.mxu2  ;;  %v2077_v60 = vpop.f32.mrf.mxu3  ;;  %v9061_v43 = vsel %vm4949_vm1, %v5225_v27, %v5224_v48  ;;  %v6465_v48 = vld [vmem:[%s12747_s1 + $0x90] sm:$0xff]  ;;  %v3086_v27 = vld [vmem:[%s7346_s12 + $0x600] sm:$0xff] }
 0x348   : > { %v1965_v46 = vadd.f32 %v1964_v19, %v1852_v6  ;;  %v1741_v57 = vpop.f32.mrf.mxu0  ;;  %v1854_v51 = vpop.f32.mrf.mxu1  ;;  %v5217_v32 = vsel %vm4993_vm12, %v5216_v39, %v5215_v31  ;;  %3605 = vadd.xlane.f32.xlu0 %v3604_v28  ;;  %v6466_v31 = vld [vmem:[%s12747_s1 + $0x98] sm:$0xff]  ;;  %v3727_v39 = vsel %vm3150_vm0, %v3086_v27, 0.0  ;;  %v3046_v28 = vld [vmem:[%s7346_s12 + $0x4c0] sm:$0xff] }
 0x349   : > { %v1742_v34 = vadd.f32 %v1741_v57, %v8118_v22  ;;  %v9067_v61 = vsel %vm4997_vm13, %v5218_v41, %v5217_v32  ;;  %v6467_v22 = vld [vmem:[%s12747_s1 + $0xa0] sm:$0xff]  ;;  %v6468_v57 = vld [vmem:[%s12747_s1 + $0xa8] sm:$0xff]  ;;  %v9083_v6 = vpop.xlane.xlu2 %3563  ;;  %3833 = vadd.xlane.f32.xlu2 %v3832_v30  ;;  %3827 = vadd.xlane.f32.xlu1 %v3826_v45  ;;  %v3607_v30 = vsel %vm3150_vm0, %v3046_v28, 0.0  ;;  %v6472_v27 = vld [vmem:[%s12747_s1 + $0xd8] sm:$0xff] }
 0x34a   : > { %v2078_v44 = vadd.f32 %v2077_v60, %v1965_v46  ;;  %12865 = vst [vmem:[#allocation102_spill] sm:$0xff] %v9067_v61  ;;  %2144 = vmatmul.f32.gmra.mxu0 %v6465_v48  ;;  %v3549_v3 = vpop.xlane.xlu0 %3548  ;;  %v4050_v48 = vmul.f32 0.015625, %v9008_v56  ;;  %v6470_v45 = vld [vmem:[%s12747_s1 + $0xc8] sm:$0xff] }
 0x34b   : > { %2257 = vmatmul.f32.gmra.mxu1 %v6466_v31  ;;  %v9085_v41 = vpop.xlane.xlu1 %3533  ;;  %v1855_v0 = vadd.f32 %v1854_v51, %v1742_v34  ;;  %v3703_v51 = vsel %vm3150_vm0, %v3078_v12, 0.0  ;;  %v6469_v34 = vld [vmem:[%s12747_s1 + $0xc0] sm:$0xff]  ;;  %v4051_v56 = vmul.f32 0.015625, %v3549_v3  ;;  %v3088_v12 = vld [vmem:[%s7346_s12 + $0x610] sm:$0xff] }
 0x34c   : > { %2853 = vst [vmem:[%s7551_s16 + $0x1b8] sm:$0xff] %v2078_v44  ;;  %2370 = vmatmul.f32.gmra.mxu2 %v6467_v22  ;;  %2483 = vmatmul.f32.gmra.mxu3 %v6468_v57  ;;  %v5229_v28 = vperm.slane %v4050_v48, %v8937_v42  ;;  %v3733_v48 = vsel %vm3150_vm0, %v3088_v12, 0.0 }
 0x34d   : > { %12866 = vst [vmem:[#allocation103_spill] sm:$0xff] %v9085_v41 }
 0x34f   : > { %v1967_v19 = vpop.f32.mrf.mxu2  ;;  %v2080_v60 = vpop.f32.mrf.mxu3 }
 0x350   : > { %v1968_v46 = vadd.f32 %v1967_v19, %v1855_v0  ;;  %v1744_v32 = vpop.f32.mrf.mxu0  ;;  %v1857_v44 = vpop.f32.mrf.mxu1  ;;  %3728 = vadd.xlane.f32.xlu0 %v3727_v39 }
 0x351   : > { %v1745_v22 = vadd.f32 %v1744_v32, %v8146_v40  ;;  %v6471_v40 = vld [vmem:[%s12747_s1 + $0xd0] sm:$0xff]  ;;  %v9108_v0 = vpop.xlane.xlu2 %3572  ;;  %3608 = vadd.xlane.f32.xlu2 %v3607_v30  ;;  %3704 = vadd.xlane.f32.xlu1 %v3703_v51  ;;  %v4053_v30 = vmul.f32 0.015625, %v9048_v52  ;;  %v6474_v52 = vld [vmem:[%s12747_s1 + $0xf8] sm:$0xff] }
 0x352   : > { %v2081_v31 = vadd.f32 %v2080_v60, %v1968_v46  ;;  %2147 = vmatmul.f32.gmra.mxu0 %v6469_v34  ;;  %v3558_v57 = vpop.xlane.xlu0 %3557  ;;  %v3134_v60 = vld [vmem:[%s7346_s12 + $0x780] sm:$0xff] }
 0x353   : > { %2260 = vmatmul.f32.gmra.mxu1 %v6470_v45  ;;  %v3543_v19 = vpop.xlane.xlu1 %3542  ;;  %v1858_v39 = vadd.f32 %v1857_v44, %v1745_v22  ;;  %v3871_v45 = vsel %vm3150_vm0, %v3134_v60, 0.0  ;;  %v6473_v60 = vld [vmem:[%s12747_s1 + $0xf0] sm:$0xff] }
 0x354   : > { %2856 = vst [vmem:[%s7551_s16 + $0x1d0] sm:$0xff] %v2081_v31  ;;  %2373 = vmatmul.f32.gmra.mxu2 %v6471_v40  ;;  %2486 = vmatmul.f32.gmra.mxu3 %v6472_v27  ;;  %v4049_v3 = vmul.f32 0.015625, %v3543_v19  ;;  %v5231_v31 = vperm.slane %v4051_v56, %v8921_v54  ;;  %v3065_v40 = vld [vmem:[%s7346_s12 + $0x558] sm:$0xff] }
 0x355   : > { %v3664_v19 = vsel %vm3150_vm0, %v3065_v40, 0.0 }
 0x356   : > { %v5227_v34 = vperm.slane %v4049_v3, %v8890_v17 }
 0x357   : > { %v1970_v46 = vpop.f32.mrf.mxu2  ;;  %v2083_v32 = vpop.f32.mrf.mxu3 }
 0x358   : > { %v1971_v27 = vadd.f32 %v1970_v46, %v1858_v39  ;;  %v1747_v61 = vpop.f32.mrf.mxu0  ;;  %v1860_v41 = vpop.f32.mrf.mxu1  ;;  %v5228_v44 = vsel %vm4953_vm2, %v5227_v34, %v9061_v43  ;;  %3872 = vadd.xlane.f32.xlu0 %v3871_v45  ;;  %v4054_v43 = vmul.f32 0.015625, %v3558_v57  ;;  %v6476_v39 = vld [vmem:[%s12747_s1 + $0x108] sm:$0xff]  ;;  %v3066_v57 = vld [vmem:[%s7346_s12 + $0x560] sm:$0xff] }
 0x359   : > { %v1748_v51 = vadd.f32 %v1747_v61, %v8174_v23  ;;  %v5230_v56 = vsel %vm4957_vm3, %v5229_v28, %v5228_v44  ;;  %v6475_v61 = vld [vmem:[%s12747_s1 + $0x100] sm:$0xff]  ;;  %v9138_v28 = vpop.xlane.xlu2 %3581  ;;  %3734 = vadd.xlane.f32.xlu2 %v3733_v48  ;;  %3665 = vadd.xlane.f32.xlu1 %v3664_v19  ;;  %v3047_v34 = vld [vmem:[%s7346_s12 + $0x4c8] sm:$0xff]  ;;  %v4056_v48 = vmul.f32 0.015625, %v9083_v6 }
 0x35a   : > { %v2084_v22 = vadd.f32 %v2083_v32, %v1971_v27  ;;  %2150 = vmatmul.f32.gmra.mxu0 %v6473_v60  ;;  %v3567_v3 = vpop.xlane.xlu0 %3566  ;;  %v5232_v23 = vsel %vm4961_vm4, %v5231_v31, %v5230_v56  ;;  %v5235_v31 = vperm.slane %v4053_v30, %v8975_v4  ;;  %v5237_v27 = vperm.slane %v4054_v43, %v8959_v26  ;;  %v3087_v56 = vld [vmem:[%s7346_s12 + $0x608] sm:$0xff] }
 0x35b   : > { %2263 = vmatmul.f32.gmra.mxu1 %v6474_v52  ;;  %v3552_v12 = vpop.xlane.xlu1 %3551  ;;  %v1861_v32 = vadd.f32 %v1860_v41, %v1748_v51  ;;  %v3610_v30 = vsel %vm3150_vm0, %v3047_v34, 0.0  ;;  %v6478_v6 = vld [vmem:[%s12747_s1 + $0x128] sm:$0xff] }
 0x35c   : > { %2859 = vst [vmem:[%s7551_s16 + $0x1e8] sm:$0xff] %v2084_v22  ;;  %2376 = vmatmul.f32.gmra.mxu2 %v6475_v61  ;;  %2489 = vmatmul.f32.gmra.mxu3 %v6476_v39  ;;  %v4052_v46 = vmul.f32 0.015625, %v3552_v12  ;;  %v3667_v22 = vsel %vm3150_vm0, %v3066_v57, 0.0  ;;  %v3730_v39 = vsel %vm3150_vm0, %v3087_v56, 0.0  ;;  %v6477_v12 = vld [vmem:[%s12747_s1 + $0x120] sm:$0xff] }
 0x35e   : > { %v5233_v44 = vperm.slane %v4052_v46, %v8934_v37  ;;  %v6479_v46 = vld [vmem:[%s12747_s1 + $0x130] sm:$0xff] }
 0x35f   : > { %v1973_v45 = vpop.f32.mrf.mxu2  ;;  %v2086_v40 = vpop.f32.mrf.mxu3 }
 0x360   : > { %v1974_v60 = vadd.f32 %v1973_v45, %v1861_v32  ;;  %v1750_v52 = vpop.f32.mrf.mxu0  ;;  %v1863_v61 = vpop.f32.mrf.mxu1  ;;  %v5234_v41 = vsel %vm4965_vm5, %v5233_v44, %v5232_v23  ;;  %3668 = vadd.xlane.f32.xlu0 %v3667_v22  ;;  %v4057_v23 = vmul.f32 0.015625, %v3567_v3  ;;  %v6480_v32 = vld [vmem:[%s12747_s1 + $0x138] sm:$0xff]  ;;  %v3122_v3 = vld [vmem:[%s7346_s12 + $0x720] sm:$0xff] }
 0x361   : > { %v1751_v19 = vadd.f32 %v1750_v52, %v8202_v2  ;;  %v5236_v43 = vsel %vm4969_vm6, %v5235_v31, %v5234_v41  ;;  %v9167_v31 = vpop.xlane.xlu2 %3635  ;;  %3611 = vadd.xlane.f32.xlu2 %v3610_v30  ;;  %3731 = vadd.xlane.f32.xlu1 %v3730_v39  ;;  %v3089_v44 = vld [vmem:[%s7346_s12 + $0x618] sm:$0xff]  ;;  %v3835_v41 = vsel %vm3150_vm0, %v3122_v3, 0.0  ;;  %v4059_v30 = vmul.f32 0.015625, %v9108_v0  ;;  %v6483_v3 = vld [vmem:[%s12747_s1 + $0x160] sm:$0xff] }
 0x362   : > { %v2087_v51 = vadd.f32 %v2086_v40, %v1974_v60  ;;  %2153 = vmatmul.f32.gmra.mxu0 %v6477_v12  ;;  %v3576_v57 = vpop.xlane.xlu0 %3575  ;;  %v5238_v2 = vsel %vm4973_vm7, %v5237_v27, %v5236_v43  ;;  %v5241_v27 = vperm.slane %v4056_v48, %v9015_v25  ;;  %v5243_v60 = vperm.slane %v4057_v23, %v8999_v63  ;;  %v6482_v0 = vld [vmem:[%s12747_s1 + $0x158] sm:$0xff] }
 0x363   : > { %2266 = vmatmul.f32.gmra.mxu1 %v6478_v6  ;;  %v3561_v34 = vpop.xlane.xlu1 %3560  ;;  %v1864_v40 = vadd.f32 %v1863_v61, %v1751_v19  ;;  %v3736_v48 = vsel %vm3150_vm0, %v3089_v44, 0.0 }
 0x364   : > { %2862 = vst [vmem:[%s7551_s16 + $0x200] sm:$0xff] %v2087_v51  ;;  %2379 = vmatmul.f32.gmra.mxu2 %v6479_v46  ;;  %2492 = vmatmul.f32.gmra.mxu3 %v6480_v32  ;;  %v4055_v45 = vmul.f32 0.015625, %v3561_v34  ;;  %v3135_v51 = vld [vmem:[%s7346_s12 + $0x788] sm:$0xff]  ;;  %v6481_v32 = vld [vmem:[%s12747_s1 + $0x150] sm:$0xff] }
 0x365   : > { %v3874_v46 = vsel %vm3150_vm0, %v3135_v51, 0.0 }
 0x366   : > { %v5239_v52 = vperm.slane %v4055_v45, %v8972_v15  ;;  %v6484_v45 = vld [vmem:[%s12747_s1 + $0x168] sm:$0xff] }
 0x367   : > { %v1976_v22 = vpop.f32.mrf.mxu2  ;;  %v2089_v56 = vpop.f32.mrf.mxu3 }
 0x368   : > { %v1977_v43 = vadd.f32 %v1976_v22, %v1864_v40  ;;  %v1753_v12 = vpop.f32.mrf.mxu0  ;;  %v1866_v6 = vpop.f32.mrf.mxu1  ;;  %v5240_v61 = vsel %vm4977_vm8, %v5239_v52, %v5238_v2  ;;  %3836 = vadd.xlane.f32.xlu0 %v3835_v41  ;;  %v4060_v2 = vmul.f32 0.015625, %v3576_v57  ;;  %v3067_v57 = vld [vmem:[%s7346_s12 + $0x568] sm:$0xff] }
 0x369   : > { %v1754_v39 = vadd.f32 %v1753_v12, %v8230_v8  ;;  %v5242_v23 = vsel %vm4981_vm9, %v5241_v27, %v5240_v61  ;;  %v3681_v40 = vpop.xlane.xlu2 %3680  ;;  %3737 = vadd.xlane.f32.xlu2 %v3736_v48  ;;  %3875 = vadd.xlane.f32.xlu1 %v3874_v46  ;;  %v3670_v12 = vsel %vm3150_vm0, %v3067_v57, 0.0  ;;  %v3080_v61 = vld [vmem:[%s7346_s12 + $0x5d0] sm:$0xff] }
 0x36a   : > { %v2090_v19 = vadd.f32 %v2089_v56, %v1977_v43  ;;  %2156 = vmatmul.f32.gmra.mxu0 %v6481_v32  ;;  %v9188_v34 = vpop.xlane.xlu0 %3584  ;;  %v5244_v8 = vsel %vm4985_vm10, %v5243_v60, %v5242_v23  ;;  %v5247_v56 = vperm.slane %v4059_v30, %v9052_v38  ;;  %v3123_v60 = vld [vmem:[%s7346_s12 + $0x728] sm:$0xff]  ;;  %v5249_v51 = vperm.slane %v4060_v2, %v9038_v36  ;;  %v6485_v2 = vld [vmem:[%s12747_s1 + $0x180] sm:$0xff] }
 0x36b   : > { %2269 = vmatmul.f32.gmra.mxu1 %v6482_v0  ;;  %v3570_v27 = vpop.xlane.xlu1 %3569  ;;  %v1867_v22 = vadd.f32 %v1866_v6, %v1754_v39  ;;  %v3838_v6 = vsel %vm3150_vm0, %v3123_v60, 0.0  ;;  %v3709_v0 = vsel %vm3150_vm0, %v3080_v61, 0.0 }
 0x36c   : > { %2865 = vst [vmem:[%s7551_s16 + $0x218] sm:$0xff] %v2090_v19  ;;  %2382 = vmatmul.f32.gmra.mxu2 %v6483_v3  ;;  %2495 = vmatmul.f32.gmra.mxu3 %v6484_v45  ;;  %v4058_v44 = vmul.f32 0.015625, %v3570_v27  ;;  %v6487_v45 = vld [vmem:[%s12747_s1 + $0x190] sm:$0xff]  ;;  %v6488_v27 = vld [vmem:[%s12747_s1 + $0x198] sm:$0xff] }
 0x36e   : > { %v5245_v43 = vperm.slane %v4058_v44, %v9012_v33 }
 0x36f   : > { %v1979_v52 = vpop.f32.mrf.mxu2  ;;  %v2092_v41 = vpop.f32.mrf.mxu3 }
 0x370   : > { %v1980_v19 = vadd.f32 %v1979_v52, %v1867_v22  ;;  %v1756_v23 = vpop.f32.mrf.mxu0  ;;  %v1869_v32 = vpop.f32.mrf.mxu1  ;;  %v5246_v48 = vsel %vm4989_vm11, %v5245_v43, %v5244_v8  ;;  %3671 = vadd.xlane.f32.xlu0 %v3670_v12  ;;  %v6486_v8 = vld [vmem:[%s12747_s1 + $0x188] sm:$0xff]  ;;  %v3102_v22 = vld [vmem:[%s7346_s12 + $0x680] sm:$0xff] }
 0x371   : > { %v1757_v30 = vadd.f32 %v1756_v23, %v8258_v62  ;;  %v5248_v46 = vsel %vm4993_vm12, %v5247_v56, %v5246_v48  ;;  %v3687_v57 = vpop.xlane.xlu2 %3686  ;;  %v9226_v56 = vadd.s32 4294967184, %v8872_v35  ;;  %3839 = vadd.xlane.f32.xlu2 %v3838_v6  ;;  %3710 = vadd.xlane.f32.xlu1 %v3709_v0  ;;  %v3775_v61 = vsel %vm3150_vm0, %v3102_v22, 0.0 }
 0x372   : > { %v2093_v39 = vadd.f32 %v2092_v41, %v1980_v19  ;;  %2159 = vmatmul.f32.gmra.mxu0 %v6485_v2  ;;  %v3639_v3 = vpop.xlane.xlu0 %3638  ;;  %v5250_v62 = vsel %vm4997_vm13, %v5249_v51, %v5248_v46  ;;  %v3068_v41 = vld [vmem:[%s7346_s12 + $0x570] sm:$0xff]  ;;  %v4095_v46 = vmul.f32 0.015625, %v3681_v40  ;;  %v4080_v2 = vmul.f32 0.015625, %v9167_v31  ;;  %v6490_v31 = vld [vmem:[%s12747_s1 + $0x1b8] sm:$0xff] }
 0x373   : > { %2272 = vmatmul.f32.gmra.mxu1 %v6486_v8  ;;  %v3579_v44 = vpop.xlane.xlu1 %3578  ;;  %v1870_v52 = vadd.f32 %v1869_v32, %v1757_v30  ;;  %v3136_v19 = vld [vmem:[%s7346_s12 + $0x790] sm:$0xff]  ;;  %v4097_v6 = vmul.f32 0.015625, %v3687_v57  ;;  %v3673_v32 = vsel %vm3150_vm0, %v3068_v41, 0.0 }
 0x374   : > { %2868 = vst [vmem:[%s7551_s16 + $0x230] sm:$0xff] %v2093_v39  ;;  %2385 = vmatmul.f32.gmra.mxu2 %v6487_v45  ;;  %2498 = vmatmul.f32.gmra.mxu3 %v6488_v27  ;;  %v4061_v60 = vmul.f32 0.015625, %v3579_v44  ;;  %v4081_v45 = vmul.f32 0.015625, %v3639_v3  ;;  %v3877_v27 = vsel %vm3150_vm0, %v3136_v19, 0.0  ;;  %v6489_v40 = vld [vmem:[%s12747_s1 + $0x1b0] sm:$0xff]  ;;  %v6492_v3 = vld [vmem:[%s12747_s1 + $0x1c8] sm:$0xff]  ;;  %v5317_v57 = vperm.slane %v4095_v46, %v8872_v35 }
 0x375   : > { %v5287_v41 = vperm.slane %v4080_v2, %v8881_v59  ;;  %v4015_v46 = vmul.f32 0.015625, %v8653_v29 }
 0x376   : > { %v5251_v12 = vperm.slane %v4061_v60, %v9226_v56  ;;  %v5289_v19 = vperm.slane %v4081_v45, %v8890_v17  ;;  %v4063_v45 = vmul.f32 0.015625, %v9188_v34  ;;  %v4017_v34 = vmul.f32 0.015625, %v8636_v49 }
 0x377   : > { %v1982_v51 = vpop.f32.mrf.mxu2  ;;  %v2095_v43 = vpop.f32.mrf.mxu3 }
 0x378   : > { %v1983_v23 = vadd.f32 %v1982_v51, %v1870_v52  ;;  %v1759_v48 = vpop.f32.mrf.mxu0  ;;  %v1872_v39 = vpop.f32.mrf.mxu1  ;;  %v9234_v0 = vsel %vm5001_vm14, %v5251_v12, %v5250_v62  ;;  %3776 = vadd.xlane.f32.xlu0 %v3775_v61  ;;  %v3137_v52 = vld [vmem:[%s7346_s12 + $0x798] sm:$0xff]  ;;  %v5320_v51 = vperm.slane %v4097_v6, %v8890_v17  ;;  %v5255_v49 = vperm.slane %v4063_v45, %v8872_v35 }
 0x379   : > { %v1760_v8 = vadd.f32 %v1759_v48, %v8282_v55  ;;  %v6491_v55 = vld [vmem:[%s12747_s1 + $0x1c0] sm:$0xff]  ;;  %v3690_v22 = vpop.xlane.xlu2 %3689  ;;  %3674 = vadd.xlane.f32.xlu2 %v3673_v32  ;;  %3878 = vadd.xlane.f32.xlu1 %v3877_v27  ;;  %v3104_v48 = vld [vmem:[%s7346_s12 + $0x690] sm:$0xff]  ;;  %v3880_v6 = vsel %vm3150_vm0, %v3137_v52, 0.0  ;;  %v4016_v32 = vmul.f32 0.015625, %v8727_v7 }
 0x37a   : > { %v2096_v30 = vadd.f32 %v2095_v43, %v1983_v23  ;;  %2162 = vmatmul.f32.gmra.mxu0 %v6489_v40  ;;  %v3684_v62 = vpop.xlane.xlu0 %3683  ;;  %v4098_v43 = vmul.f32 0.015625, %v3690_v22 }
 0x37b   : > { %2275 = vmatmul.f32.gmra.mxu1 %v6490_v31  ;;  %v4096_v44 = vmul.f32 0.015625, %v3684_v62  ;;  %v3633_v60 = vpop.xlane.xlu1 %3632  ;;  %v1873_v61 = vadd.f32 %v1872_v39, %v1760_v8 }
 0x37c   : > { %2871 = vst [vmem:[%s7551_s16 + $0x248] sm:$0xff] %v2096_v30  ;;  %2388 = vmatmul.f32.gmra.mxu2 %v6491_v55  ;;  %2501 = vmatmul.f32.gmra.mxu3 %v6492_v3  ;;  %v4079_v12 = vmul.f32 0.015625, %v3633_v60  ;;  %v3081_v30 = vld [vmem:[%s7346_s12 + $0x5d8] sm:$0xff]  ;;  %v5322_v62 = vperm.slane %v4098_v43, %v8937_v42 }
 0x37d   : > { %v5318_v23 = vperm.slane %v4096_v44, %v8881_v59  ;;  %v3781_v44 = vsel %vm3150_vm0, %v3104_v48, 0.0  ;;  %v3712_v22 = vsel %vm3150_vm0, %v3081_v30, 0.0 }
 0x37e   : > { %v5286_v2 = vperm.slane %v4079_v12, %v8872_v35  ;;  %v5163_v12 = vperm.slane %v4016_v32, %v8881_v59 }
 0x37f   : > { %v1985_v40 = vpop.f32.mrf.mxu2  ;;  %v2098_v31 = vpop.f32.mrf.mxu3  ;;  %v5319_v55 = vsel %vm4949_vm1, %v5318_v23, %v5317_v57  ;;  %v5162_v57 = vperm.slane %v4015_v46, %v8872_v35  ;;  %v3082_v46 = vld [vmem:[%s7346_s12 + $0x5e0] sm:$0xff] }
 0x380   : > { %v1986_v27 = vadd.f32 %v1985_v40, %v1873_v61  ;;  %v1762_v39 = vpop.f32.mrf.mxu0  ;;  %v1875_v8 = vpop.f32.mrf.mxu1  ;;  %v5321_v3 = vsel %vm4953_vm2, %v5320_v51, %v5319_v55  ;;  %v5288_v29 = vsel %vm4949_vm1, %v5287_v41, %v5286_v2  ;;  %3881 = vadd.xlane.f32.xlu0 %v3880_v6  ;;  %v6493_v41 = vld [vmem:[%s12747_s1 + $0x1e0] sm:$0xff]  ;;  %v6495_v61 = vld [vmem:[%s12747_s1 + $0x1f0] sm:$0xff]  ;;  %v714_v40 = vld [vmem:[%s6702_s26 + $0x778] sm:$0xff] }
 0x381   : > { %v1763_v52 = vadd.f32 %v1762_v39, %v8310_v58  ;;  %v5323_v7 = vsel %vm4957_vm3, %v5322_v62, %v5321_v3  ;;  %v5290_v43 = vsel %vm4953_vm2, %v5289_v19, %v5288_v29  ;;  %v6494_v58 = vld [vmem:[%s12747_s1 + $0x1e8] sm:$0xff]  ;;  %v6496_v19 = vld [vmem:[%s12747_s1 + $0x1f8] sm:$0xff]  ;;  %v3693_v48 = vpop.xlane.xlu2 %3692  ;;  %v4018_v62 = vmul.f32 0.015625, %v8679_v24  ;;  %3782 = vadd.xlane.f32.xlu2 %v3781_v44  ;;  %3713 = vadd.xlane.f32.xlu1 %v3712_v22 }
 0x382   : > { %v2099_v60 = vadd.f32 %v2098_v31, %v1986_v27  ;;  %2165 = vmatmul.f32.gmra.mxu0 %v6493_v41  ;;  %v3588_v51 = vpop.xlane.xlu0 %3587  ;;  %v762_v31 = vld [vmem:[%s6702_s26 + $0x8f8] sm:$0xff]  ;;  %v4099_v2 = vmul.f32 0.015625, %v3693_v48  ;;  %v5165_v39 = vperm.slane %v4017_v34, %v8890_v17  ;;  %v3715_v24 = vsel %vm3150_vm0, %v3082_v46, 0.0  ;;  %v3103_v44 = vld [vmem:[%s7346_s12 + $0x688] sm:$0xff] }
 0x383   : > { %2278 = vmatmul.f32.gmra.mxu1 %v6494_v58  ;;  %v4064_v23 = vmul.f32 0.015625, %v3588_v51  ;;  %v3642_v30 = vpop.xlane.xlu1 %3641  ;;  %v1876_v32 = vadd.f32 %v1875_v8, %v1763_v52  ;;  %2571 = vmatpush.msra.mxu0 %v714_v40  ;;  %v5164_v22 = vsel %vm4949_vm1, %v5163_v12, %v5162_v57  ;;  %v5167_v34 = vperm.slane %v4018_v62, %v8937_v42  ;;  %v3124_v40 = vld [vmem:[%s7346_s12 + $0x730] sm:$0xff] }
 0x384   : > { %2874 = vst [vmem:[%s7551_s16 + $0x260] sm:$0xff] %v2099_v60  ;;  %2391 = vmatmul.f32.gmra.mxu2 %v6495_v61  ;;  %2504 = vmatmul.f32.gmra.mxu3 %v6496_v19  ;;  %v4082_v6 = vmul.f32 0.015625, %v3642_v30  ;;  %v5324_v3 = vperm.slane %v4099_v2, %v8921_v54  ;;  %v3049_v60 = vld [vmem:[%s7346_s12 + $0x4d8] sm:$0xff]  ;;  %v4019_v51 = vmul.f32 0.015625, %v8760_v21  ;;  %v3778_v12 = vsel %vm3150_vm0, %v3103_v44, 0.0  ;;  %v6497_v21 = vld [vmem:[%s12747_s1 + $0x210] sm:$0xff] }
 0x385   : > { %v5256_v27 = vperm.slane %v4064_v23, %v8881_v59  ;;  %2684 = vmatpush.msra.mxu1 %v762_v31  ;;  %v3616_v57 = vsel %vm3150_vm0, %v3049_v60, 0.0  ;;  %v6500_v30 = vld [vmem:[%s12747_s1 + $0x228] sm:$0xff]  ;;  %v4020_v31 = vmul.f32 0.015625, %v8664_v47 }
 0x386   : > { %v5291_v29 = vperm.slane %v4082_v6, %v8937_v42  ;;  %v9307_v61 = vsel %vm4961_vm4, %v5324_v3, %v5323_v7  ;;  %v6498_v7 = vld [vmem:[%s12747_s1 + $0x218] sm:$0xff]  ;;  %v5169_v62 = vperm.slane %v4019_v51, %v8921_v54  ;;  %v3841_v3 = vsel %vm3150_vm0, %v3124_v40, 0.0 }
 0x387   : > { %v1988_v45 = vpop.f32.mrf.mxu2  ;;  %v2101_v55 = vpop.f32.mrf.mxu3  ;;  %v5257_v58 = vsel %vm4949_vm1, %v5256_v27, %v5255_v49  ;;  %v5166_v49 = vsel %vm4953_vm2, %v5165_v39, %v5164_v22  ;;  %v3091_v27 = vld [vmem:[%s7346_s12 + $0x628] sm:$0xff]  ;;  %v3048_v39 = vld [vmem:[%s7346_s12 + $0x4d0] sm:$0xff]  ;;  %v5171_v22 = vperm.slane %v4020_v31, %v8934_v37  ;;  %v4022_v31 = vmul.f32 0.015625, %v8796_v10 }
 0x388   : > { %v1989_v41 = vadd.f32 %v1988_v45, %v1876_v32  ;;  %v1765_v8 = vpop.f32.mrf.mxu0  ;;  %v1878_v52 = vpop.f32.mrf.mxu1  ;;  %v9310_v19 = vsel %vm4957_vm3, %v5291_v29, %v5290_v43  ;;  %3716 = vadd.xlane.f32.xlu0 %v3715_v24  ;;  %v6499_v43 = vld [vmem:[%s12747_s1 + $0x220] sm:$0xff]  ;;  %v5168_v2 = vsel %vm4957_vm3, %v5167_v34, %v5166_v49  ;;  %v4021_v29 = vmul.f32 0.015625, %v8714_v9 }
 0x389   : > { %v1766_v48 = vadd.f32 %v1765_v8, %v8338_v13  ;;  %3617 = vadd.xlane.f32.xlu2 %v3616_v57  ;;  %3779 = vadd.xlane.f32.xlu1 %v3778_v12  ;;  %v3742_v34 = vsel %vm3150_vm0, %v3091_v27, 0.0  ;;  %v3613_v51 = vsel %vm3150_vm0, %v3048_v39, 0.0  ;;  %v6502_v12 = vld [vmem:[%s12747_s1 + $0x248] sm:$0xff] }
 0x38a   : > { %v2102_v23 = vadd.f32 %v2101_v55, %v1989_v41  ;;  %2168 = vmatmul.f32.gmra.mxu0 %v6497_v21  ;;  %v3591_v13 = vpop.xlane.xlu0 %3590  ;;  %v5170_v41 = vsel %vm4961_vm4, %v5169_v62, %v5168_v2  ;;  %v5173_v49 = vperm.slane %v4021_v29, %v8975_v4  ;;  %v6504_v21 = vld [vmem:[%s12747_s1 + $0x258] sm:$0xff]  ;;  %v3139_v39 = vld [vmem:[%s7346_s12 + $0x7a8] sm:$0xff] }
 0x38b   : > { %2281 = vmatmul.f32.gmra.mxu1 %v6498_v7  ;;  %v4065_v46 = vmul.f32 0.015625, %v3591_v13  ;;  %v1879_v6 = vadd.f32 %v1878_v52, %v1766_v48  ;;  %v5172_v40 = vsel %vm4965_vm5, %v5171_v22, %v5170_v41 }
 0x38c   : > { %2877 = vst [vmem:[%s7551_s16 + $0x278] sm:$0xff] %v2102_v23  ;;  %2394 = vmatmul.f32.gmra.mxu2 %v6499_v43  ;;  %2507 = vmatmul.f32.gmra.mxu3 %v6500_v30  ;;  %v3696_v8 = vpop.xlane.xlu2 %3695  ;;  %v3645_v52 = vpop.xlane.xlu1 %3644  ;;  %v3069_v43 = vld [vmem:[%s7346_s12 + $0x578] sm:$0xff]  ;;  %v711_v30 = vld [vmem:[%s6702_s26 + $0x760] sm:$0xff] }
 0x38d   : > { %v5258_v32 = vperm.slane %v4065_v46, %v8890_v17  ;;  %v4100_v9 = vmul.f32 0.015625, %v3696_v8  ;;  %v4083_v57 = vmul.f32 0.015625, %v3645_v52  ;;  %v759_v46 = vld [vmem:[%s6702_s26 + $0x8e0] sm:$0xff]  ;;  %2572 = vmatpush.msra.mxu0 %v711_v30  ;;  %v3676_v10 = vsel %vm3150_vm0, %v3069_v43, 0.0  ;;  %v3105_v43 = vld [vmem:[%s7346_s12 + $0x698] sm:$0xff] }
 0x38e   : > { %2685 = vmatpush.msra.mxu1 %v759_v46 }
 0x38f   : > { %v1991_v45 = vpop.f32.mrf.mxu2  ;;  %v2104_v55 = vpop.f32.mrf.mxu3  ;;  %v5259_v44 = vsel %vm4953_vm2, %v5258_v32, %v5257_v58  ;;  %v6501_v58 = vld [vmem:[%s12747_s1 + $0x240] sm:$0xff]  ;;  %v5326_v7 = vperm.slane %v4100_v9, %v8934_v37  ;;  %v5293_v13 = vperm.slane %v4083_v57, %v8921_v54 }
 0x390   : > { %v1992_v24 = vadd.f32 %v1991_v45, %v1879_v6  ;;  %v1768_v60 = vpop.f32.mrf.mxu0  ;;  %v1881_v47 = vpop.f32.mrf.mxu1  ;;  %3842 = vadd.xlane.f32.xlu0 %v3841_v3  ;;  %v3090_v45 = vld [vmem:[%s7346_s12 + $0x620] sm:$0xff] }
 0x391   : > { %v1769_v48 = vadd.f32 %v1768_v60, %v8368_v14  ;;  %v6503_v14 = vld [vmem:[%s12747_s1 + $0x250] sm:$0xff]  ;;  %3743 = vadd.xlane.f32.xlu2 %v3742_v34  ;;  %3614 = vadd.xlane.f32.xlu1 %v3613_v51  ;;  %v5327_v6 = vsel %vm4965_vm5, %v5326_v7, %v9307_v61  ;;  %v5294_v32 = vsel %vm4961_vm4, %v5293_v13, %v9310_v19  ;;  %v3886_v34 = vsel %vm3150_vm0, %v3139_v39, 0.0  ;;  %v4415_v51 = vld [vmem:[%s12749_s3 + $0x780] sm:$0xff] }
 0x392   : > { %v2105_v23 = vadd.f32 %v2104_v55, %v1992_v24  ;;  %2171 = vmatmul.f32.gmra.mxu0 %v6501_v58  ;;  %v4023_v55 = vmul.f32 0.015625, %v8690_v5  ;;  %v5174_v24 = vsel %vm4969_vm6, %v5173_v49, %v5172_v40  ;;  %v5175_v19 = vperm.slane %v4022_v31, %v8959_v26  ;;  %5493 = vmatpush.xpose.msra.mxu2 %v4415_v51  ;;  %v6505_v58 = vld [vmem:[%s12747_s1 + $0x270] sm:$0xff]  ;;  %v3138_v39 = vld [vmem:[%s7346_s12 + $0x7a0] sm:$0xff] }
 0x393   : > { %2284 = vmatmul.f32.gmra.mxu1 %v6502_v12  ;;  %v3594_v62 = vpop.xlane.xlu0 %3593  ;;  %v1882_v2 = vadd.f32 %v1881_v47, %v1769_v48  ;;  %v3739_v5 = vsel %vm3150_vm0, %v3090_v45, 0.0  ;;  %v6506_v12 = vld [vmem:[%s12747_s1 + $0x278] sm:$0xff]  ;;  %v9394_v49 = vmul.f32 0.015625, %v8746_v20  ;;  %v4399_v20 = vld [vmem:[%s12749_s3 + $0x700] sm:$0xff] }
 0x394   : > { %2880 = vst [vmem:[%s7551_s16 + $0x290] sm:$0xff] %v2105_v23  ;;  %2397 = vmatmul.f32.gmra.mxu2 %v6503_v14  ;;  %2510 = vmatmul.f32.gmra.mxu3 %v6504_v21  ;;  %v4066_v27 = vmul.f32 0.015625, %v3594_v62  ;;  %v3699_v8 = vpop.xlane.xlu2 %3698  ;;  %v3648_v52 = vpop.xlane.xlu1 %3647  ;;  %v6507_v14 = vld [vmem:[%s12747_s1 + $0x280] sm:$0xff]  ;;  %v6508_v21 = vld [vmem:[%s12747_s1 + $0x288] sm:$0xff]  ;;  %v5176_v30 = vsel %vm4973_vm7, %v5175_v19, %v5174_v24 }
 0x395   : > { %v4101_v9 = vmul.f32 0.015625, %v3699_v8  ;;  %v4084_v57 = vmul.f32 0.015625, %v3648_v52  ;;  %v3883_v52 = vsel %vm3150_vm0, %v3138_v39, 0.0 }
 0x396   : > { %v5260_v61 = vperm.slane %v4066_v27, %v8937_v42  ;;  %v3092_v27 = vld [vmem:[%s7346_s12 + $0x630] sm:$0xff]  ;;  %5494 = vmatpush.xpose.msra.mxu2 %v4399_v20 }
 0x397   : > { %v1994_v3 = vpop.f32.mrf.mxu2  ;;  %v2107_v29 = vpop.f32.mrf.mxu3  ;;  %v5328_v7 = vperm.slane %v4101_v9, %v8975_v4  ;;  %v5295_v13 = vperm.slane %v4084_v57, %v8934_v37  ;;  %v3745_v8 = vsel %vm3150_vm0, %v3092_v27, 0.0  ;;  %v4384_v9 = vld [vmem:[%s12749_s3 + $0x688] sm:$0xff]  ;;  %v9440_v57 = vmul.f32 0.015625, %v8725_v11 }
 0x398   : > { %v1995_v60 = vadd.f32 %v1994_v3, %v1882_v2  ;;  %v1771_v47 = vpop.f32.mrf.mxu0  ;;  %v1884_v22 = vpop.f32.mrf.mxu1  ;;  %v5261_v48 = vsel %vm4957_vm3, %v5260_v61, %v5259_v44  ;;  %3677 = vadd.xlane.f32.xlu0 %v3676_v10  ;;  %v4416_v44 = vld [vmem:[%s12749_s3 + $0x788] sm:$0xff]  ;;  %v3784_v3 = vsel %vm3150_vm0, %v3105_v43, 0.0  ;;  %v5179_v10 = vperm.slane %v9394_v49, %v9015_v25  ;;  %v3050_v49 = vld [vmem:[%s7346_s12 + $0x4e0] sm:$0xff] }
 0x399   : > { %v1772_v41 = vadd.f32 %v1771_v47, %v8396_v1  ;;  %v5177_v1 = vperm.slane %v4023_v55, %v8972_v15  ;;  %3887 = vadd.xlane.f32.xlu2 %v3886_v34  ;;  %3740 = vadd.xlane.f32.xlu1 %v3739_v5  ;;  %v5329_v31 = vsel %vm4969_vm6, %v5328_v7, %v5327_v6  ;;  %v708_v11 = vld [vmem:[%s6702_s26 + $0x748] sm:$0xff] }
 0x39a   : > { %v2108_v23 = vadd.f32 %v2107_v29, %v1995_v60  ;;  %2174 = vmatmul.f32.gmra.mxu0 %v6505_v58  ;;  %v5296_v62 = vsel %vm4965_vm5, %v5295_v13, %v5294_v32  ;;  %5513 = vmatpush.xpose.msra.mxu3 %v4416_v44  ;;  %v4400_v29 = vld [vmem:[%s12749_s3 + $0x708] sm:$0xff]  ;;  %v6512_v58 = vld [vmem:[%s12747_s1 + $0x2b8] sm:$0xff] }
 0x39b   : > { %2287 = vmatmul.f32.gmra.mxu1 %v6506_v12  ;;  %v3597_v46 = vpop.xlane.xlu0 %3596  ;;  %v1885_v40 = vadd.f32 %v1884_v22, %v1772_v41  ;;  %v5178_v6 = vsel %vm4977_vm8, %v5177_v1, %v5176_v30  ;;  %v4025_v22 = vmul.f32 0.015625, %v8829_v50  ;;  %v6510_v50 = vld [vmem:[%s12747_s1 + $0x2a8] sm:$0xff]  ;;  %v6511_v1 = vld [vmem:[%s12747_s1 + $0x2b0] sm:$0xff]  ;;  %2573 = vmatpush.msra.mxu0 %v708_v11 }
 0x39c   : > { %2883 = vst [vmem:[%s7551_s16 + $0x2a8] sm:$0xff] %v2108_v23  ;;  %2400 = vmatmul.f32.gmra.mxu2 %v6507_v14  ;;  %2513 = vmatmul.f32.gmra.mxu3 %v6508_v21  ;;  %v4067_v2 = vmul.f32 0.015625, %v3597_v46  ;;  %v3702_v19 = vpop.xlane.xlu2 %3701  ;;  %v3651_v41 = vpop.xlane.xlu1 %3650  ;;  %v756_v14 = vld [vmem:[%s6702_s26 + $0x8c8] sm:$0xff]  ;;  %v5180_v21 = vsel %vm4981_vm9, %v5179_v10, %v5178_v6 }
 0x39d   : > { %v4102_v51 = vmul.f32 0.015625, %v3702_v19  ;;  %v4085_v23 = vmul.f32 0.015625, %v3651_v41  ;;  %v5181_v7 = vperm.slane %v4025_v22, %v8999_v63  ;;  %2686 = vmatpush.msra.mxu1 %v756_v14 }
 0x39e   : > { %v5262_v47 = vperm.slane %v4067_v2, %v8921_v54  ;;  %5514 = vmatpush.xpose.msra.mxu3 %v4400_v29  ;;  %v3083_v2 = vld [vmem:[%s7346_s12 + $0x5e8] sm:$0xff] }
 0x39f   : > { %v1997_v45 = vpop.f32.mrf.mxu2  ;;  %v2110_v55 = vpop.f32.mrf.mxu3  ;;  %v5330_v12 = vperm.slane %v4102_v51, %v8959_v26  ;;  %v5297_v44 = vperm.slane %v4085_v23, %v8975_v4  ;;  %v6515_v51 = vld [vmem:[%s12747_s1 + $0x2e0] sm:$0xff]  ;;  %v6516_v23 = vld [vmem:[%s12747_s1 + $0x2e8] sm:$0xff] }
 0x3a0   : > { %v1998_v24 = vadd.f32 %v1997_v45, %v1885_v40  ;;  %v1774_v32 = vpop.f32.mrf.mxu0  ;;  %v1887_v60 = vpop.f32.mrf.mxu1  ;;  %v5263_v5 = vsel %vm4961_vm4, %v5262_v47, %v5261_v48  ;;  %3785 = vadd.xlane.f32.xlu0 %v3784_v3  ;;  %v4383_v48 = vld [vmem:[%s12749_s3 + $0x680] sm:$0xff]  ;;  %v3140_v40 = vld [vmem:[%s7346_s12 + $0x7b0] sm:$0xff]  ;;  %v3619_v45 = vsel %vm3150_vm0, %v3050_v49, 0.0 }
 0x3a1   : > { %v1775_v61 = vadd.f32 %v1774_v32, %v8426_v53  ;;  %v6509_v53 = vld [vmem:[%s12747_s1 + $0x2a0] sm:$0xff]  ;;  %3746 = vadd.xlane.f32.xlu2 %v3745_v8  ;;  %3884 = vadd.xlane.f32.xlu1 %v3883_v52  ;;  %v9457_v20 = vsel %vm4973_vm7, %v5330_v12, %v5329_v31  ;;  %v5298_v30 = vsel %vm4969_vm6, %v5297_v44, %v5296_v62  ;;  %v4027_v62 = vmul.f32 0.015625, %v8782_v16  ;;  %v6513_v52 = vld [vmem:[%s12747_s1 + $0x2d0] sm:$0xff] }
 0x3a2   : > { %v2111_v34 = vadd.f32 %v2110_v55, %v1998_v24  ;;  %2177 = vmatmul.f32.gmra.mxu0 %v6509_v53  ;;  %5495 = vmatpush.xpose.msra.mxu2 %v4383_v48  ;;  %v4367_v55 = vld [vmem:[%s12749_s3 + $0x600] sm:$0xff]  ;;  %v5183_v31 = vperm.slane %v9440_v57, %v9012_v33  ;;  %v5182_v24 = vsel %vm4985_vm10, %v5181_v7, %v5180_v21  ;;  %v3889_v22 = vsel %vm3150_vm0, %v3140_v40, 0.0 }
 0x3a3   : > { %2290 = vmatmul.f32.gmra.mxu1 %v6510_v50  ;;  %v3600_v13 = vpop.xlane.xlu0 %3599  ;;  %v1888_v43 = vadd.f32 %v1887_v60, %v1775_v61  ;;  %5515 = vmatpush.xpose.msra.mxu3 %v4384_v9  ;;  %v3718_v61 = vsel %vm3150_vm0, %v3083_v2, 0.0  ;;  %v3106_v48 = vld [vmem:[%s7346_s12 + $0x6a0] sm:$0xff]  ;;  %v5185_v9 = vperm.slane %v4027_v62, %v9052_v38 }
 0x3a4   : > { %2886 = vst [vmem:[%s7551_s16 + $0x2c0] sm:$0xff] %v2111_v34  ;;  %2403 = vmatmul.f32.gmra.mxu2 %v6511_v1  ;;  %2516 = vmatmul.f32.gmra.mxu3 %v6512_v58  ;;  %v4068_v46 = vmul.f32 0.015625, %v3600_v13  ;;  %v3603_v60 = vpop.xlane.xlu2 %3602  ;;  %v3654_v47 = vpop.xlane.xlu1 %3653  ;;  %v4368_v34 = vld [vmem:[%s12749_s3 + $0x608] sm:$0xff]  ;;  %v5184_v57 = vsel %vm4989_vm11, %v5183_v31, %v5182_v24  ;;  %v12867_v1 = vld [vmem:[#allocation100_spill] sm:$0xff]  ;;  %v3787_v7 = vsel %vm3150_vm0, %v3106_v48, 0.0  ;;  %v3093_v13 = vld [vmem:[%s7346_s12 + $0x638] sm:$0xff] }
 0x3a5   : > { %v4069_v16 = vmul.f32 0.015625, %v3603_v60  ;;  %v4086_v8 = vmul.f32 0.015625, %v3654_v47  ;;  %v4028_v58 = vmul.f32 0.015625, %v12867_v1  ;;  %v12868_v40 = vld [vmem:[#allocation98_spill] sm:$0xff]  ;;  %v3748_v24 = vsel %vm3150_vm0, %v3093_v13, 0.0 }
 0x3a6   : > { %v5264_v6 = vperm.slane %v4068_v46, %v8934_v37  ;;  %5496 = vmatpush.xpose.msra.mxu2 %v4367_v55  ;;  %v4352_v46 = vld [vmem:[%s12749_s3 + $0x588] sm:$0xff]  ;;  %v4029_v2 = vmul.f32 0.015625, %v12868_v40  ;;  %v9521_v60 = vadd.s32 4294967176, %v8872_v35  ;;  %v6517_v47 = vld [vmem:[%s12747_s1 + $0x300] sm:$0xff] }
 0x3a7   : > { %v2000_v27 = vpop.f32.mrf.mxu2  ;;  %v2113_v39 = vpop.f32.mrf.mxu3  ;;  %v5266_v53 = vperm.slane %v4069_v16, %v8975_v4  ;;  %v5299_v50 = vperm.slane %v4086_v8, %v8959_v26  ;;  %5516 = vmatpush.xpose.msra.mxu3 %v4368_v34  ;;  %v12869_v55 = vld [vmem:[#allocation99_spill] sm:$0xff]  ;;  %v5187_v62 = vperm.slane %v4028_v58, %v9038_v36  ;;  %v6519_v16 = vld [vmem:[%s12747_s1 + $0x310] sm:$0xff]  ;;  %v6520_v8 = vld [vmem:[%s12747_s1 + $0x318] sm:$0xff] }
 0x3a8   : > { %v2001_v3 = vadd.f32 %v2000_v27, %v1888_v43  ;;  %v1777_v29 = vpop.f32.mrf.mxu0  ;;  %v1890_v10 = vpop.f32.mrf.mxu1  ;;  %v5265_v41 = vsel %vm4965_vm5, %v5264_v6, %v5263_v5  ;;  %3620 = vadd.xlane.f32.xlu0 %v3619_v45  ;;  %v4351_v5 = vld [vmem:[%s12749_s3 + $0x580] sm:$0xff]  ;;  %v3125_v43 = vld [vmem:[%s7346_s12 + $0x738] sm:$0xff]  ;;  %v4030_v31 = vmul.f32 0.015625, %v12869_v55  ;;  %v705_v34 = vld [vmem:[%s6702_s26 + $0x730] sm:$0xff] }
 0x3a9   : > { %v1778_v32 = vadd.f32 %v1777_v29, %v8454_v18  ;;  %v6514_v18 = vld [vmem:[%s12747_s1 + $0x2d8] sm:$0xff]  ;;  %3890 = vadd.xlane.f32.xlu2 %v3889_v22  ;;  %3719 = vadd.xlane.f32.xlu1 %v3718_v61  ;;  %v9503_v49 = vsel %vm4969_vm6, %v5266_v53, %v5265_v41  ;;  %v5300_v11 = vsel %vm4973_vm7, %v5299_v50, %v5298_v30  ;;  %v6518_v22 = vld [vmem:[%s12747_s1 + $0x308] sm:$0xff]  ;;  %v4335_v61 = vld [vmem:[%s12749_s3 + $0x500] sm:$0xff] }
 0x3aa   : > { %v2114_v19 = vadd.f32 %v2113_v39, %v2001_v3  ;;  %2180 = vmatmul.f32.gmra.mxu0 %v6513_v52  ;;  %5497 = vmatpush.xpose.msra.mxu2 %v4351_v5  ;;  %v5186_v30 = vsel %vm4993_vm12, %v5185_v9, %v5184_v57  ;;  %v5189_v41 = vperm.slane %v4029_v2, %v9226_v56  ;;  %v753_v5 = vld [vmem:[%s6702_s26 + $0x8b0] sm:$0xff]  ;;  %v3141_v58 = vld [vmem:[%s7346_s12 + $0x7b8] sm:$0xff] }
 0x3ab   : > { %2293 = vmatmul.f32.gmra.mxu1 %v6514_v18  ;;  %v9500_v12 = vpop.xlane.xlu0 %3824  ;;  %v1891_v44 = vadd.f32 %v1890_v10, %v1778_v32  ;;  %v3844_v32 = vsel %vm3150_vm0, %v3125_v43, 0.0  ;;  %5517 = vmatpush.xpose.msra.mxu3 %v4352_v46  ;;  %v3051_v18 = vld [vmem:[%s7346_s12 + $0x4e8] sm:$0xff]  ;;  %v6521_v55 = vld [vmem:[%s12747_s1 + $0x330] sm:$0xff] }
 0x3ac   : > { %2889 = vst [vmem:[%s7551_s16 + $0x2d8] sm:$0xff] %v2114_v19  ;;  %2406 = vmatmul.f32.gmra.mxu2 %v6515_v51  ;;  %2519 = vmatmul.f32.gmra.mxu3 %v6516_v23  ;;  %v9516_v3 = vpop.xlane.xlu2 %3830  ;;  %v3657_v29 = vpop.xlane.xlu1 %3656  ;;  %v4336_v19 = vld [vmem:[%s12749_s3 + $0x508] sm:$0xff]  ;;  %v5191_v51 = vperm.slane %v4030_v31, %v9521_v60  ;;  %v5188_v23 = vsel %vm4997_vm13, %v5187_v62, %v5186_v30  ;;  %v3622_v1 = vsel %vm3150_vm0, %v3051_v18, 0.0  ;;  %v6522_v31 = vld [vmem:[%s12747_s1 + $0x338] sm:$0xff] }
 0x3ad   : > { %v4087_v6 = vmul.f32 0.015625, %v3657_v29  ;;  %2574 = vmatpush.msra.mxu0 %v705_v34  ;;  %2687 = vmatpush.msra.mxu1 %v753_v5  ;;  %v4320_v62 = vld [vmem:[%s12749_s3 + $0x488] sm:$0xff]  ;;  %v4303_v29 = vld [vmem:[%s12749_s3 + $0x400] sm:$0xff]  ;;  %v4145_v18 = vmul.f32 0.015625, %v9516_v3 }
 0x3ae   : > { %5498 = vmatpush.xpose.msra.mxu2 %v4335_v61 }
 0x3af   : > { %v2003_v14 = vpop.f32.mrf.mxu2  ;;  %v2116_v21 = vpop.f32.mrf.mxu3  ;;  %v5301_v52 = vperm.slane %v4087_v6, %v8972_v15  ;;  %5518 = vmatpush.xpose.msra.mxu3 %v4336_v19  ;;  %v6524_v6 = vld [vmem:[%s12747_s1 + $0x348] sm:$0xff] }
 0x3b0   : > { %v2004_v27 = vadd.f32 %v2003_v14, %v1891_v44  ;;  %v2136_v39 = vpop.f32.mrf.mxu0  ;;  %v2249_v45 = vpop.f32.mrf.mxu1  ;;  %3788 = vadd.xlane.f32.xlu0 %v3787_v7  ;;  %v3084_v44 = vld [vmem:[%s7346_s12 + $0x5f0] sm:$0xff]  ;;  %v4319_v14 = vld [vmem:[%s12749_s3 + $0x480] sm:$0xff] }
 0x3b1   : > { %3749 = vadd.xlane.f32.xlu2 %v3748_v24  ;;  %3845 = vadd.xlane.f32.xlu1 %v3844_v32  ;;  %v2250_v50 = vadd.f32 %v2249_v45, %v2136_v39  ;;  %v5302_v48 = vsel %vm4977_vm8, %v5301_v52, %v5300_v11  ;;  %v5190_v11 = vsel %vm5001_vm14, %v5189_v41, %v5188_v23  ;;  %v3892_v39 = vsel %vm3150_vm0, %v3141_v58, 0.0  ;;  %v3107_v32 = vld [vmem:[%s7346_s12 + $0x6a8] sm:$0xff] }
 0x3b2   : > { %v2117_v10 = vadd.f32 %v2116_v21, %v2004_v27  ;;  %2183 = vmatmul.f32.gmra.mxu0 %v6517_v47  ;;  %v9560_v40 = vsel %vm5005_vm15, %v5191_v51, %v5190_v11  ;;  %v3721_v45 = vsel %vm3150_vm0, %v3084_v44, 0.0  ;;  %5499 = vmatpush.xpose.msra.mxu2 %v4319_v14  ;;  %v4143_v47 = vmul.f32 0.015625, %v9500_v12  ;;  %v4304_v12 = vld [vmem:[%s12749_s3 + $0x408] sm:$0xff]  ;;  %v3126_v51 = vld [vmem:[%s7346_s12 + $0x740] sm:$0xff] }
 0x3b3   : > { %2296 = vmatmul.f32.gmra.mxu1 %v6518_v22  ;;  %v3663_v53 = vpop.xlane.xlu0 %3662  ;;  %12870 = vst [vmem:[#allocation100_spill] sm:$0xff] %v9560_v40  ;;  %5519 = vmatpush.xpose.msra.mxu3 %v4320_v62  ;;  %v3790_v5 = vsel %vm3150_vm0, %v3107_v32, 0.0  ;;  %v6526_v11 = vld [vmem:[%s12747_s1 + $0x368] sm:$0xff] }
 0x3b4   : > { %2892 = vst [vmem:[%s7551_s16 + $0x2f0] sm:$0xff] %v2117_v10  ;;  %2409 = vmatmul.f32.gmra.mxu2 %v6519_v16  ;;  %2522 = vmatmul.f32.gmra.mxu3 %v6520_v8  ;;  %v9557_v43 = vpop.xlane.xlu2 %3707  ;;  %v3660_v46 = vpop.xlane.xlu1 %3659  ;;  %v4089_v30 = vmul.f32 0.015625, %v3663_v53  ;;  %v6523_v10 = vld [vmem:[%s12747_s1 + $0x340] sm:$0xff]  ;;  %v3108_v16 = vld [vmem:[%s7346_s12 + $0x6b0] sm:$0xff] }
 0x3b5   : > { %v4088_v27 = vmul.f32 0.015625, %v3660_v46  ;;  %v3793_v3 = vsel %vm3150_vm0, %v3108_v16, 0.0  ;;  %v4288_v46 = vld [vmem:[%s12749_s3 + $0x388] sm:$0xff] }
 0x3b6   : > { %5500 = vmatpush.xpose.msra.mxu2 %v4303_v29  ;;  %v5305_v34 = vperm.slane %v4089_v30, %v8999_v63  ;;  %v750_v30 = vld [vmem:[%s6702_s26 + $0x898] sm:$0xff] }
 0x3b7   : > { %v2362_v9 = vpop.f32.mrf.mxu2  ;;  %v2475_v57 = vpop.f32.mrf.mxu3  ;;  %v5303_v24 = vperm.slane %v4088_v27, %v9015_v25  ;;  %5520 = vmatpush.xpose.msra.mxu3 %v4304_v12  ;;  %2688 = vmatpush.msra.mxu1 %v750_v30  ;;  %v4239_v30 = vld [vmem:[%s12749_s3 + $0x200] sm:$0xff] }
 0x3b8   : > { %v2363_v21 = vadd.f32 %v2362_v9, %v2250_v50  ;;  %v2139_v7 = vpop.f32.mrf.mxu0  ;;  %v2252_v13 = vpop.f32.mrf.mxu1  ;;  %3623 = vadd.xlane.f32.xlu0 %v3622_v1  ;;  %v5410_v9 = vperm.slane %v4143_v47, %v8872_v35 }
 0x3b9   : > { %3893 = vadd.xlane.f32.xlu2 %v3892_v39  ;;  %3722 = vadd.xlane.f32.xlu1 %v3721_v45  ;;  %v2253_v61 = vadd.f32 %v2252_v13, %v2139_v7  ;;  %v5304_v19 = vsel %vm4981_vm9, %v5303_v24, %v5302_v48  ;;  %v5413_v7 = vperm.slane %v4145_v18, %v8890_v17  ;;  %v6525_v13 = vld [vmem:[%s12747_s1 + $0x360] sm:$0xff]  ;;  %v6527_v39 = vld [vmem:[%s12747_s1 + $0x370] sm:$0xff]  ;;  %v6528_v45 = vld [vmem:[%s12747_s1 + $0x378] sm:$0xff] }
 0x3ba   : > { %v9562_v2 = vadd.f32 %v2475_v57, %v2363_v21  ;;  %2186 = vmatmul.f32.gmra.mxu0 %v6521_v55  ;;  %v3847_v21 = vsel %vm3150_vm0, %v3126_v51, 0.0  ;;  %v9620_v27 = vsel %vm4985_vm10, %v5305_v34, %v5304_v19  ;;  %v3053_v19 = vld [vmem:[%s7346_s12 + $0x4f8] sm:$0xff] }
 0x3bb   : > { %2299 = vmatmul.f32.gmra.mxu1 %v6522_v31  ;;  %v3606_v22 = vpop.xlane.xlu0 %3605  ;;  %v702_v31 = vld [vmem:[%s6702_s26 + $0x718] sm:$0xff]  ;;  %5521 = vmatpush.xpose.msra.mxu3 %v4288_v46 }
 0x3bc   : > { %2412 = vmatmul.f32.gmra.mxu2 %v6523_v10  ;;  %2525 = vmatmul.f32.gmra.mxu3 %v6524_v6  ;;  %v4070_v41 = vmul.f32 0.015625, %v3606_v22  ;;  %v3834_v57 = vpop.xlane.xlu2 %3833  ;;  %v3828_v1 = vpop.xlane.xlu1 %3827  ;;  %v3052_v6 = vld [vmem:[%s7346_s12 + $0x4f0] sm:$0xff]  ;;  %v4271_v22 = vld [vmem:[%s12749_s3 + $0x300] sm:$0xff] }
 0x3bd   : > { %v4144_v14 = vmul.f32 0.015625, %v3828_v1  ;;  %2575 = vmatpush.msra.mxu0 %v702_v31  ;;  %v4146_v18 = vmul.f32 0.015625, %v3834_v57  ;;  %v4255_v1 = vld [vmem:[%s12749_s3 + $0x280] sm:$0xff] }
 0x3be   : > { %v5268_v48 = vperm.slane %v4070_v41, %v8959_v26 }
 0x3bf   : > { %v2365_v8 = vpop.f32.mrf.mxu2  ;;  %v2478_v52 = vpop.f32.mrf.mxu3  ;;  %v5411_v55 = vperm.slane %v4144_v14, %v8881_v59  ;;  %v6532_v14 = vld [vmem:[%s12747_s1 + $0x3a8] sm:$0xff] }
 0x3c0   : > { %v2366_v23 = vadd.f32 %v2365_v8, %v2253_v61  ;;  %v2142_v53 = vpop.f32.mrf.mxu0  ;;  %v2255_v50 = vpop.f32.mrf.mxu1  ;;  %v9603_v44 = vsel %vm4973_vm7, %v5268_v48, %v9503_v49  ;;  %3791 = vadd.xlane.f32.xlu0 %v3790_v5  ;;  %v4287_v49 = vld [vmem:[%s12749_s3 + $0x380] sm:$0xff]  ;;  %v4272_v61 = vld [vmem:[%s12749_s3 + $0x308] sm:$0xff]  ;;  %v3625_v5 = vsel %vm3150_vm0, %v3052_v6, 0.0  ;;  %v6529_v48 = vld [vmem:[%s12747_s1 + $0x390] sm:$0xff] }
 0x3c1   : > { %3794 = vadd.xlane.f32.xlu2 %v3793_v3  ;;  %3848 = vadd.xlane.f32.xlu1 %v3847_v21  ;;  %v2256_v29 = vadd.f32 %v2255_v50, %v2142_v53  ;;  %v5412_v10 = vsel %vm4949_vm1, %v5411_v55, %v5410_v9  ;;  %v3628_v50 = vsel %vm3150_vm0, %v3053_v19, 0.0  ;;  %v6530_v9 = vld [vmem:[%s12747_s1 + $0x398] sm:$0xff]  ;;  %v6531_v3 = vld [vmem:[%s12747_s1 + $0x3a0] sm:$0xff] }
 0x3c2   : > { %v9599_v58 = vadd.f32 %v2478_v52, %v2366_v23  ;;  %2189 = vmatmul.f32.gmra.mxu0 %v6525_v13  ;;  %5501 = vmatpush.xpose.msra.mxu2 %v4287_v49  ;;  %v5414_v47 = vsel %vm4953_vm2, %v5413_v7, %v5412_v10  ;;  %v3085_v52 = vld [vmem:[%s7346_s12 + $0x5f8] sm:$0xff]  ;;  %v4256_v13 = vld [vmem:[%s12749_s3 + $0x288] sm:$0xff] }
 0x3c3   : > { %2302 = vmatmul.f32.gmra.mxu1 %v6526_v11  ;;  %v9631_v62 = vpop.xlane.xlu0 %3728  ;;  %5522 = vmatpush.xpose.msra.mxu3 %v4272_v61  ;;  %v3724_v57 = vsel %vm3150_vm0, %v3085_v52, 0.0  ;;  %v5415_v11 = vperm.slane %v4146_v18, %v8937_v42  ;;  %v12872_v61 = vld [vmem:[#allocation5_spill] sm:$0xff]  ;;  %v4240_v52 = vld [vmem:[%s12749_s3 + $0x208] sm:$0xff] }
 0x3c4   : > { %2415 = vmatmul.f32.gmra.mxu2 %v6527_v39  ;;  %2528 = vmatmul.f32.gmra.mxu3 %v6528_v45  ;;  %v3609_v34 = vpop.xlane.xlu2 %3608  ;;  %v3705_v12 = vpop.xlane.xlu1 %3704  ;;  %v3920_v19 = vmul.f32 0.015625, %v12872_v61 }
 0x3c5   : > { %v4071_v23 = vmul.f32 0.015625, %v3609_v34  ;;  %v4103_v53 = vmul.f32 0.015625, %v3705_v12  ;;  %v9694_v34 = vsel %vm4957_vm3, %v5415_v11, %v5414_v47  ;;  %v9697_v12 = vmul.f32 0.015625, %v9557_v43  ;;  %v4223_v47 = vld [vmem:[%s12749_s3 + $0x180] sm:$0xff]  ;;  %v6535_v43 = vld [vmem:[%s12747_s1 + $0x3d0] sm:$0xff] }
 0x3c6   : > { %5502 = vmatpush.xpose.msra.mxu2 %v4271_v22 }
 0x3c7   : > { %v2368_v24 = vpop.f32.mrf.mxu2  ;;  %v2481_v32 = vpop.f32.mrf.mxu3  ;;  %v5270_v21 = vperm.slane %v4071_v23, %v8972_v15  ;;  %v5332_v7 = vperm.slane %v4103_v53, %v8972_v15  ;;  %5523 = vmatpush.xpose.msra.mxu3 %v4256_v13  ;;  %v6534_v23 = vld [vmem:[%s12747_s1 + $0x3c8] sm:$0xff] }
 0x3c8   : > { %v2369_v41 = vadd.f32 %v2368_v24, %v2256_v29  ;;  %v2145_v16 = vpop.f32.mrf.mxu0  ;;  %v2258_v8 = vpop.f32.mrf.mxu1  ;;  %3626 = vadd.xlane.f32.xlu0 %v3625_v5  ;;  %v3128_v29 = vld [vmem:[%s7346_s12 + $0x750] sm:$0xff]  ;;  %v6533_v5 = vld [vmem:[%s12747_s1 + $0x3c0] sm:$0xff] }
 0x3c9   : > { %3629 = vadd.xlane.f32.xlu2 %v3628_v50  ;;  %v2259_v46 = vadd.f32 %v2258_v8, %v2145_v16  ;;  %v9674_v39 = vsel %vm4977_vm8, %v5270_v21, %v9603_v44  ;;  %v9678_v45 = vsel %vm4977_vm8, %v5332_v7, %v9457_v20  ;;  %3725 = vadd.xlane.f32.xlu1 %v3724_v57  ;;  %v12871_v44 = vld [vmem:[#allocation3_spill] sm:$0xff]  ;;  %v3853_v18 = vsel %vm3150_vm0, %v3128_v29, 0.0  ;;  %v12873_v50 = vld [vmem:[#allocation9_spill] sm:$0xff] }
 0x3ca   : > { %v9645_v51 = vadd.f32 %v2481_v32, %v2369_v41  ;;  %2192 = vmatmul.f32.gmra.mxu0 %v6529_v48  ;;  %5503 = vmatpush.xpose.msra.mxu2 %v4255_v1  ;;  %v3127_v32 = vld [vmem:[%s7346_s12 + $0x748] sm:$0xff]  ;;  %v3919_v22 = vmul.f32 0.015625, %v12871_v44  ;;  %v3921_v48 = vmul.f32 0.015625, %v12873_v50  ;;  %v699_v1 = vld [vmem:[%s6702_s26 + $0x700] sm:$0xff]  ;;  %v4948_v21 = vperm.slane %v3920_v19, %v8881_v59 }
 0x3cb   : > { %2305 = vmatmul.f32.gmra.mxu1 %v6530_v9  ;;  %v9670_v49 = vpop.xlane.xlu0 %3872  ;;  %v3850_v53 = vsel %vm3150_vm0, %v3127_v32, 0.0  ;;  %v6536_v9 = vld [vmem:[%s12747_s1 + $0x3d8] sm:$0xff]  ;;  %v9722_v7 = vmul.f32 0.015625, %v9631_v62  ;;  %5524 = vmatpush.xpose.msra.mxu3 %v4240_v52  ;;  %v5334_v62 = vperm.slane %v9697_v12, %v9015_v25  ;;  %v3094_v19 = vld [vmem:[%s7346_s12 + $0x640] sm:$0xff] }
 0x3cc   : > { %2418 = vmatmul.f32.gmra.mxu2 %v6531_v3  ;;  %2531 = vmatmul.f32.gmra.mxu3 %v6532_v14  ;;  %v3735_v20 = vpop.xlane.xlu2 %3734  ;;  %v3666_v41 = vpop.xlane.xlu1 %3665  ;;  %v747_v3 = vld [vmem:[%s6702_s26 + $0x880] sm:$0xff]  ;;  %v4946_v14 = vperm.slane %v3919_v22, %v8872_v35 }
 0x3cd   : > { %v4090_v8 = vmul.f32 0.015625, %v3666_v41  ;;  %v4113_v32 = vmul.f32 0.015625, %v3735_v20  ;;  %2576 = vmatpush.msra.mxu0 %v699_v1  ;;  %2689 = vmatpush.msra.mxu1 %v747_v3  ;;  %v5348_v20 = vperm.slane %v9722_v7, %v8872_v35  ;;  %v3751_v1 = vsel %vm3150_vm0, %v3094_v19, 0.0  ;;  %v4191_v3 = vld [vmem:[%s12749_s3 + $0x80] sm:$0xff] }
 0x3ce   : > { %5504 = vmatpush.xpose.msra.mxu2 %v4239_v30  ;;  %v3095_v30 = vld [vmem:[%s7346_s12 + $0x648] sm:$0xff]  ;;  %v4950_v41 = vsel %vm4949_vm1, %v4948_v21, %v4946_v14  ;;  %v9764_v14 = vsel %vm4981_vm9, %v5334_v62, %v9678_v45  ;;  %v12875_v21 = vld [vmem:[#allocation2_spill] sm:$0xff]  ;;  %v12876_v62 = vld [vmem:[#allocation101_spill] sm:$0xff] }
 0x3cf   : > { %v2371_v55 = vpop.f32.mrf.mxu2  ;;  %v2484_v31 = vpop.f32.mrf.mxu3  ;;  %v5307_v57 = vperm.slane %v4090_v8, %v9012_v33  ;;  %v12874_v8 = vld [vmem:[#allocation12_spill] sm:$0xff]  ;;  %v9767_v7 = vmul.f32 0.015625, %v12875_v21 }
 0x3d0   : > { %v2372_v10 = vadd.f32 %v2371_v55, %v2259_v46  ;;  %v2148_v6 = vpop.f32.mrf.mxu0  ;;  %v2261_v24 = vpop.f32.mrf.mxu1  ;;  %3854 = vadd.xlane.f32.xlu0 %v3853_v18  ;;  %v3922_v52 = vmul.f32 0.015625, %v12874_v8 }
 0x3d1   : > { %v2262_v11 = vadd.f32 %v2261_v24, %v2148_v6  ;;  %v5308_v46 = vsel %vm4989_vm11, %v5307_v57, %v9620_v27  ;;  %3851 = vadd.xlane.f32.xlu1 %v3850_v53  ;;  %v4207_v6 = vld [vmem:[%s12749_s3 + $0x100] sm:$0xff]  ;;  %v4952_v27 = vperm.slane %v3921_v48, %v8890_v17  ;;  %v4208_v48 = vld [vmem:[%s12749_s3 + $0x108] sm:$0xff]  ;;  %v5351_v57 = vperm.slane %v4113_v32, %v8890_v17 }
 0x3d2   : > { %v9687_v16 = vadd.f32 %v2484_v31, %v2372_v10  ;;  %2195 = vmatmul.f32.gmra.mxu0 %v6533_v5  ;;  %5505 = vmatpush.xpose.msra.mxu2 %v4223_v47  ;;  %v4224_v31 = vld [vmem:[%s12749_s3 + $0x188] sm:$0xff]  ;;  %v3754_v5 = vsel %vm3150_vm0, %v3095_v30, 0.0  ;;  %v4956_v30 = vperm.slane %v3922_v52, %v8937_v42 }
 0x3d3   : > { %2308 = vmatmul.f32.gmra.mxu1 %v6534_v23  ;;  %v3669_v13 = vpop.xlane.xlu0 %3668  ;;  %5525 = vmatpush.xpose.msra.mxu3 %v4224_v31  ;;  %v3129_v31 = vld [vmem:[%s7346_s12 + $0x758] sm:$0xff] }
 0x3d4   : > { %2421 = vmatmul.f32.gmra.mxu2 %v6535_v43  ;;  %2534 = vmatmul.f32.gmra.mxu3 %v6536_v9  ;;  %v4091_v55 = vmul.f32 0.015625, %v3669_v13  ;;  %v3612_v18 = vpop.xlane.xlu2 %3611  ;;  %v3732_v12 = vpop.xlane.xlu1 %3731  ;;  %v6537_v43 = vld [vmem:[%s12747_s1 + $0x3f0] sm:$0xff]  ;;  %v6538_v9 = vld [vmem:[%s12747_s1 + $0x3f8] sm:$0xff]  ;;  %v4954_v13 = vsel %vm4953_vm2, %v4952_v27, %v4950_v41  ;;  %v12877_v41 = vld [vmem:[#allocation103_spill] sm:$0xff] }
 0x3d5   : > { %v4072_v47 = vmul.f32 0.015625, %v3612_v18  ;;  %v4112_v50 = vmul.f32 0.015625, %v3732_v12  ;;  %v9796_v8 = vmul.f32 0.015625, %v12877_v41  ;;  %v696_v41 = vld [vmem:[%s6702_s26 + $0x6e8] sm:$0xff] }
 0x3d6   : > { %v5309_v61 = vperm.slane %v4091_v55, %v9052_v38  ;;  %5506 = vmatpush.xpose.msra.mxu2 %v4207_v6  ;;  %v3856_v6 = vsel %vm3150_vm0, %v3129_v31, 0.0  ;;  %v4417_v31 = vld [vmem:[%s12749_s3 + $0x790] sm:$0xff]  ;;  %2577 = vmatpush.msra.mxu0 %v696_v41 }
 0x3d7   : > { %v2374_v29 = vpop.f32.mrf.mxu2  ;;  %v2487_v10 = vpop.f32.mrf.mxu3  ;;  %v5272_v55 = vperm.slane %v4072_v47, %v9015_v25  ;;  %v5349_v45 = vperm.slane %v4112_v50, %v8881_v59  ;;  %5526 = vmatpush.xpose.msra.mxu3 %v4208_v48  ;;  %3857 = vadd.xlane.f32.xlu2 %v3856_v6  ;;  %v3142_v48 = vld [vmem:[%s7346_s12 + $0x7c0] sm:$0xff]  ;;  %v6543_v6 = vld [vmem:[%s12747_s1 + $0x430] sm:$0xff] }
 0x3d8   : > { %v2375_v24 = vadd.f32 %v2374_v29, %v2262_v11  ;;  %v2151_v44 = vpop.f32.mrf.mxu0  ;;  %v2264_v22 = vpop.f32.mrf.mxu1  ;;  %v9746_v53 = vsel %vm4993_vm12, %v5309_v61, %v5308_v46  ;;  %v6539_v11 = vld [vmem:[%s12747_s1 + $0x400] sm:$0xff]  ;;  %v6540_v46 = vld [vmem:[%s12747_s1 + $0x408] sm:$0xff]  ;;  %v9781_v29 = vmul.f32 0.015625, %v12876_v62  ;;  %3755 = vadd.xlane.f32.xlu0 %v3754_v5 }
 0x3d9   : > { %v2265_v27 = vadd.f32 %v2264_v22, %v2151_v44  ;;  %v5350_v61 = vsel %vm4949_vm1, %v5349_v45, %v5348_v20  ;;  %3752 = vadd.xlane.f32.xlu1 %v3751_v1  ;;  %v12878_v22 = vld [vmem:[#allocation4_spill] sm:$0xff]  ;;  %v6542_v62 = vld [vmem:[%s12747_s1 + $0x428] sm:$0xff] }
 0x3da   : > { %v9743_v23 = vadd.f32 %v2487_v10, %v2375_v24  ;;  %2198 = vmatmul.f32.gmra.mxu0 %v6537_v43  ;;  %v9784_v10 = vmul.f32 0.015625, %v9670_v49  ;;  %v9789_v24 = vsel %vm4981_vm9, %v5272_v55, %v9674_v39  ;;  %5507 = vmatpush.xpose.msra.mxu2 %v4191_v3  ;;  %v4192_v49 = vld [vmem:[%s12749_s3 + $0x88] sm:$0xff]  ;;  %v5352_v44 = vsel %vm4953_vm2, %v5351_v57, %v5350_v61  ;;  %v4175_v39 = vld [vmem:[%s12749_s3] sm:$0xff] }
 0x3db   : > { %2311 = vmatmul.f32.gmra.mxu1 %v6538_v9  ;;  %v3837_v32 = vpop.xlane.xlu0 %3836  ;;  %v9803_v20 = vmul.f32 0.015625, %v12878_v22  ;;  %v4960_v43 = vperm.slane %v9767_v7, %v8921_v54  ;;  %v4958_v9 = vsel %vm4957_vm3, %v4956_v30, %v4954_v13  ;;  %v5220_v57 = vperm.slane %v9781_v29, %v9226_v56  ;;  %5527 = vmatpush.xpose.msra.mxu3 %v4192_v49  ;;  %v4176_v13 = vld [vmem:[%s12749_s3 + $0x8] sm:$0xff]  ;;  %v4418_v29 = vld [vmem:[%s12749_s3 + $0x798] sm:$0xff] }
 0x3dc   : > { %2424 = vmatmul.f32.gmra.mxu2 %v6539_v11  ;;  %2537 = vmatmul.f32.gmra.mxu3 %v6540_v46  ;;  %v4147_v19 = vmul.f32 0.015625, %v3837_v32  ;;  %v5441_v1 = vperm.slane %v9784_v10, %v8872_v35  ;;  %v3738_v3 = vpop.xlane.xlu2 %3737  ;;  %v3876_v21 = vpop.xlane.xlu1 %3875  ;;  %v3143_v11 = vld [vmem:[%s7346_s12 + $0x7c8] sm:$0xff]  ;;  %v5222_v30 = vperm.slane %v9796_v8, %v9521_v60  ;;  %v3895_v10 = vsel %vm3150_vm0, %v3142_v48, 0.0  ;;  %v3110_v8 = vld [vmem:[%s7346_s12 + $0x6c0] sm:$0xff] }
 0x3dd   : > { %v4114_v45 = vmul.f32 0.015625, %v3738_v3  ;;  %v4160_v7 = vmul.f32 0.015625, %v3876_v21  ;;  %v4964_v32 = vperm.slane %v9803_v20, %v8934_v37  ;;  %v3898_v49 = vsel %vm3150_vm0, %v3143_v11, 0.0 }
 0x3de   : > { %v5417_v50 = vperm.slane %v4147_v19, %v8921_v54  ;;  %5508 = vmatpush.xpose.msra.mxu2 %v4175_v39  ;;  %v4962_v39 = vsel %vm4961_vm4, %v4960_v43, %v4958_v9 }
 0x3df   : > { %v2377_v52 = vpop.f32.mrf.mxu2  ;;  %v2490_v18 = vpop.f32.mrf.mxu3  ;;  %v5353_v61 = vperm.slane %v4114_v45, %v8937_v42  ;;  %v5442_v19 = vperm.slane %v4160_v7, %v8881_v59  ;;  %5528 = vmatpush.xpose.msra.mxu3 %v4176_v13 }
 0x3e0   : > { %v2378_v12 = vadd.f32 %v2377_v52, %v2265_v27  ;;  %v2154_v5 = vpop.f32.mrf.mxu0  ;;  %v2267_v47 = vpop.f32.mrf.mxu1  ;;  %v9819_v55 = vsel %vm4961_vm4, %v5417_v50, %v9694_v34  ;;  %v6541_v34 = vld [vmem:[%s12747_s1 + $0x420] sm:$0xff]  ;;  %v6544_v27 = vld [vmem:[%s12747_s1 + $0x438] sm:$0xff]  ;;  %v12879_v52 = vld [vmem:[#allocation7_spill] sm:$0xff]  ;;  %v3799_v50 = vsel %vm3150_vm0, %v3110_v8, 0.0  ;;  %3899 = vadd.xlane.f32.xlu0 %v3898_v49 }
 0x3e1   : > { %v2268_v22 = vadd.f32 %v2267_v47, %v2154_v5  ;;  %v9857_v48 = vsel %vm4957_vm3, %v5353_v61, %v5352_v44  ;;  %v9860_v3 = vsel %vm4949_vm1, %v5442_v19, %v5441_v1  ;;  %3896 = vadd.xlane.f32.xlu1 %v3895_v10  ;;  %v4401_v5 = vld [vmem:[%s12749_s3 + $0x710] sm:$0xff]  ;;  %v12880_v47 = vld [vmem:[#allocation102_spill] sm:$0xff]  ;;  %v4402_v44 = vld [vmem:[%s12749_s3 + $0x718] sm:$0xff]  ;;  %3800 = vadd.xlane.f32.xlu2 %v3799_v50 }
 0x3e2   : > { %v9815_v46 = vadd.f32 %v2490_v18, %v2378_v12  ;;  %2201 = vmatmul.f32.gmra.mxu0 %v6541_v34  ;;  %v3925_v18 = vmul.f32 0.015625, %v12879_v52  ;;  %5533 = vmatpush.xpose.msrb.mxu2 %v4417_v31  ;;  %v744_v12 = vld [vmem:[%s6702_s26 + $0x868] sm:$0xff]  ;;  %v5221_v43 = vsel %vm5001_vm14, %v5220_v57, %v12880_v47  ;;  %v3109_v34 = vld [vmem:[%s7346_s12 + $0x6b8] sm:$0xff]  ;;  %v4966_v10 = vsel %vm4965_vm5, %v4964_v32, %v4962_v39  ;;  %v3130_v61 = vld [vmem:[%s7346_s12 + $0x760] sm:$0xff] }
 0x3e3   : > { %2314 = vmatmul.f32.gmra.mxu1 %v6542_v62  ;;  %v3672_v20 = vpop.xlane.xlu0 %3671  ;;  %5553 = vmatpush.xpose.msrb.mxu3 %v4418_v29  ;;  %v9871_v1 = vsel %vm5005_vm15, %v5222_v30, %v5221_v43  ;;  %v12882_v62 = vld [vmem:[#allocation15_spill] sm:$0xff]  ;;  %v4385_v8 = vld [vmem:[%s12749_s3 + $0x690] sm:$0xff]  ;;  %v6546_v52 = vld [vmem:[%s12747_s1 + $0x458] sm:$0xff] }
 0x3e4   : > { %2427 = vmatmul.f32.gmra.mxu2 %v6543_v6  ;;  %2540 = vmatmul.f32.gmra.mxu3 %v6544_v27  ;;  %v4092_v21 = vmul.f32 0.015625, %v3672_v20  ;;  %12881 = vst [vmem:[#allocation98_spill] sm:$0xff] %v9871_v1  ;;  %v4968_v57 = vperm.slane %v3925_v18, %v8975_v4  ;;  %v3926_v29 = vmul.f32 0.015625, %v12882_v62  ;;  %v3840_v6 = vpop.xlane.xlu2 %3839  ;;  %v3711_v27 = vpop.xlane.xlu1 %3710  ;;  %v6545_v32 = vld [vmem:[%s12747_s1 + $0x450] sm:$0xff]  ;;  %v3796_v18 = vsel %vm3150_vm0, %v3109_v34, 0.0  ;;  %v12884_v39 = vld [vmem:[#allocation6_spill] sm:$0xff] }
 0x3e5   : > { %2690 = vmatpush.msra.mxu1 %v744_v12  ;;  %v4148_v49 = vmul.f32 0.015625, %v3840_v6  ;;  %v4105_v41 = vmul.f32 0.015625, %v3711_v27  ;;  %v6547_v20 = vld [vmem:[%s12747_s1 + $0x460] sm:$0xff]  ;;  %v6548_v12 = vld [vmem:[%s12747_s1 + $0x468] sm:$0xff]  ;;  %v3097_v47 = vld [vmem:[%s7346_s12 + $0x658] sm:$0xff] }
 0x3e6   : > { %v5311_v31 = vperm.slane %v4092_v21, %v9038_v36  ;;  %5534 = vmatpush.xpose.msrb.mxu2 %v4401_v5  ;;  %v3859_v5 = vsel %vm3150_vm0, %v3130_v61, 0.0  ;;  %v4970_v43 = vsel %vm4969_vm6, %v4968_v57, %v4966_v10  ;;  %v4369_v57 = vld [vmem:[%s12749_s3 + $0x610] sm:$0xff]  ;;  %v12885_v62 = vld [vmem:[#allocation10_spill] sm:$0xff] }
 0x3e7   : > { %v2380_v9 = vpop.f32.mrf.mxu2  ;;  %v2493_v11 = vpop.f32.mrf.mxu3  ;;  %5554 = vmatpush.xpose.msrb.mxu3 %v4402_v44  ;;  %v5419_v50 = vperm.slane %v4148_v49, %v8934_v37  ;;  %v5336_v21 = vperm.slane %v4105_v41, %v8999_v63  ;;  %v3760_v44 = vsel %vm3150_vm0, %v3097_v47, 0.0  ;;  %v12886_v10 = vld [vmem:[#allocation14_spill] sm:$0xff]  ;;  %v693_v47 = vld [vmem:[%s6702_s26 + $0x6d0] sm:$0xff] }
 0x3e8   : > { %v2381_v45 = vadd.f32 %v2380_v9, %v2268_v22  ;;  %v2157_v7 = vpop.f32.mrf.mxu0  ;;  %v2270_v13 = vpop.f32.mrf.mxu1  ;;  %v9883_v19 = vsel %vm4997_vm13, %v5311_v31, %v9746_v53  ;;  %v4386_v53 = vld [vmem:[%s12749_s3 + $0x698] sm:$0xff]  ;;  %v3927_v22 = vmul.f32 0.015625, %v12884_v39  ;;  %v4972_v9 = vperm.slane %v3926_v29, %v8959_v26  ;;  %3860 = vadd.xlane.f32.xlu0 %v3859_v5  ;;  %2578 = vmatpush.msra.mxu0 %v693_v47 }
 0x3e9   : > { %v9916_v31 = vsel %vm4965_vm5, %v5419_v50, %v9819_v55  ;;  %v9920_v34 = vsel %vm4985_vm10, %v5336_v21, %v9764_v14  ;;  %3797 = vadd.xlane.f32.xlu1 %v3796_v18  ;;  %v9926_v29 = vmul.f32 0.015625, %v12885_v62  ;;  %v4370_v14 = vld [vmem:[%s12749_s3 + $0x618] sm:$0xff]  ;;  %3761 = vadd.xlane.f32.xlu2 %v3760_v44 }
 0x3ea   : > { %v9879_v30 = vadd.f32 %v2493_v11, %v2381_v45  ;;  %2204 = vmatmul.f32.gmra.mxu0 %v6545_v32  ;;  %5535 = vmatpush.xpose.msrb.mxu2 %v4385_v8  ;;  %v2271_v45 = vadd.f32 %v2270_v13, %v2157_v7  ;;  %v3936_v7 = vmul.f32 0.015625, %v12886_v10  ;;  %v12887_v13 = vld [vmem:[#allocation24_spill] sm:$0xff]  ;;  %v4976_v61 = vperm.slane %v3927_v22, %v8972_v15  ;;  %v4354_v62 = vld [vmem:[%s12749_s3 + $0x598] sm:$0xff] }
 0x3eb   : > { %2317 = vmatmul.f32.gmra.mxu1 %v6546_v52  ;;  %v9911_v11 = vpop.xlane.xlu0 %3776  ;;  %5555 = vmatpush.xpose.msrb.mxu3 %v4386_v53  ;;  %v3935_v6 = vmul.f32 0.015625, %v12887_v13  ;;  %v3096_v32 = vld [vmem:[%s7346_s12 + $0x650] sm:$0xff]  ;;  %v4974_v52 = vsel %vm4973_vm7, %v4972_v9, %v4970_v43  ;;  %v12888_v53 = vld [vmem:[#allocation19_spill] sm:$0xff]  ;;  %v4980_v43 = vperm.slane %v9926_v29, %v9015_v25  ;;  %v6552_v13 = vld [vmem:[%s12747_s1 + $0x498] sm:$0xff] }
 0x3ec   : > { %12883 = vst [vmem:[#allocation99_spill] sm:$0xff] %v9879_v30  ;;  %2430 = vmatmul.f32.gmra.mxu2 %v6547_v20  ;;  %2543 = vmatmul.f32.gmra.mxu3 %v6548_v12  ;;  %v9937_v18 = vmul.f32 0.015625, %v12888_v53  ;;  %v3675_v39 = vpop.xlane.xlu2 %3674  ;;  %v3879_v20 = vpop.xlane.xlu1 %3878  ;;  %v3111_v12 = vld [vmem:[%s7346_s12 + $0x6c8] sm:$0xff]  ;;  %v4353_v22 = vld [vmem:[%s12749_s3 + $0x590] sm:$0xff]  ;;  %v5008_v9 = vperm.slane %v3936_v7, %v8881_v59  ;;  %v3757_v29 = vsel %vm3150_vm0, %v3096_v32, 0.0  ;;  %v4978_v10 = vsel %vm4977_vm8, %v4976_v61, %v4974_v52  ;;  %v12890_v32 = vld [vmem:[#allocation18_spill] sm:$0xff] }
 0x3ed   : > { %v4093_v21 = vmul.f32 0.015625, %v3675_v39  ;;  %v4161_v5 = vmul.f32 0.015625, %v3879_v20  ;;  %v5007_v44 = vperm.slane %v3935_v6, %v8872_v35  ;;  %v6551_v7 = vld [vmem:[%s12747_s1 + $0x490] sm:$0xff]  ;;  %v3929_v61 = vmul.f32 0.015625, %v12890_v32  ;;  %v12891_v53 = vld [vmem:[#allocation27_spill] sm:$0xff] }
 0x3ee   : > { %5536 = vmatpush.xpose.msrb.mxu2 %v4369_v57  ;;  %v6550_v57 = vld [vmem:[%s12747_s1 + $0x488] sm:$0xff]  ;;  %v5010_v52 = vperm.slane %v9937_v18, %v8890_v17  ;;  %v3938_v39 = vmul.f32 0.015625, %v12891_v53  ;;  %v4337_v18 = vld [vmem:[%s12749_s3 + $0x510] sm:$0xff] }
 0x3ef   : > { %v2383_v55 = vpop.f32.mrf.mxu2  ;;  %v2496_v27 = vpop.f32.mrf.mxu3  ;;  %5556 = vmatpush.xpose.msrb.mxu3 %v4370_v14  ;;  %v5313_v6 = vperm.slane %v4093_v21, %v9226_v56  ;;  %v741_v14 = vld [vmem:[%s6702_s26 + $0x850] sm:$0xff] }
 0x3f0   : > { %v2384_v49 = vadd.f32 %v2383_v55, %v2271_v45  ;;  %v2160_v41 = vpop.f32.mrf.mxu0  ;;  %v2273_v8 = vpop.f32.mrf.mxu1  ;;  %v6549_v45 = vld [vmem:[%s12747_s1 + $0x480] sm:$0xff]  ;;  %v5444_v55 = vperm.slane %v4161_v5, %v8890_v17  ;;  %2691 = vmatpush.msra.mxu1 %v741_v14 }
 0x3f1   : > { %v9979_v21 = vsel %vm5001_vm14, %v5313_v6, %v9883_v19  ;;  %3758 = vadd.xlane.f32.xlu1 %v3757_v29  ;;  %v12894_v19 = vld [vmem:[#allocation17_spill] sm:$0xff]  ;;  %v3098_v14 = vld [vmem:[%s7346_s12 + $0x660] sm:$0xff] }
 0x3f2   : > { %v9940_v50 = vadd.f32 %v2496_v27, %v2384_v49  ;;  %2207 = vmatmul.f32.gmra.mxu0 %v6549_v45  ;;  %v3802_v27 = vsel %vm3150_vm0, %v3111_v12, 0.0  ;;  %v3145_v49 = vld [vmem:[%s7346_s12 + $0x7d8] sm:$0xff]  ;;  %5537 = vmatpush.xpose.msrb.mxu2 %v4353_v22  ;;  %12892 = vst [vmem:[#allocation5_spill] sm:$0xff] %v9979_v21  ;;  %v5445_v12 = vsel %vm4953_vm2, %v5444_v55, %v9860_v3  ;;  %v12893_v22 = vld [vmem:[#allocation8_spill] sm:$0xff] }
 0x3f3   : > { %2320 = vmatmul.f32.gmra.mxu1 %v6550_v57  ;;  %v3882_v20 = vpop.xlane.xlu0 %3881  ;;  %v3904_v45 = vsel %vm3150_vm0, %v3145_v49, 0.0  ;;  %v2274_v57 = vadd.f32 %v2273_v8, %v2160_v41  ;;  %5557 = vmatpush.xpose.msrb.mxu3 %v4354_v62  ;;  %v9987_v47 = vmul.f32 0.015625, %v12893_v22  ;;  %v5009_v41 = vsel %vm4949_vm1, %v5008_v9, %v5007_v44  ;;  %v4338_v3 = vld [vmem:[%s12749_s3 + $0x518] sm:$0xff]  ;;  %v3144_v49 = vld [vmem:[%s7346_s12 + $0x7d0] sm:$0xff] }
 0x3f4   : > { %12889 = vst [vmem:[#allocation3_spill] sm:$0xff] %v9940_v50  ;;  %2433 = vmatmul.f32.gmra.mxu2 %v6551_v7  ;;  %2546 = vmatmul.f32.gmra.mxu3 %v6552_v13  ;;  %v4162_v5 = vmul.f32 0.015625, %v3882_v20  ;;  %v9994_v62 = vmul.f32 0.015625, %v12894_v19  ;;  %v4982_v9 = vsel %vm4981_vm9, %v4980_v43, %v4978_v10  ;;  %v4984_v44 = vperm.slane %v3929_v61, %v8999_v63  ;;  %v10001_v32 = vpop.xlane.xlu2 %3782  ;;  %v3714_v53 = vpop.xlane.xlu1 %3713  ;;  %v4321_v43 = vld [vmem:[%s12749_s3 + $0x490] sm:$0xff] }
 0x3f5   : > { %3803 = vadd.xlane.f32.xlu0 %v3802_v27  ;;  %3905 = vadd.xlane.f32.xlu2 %v3904_v45  ;;  %v5012_v27 = vperm.slane %v3938_v39, %v8937_v42  ;;  %v5011_v20 = vsel %vm4953_vm2, %v5010_v52, %v5009_v41  ;;  %v4988_v10 = vperm.slane %v9987_v47, %v9012_v33  ;;  %v6553_v61 = vld [vmem:[%s12747_s1 + $0x4b0] sm:$0xff]  ;;  %v6554_v52 = vld [vmem:[%s12747_s1 + $0x4b8] sm:$0xff]  ;;  %v3901_v45 = vsel %vm3150_vm0, %v3144_v49, 0.0  ;;  %v6555_v41 = vld [vmem:[%s12747_s1 + $0x4c0] sm:$0xff] }
 0x3f6   : > { %v5446_v55 = vperm.slane %v4162_v5, %v8937_v42  ;;  %5538 = vmatpush.xpose.msrb.mxu2 %v4337_v18  ;;  %v4106_v5 = vmul.f32 0.015625, %v3714_v53  ;;  %v4322_v39 = vld [vmem:[%s12749_s3 + $0x498] sm:$0xff]  ;;  %v5014_v47 = vperm.slane %v9994_v62, %v8921_v54  ;;  %v3132_v19 = vld [vmem:[%s7346_s12 + $0x770] sm:$0xff] }
 0x3f7   : > { %v2386_v8 = vpop.f32.mrf.mxu2  ;;  %v2499_v7 = vpop.f32.mrf.mxu3  ;;  %5558 = vmatpush.xpose.msrb.mxu3 %v4338_v3  ;;  %v3763_v3 = vsel %vm3150_vm0, %v3098_v14, 0.0  ;;  %v5013_v62 = vsel %vm4957_vm3, %v5012_v27, %v5011_v20 }
 0x3f8   : > { %v2387_v29 = vadd.f32 %v2386_v8, %v2274_v57  ;;  %v2163_v13 = vpop.f32.mrf.mxu0  ;;  %v2276_v6 = vpop.f32.mrf.mxu1  ;;  %v10008_v22 = vsel %vm4957_vm3, %v5446_v55, %v5445_v12  ;;  %v12896_v12 = vld [vmem:[#allocation13_spill] sm:$0xff]  ;;  %v6556_v8 = vld [vmem:[%s12747_s1 + $0x4c8] sm:$0xff]  ;;  %v12897_v55 = vld [vmem:[#allocation22_spill] sm:$0xff] }
 0x3f9   : > { %v10026_v18 = vmul.f32 0.015625, %v12896_v12  ;;  %v10041_v49 = vmul.f32 0.015625, %v12897_v55  ;;  %v4127_v12 = vmul.f32 0.015625, %v9911_v11  ;;  %3902 = vadd.xlane.f32.xlu1 %v3901_v45  ;;  %v4306_v11 = vld [vmem:[%s12749_s3 + $0x418] sm:$0xff]  ;;  %v12902_v55 = vld [vmem:[#allocation30_spill] sm:$0xff] }
 0x3fa   : > { %v10005_v57 = vadd.f32 %v2499_v7, %v2387_v29  ;;  %2210 = vmatmul.f32.gmra.mxu0 %v6553_v61  ;;  %v5338_v7 = vperm.slane %v4106_v5, %v9012_v33  ;;  %v4986_v29 = vsel %vm4985_vm10, %v4984_v44, %v4982_v9  ;;  %5539 = vmatpush.xpose.msrb.mxu2 %v4321_v43  ;;  %v3865_v61 = vsel %vm3150_vm0, %v3132_v19, 0.0  ;;  %v4305_v9 = vld [vmem:[%s12749_s3 + $0x410] sm:$0xff]  ;;  %v12898_v44 = vld [vmem:[#allocation11_spill] sm:$0xff] }
 0x3fb   : > { %2323 = vmatmul.f32.gmra.mxu1 %v6554_v52  ;;  %v3717_v53 = vpop.xlane.xlu0 %3716  ;;  %v2277_v52 = vadd.f32 %v2276_v6, %v2163_v13  ;;  %5559 = vmatpush.xpose.msrb.mxu3 %v4322_v39  ;;  %v10052_v27 = vmul.f32 0.015625, %v12898_v44  ;;  %v4990_v13 = vsel %vm4989_vm11, %v4988_v10, %v4986_v29  ;;  %v5016_v19 = vperm.slane %v10041_v49, %v8934_v37  ;;  %v690_v49 = vld [vmem:[%s6702_s26 + $0x6b8] sm:$0xff] }
 0x3fc   : > { %12895 = vst [vmem:[#allocation9_spill] sm:$0xff] %v10005_v57  ;;  %2436 = vmatmul.f32.gmra.mxu2 %v6555_v41  ;;  %2549 = vmatmul.f32.gmra.mxu3 %v6556_v8  ;;  %v5339_v5 = vsel %vm4989_vm11, %v5338_v7, %v9920_v34  ;;  %v4107_v14 = vmul.f32 0.015625, %v3717_v53  ;;  %v4992_v34 = vperm.slane %v10026_v18, %v9052_v38  ;;  %v3131_v8 = vld [vmem:[%s7346_s12 + $0x768] sm:$0xff]  ;;  %v12901_v7 = vld [vmem:[#allocation20_spill] sm:$0xff]  ;;  %v10073_v10 = vmul.f32 0.015625, %v12902_v55  ;;  %v10075_v29 = vpop.xlane.xlu2 %3617  ;;  %v3780_v53 = vpop.xlane.xlu1 %3779  ;;  %v12905_v55 = vld [vmem:[#allocation34_spill] sm:$0xff] }
 0x3fd   : > { %3764 = vadd.xlane.f32.xlu0 %v3763_v3  ;;  %3866 = vadd.xlane.f32.xlu2 %v3865_v61  ;;  %v10067_v3 = vmul.f32 0.015625, %v12901_v7  ;;  %v5015_v18 = vsel %vm4961_vm4, %v5014_v47, %v5013_v62  ;;  %v5379_v61 = vperm.slane %v4127_v12, %v8872_v35  ;;  %v4289_v47 = vld [vmem:[%s12749_s3 + $0x390] sm:$0xff]  ;;  %v12904_v62 = vld [vmem:[#allocation29_spill] sm:$0xff]  ;;  %v6557_v12 = vld [vmem:[%s12747_s1 + $0x4e0] sm:$0xff] }
 0x3fe   : > { %v5340_v41 = vperm.slane %v4107_v14, %v9052_v38  ;;  %5540 = vmatpush.xpose.msrb.mxu2 %v4305_v9  ;;  %v10089_v7 = vmul.f32 0.015625, %v12904_v62  ;;  %v10092_v9 = vmul.f32 0.015625, %v12905_v55  ;;  %v6559_v62 = vld [vmem:[%s12747_s1 + $0x4f0] sm:$0xff]  ;;  %v6560_v55 = vld [vmem:[%s12747_s1 + $0x4f8] sm:$0xff]  ;;  %2579 = vmatpush.msra.mxu0 %v690_v49 }
 0x3ff   : > { %v2389_v20 = vpop.f32.mrf.mxu2  ;;  %v2502_v43 = vpop.f32.mrf.mxu3  ;;  %5560 = vmatpush.xpose.msrb.mxu3 %v4306_v11  ;;  %v4290_v11 = vld [vmem:[%s12749_s3 + $0x398] sm:$0xff] }
 0x400   : > { %v2390_v6 = vadd.f32 %v2389_v20, %v2277_v52  ;;  %v10060_v39 = vpop.f32.mrf.mxu0  ;;  %v10062_v45 = vpop.f32.mrf.mxu1  ;;  %v3146_v52 = vld [vmem:[%s7346_s12 + $0x7e0] sm:$0xff]  ;;  %v10082_v44 = vsel %vm4993_vm12, %v5340_v41, %v5339_v5  ;;  %v4128_v20 = vmul.f32 0.015625, %v3780_v53  ;;  %v6558_v5 = vld [vmem:[%s12747_s1 + $0x4e8] sm:$0xff]  ;;  %v12906_v41 = vld [vmem:[#allocation21_spill] sm:$0xff] }
 0x401   : > { %12899 = vst [vmem:[#allocation12_spill] sm:$0xff] %v10060_v39  ;;  %v10108_v53 = vmul.f32 0.015625, %v12906_v41  ;;  %v12912_v39 = vld [vmem:[#allocation49_spill] sm:$0xff] }
 0x402   : > { %12900 = vst [vmem:[#allocation2_spill] sm:$0xff] %v10062_v45  ;;  %v10078_v14 = vadd.f32 %v2502_v43, %v2390_v6  ;;  %2213 = vmatmul.f32.gmra.mxu0 %v6557_v12  ;;  %v10101_v43 = vmul.f32 0.015625, %v10001_v32  ;;  %v3862_v6 = vsel %vm3150_vm0, %v3131_v8, 0.0  ;;  %v5380_v32 = vperm.slane %v4128_v20, %v8881_v59  ;;  %5541 = vmatpush.xpose.msrb.mxu2 %v4289_v47  ;;  %v12908_v47 = vld [vmem:[#allocation16_spill] sm:$0xff] }
 0x403   : > { %2326 = vmatmul.f32.gmra.mxu1 %v6558_v5  ;;  %v3907_v12 = vsel %vm3150_vm0, %v3146_v52, 0.0  ;;  %v738_v5 = vld [vmem:[%s6702_s26 + $0x838] sm:$0xff]  ;;  %v5017_v52 = vsel %vm4965_vm5, %v5016_v19, %v5015_v18  ;;  %v5018_v20 = vperm.slane %v10073_v10, %v8975_v4  ;;  %5561 = vmatpush.xpose.msrb.mxu3 %v4290_v11  ;;  %v10139_v49 = vmul.f32 0.015625, %v12908_v47 }
 0x404   : > { %12903 = vst [vmem:[#allocation101_spill] sm:$0xff] %v10078_v14  ;;  %2439 = vmatmul.f32.gmra.mxu2 %v6559_v62  ;;  %2552 = vmatmul.f32.gmra.mxu3 %v6560_v55  ;;  %v10124_v62 = vsel %vm4993_vm12, %v4992_v34, %v4990_v13  ;;  %v12907_v14 = vld [vmem:[#allocation25_spill] sm:$0xff]  ;;  %v3843_v55 = vpop.xlane.xlu0 %3842  ;;  %v5381_v8 = vsel %vm4949_vm1, %v5380_v32, %v5379_v61  ;;  %v4273_v34 = vld [vmem:[%s12749_s3 + $0x310] sm:$0xff]  ;;  %v687_v13 = vld [vmem:[%s6702_s26 + $0x6a0] sm:$0xff]  ;;  %v10166_v57 = vmul.f32 0.015625, %v12912_v39  ;;  %v3615_v21 = vpop.xlane.xlu1 %3614 }
 0x405   : > { %v10127_v45 = vmul.f32 0.015625, %v12907_v14  ;;  %3863 = vadd.xlane.f32.xlu1 %v3862_v6  ;;  %v4149_v41 = vmul.f32 0.015625, %v3843_v55  ;;  %v735_v14 = vld [vmem:[%s6702_s26 + $0x820] sm:$0xff]  ;;  %v5038_v19 = vperm.slane %v10089_v7, %v8872_v35  ;;  %v5039_v18 = vperm.slane %v10092_v9, %v8881_v59  ;;  %3908 = vadd.xlane.f32.xlu0 %v3907_v12  ;;  %v4274_v61 = vld [vmem:[%s12749_s3 + $0x318] sm:$0xff]  ;;  %v3112_v12 = vld [vmem:[%s7346_s12 + $0x6d0] sm:$0xff] }
 0x406   : > { %v5382_v10 = vperm.slane %v10101_v43, %v8890_v17  ;;  %2692 = vmatpush.msra.mxu1 %v738_v5  ;;  %v3113_v11 = vld [vmem:[%s7346_s12 + $0x6d8] sm:$0xff]  ;;  %v12909_v32 = vld [vmem:[#allocation42_spill] sm:$0xff]  ;;  %2580 = vmatpush.msra.mxu0 %v687_v13  ;;  %v5019_v13 = vsel %vm4969_vm6, %v5018_v20, %v5017_v52  ;;  %v4073_v5 = vmul.f32 0.015625, %v3615_v21  ;;  %v3805_v20 = vsel %vm3150_vm0, %v3112_v12, 0.0  ;;  %v732_v12 = vld [vmem:[%s6702_s26 + $0x808] sm:$0xff] }
 0x407   : > { %v10154_v55 = vmul.f32 0.015625, %v12909_v32  ;;  %v5421_v43 = vperm.slane %v4149_v41, %v8975_v4  ;;  %v3808_v47 = vsel %vm3150_vm0, %v3113_v11, 0.0  ;;  %v12913_v6 = vld [vmem:[#allocation57_spill] sm:$0xff]  ;;  %5542 = vmatpush.xpose.msrb.mxu2 %v4273_v34  ;;  %v10177_v11 = vmul.f32 0.015625, %v10075_v29  ;;  %5562 = vmatpush.xpose.msrb.mxu3 %v4274_v61  ;;  %v12914_v34 = vld [vmem:[#allocation32_spill] sm:$0xff] }
 0x408   : > { %v10156_v7 = vpop.f32.mrf.mxu0  ;;  %v10158_v9 = vpop.f32.mrf.mxu1  ;;  %v10169_v32 = vmul.f32 0.015625, %v12913_v6  ;;  %v3133_v41 = vld [vmem:[%s7346_s12 + $0x778] sm:$0xff]  ;;  %2693 = vmatpush.msra.mxu1 %v735_v14  ;;  %3809 = vadd.xlane.f32.xlu2 %v3808_v47  ;;  %v684_v6 = vld [vmem:[%s6702_s26 + $0x688] sm:$0xff]  ;;  %v10188_v50 = vmul.f32 0.015625, %v12914_v34  ;;  %v5040_v52 = vsel %vm4949_vm1, %v5039_v18, %v5038_v19  ;;  %v6561_v29 = vld [vmem:[%s12747_s1 + $0x510] sm:$0xff]  ;;  %v10202_v14 = vsel %vm4953_vm2, %v5382_v10, %v5381_v8 }
 0x409   : > { %12910 = vst [vmem:[#allocation103_spill] sm:$0xff] %v10156_v7  ;;  %v10172_v7 = vmul.f32 0.015625, %v9138_v28  ;;  %v10181_v39 = vsel %vm4969_vm6, %v5421_v43, %v9916_v31  ;;  %v4257_v28 = vld [vmem:[%s12749_s3 + $0x290] sm:$0xff]  ;;  %v6562_v31 = vld [vmem:[%s12747_s1 + $0x518] sm:$0xff]  ;;  %v5041_v19 = vperm.slane %v10154_v55, %v8890_v17  ;;  %v12915_v18 = vld [vmem:[#allocation47_spill] sm:$0xff]  ;;  %v5274_v8 = vperm.slane %v4073_v5, %v8999_v63  ;;  %2581 = vmatpush.msra.mxu0 %v684_v6 }
 0x40a   : > { %12911 = vst [vmem:[#allocation4_spill] sm:$0xff] %v10158_v9  ;;  %v3744_v9 = vpop.xlane.xlu2 %3743  ;;  %2216 = vmatmul.f32.gmra.mxu0 %v6561_v29  ;;  %v4258_v21 = vld [vmem:[%s12749_s3 + $0x298] sm:$0xff]  ;;  %v10207_v61 = vmul.f32 0.015625, %v12915_v18  ;;  %v6563_v43 = vld [vmem:[%s12747_s1 + $0x520] sm:$0xff]  ;;  %v6564_v47 = vld [vmem:[%s12747_s1 + $0x528] sm:$0xff]  ;;  %v3868_v10 = vsel %vm3150_vm0, %v3133_v41, 0.0  ;;  %v5069_v55 = vperm.slane %v10166_v57, %v8872_v35  ;;  %v5070_v34 = vperm.slane %v10169_v32, %v8881_v59  ;;  %2694 = vmatpush.msra.mxu1 %v732_v12 }
 0x40b   : > { %2329 = vmatmul.f32.gmra.mxu1 %v6562_v31  ;;  %v5253_v29 = vperm.slane %v10172_v7, %v9521_v60  ;;  %5543 = vmatpush.xpose.msrb.mxu2 %v4257_v28  ;;  %v681_v18 = vld [vmem:[%s6702_s26 + $0x670] sm:$0xff]  ;;  %v12917_v5 = vperm.slane %v10067_v3, %v8959_v26  ;;  %v5276_v57 = vperm.slane %v10177_v11, %v9012_v33  ;;  %v10249_v11 = vmul.f32 0.015625, %v3744_v9  ;;  %v3099_v12 = vld [vmem:[%s7346_s12 + $0x668] sm:$0xff] }
 0x40c   : > { %2442 = vmatmul.f32.gmra.mxu2 %v6563_v43  ;;  %2555 = vmatmul.f32.gmra.mxu3 %v6564_v47  ;;  %v10224_v31 = vpop.xlane.xlu0 %3677  ;;  %v12918_v43 = vld [vmem:[#allocation37_spill] sm:$0xff]  ;;  %v5275_v7 = vsel %vm4985_vm10, %v5274_v8, %v9789_v24  ;;  %v4241_v32 = vld [vmem:[%s12749_s3 + $0x210] sm:$0xff]  ;;  %v5043_v28 = vperm.slane %v10188_v50, %v8937_v42  ;;  %v5042_v9 = vsel %vm4953_vm2, %v5041_v19, %v5040_v52 }
 0x40d   : > { %12916 = vst [vmem:[#allocation7_spill] sm:$0xff] %v10224_v31  ;;  %v5021_v41 = vsel %vm4973_vm7, %v12917_v5, %v5019_v13  ;;  %v10232_v47 = vmul.f32 0.015625, %v12918_v43  ;;  %5563 = vmatpush.xpose.msrb.mxu3 %v4258_v21  ;;  %3806 = vadd.xlane.f32.xlu1 %v3805_v20  ;;  %v729_v3 = vld [vmem:[%s6702_s26 + $0x7f0] sm:$0xff]  ;;  %v4242_v24 = vld [vmem:[%s12749_s3 + $0x218] sm:$0xff]  ;;  %v12920_v20 = vperm.slane %v10108_v53, %v9038_v36 }
 0x40e   : > { %v12919_v6 = vld [vmem:[#allocation52_spill] sm:$0xff]  ;;  %3869 = vadd.xlane.f32.xlu0 %v3868_v10  ;;  %v678_v21 = vld [vmem:[%s6702_s26 + $0x658] sm:$0xff]  ;;  %v5072_v10 = vperm.slane %v10207_v61, %v8890_v17  ;;  %2582 = vmatpush.msra.mxu0 %v681_v18  ;;  %v12924_v53 = vperm.slane %v10127_v45, %v8972_v15  ;;  %v5071_v52 = vsel %vm4949_vm1, %v5070_v34, %v5069_v55  ;;  %v3741_v61 = vpop.xlane.xlu1 %3740 }
 0x40f   : > { %v10247_v5 = vmul.f32 0.015625, %v12919_v6  ;;  %v10260_v8 = vsel %vm4997_vm13, %v12920_v20, %v10124_v62  ;;  %v12921_v50 = vld [vmem:[#allocation33_spill] sm:$0xff]  ;;  %5544 = vmatpush.xpose.msrb.mxu2 %v4241_v32  ;;  %2695 = vmatpush.msra.mxu1 %v729_v3  ;;  %v5045_v18 = vperm.slane %v10232_v47, %v8921_v54  ;;  %v12927_v45 = vld [vmem:[#allocation60_spill] sm:$0xff]  ;;  %v10296_v3 = vsel %vm4989_vm11, %v5276_v57, %v5275_v7  ;;  %v6565_v47 = vld [vmem:[%s12747_s1 + $0x540] sm:$0xff] }
 0x410   : > { %v10263_v43 = vmul.f32 0.015625, %v12921_v50  ;;  %v10268_v6 = vpop.f32.mrf.mxu0  ;;  %v10270_v13 = vpop.f32.mrf.mxu1  ;;  %v5023_v62 = vsel %vm4977_vm8, %v12924_v53, %v5021_v41  ;;  %v12925_v20 = vld [vmem:[#allocation45_spill] sm:$0xff]  ;;  %v4115_v41 = vmul.f32 0.015625, %v3741_v61  ;;  %v4225_v55 = vld [vmem:[%s12749_s3 + $0x190] sm:$0xff]  ;;  %2583 = vmatpush.msra.mxu0 %v678_v21  ;;  %v5357_v57 = vperm.slane %v10249_v11, %v8934_v37  ;;  %v675_v61 = vld [vmem:[%s6702_s26 + $0x640] sm:$0xff] }
 0x411   : > { %12922 = vst [vmem:[#allocation102_spill] sm:$0xff] %v10268_v6  ;;  %v10278_v50 = vmul.f32 0.015625, %v12925_v20  ;;  %v10288_v6 = vmul.f32 0.015625, %v12927_v45  ;;  %5564 = vmatpush.xpose.msrb.mxu3 %v4242_v24  ;;  %v726_v34 = vld [vmem:[%s6702_s26 + $0x7d8] sm:$0xff]  ;;  %v3100_v32 = vld [vmem:[%s7346_s12 + $0x670] sm:$0xff]  ;;  %v6566_v24 = vld [vmem:[%s12747_s1 + $0x548] sm:$0xff]  ;;  %v5073_v53 = vsel %vm4953_vm2, %v5072_v10, %v5071_v52 }
 0x412   : > { %12923 = vst [vmem:[#allocation15_spill] sm:$0xff] %v10270_v13  ;;  %v3888_v19 = vpop.xlane.xlu2 %3887  ;;  %v10283_v13 = vsel %vm5005_vm15, %v5253_v29, %v9234_v0  ;;  %v5044_v0 = vsel %vm4957_vm3, %v5043_v28, %v5042_v9  ;;  %v5074_v29 = vperm.slane %v10247_v5, %v8937_v42  ;;  %2219 = vmatmul.f32.gmra.mxu0 %v6565_v47  ;;  %v4226_v7 = vld [vmem:[%s12749_s3 + $0x198] sm:$0xff]  ;;  %v3766_v28 = vsel %vm3150_vm0, %v3099_v12, 0.0  ;;  %v12928_v5 = vld [vmem:[#allocation23_spill] sm:$0xff]  ;;  %v6567_v20 = vld [vmem:[%s12747_s1 + $0x550] sm:$0xff] }
 0x413   : > { %12926 = vst [vmem:[#allocation6_spill] sm:$0xff] %v10283_v13  ;;  %2332 = vmatmul.f32.gmra.mxu1 %v6566_v24  ;;  %v10314_v21 = vmul.f32 0.015625, %v12928_v5  ;;  %v5024_v9 = vperm.slane %v10263_v43, %v9015_v25  ;;  %v6568_v11 = vld [vmem:[%s12747_s1 + $0x558] sm:$0xff]  ;;  %v5355_v12 = vperm.slane %v4115_v41, %v8921_v54  ;;  %v723_v45 = vld [vmem:[%s6702_s26 + $0x7c0] sm:$0xff]  ;;  %v12929_v47 = vld [vmem:[#allocation35_spill] sm:$0xff]  ;;  %v5047_v43 = vperm.slane %v10278_v50, %v8934_v37 }
 0x414   : > { %2445 = vmatmul.f32.gmra.mxu2 %v6567_v20  ;;  %2558 = vmatmul.f32.gmra.mxu3 %v6568_v11  ;;  %v10329_v24 = vmul.f32 0.015625, %v12929_v47  ;;  %v12930_v10 = vld [vmem:[#allocation50_spill] sm:$0xff]  ;;  %v3786_v5 = vpop.xlane.xlu0 %3785  ;;  %v3769_v20 = vsel %vm3150_vm0, %v3100_v32, 0.0  ;;  %v5046_v41 = vsel %vm4961_vm4, %v5045_v18, %v5044_v0  ;;  %v5076_v11 = vperm.slane %v10288_v6, %v8921_v54  ;;  %v12939_v31 = vld [vmem:[#allocation53_spill] sm:$0xff] }
 0x415   : > { %v10334_v52 = vmul.f32 0.015625, %v12930_v10  ;;  %5545 = vmatpush.xpose.msrb.mxu2 %v4225_v55  ;;  %2696 = vmatpush.msra.mxu1 %v726_v34  ;;  %v5356_v47 = vsel %vm4961_vm4, %v5355_v12, %v9857_v48  ;;  %v4130_v50 = vmul.f32 0.015625, %v3786_v5  ;;  %v4209_v55 = vld [vmem:[%s12749_s3 + $0x110] sm:$0xff]  ;;  %v672_v10 = vld [vmem:[%s6702_s26 + $0x628] sm:$0xff]  ;;  %v5075_v18 = vsel %vm4957_vm3, %v5074_v29, %v5073_v53  ;;  %v4210_v48 = vld [vmem:[%s12749_s3 + $0x118] sm:$0xff] }
 0x416   : > { %5565 = vmatpush.xpose.msrb.mxu3 %v4226_v7  ;;  %3767 = vadd.xlane.f32.xlu1 %v3766_v28  ;;  %v12931_v34 = vld [vmem:[#allocation40_spill] sm:$0xff]  ;;  %v10350_v0 = vmul.f32 0.015625, %v3888_v19  ;;  %v5358_v6 = vsel %vm4965_vm5, %v5357_v57, %v5356_v47  ;;  %v720_v7 = vld [vmem:[%s6702_s26 + $0x7a8] sm:$0xff]  ;;  %v10360_v12 = vsel %vm4981_vm9, %v5024_v9, %v5023_v62  ;;  %v5049_v62 = vperm.slane %v10329_v24, %v8975_v4  ;;  %v3885_v28 = vpop.xlane.xlu1 %3884 }
 0x417   : > { %v10347_v32 = vmul.f32 0.015625, %v12931_v34  ;;  %2584 = vmatpush.msra.mxu0 %v675_v61  ;;  %2697 = vmatpush.msra.mxu1 %v723_v45  ;;  %v12932_v5 = vld [vmem:[#allocation55_spill] sm:$0xff]  ;;  %v5384_v57 = vperm.slane %v4130_v50, %v8937_v42  ;;  %v12935_v61 = vld [vmem:[#allocation28_spill] sm:$0xff]  ;;  %v5048_v9 = vsel %vm4965_vm5, %v5047_v43, %v5046_v41  ;;  %v5078_v47 = vperm.slane %v10334_v52, %v8934_v37  ;;  %v3101_v52 = vld [vmem:[%s7346_s12 + $0x678] sm:$0xff] }
 0x418   : > { %v10363_v34 = vmul.f32 0.015625, %v12932_v5  ;;  %v10365_v19 = vpop.f32.mrf.mxu0  ;;  %v10367_v29 = vpop.f32.mrf.mxu1  ;;  %3770 = vadd.xlane.f32.xlu2 %v3769_v20  ;;  %v3147_v53 = vld [vmem:[%s7346_s12 + $0x7e8] sm:$0xff]  ;;  %v10372_v45 = vmul.f32 0.015625, %v12935_v61  ;;  %v5077_v20 = vsel %vm4961_vm4, %v5076_v11, %v5075_v18  ;;  %v4163_v13 = vmul.f32 0.015625, %v3885_v28  ;;  %v4193_v24 = vld [vmem:[%s12749_s3 + $0x90] sm:$0xff]  ;;  %v6570_v11 = vld [vmem:[%s12747_s1 + $0x578] sm:$0xff] }
 0x419   : > { %12933 = vst [vmem:[#allocation10_spill] sm:$0xff] %v10365_v19  ;;  %5546 = vmatpush.xpose.msrb.mxu2 %v4209_v55  ;;  %2585 = vmatpush.msra.mxu0 %v672_v10  ;;  %v10382_v50 = vsel %vm4957_vm3, %v5384_v57, %v10202_v14  ;;  %v669_v43 = vld [vmem:[%s6702_s26 + $0x610] sm:$0xff]  ;;  %v5051_v41 = vperm.slane %v10347_v32, %v8959_v26  ;;  %v12936_v55 = vld [vmem:[#allocation63_spill] sm:$0xff]  ;;  %v4194_v32 = vld [vmem:[%s12749_s3 + $0x98] sm:$0xff]  ;;  %v3975_v30 = vmul.f32 0.015625, %v12939_v31 }
 0x41a   : > { %12934 = vst [vmem:[#allocation14_spill] sm:$0xff] %v10367_v29  ;;  %v3747_v5 = vpop.xlane.xlu2 %3746  ;;  %5566 = vmatpush.xpose.msrb.mxu3 %v4210_v48  ;;  %2698 = vmatpush.msra.mxu1 %v720_v7  ;;  %v3974_v10 = vmul.f32 0.015625, %v12936_v55  ;;  %v6569_v14 = vld [vmem:[%s12747_s1 + $0x570] sm:$0xff]  ;;  %v5450_v18 = vperm.slane %v10350_v0, %v8934_v37  ;;  %v3910_v48 = vsel %vm3150_vm0, %v3147_v53, 0.0  ;;  %v12937_v7 = vld [vmem:[#allocation26_spill] sm:$0xff]  ;;  %v5080_v57 = vperm.slane %v10363_v34, %v8975_v4  ;;  %v6572_v0 = vld [vmem:[%s12747_s1 + $0x588] sm:$0xff] }
 0x41b   : > { %v4117_v61 = vmul.f32 0.015625, %v3747_v5  ;;  %2222 = vmatmul.f32.gmra.mxu0 %v6569_v14  ;;  %2335 = vmatmul.f32.gmra.mxu1 %v6570_v11  ;;  %v10405_v28 = vmul.f32 0.015625, %v12937_v7  ;;  %v6571_v5 = vld [vmem:[%s12747_s1 + $0x580] sm:$0xff]  ;;  %v5448_v53 = vperm.slane %v4163_v13, %v8921_v54  ;;  %v717_v14 = vld [vmem:[%s6702_s26 + $0x790] sm:$0xff]  ;;  %v5050_v11 = vsel %vm4969_vm6, %v5049_v62, %v5048_v9 }
 0x41c   : > { %2448 = vmatmul.f32.gmra.mxu2 %v6571_v5  ;;  %2561 = vmatmul.f32.gmra.mxu3 %v6572_v0  ;;  %v12938_v7 = vld [vmem:[#allocation48_spill] sm:$0xff]  ;;  %v5079_v34 = vsel %vm4965_vm5, %v5078_v47, %v5077_v20  ;;  %v3621_v19 = vpop.xlane.xlu0 %3620  ;;  %v3772_v5 = vsel %vm3150_vm0, %v3101_v52, 0.0  ;;  %v5028_v47 = vperm.slane %v10372_v45, %v9012_v33  ;;  %v12940_v20 = vld [vmem:[#allocation31_spill] sm:$0xff]  ;;  %v5082_v31 = vperm.slane %v3974_v10, %v8959_v26 }
 0x41d   : > { %v5359_v55 = vperm.slane %v4117_v61, %v8975_v4  ;;  %v3959_v29 = vmul.f32 0.015625, %v12938_v7  ;;  %5547 = vmatpush.xpose.msrb.mxu2 %v4193_v24  ;;  %2586 = vmatpush.msra.mxu0 %v669_v43  ;;  %v5449_v13 = vsel %vm4961_vm4, %v5448_v53, %v10008_v22  ;;  %v4075_v62 = vmul.f32 0.015625, %v3621_v19  ;;  %v4177_v9 = vld [vmem:[%s12749_s3 + $0x10] sm:$0xff]  ;;  %v4178_v22 = vld [vmem:[%s12749_s3 + $0x18] sm:$0xff]  ;;  %v12942_v43 = vld [vmem:[#allocation38_spill] sm:$0xff] }
 0x41e   : > { %5567 = vmatpush.xpose.msrb.mxu3 %v4194_v32  ;;  %3911 = vadd.xlane.f32.xlu1 %v3910_v48  ;;  %v10434_v61 = vmul.f32 0.015625, %v12940_v20  ;;  %v12941_v19 = vperm.slane %v10314_v21, %v8999_v63  ;;  %v3960_v45 = vmul.f32 0.015625, %v12942_v43  ;;  %v5081_v52 = vsel %vm4969_vm6, %v5080_v57, %v5079_v34  ;;  %v3148_v48 = vld [vmem:[%s7346_s12 + $0x7f0] sm:$0xff]  ;;  %v12944_v7 = vld [vmem:[#allocation58_spill] sm:$0xff]  ;;  %v3720_v20 = vpop.xlane.xlu1 %3719  ;;  %v12945_v43 = vld [vmem:[#allocation43_spill] sm:$0xff] }
 0x41f   : > { %v10424_v0 = vsel %vm4969_vm6, %v5359_v55, %v5358_v6  ;;  %v5451_v6 = vsel %vm4965_vm5, %v5450_v18, %v5449_v13  ;;  %2699 = vmatpush.msra.mxu1 %v717_v14  ;;  %v5278_v18 = vperm.slane %v4075_v62, %v9052_v38  ;;  %v12943_v55 = vld [vmem:[#allocation36_spill] sm:$0xff]  ;;  %v5052_v14 = vsel %vm4973_vm7, %v5051_v41, %v5050_v11  ;;  %v6573_v11 = vld [vmem:[%s12747_s1 + $0x5a0] sm:$0xff] }
 0x420   : > { %v5027_v24 = vsel %vm4985_vm10, %v12941_v19, %v10360_v12  ;;  %v10448_v32 = vpop.f32.mrf.mxu0  ;;  %v10450_v10 = vpop.f32.mrf.mxu1  ;;  %3773 = vadd.xlane.f32.xlu2 %v3772_v5  ;;  %v3947_v53 = vmul.f32 0.015625, %v12943_v55  ;;  %v5053_v21 = vperm.slane %v3959_v29, %v8972_v15  ;;  %v3976_v12 = vmul.f32 0.015625, %v12944_v7  ;;  %v12947_v55 = vld [vmem:[#allocation39_spill] sm:$0xff] }
 0x421   : > { %5548 = vmatpush.xpose.msrb.mxu2 %v4177_v9  ;;  %v5084_v57 = vperm.slane %v3975_v30, %v8972_v15  ;;  %v10461_v34 = vsel %vm4993_vm12, %v5278_v18, %v10296_v3  ;;  %v4108_v5 = vmul.f32 0.015625, %v3720_v20  ;;  %v5029_v19 = vsel %vm4989_vm11, %v5028_v47, %v5027_v24  ;;  %v6574_v30 = vld [vmem:[%s12747_s1 + $0x5a8] sm:$0xff]  ;;  %v6576_v24 = vld [vmem:[%s12747_s1 + $0x5b8] sm:$0xff] }
 0x422   : > { %v3891_v13 = vpop.xlane.xlu2 %3890  ;;  %5568 = vmatpush.xpose.msrb.mxu3 %v4178_v22  ;;  %v3961_v41 = vmul.f32 0.015625, %v12945_v43  ;;  %v5083_v29 = vsel %vm4973_vm7, %v5082_v31, %v5081_v52  ;;  %v3913_v3 = vsel %vm3150_vm0, %v3148_v48, 0.0  ;;  %v5055_v9 = vperm.slane %v3960_v45, %v9015_v25  ;;  %v12946_v22 = vld [vmem:[#allocation66_spill] sm:$0xff]  ;;  %v6575_v31 = vld [vmem:[%s12747_s1 + $0x5b0] sm:$0xff] }
 0x423   : > { %v4165_v62 = vmul.f32 0.015625, %v3891_v13  ;;  %2225 = vmatmul.f32.gmra.mxu0 %v6573_v11  ;;  %2338 = vmatmul.f32.gmra.mxu1 %v6574_v30  ;;  %v3977_v47 = vmul.f32 0.015625, %v12946_v22  ;;  %v5342_v18 = vperm.slane %v4108_v5, %v9038_v36  ;;  %v5030_v48 = vperm.slane %v3947_v53, %v9052_v38  ;;  %v12949_v30 = vld [vmem:[#allocation56_spill] sm:$0xff] }
 0x424   : > { %2451 = vmatmul.f32.gmra.mxu2 %v6575_v31  ;;  %2564 = vmatmul.f32.gmra.mxu3 %v6576_v24  ;;  %v10485_v45 = vmul.f32 0.015625, %v12947_v55  ;;  %v5054_v7 = vsel %vm4977_vm8, %v5053_v21, %v5052_v14  ;;  %v5086_v13 = vperm.slane %v3976_v12, %v9015_v25  ;;  %v3789_v20 = vpop.xlane.xlu0 %3788  ;;  %v5085_v43 = vsel %vm4977_vm8, %v5084_v57, %v5083_v29  ;;  %v12948_v21 = vld [vmem:[#allocation51_spill] sm:$0xff] }
 0x425   : > { %v5452_v52 = vperm.slane %v4165_v62, %v8975_v4  ;;  %v10495_v62 = vsel %vm4997_vm13, %v5342_v18, %v10082_v44  ;;  %v4131_v53 = vmul.f32 0.015625, %v3789_v20  ;;  %v5032_v5 = vperm.slane %v10405_v28, %v9038_v36  ;;  %v3149_v28 = vld [vmem:[%s7346_s12 + $0x7f8] sm:$0xff] }
 0x426   : > { %3914 = vadd.xlane.f32.xlu1 %v3913_v3  ;;  %v5057_v14 = vperm.slane %v3961_v41, %v8999_v63  ;;  %v3962_v12 = vmul.f32 0.015625, %v12948_v21  ;;  %v3978_v22 = vmul.f32 0.015625, %v12949_v30  ;;  %v5034_v57 = vperm.slane %v10434_v61, %v9226_v56 }
 0x427   : > { %v10491_v11 = vsel %vm4969_vm6, %v5452_v52, %v5451_v6  ;;  %v5056_v6 = vsel %vm4981_vm9, %v5055_v9, %v5054_v7  ;;  %v5088_v29 = vperm.slane %v3977_v47, %v8999_v63  ;;  %v5386_v31 = vperm.slane %v4131_v53, %v8921_v54  ;;  %v12950_v52 = vld [vmem:[#allocation41_spill] sm:$0xff]  ;;  %v3846_v9 = vpop.xlane.xlu1 %3845 }
 0x428   : > { %v10506_v44 = vpop.f32.mrf.mxu0  ;;  %v10508_v3 = vpop.f32.mrf.mxu1  ;;  %v5031_v41 = vsel %vm4993_vm12, %v5030_v48, %v5029_v19  ;;  %v3963_v18 = vmul.f32 0.015625, %v12950_v52  ;;  %v5087_v61 = vsel %vm4981_vm9, %v5086_v13, %v5085_v43  ;;  %v12951_v7 = vld [vmem:[#allocation61_spill] sm:$0xff]  ;;  %v4150_v53 = vmul.f32 0.015625, %v3846_v9  ;;  %v6577_v13 = vld [vmem:[%s12747_s1 + $0x5d0] sm:$0xff] }
 0x429   : > { %v3979_v47 = vmul.f32 0.015625, %v12951_v7  ;;  %v10520_v20 = vsel %vm4961_vm4, %v5386_v31, %v10382_v50  ;;  %v5058_v30 = vsel %vm4985_vm10, %v5057_v14, %v5056_v6  ;;  %v5059_v19 = vperm.slane %v3962_v12, %v9012_v33  ;;  %v6578_v43 = vld [vmem:[%s12747_s1 + $0x5d8] sm:$0xff]  ;;  %v6579_v14 = vld [vmem:[%s12747_s1 + $0x5e0] sm:$0xff]  ;;  %v6580_v12 = vld [vmem:[%s12747_s1 + $0x5e8] sm:$0xff] }
 0x42a   : > { %v3750_v55 = vpop.xlane.xlu2 %3749  ;;  %v5090_v48 = vperm.slane %v3978_v22, %v9012_v33  ;;  %v3916_v50 = vsel %vm3150_vm0, %v3149_v28, 0.0  ;;  %v5089_v31 = vsel %vm4985_vm10, %v5088_v29, %v5087_v61  ;;  %v5423_v6 = vperm.slane %v4150_v53, %v8959_v26  ;;  %v12952_v28 = vld [vmem:[#allocation46_spill] sm:$0xff]  ;;  %v12953_v29 = vld [vmem:[#allocation69_spill] sm:$0xff] }
 0x42b   : > { %v4118_v21 = vmul.f32 0.015625, %v3750_v55  ;;  %2228 = vmatmul.f32.gmra.mxu0 %v6577_v13  ;;  %2341 = vmatmul.f32.gmra.mxu1 %v6578_v43  ;;  %v5061_v52 = vperm.slane %v3963_v18, %v9052_v38  ;;  %v3964_v55 = vmul.f32 0.015625, %v12952_v28  ;;  %v3980_v61 = vmul.f32 0.015625, %v12953_v29  ;;  %v12955_v28 = vld [vmem:[#allocation59_spill] sm:$0xff] }
 0x42c   : > { %2454 = vmatmul.f32.gmra.mxu2 %v6579_v14  ;;  %2567 = vmatmul.f32.gmra.mxu3 %v6580_v12  ;;  %v5033_v9 = vsel %vm4997_vm13, %v5032_v5, %v5031_v41  ;;  %v3624_v7 = vpop.xlane.xlu0 %3623  ;;  %v5092_v13 = vperm.slane %v3979_v47, %v9052_v38  ;;  %v5060_v18 = vsel %vm4989_vm11, %v5059_v19, %v5058_v30  ;;  %v12954_v14 = vld [vmem:[#allocation54_spill] sm:$0xff]  ;;  %v3981_v29 = vmul.f32 0.015625, %v12955_v28 }
 0x42d   : > { %v5361_v22 = vperm.slane %v4118_v21, %v8959_v26  ;;  %v10552_v21 = vsel %vm4973_vm7, %v5423_v6, %v10181_v39  ;;  %v4076_v53 = vmul.f32 0.015625, %v3624_v7  ;;  %v3965_v12 = vmul.f32 0.015625, %v12954_v14  ;;  %v3114_v41 = vld [vmem:[%s7346_s12 + $0x6e0] sm:$0xff] }
 0x42e   : > { %3917 = vadd.xlane.f32.xlu1 %v3916_v50  ;;  %v5091_v5 = vsel %vm4989_vm11, %v5090_v48, %v5089_v31  ;;  %v12956_v39 = vperm.slane %v10052_v27, %v9226_v56  ;;  %v5035_v50 = vsel %vm5001_vm14, %v5034_v57, %v5033_v9  ;;  %v3811_v19 = vsel %vm3150_vm0, %v3114_v41, 0.0  ;;  %v4420_v57 = vld [vmem:[%s12749_s3 + $0x7a8] sm:$0xff] }
 0x42f   : > { %v10548_v43 = vsel %vm4973_vm7, %v5361_v22, %v10424_v0  ;;  %v5280_v30 = vperm.slane %v4076_v53, %v9038_v36  ;;  %v5063_v22 = vperm.slane %v3964_v55, %v9038_v36  ;;  %v5094_v48 = vperm.slane %v3980_v61, %v9038_v36  ;;  %v10575_v6 = vpop.xlane.xlu1 %3722  ;;  %3812 = vadd.xlane.f32.xlu0 %v3811_v19  ;;  %v12957_v61 = vld [vmem:[#allocation44_spill] sm:$0xff] }
 0x430   : > { %v10559_v47 = vpop.f32.mrf.mxu0  ;;  %v10561_v24 = vpop.f32.mrf.mxu1  ;;  %v5002_v0 = vsel %vm5001_vm14, %v12956_v39, %v10260_v8  ;;  %v5062_v7 = vsel %vm4993_vm12, %v5061_v52, %v5060_v18  ;;  %v5093_v27 = vsel %vm4993_vm12, %v5092_v13, %v5091_v5  ;;  %v4419_v8 = vld [vmem:[%s12749_s3 + $0x7a0] sm:$0xff]  ;;  %v3966_v9 = vmul.f32 0.015625, %v12957_v61  ;;  %v12958_v53 = vld [vmem:[#allocation64_spill] sm:$0xff]  ;;  %v6582_v13 = vld [vmem:[%s12747_s1 + $0x28] sm:$0xff] }
 0x431   : > { %v10587_v55 = vsel %vm4997_vm13, %v5280_v30, %v10461_v34  ;;  %v3982_v14 = vmul.f32 0.015625, %v12958_v53  ;;  %v6581_v52 = vld [vmem:[%s12747_s1 + $0x20] sm:$0xff]  ;;  %v12959_v18 = vperm.slane %v10139_v49, %v9521_v60  ;;  %v12961_v28 = vperm.slane %v10485_v45, %v9521_v60  ;;  %v3115_v61 = vld [vmem:[%s7346_s12 + $0x6e8] sm:$0xff] }
 0x432   : > { %v10573_v31 = vpop.xlane.xlu2 %3893  ;;  %v5065_v41 = vperm.slane %v3965_v12, %v9226_v56  ;;  %v5096_v39 = vperm.slane %v3981_v29, %v9226_v56  ;;  %v5095_v49 = vsel %vm4997_vm13, %v5094_v48, %v5093_v27  ;;  %v4403_v45 = vld [vmem:[%s12749_s3 + $0x720] sm:$0xff]  ;;  %v4404_v12 = vld [vmem:[%s12749_s3 + $0x728] sm:$0xff] }
 0x433   : > { %2587 = vmatmul.f32.vlgmr.msra.gmra.mxu0 %v6581_v52  ;;  %2700 = vmatmul.f32.vlgmr.msra.gmra.mxu1 %v6582_v13  ;;  %v10601_v34 = vsel %vm5005_vm15, %v12959_v18, %v5002_v0  ;;  %v10607_v5 = vsel %vm5005_vm15, %v12961_v28, %v5035_v50  ;;  %v5064_v0 = vsel %vm4997_vm13, %v5063_v22, %v5062_v7 }
 0x434   : > { %12960 = vst [vmem:[#allocation24_spill] sm:$0xff] %v10601_v34  ;;  %5509 = vmatmul.f32.vlgmr.msra.gmra.mxu2 %v10601_v34  ;;  %5529 = vmatmul.f32.vlgmr.msra.gmra.mxu3 %v10607_v5  ;;  %v3792_v30 = vpop.xlane.xlu0 %3791  ;;  %v5067_v50 = vperm.slane %v3966_v9, %v9521_v60  ;;  %v5098_v19 = vperm.slane %v3982_v14, %v9521_v60  ;;  %v4387_v9 = vld [vmem:[%s12749_s3 + $0x6a0] sm:$0xff]  ;;  %v4388_v14 = vld [vmem:[%s12749_s3 + $0x6a8] sm:$0xff] }
 0x435   : > { %12962 = vst [vmem:[#allocation19_spill] sm:$0xff] %v10607_v5  ;;  %5573 = vmatpush.xpose.msra.mxu2 %v4419_v8  ;;  %5593 = vmatpush.xpose.msra.mxu3 %v4420_v57  ;;  %v4132_v29 = vmul.f32 0.015625, %v3792_v30  ;;  %v5066_v22 = vsel %vm5001_vm14, %v5065_v41, %v5064_v0  ;;  %v5097_v7 = vsel %vm5001_vm14, %v5096_v39, %v5095_v49  ;;  %v3814_v57 = vsel %vm3150_vm0, %v3115_v61, 0.0  ;;  %v6583_v41 = vld [vmem:[%s12747_s1 + $0x50] sm:$0xff]  ;;  %v6584_v39 = vld [vmem:[%s12747_s1 + $0x58] sm:$0xff] }
 0x436   : > { %v10647_v49 = vsel %vm5005_vm15, %v5067_v50, %v5066_v22  ;;  %v12965_v22 = vld [vmem:[#allocation62_spill] sm:$0xff] }
 0x437   : > { %v5388_v8 = vperm.slane %v4132_v29, %v8934_v37  ;;  %v3849_v52 = vpop.xlane.xlu1 %3848  ;;  %3815 = vadd.xlane.f32.xlu0 %v3814_v57  ;;  %12963 = vst [vmem:[#allocation18_spill] sm:$0xff] %v10647_v49  ;;  %v4372_v29 = vld [vmem:[%s12749_s3 + $0x628] sm:$0xff] }
 0x438   : > { %v10624_v48 = vpop.f32.mrf.mxu0  ;;  %v10626_v27 = vpop.f32.mrf.mxu1  ;;  %v4151_v28 = vmul.f32 0.015625, %v3849_v52 }
 0x439   : > { %5574 = vmatpush.xpose.msra.mxu2 %v4403_v45  ;;  %5594 = vmatpush.xpose.msra.mxu3 %v4404_v12  ;;  %v5389_v13 = vsel %vm4965_vm5, %v5388_v8, %v10520_v20  ;;  %v10650_v20 = vsel %vm5005_vm15, %v5098_v19, %v5097_v7  ;;  %v3116_v45 = vld [vmem:[%s7346_s12 + $0x6f0] sm:$0xff]  ;;  %v4371_v12 = vld [vmem:[%s12749_s3 + $0x620] sm:$0xff]  ;;  %v3984_v7 = vmul.f32 0.015625, %v12965_v22  ;;  %v3117_v8 = vld [vmem:[%s7346_s12 + $0x6f8] sm:$0xff] }
 0x43a   : > { %v3795_v53 = vpop.xlane.xlu2 %3794  ;;  %12964 = vst [vmem:[#allocation27_spill] sm:$0xff] %v10650_v20  ;;  %v5425_v30 = vperm.slane %v4151_v28, %v8972_v15  ;;  %v3817_v61 = vsel %vm3150_vm0, %v3116_v45, 0.0  ;;  %v3820_v52 = vsel %vm3150_vm0, %v3117_v8, 0.0  ;;  %v12968_v28 = vld [vmem:[#allocation82_spill] sm:$0xff]  ;;  %vm2799_vm0 = vcmask 269312  }
 0x43b   : > { %v4133_v18 = vmul.f32 0.015625, %v3795_v53  ;;  %2590 = vmatmul.f32.gmra.mxu0 %v6583_v41  ;;  %2703 = vmatmul.f32.gmra.mxu1 %v6584_v39  ;;  %v4000_v41 = vmul.f32 0.015625, %v12968_v28  ;;  %v5101_v8 = vperm.slane %v3984_v7, %v8881_v59  ;;  %v12970_v28 = vld [vmem:[#allocation90_spill] sm:$0xff] }
 0x43c   : > { %5549 = vmatmul.f32.vlgmr.msrb.gmra.mxu2 %v10647_v49  ;;  %5569 = vmatmul.f32.vlgmr.msrb.gmra.mxu3 %v10650_v20  ;;  %v10668_v19 = vsel %vm4977_vm8, %v5425_v30, %v10552_v21  ;;  %v3627_v21 = vpop.xlane.xlu0 %3626  ;;  %v4356_v30 = vld [vmem:[%s12749_s3 + $0x5a8] sm:$0xff] }
 0x43d   : > { %v5390_v0 = vperm.slane %v4133_v18, %v8975_v4  ;;  %5575 = vmatpush.xpose.msra.mxu2 %v4387_v9  ;;  %5595 = vmatpush.xpose.msra.mxu3 %v4388_v14  ;;  %v12966_v9 = vld [vmem:[#allocation72_spill] sm:$0xff]  ;;  %v4077_v45 = vmul.f32 0.015625, %v3627_v21  ;;  %v4001_v21 = vmul.f32 0.015625, %v12970_v28  ;;  %v5132_v34 = vperm.slane %v4000_v41, %v8881_v59 }
 0x43e   : > { %3818 = vadd.xlane.f32.xlu2 %v3817_v61  ;;  %v3983_v14 = vmul.f32 0.015625, %v12966_v9  ;;  %v12969_v9 = vld [vmem:[#allocation67_spill] sm:$0xff] }
 0x43f   : > { %v10664_v50 = vsel %vm4969_vm6, %v5390_v0, %v5389_v13  ;;  %v12967_v13 = vld [vmem:[#allocation77_spill] sm:$0xff]  ;;  %v4355_v0 = vld [vmem:[%s12749_s3 + $0x5a0] sm:$0xff]  ;;  %v10687_v22 = vpop.xlane.xlu1 %3725  ;;  %3821 = vadd.xlane.f32.xlu0 %v3820_v52 }
 0x440   : > { %v10673_v57 = vpop.f32.mrf.mxu0  ;;  %v10675_v53 = vpop.f32.mrf.mxu1  ;;  %v3999_v18 = vmul.f32 0.015625, %v12967_v13  ;;  %v3985_v13 = vmul.f32 0.015625, %v12969_v9  ;;  %v5100_v7 = vperm.slane %v3983_v14, %v8872_v35  ;;  %v12972_v14 = vld [vmem:[#allocation80_spill] sm:$0xff] }
 0x441   : > { %5576 = vmatpush.xpose.msra.mxu2 %v4371_v12  ;;  %5596 = vmatpush.xpose.msra.mxu3 %v4372_v29  ;;  %v6585_v12 = vld [vmem:[%s12747_s1 + $0x80] sm:$0xff]  ;;  %v6586_v29 = vld [vmem:[%s12747_s1 + $0x88] sm:$0xff]  ;;  %v4002_v28 = vmul.f32 0.015625, %v12972_v14 }
 0x442   : > { %v3630_v39 = vpop.xlane.xlu2 %3629  ;;  %v5131_v5 = vperm.slane %v3999_v18, %v8872_v35  ;;  %v5103_v59 = vperm.slane %v3985_v13, %v8890_v17  ;;  %v5134_v18 = vperm.slane %v4001_v21, %v8890_v17  ;;  %v4323_v17 = vld [vmem:[%s12749_s3 + $0x4a0] sm:$0xff]  ;;  %v4324_v13 = vld [vmem:[%s12749_s3 + $0x4a8] sm:$0xff] }
 0x443   : > { %v4078_v61 = vmul.f32 0.015625, %v3630_v39  ;;  %2593 = vmatmul.f32.gmra.mxu0 %v6585_v12  ;;  %2706 = vmatmul.f32.gmra.mxu1 %v6586_v29  ;;  %v5282_v39 = vperm.slane %v4077_v45, %v9226_v56  ;;  %v4339_v12 = vld [vmem:[%s12749_s3 + $0x520] sm:$0xff]  ;;  %v4340_v29 = vld [vmem:[%s12749_s3 + $0x528] sm:$0xff] }
 0x444   : > { %v5133_v20 = vsel %vm4949_vm1, %v5132_v34, %v5131_v5  ;;  %v5136_v34 = vperm.slane %v4002_v28, %v8937_v42  ;;  %v6587_v5 = vld [vmem:[%s12747_s1 + $0xb0] sm:$0xff] }
 0x445   : > { %v5284_v52 = vperm.slane %v4078_v61, %v9521_v60  ;;  %5577 = vmatpush.xpose.msra.mxu2 %v4355_v0  ;;  %5597 = vmatpush.xpose.msra.mxu3 %v4356_v30  ;;  %v5283_v45 = vsel %vm5001_vm14, %v5282_v39, %v10587_v55  ;;  %v12971_v61 = vld [vmem:[#allocation75_spill] sm:$0xff]  ;;  %v5102_v30 = vsel %vm4949_vm1, %v5101_v8, %v5100_v7  ;;  %v10724_v55 = vpop.xlane.xlu0 %3854  ;;  %v12974_v39 = vld [vmem:[#allocation65_spill] sm:$0xff]  ;;  %vm6136_vm1 = vcmask 1040384  }
 0x446   : > { %v3986_v9 = vmul.f32 0.015625, %v12971_v61  ;;  %v3987_v61 = vmul.f32 0.015625, %v12974_v39  ;;  %v6588_v7 = vld [vmem:[%s12747_s1 + $0xb8] sm:$0xff]  ;;  %v5135_v14 = vsel %vm4953_vm2, %v5134_v18, %v5133_v20  ;;  %v12976_v39 = vld [vmem:[#allocation70_spill] sm:$0xff]  ;;  %v4308_v20 = vld [vmem:[%s12749_s3 + $0x428] sm:$0xff] }
 0x447   : > { %v10714_v35 = vsel %vm5005_vm15, %v5284_v52, %v5283_v45  ;;  %v12975_v52 = vld [vmem:[#allocation85_spill] sm:$0xff]  ;;  %v3852_v21 = vpop.xlane.xlu1 %3851  ;;  %v5137_v18 = vsel %vm4957_vm3, %v5136_v34, %v5135_v14  ;;  %v4292_v14 = vld [vmem:[%s12749_s3 + $0x3a8] sm:$0xff] }
 0x448   : > { %v10718_v41 = vpop.f32.mrf.mxu0  ;;  %v10720_v0 = vpop.f32.mrf.mxu1  ;;  %v4003_v45 = vmul.f32 0.015625, %v12975_v52  ;;  %v5105_v8 = vperm.slane %v3986_v9, %v8937_v42  ;;  %v3988_v52 = vmul.f32 0.015625, %v12976_v39  ;;  %v12977_v9 = vld [vmem:[#allocation93_spill] sm:$0xff]  ;;  %v5107_v28 = vperm.slane %v3987_v61, %v8921_v54 }
 0x449   : > { %12973 = vst [vmem:[#allocation8_spill] sm:$0xff] %v10720_v0  ;;  %5578 = vmatpush.xpose.msra.mxu2 %v4339_v12  ;;  %5598 = vmatpush.xpose.msra.mxu3 %v4340_v29  ;;  %v4152_v12 = vmul.f32 0.015625, %v3852_v21  ;;  %v5104_v29 = vsel %vm4953_vm2, %v5103_v59, %v5102_v30  ;;  %v4004_v49 = vmul.f32 0.015625, %v12977_v9  ;;  %v4307_v21 = vld [vmem:[%s12749_s3 + $0x420] sm:$0xff] }
 0x44a   : > { %v5106_v59 = vsel %vm4957_vm3, %v5105_v8, %v5104_v29  ;;  %v4291_v29 = vld [vmem:[%s12749_s3 + $0x3a0] sm:$0xff] }
 0x44b   : > { %2596 = vmatmul.f32.gmra.mxu0 %v6587_v5  ;;  %2709 = vmatmul.f32.gmra.mxu1 %v6588_v7  ;;  %v5427_v42 = vperm.slane %v4152_v12, %v9015_v25  ;;  %v5138_v5 = vperm.slane %v4003_v45, %v8921_v54  ;;  %v5109_v12 = vperm.slane %v3988_v52, %v8934_v37  ;;  %v12982_v52 = vld [vmem:[#allocation68_spill] sm:$0xff]  ;;  %v4187_v0 = vld [vmem:[%s12749_s3 + $0x60] sm:$0xff] }
 0x44c   : > { %v5140_v39 = vperm.slane %v4004_v49, %v8934_v37  ;;  %v5108_v34 = vsel %vm4961_vm4, %v5107_v28, %v5106_v59  ;;  %v12983_v37 = vld [vmem:[#allocation88_spill] sm:$0xff]  ;;  %v6589_v28 = vld [vmem:[%s12747_s1 + $0xe0] sm:$0xff] }
 0x44d   : > { %5579 = vmatpush.xpose.msra.mxu2 %v4323_v17  ;;  %5599 = vmatpush.xpose.msra.mxu3 %v4324_v13  ;;  %v10759_v30 = vsel %vm4981_vm9, %v5427_v42, %v10668_v19  ;;  %v12978_v17 = vld [vmem:[#allocation78_spill] sm:$0xff]  ;;  %v12979_v13 = vld [vmem:[#allocation83_spill] sm:$0xff]  ;;  %v3756_v8 = vpop.xlane.xlu0 %3755  ;;  %v5139_v19 = vsel %vm4961_vm4, %v5138_v5, %v5137_v18  ;;  %v4006_v49 = vmul.f32 0.015625, %v12983_v37  ;;  %v4166_v18 = vmul.f32 0.015625, %v10573_v31 }
 0x44e   : > { %v3989_v61 = vmul.f32 0.015625, %v12978_v17  ;;  %v4005_v54 = vmul.f32 0.015625, %v12979_v13  ;;  %v4120_v42 = vmul.f32 0.015625, %v3756_v8  ;;  %v3990_v17 = vmul.f32 0.015625, %v12982_v52  ;;  %v6590_v5 = vld [vmem:[%s12747_s1 + $0xe8] sm:$0xff] }
 0x44f   : > { %v3753_v9 = vpop.xlane.xlu1 %3752  ;;  %v5110_v8 = vsel %vm4965_vm5, %v5109_v12, %v5108_v34  ;;  %v5141_v52 = vsel %vm4965_vm5, %v5140_v39, %v5139_v19  ;;  %v4276_v31 = vld [vmem:[%s12749_s3 + $0x328] sm:$0xff]  ;;  %v5454_v19 = vperm.slane %v4166_v18, %v8959_v26 }
 0x450   : > { %v10763_v45 = vpop.f32.mrf.mxu0  ;;  %v10765_v7 = vpop.f32.mrf.mxu1  ;;  %v5142_v59 = vperm.slane %v4005_v54, %v8975_v4  ;;  %v5365_v13 = vperm.slane %v4120_v42, %v9015_v25  ;;  %v5144_v54 = vperm.slane %v4006_v49, %v8959_v26  ;;  %v4260_v18 = vld [vmem:[%s12749_s3 + $0x2a8] sm:$0xff] }
 0x451   : > { %12980 = vst [vmem:[#allocation17_spill] sm:$0xff] %v10763_v45  ;;  %5580 = vmatpush.xpose.msra.mxu2 %v4307_v21  ;;  %5600 = vmatpush.xpose.msra.mxu3 %v4308_v20  ;;  %v4119_v21 = vmul.f32 0.015625, %v3753_v9  ;;  %v5111_v20 = vperm.slane %v3989_v61, %v8975_v4  ;;  %v4275_v4 = vld [vmem:[%s12749_s3 + $0x320] sm:$0xff]  ;;  %v5113_v61 = vperm.slane %v3990_v17, %v8959_v26  ;;  %v4153_v45 = vmul.f32 0.015625, %v10724_v55 }
 0x452   : > { %12981 = vst [vmem:[#allocation13_spill] sm:$0xff] %v10765_v7  ;;  %v5143_v34 = vsel %vm4969_vm6, %v5142_v59, %v5141_v52  ;;  %v4259_v59 = vld [vmem:[%s12749_s3 + $0x2a0] sm:$0xff] }
 0x453   : > { %2599 = vmatmul.f32.gmra.mxu0 %v6589_v28  ;;  %2712 = vmatmul.f32.gmra.mxu1 %v6590_v5  ;;  %v5363_v37 = vperm.slane %v4119_v21, %v8972_v15  ;;  %v12984_v28 = vld [vmem:[#allocation73_spill] sm:$0xff]  ;;  %v12985_v5 = vld [vmem:[#allocation95_spill] sm:$0xff]  ;;  %v5112_v39 = vsel %vm4969_vm6, %v5111_v20, %v5110_v8  ;;  %v5145_v52 = vsel %vm4973_vm7, %v5144_v54, %v5143_v34 }
 0x454   : > { %v3991_v7 = vmul.f32 0.015625, %v12984_v28  ;;  %v4007_v9 = vmul.f32 0.015625, %v12985_v5  ;;  %v12988_v21 = vld [vmem:[#allocation81_spill] sm:$0xff]  ;;  %v12989_v28 = vld [vmem:[#allocation86_spill] sm:$0xff]  ;;  %v5114_v8 = vsel %vm4973_vm7, %v5113_v61, %v5112_v39  ;;  %v5455_v61 = vsel %vm4973_vm7, %v5454_v19, %v10491_v11  ;;  %v4244_v11 = vld [vmem:[%s12749_s3 + $0x228] sm:$0xff] }
 0x455   : > { %5581 = vmatpush.xpose.msra.mxu2 %v4291_v29  ;;  %5601 = vmatpush.xpose.msra.mxu3 %v4292_v14  ;;  %v5364_v12 = vsel %vm4977_vm8, %v5363_v37, %v10548_v43  ;;  %v3992_v17 = vmul.f32 0.015625, %v12988_v21  ;;  %v4008_v49 = vmul.f32 0.015625, %v12989_v28  ;;  %v6591_v37 = vld [vmem:[%s12747_s1 + $0x110] sm:$0xff] }
 0x456   : > { %v10812_v42 = vsel %vm4981_vm9, %v5365_v13, %v5364_v12  ;;  %v5115_v43 = vperm.slane %v3991_v7, %v8972_v15  ;;  %v5146_v20 = vperm.slane %v4007_v9, %v8972_v15  ;;  %v6592_v7 = vld [vmem:[%s12747_s1 + $0x118] sm:$0xff]  ;;  %v12990_v9 = vld [vmem:[#allocation71_spill] sm:$0xff]  ;;  %v12992_v19 = vld [vmem:[#allocation76_spill] sm:$0xff] }
 0x457   : > { %v3897_v13 = vpop.xlane.xlu1 %3896  ;;  %v5117_v54 = vperm.slane %v3992_v17, %v9015_v25  ;;  %v5148_v39 = vperm.slane %v4008_v49, %v9015_v25  ;;  %v3994_v17 = vmul.f32 0.015625, %v12992_v19 }
 0x458   : > { %v10807_v29 = vpop.f32.mrf.mxu0  ;;  %v10809_v14 = vpop.f32.mrf.mxu1  ;;  %v4167_v5 = vmul.f32 0.015625, %v3897_v13  ;;  %v5116_v21 = vsel %vm4977_vm8, %v5115_v43, %v5114_v8  ;;  %v5147_v28 = vsel %vm4977_vm8, %v5146_v20, %v5145_v52  ;;  %v4243_v13 = vld [vmem:[%s12749_s3 + $0x220] sm:$0xff] }
 0x459   : > { %12986 = vst [vmem:[#allocation22_spill] sm:$0xff] %v10807_v29  ;;  %5582 = vmatpush.xpose.msra.mxu2 %v4275_v4  ;;  %5602 = vmatpush.xpose.msra.mxu3 %v4276_v31  ;;  %v3993_v4 = vmul.f32 0.015625, %v12990_v9  ;;  %v12991_v31 = vld [vmem:[#allocation91_spill] sm:$0xff]  ;;  %v5118_v52 = vsel %vm4981_vm9, %v5117_v54, %v5116_v21 }
 0x45a   : > { %12987 = vst [vmem:[#allocation11_spill] sm:$0xff] %v10809_v14  ;;  %v4009_v12 = vmul.f32 0.015625, %v12991_v31  ;;  %v5456_v34 = vperm.slane %v4167_v5, %v8972_v15  ;;  %v12996_v5 = vld [vmem:[#allocation84_spill] sm:$0xff]  ;;  %v12997_v31 = vld [vmem:[#allocation89_spill] sm:$0xff]  ;;  %v6594_v21 = vld [vmem:[%s12747_s1 + $0x148] sm:$0xff] }
 0x45b   : > { %2602 = vmatmul.f32.gmra.mxu0 %v6591_v37  ;;  %2715 = vmatmul.f32.gmra.mxu1 %v6592_v7  ;;  %v12993_v37 = vld [vmem:[#allocation96_spill] sm:$0xff]  ;;  %v5149_v7 = vsel %vm4981_vm9, %v5148_v39, %v5147_v28  ;;  %v3995_v9 = vmul.f32 0.015625, %v12996_v5  ;;  %v4011_v19 = vmul.f32 0.015625, %v12997_v31  ;;  %v6593_v39 = vld [vmem:[%s12747_s1 + $0x140] sm:$0xff] }
 0x45c   : > { %v4010_v49 = vmul.f32 0.015625, %v12993_v37  ;;  %v5150_v43 = vperm.slane %v4009_v12, %v8999_v63  ;;  %v4228_v12 = vld [vmem:[%s12749_s3 + $0x1a8] sm:$0xff]  ;;  %v12998_v37 = vld [vmem:[#allocation74_spill] sm:$0xff] }
 0x45d   : > { %5583 = vmatpush.xpose.msra.mxu2 %v4259_v59  ;;  %5603 = vmatpush.xpose.msra.mxu3 %v4260_v18  ;;  %v10850_v59 = vsel %vm4977_vm8, %v5456_v34, %v5455_v61  ;;  %v5119_v18 = vperm.slane %v3993_v4, %v8999_v63  ;;  %v4227_v4 = vld [vmem:[%s12749_s3 + $0x1a0] sm:$0xff]  ;;  %v5121_v34 = vperm.slane %v3994_v17, %v9012_v33  ;;  %v3996_v5 = vmul.f32 0.015625, %v12998_v37 }
 0x45e   : > { %v5152_v54 = vperm.slane %v4010_v49, %v9012_v33  ;;  %v12999_v17 = vld [vmem:[#allocation94_spill] sm:$0xff] }
 0x45f   : > { %v3798_v61 = vpop.xlane.xlu1 %3797  ;;  %v4012_v31 = vmul.f32 0.015625, %v12999_v17  ;;  %v13004_v17 = vld [vmem:[#allocation87_spill] sm:$0xff] }
 0x460   : > { %v10854_v20 = vpop.f32.mrf.mxu0  ;;  %v10856_v8 = vpop.f32.mrf.mxu1  ;;  %v4134_v28 = vmul.f32 0.015625, %v3798_v61  ;;  %v4211_v61 = vld [vmem:[%s12749_s3 + $0x120] sm:$0xff] }
 0x461   : > { %12994 = vst [vmem:[#allocation20_spill] sm:$0xff] %v10854_v20  ;;  %5584 = vmatpush.xpose.msra.mxu2 %v4243_v13  ;;  %5604 = vmatpush.xpose.msra.mxu3 %v4244_v11  ;;  %v5120_v13 = vsel %vm4985_vm10, %v5119_v18, %v5118_v52  ;;  %v5151_v11 = vsel %vm4985_vm10, %v5150_v43, %v5149_v7  ;;  %v4212_v18 = vld [vmem:[%s12749_s3 + $0x128] sm:$0xff] }
 0x462   : > { %12995 = vst [vmem:[#allocation30_spill] sm:$0xff] %v10856_v8  ;;  %v5392_v49 = vperm.slane %v4134_v28, %v8959_v26  ;;  %v5154_v8 = vperm.slane %v4011_v19, %v9052_v38  ;;  %v5122_v43 = vsel %vm4989_vm11, %v5121_v34, %v5120_v13  ;;  %v5153_v52 = vsel %vm4989_vm11, %v5152_v54, %v5151_v11  ;;  %v13000_v26 = vld [vmem:[#allocation79_spill] sm:$0xff] }
 0x463   : > { %2605 = vmatmul.f32.gmra.mxu0 %v6593_v39  ;;  %2718 = vmatmul.f32.gmra.mxu1 %v6594_v21  ;;  %v5123_v39 = vperm.slane %v3995_v9, %v9052_v38  ;;  %v3997_v9 = vmul.f32 0.015625, %v13000_v26  ;;  %v5125_v28 = vperm.slane %v3996_v5, %v9038_v36  ;;  %v5156_v37 = vperm.slane %v4012_v31, %v9038_v36  ;;  %v4196_v13 = vld [vmem:[%s12749_s3 + $0xa8] sm:$0xff]  ;;  %v13005_v5 = vld [vmem:[#allocation92_spill] sm:$0xff] }
 0x464   : > { %v10893_v7 = vsel %vm4973_vm7, %v5392_v49, %v10664_v50  ;;  %v5155_v54 = vsel %vm4993_vm12, %v5154_v8, %v5153_v52  ;;  %v4195_v50 = vld [vmem:[%s12749_s3 + $0xa0] sm:$0xff]  ;;  %v3998_v49 = vmul.f32 0.015625, %v13004_v17  ;;  %v4014_v26 = vmul.f32 0.015625, %v13005_v5  ;;  %v6595_v31 = vld [vmem:[%s12747_s1 + $0x170] sm:$0xff]  ;;  %v6596_v8 = vld [vmem:[%s12747_s1 + $0x178] sm:$0xff] }
 0x465   : > { %5585 = vmatpush.xpose.msra.mxu2 %v4227_v4  ;;  %5605 = vmatpush.xpose.msra.mxu3 %v4228_v12  ;;  %v13001_v4 = vld [vmem:[#allocation97_spill] sm:$0xff]  ;;  %v5124_v34 = vsel %vm4993_vm12, %v5123_v39, %v5122_v43  ;;  %v5157_v52 = vsel %vm4997_vm13, %v5156_v37, %v5155_v54  ;;  %v4179_v17 = vld [vmem:[%s12749_s3 + $0x20] sm:$0xff] }
 0x466   : > { %v4013_v19 = vmul.f32 0.015625, %v13001_v4  ;;  %v5126_v43 = vsel %vm4997_vm13, %v5125_v28, %v5124_v34  ;;  %v4421_v28 = vld [vmem:[%s12749_s3 + $0x7b0] sm:$0xff]  ;;  %v4422_v37 = vld [vmem:[%s12749_s3 + $0x7b8] sm:$0xff] }
 0x467   : > { %v3759_v11 = vpop.xlane.xlu1 %3758 }
 0x468   : > { %v10897_v12 = vpop.f32.mrf.mxu0  ;;  %v10899_v21 = vpop.f32.mrf.mxu1  ;;  %v4121_v39 = vmul.f32 0.015625, %v3759_v11  ;;  %v4180_v11 = vld [vmem:[%s12749_s3 + $0x28] sm:$0xff] }
 0x469   : > { %13002 = vst [vmem:[#allocation29_spill] sm:$0xff] %v10897_v12  ;;  %5586 = vmatpush.xpose.msra.mxu2 %v4211_v61  ;;  %5606 = vmatpush.xpose.msra.mxu3 %v4212_v18  ;;  %v5127_v61 = vperm.slane %v3997_v9, %v9226_v56  ;;  %v5158_v18 = vperm.slane %v4013_v19, %v9226_v56 }
 0x46a   : > { %13003 = vst [vmem:[#allocation34_spill] sm:$0xff] %v10899_v21  ;;  %v5367_v4 = vperm.slane %v4121_v39, %v8999_v63  ;;  %v5129_v9 = vperm.slane %v3998_v49, %v9521_v60  ;;  %v5160_v19 = vperm.slane %v4014_v26, %v9521_v60  ;;  %v4406_v39 = vld [vmem:[%s12749_s3 + $0x738] sm:$0xff] }
 0x46b   : > { %2608 = vmatmul.f32.gmra.mxu0 %v6595_v31  ;;  %2721 = vmatmul.f32.gmra.mxu1 %v6596_v8  ;;  %v5159_v49 = vsel %vm5001_vm14, %v5158_v18, %v5157_v52  ;;  %v6598_v31 = vld [vmem:[%s12747_s1 + $0x1a8] sm:$0xff]  ;;  %v4405_v8 = vld [vmem:[%s12749_s3 + $0x730] sm:$0xff]  ;;  %v10968_v18 = vpop.f32.mrf.mxu3  ;;  %v4390_v52 = vld [vmem:[%s12749_s3 + $0x6b8] sm:$0xff] }
 0x46c   : > { %v10940_v34 = vsel %vm4985_vm10, %v5367_v4, %v10812_v42  ;;  %v10952_v26 = vsel %vm5005_vm15, %v5160_v19, %v5159_v49  ;;  %v6597_v42 = vld [vmem:[%s12747_s1 + $0x1a0] sm:$0xff]  ;;  %v4373_v19 = vld [vmem:[%s12749_s3 + $0x630] sm:$0xff] }
 0x46d   : > { %5587 = vmatpush.xpose.msra.mxu2 %v4195_v50  ;;  %5607 = vmatpush.xpose.msra.mxu3 %v4196_v13  ;;  %v5128_v13 = vsel %vm5001_vm14, %v5127_v61, %v5126_v43  ;;  %13009 = vst [vmem:[#allocation42_spill] sm:$0xff] %v10952_v26  ;;  %v10966_v61 = vpop.f32.mrf.mxu2  ;;  %v4389_v43 = vld [vmem:[%s12749_s3 + $0x6b0] sm:$0xff] }
 0x46e   : > { %v10949_v5 = vsel %vm5005_vm15, %v5129_v9, %v5128_v13  ;;  %v6600_v9 = vld [vmem:[%s12747_s1 + $0x1d8] sm:$0xff] }
 0x46f   : > { %13008 = vst [vmem:[#allocation16_spill] sm:$0xff] %v10949_v5  ;;  %v4358_v13 = vld [vmem:[%s12749_s3 + $0x5b8] sm:$0xff] }
 0x470   : > { %v10942_v54 = vpop.f32.mrf.mxu0  ;;  %v10944_v50 = vpop.f32.mrf.mxu1 }
 0x471   : > { %13006 = vst [vmem:[#allocation21_spill] sm:$0xff] %v10942_v54  ;;  %5588 = vmatpush.xpose.msra.mxu2 %v4179_v17  ;;  %5608 = vmatpush.xpose.msra.mxu3 %v4180_v11  ;;  %v6599_v11 = vld [vmem:[%s12747_s1 + $0x1d0] sm:$0xff] }
 0x472   : > { %13007 = vst [vmem:[#allocation25_spill] sm:$0xff] %v10944_v50 }
 0x473   : > { %2611 = vmatmul.f32.gmra.mxu0 %v6597_v42  ;;  %2724 = vmatmul.f32.gmra.mxu1 %v6598_v31  ;;  %v4423_v31 = vld [vmem:[%s12749_s3 + $0x7c0] sm:$0xff] }
 0x474   : > { %5589 = vmatmul.f32.vlgmr.msra.gmra.mxu2 %v10949_v5  ;;  %5609 = vmatmul.f32.vlgmr.msra.gmra.mxu3 %v10952_v26  ;;  %v4391_v5 = vld [vmem:[%s12749_s3 + $0x6c0] sm:$0xff] }
 0x475   : > { %5613 = vmatpush.xpose.msrb.mxu2 %v4421_v28  ;;  %5633 = vmatpush.xpose.msrb.mxu3 %v4422_v37  ;;  %v4374_v28 = vld [vmem:[%s12749_s3 + $0x638] sm:$0xff]  ;;  %v4357_v37 = vld [vmem:[%s12749_s3 + $0x5b0] sm:$0xff] }
 0x476   : > { %5653 = vmatpush.xpose.msrb.mxu0 %v4423_v31  ;;  %v6604_v31 = vld [vmem:[%s12747_s1 + $0x238] sm:$0xff] }
 0x478   : > { %v10978_v4 = vpop.f32.mrf.mxu0  ;;  %v10980_v17 = vpop.f32.mrf.mxu1 }
 0x479   : > { %5614 = vmatpush.xpose.msrb.mxu2 %v4405_v8  ;;  %5634 = vmatpush.xpose.msrb.mxu3 %v4406_v39  ;;  %13010 = vst [vmem:[#allocation49_spill] sm:$0xff] %v10978_v4  ;;  %v6601_v8 = vld [vmem:[%s12747_s1 + $0x200] sm:$0xff]  ;;  %v6602_v39 = vld [vmem:[%s12747_s1 + $0x208] sm:$0xff]  ;;  %v13033_v4 = vld [vmem:[#allocation101_spill] sm:$0xff] }
 0x47a   : > { %13011 = vst [vmem:[#allocation57_spill] sm:$0xff] %v10980_v17 }
 0x47b   : > { %2614 = vmatmul.f32.gmra.mxu0 %v6599_v11  ;;  %2727 = vmatmul.f32.gmra.mxu1 %v6600_v9  ;;  %v4424_v11 = vld [vmem:[%s12749_s3 + $0x7c8] sm:$0xff]  ;;  %v4325_v9 = vld [vmem:[%s12749_s3 + $0x4b0] sm:$0xff] }
 0x47c   : > { %5673 = vmatpush.xpose.msrb.mxu1 %v4424_v11 }
 0x47d   : > { %5615 = vmatpush.xpose.msrb.mxu2 %v4389_v43  ;;  %5635 = vmatpush.xpose.msrb.mxu3 %v4390_v52  ;;  %v4341_v43 = vld [vmem:[%s12749_s3 + $0x530] sm:$0xff]  ;;  %v4342_v52 = vld [vmem:[%s12749_s3 + $0x538] sm:$0xff] }
 0x480   : > { %v11000_v49 = vpop.f32.mrf.mxu0  ;;  %v11002_v42 = vpop.f32.mrf.mxu1 }
 0x481   : > { %5616 = vmatpush.xpose.msrb.mxu2 %v4373_v19  ;;  %5636 = vmatpush.xpose.msrb.mxu3 %v4374_v28  ;;  %13012 = vst [vmem:[#allocation32_spill] sm:$0xff] %v11000_v49  ;;  %v4326_v19 = vld [vmem:[%s12749_s3 + $0x4b8] sm:$0xff] }
 0x482   : > { %13013 = vst [vmem:[#allocation47_spill] sm:$0xff] %v11002_v42 }
 0x483   : > { %2617 = vmatmul.f32.gmra.mxu0 %v6601_v8  ;;  %2730 = vmatmul.f32.gmra.mxu1 %v6602_v39  ;;  %v4309_v8 = vld [vmem:[%s12749_s3 + $0x430] sm:$0xff]  ;;  %v4310_v39 = vld [vmem:[%s12749_s3 + $0x438] sm:$0xff] }
 0x485   : > { %5617 = vmatpush.xpose.msrb.mxu2 %v4357_v37  ;;  %5637 = vmatpush.xpose.msrb.mxu3 %v4358_v13  ;;  %v6603_v13 = vld [vmem:[%s12747_s1 + $0x230] sm:$0xff] }
 0x488   : > { %v11028_v28 = vpop.f32.mrf.mxu0  ;;  %v11030_v37 = vpop.f32.mrf.mxu1 }
 0x489   : > { %5618 = vmatpush.xpose.msrb.mxu2 %v4341_v43  ;;  %5638 = vmatpush.xpose.msrb.mxu3 %v4342_v52  ;;  %13014 = vst [vmem:[#allocation37_spill] sm:$0xff] %v11028_v28  ;;  %v4293_v43 = vld [vmem:[%s12749_s3 + $0x3b0] sm:$0xff]  ;;  %v4294_v52 = vld [vmem:[%s12749_s3 + $0x3b8] sm:$0xff] }
 0x48a   : > { %13015 = vst [vmem:[#allocation52_spill] sm:$0xff] %v11030_v37  ;;  %v11176_v37 = vpop.f32.mrf.mxu3  ;;  %v4430_v28 = vld [vmem:[%s12749_s3 + $0x7f8] sm:$0xff] }
 0x48b   : > { %2620 = vmatmul.f32.gmra.mxu0 %v6603_v13  ;;  %2733 = vmatmul.f32.gmra.mxu1 %v6604_v31  ;;  %v6606_v13 = vld [vmem:[%s12747_s1 + $0x268] sm:$0xff]  ;;  %v4277_v31 = vld [vmem:[%s12749_s3 + $0x330] sm:$0xff] }
 0x48d   : > { %5619 = vmatpush.xpose.msrb.mxu2 %v4325_v9  ;;  %5639 = vmatpush.xpose.msrb.mxu3 %v4326_v19  ;;  %v6605_v19 = vld [vmem:[%s12747_s1 + $0x260] sm:$0xff] }
 0x490   : > { %v11050_v11 = vpop.f32.mrf.mxu0  ;;  %v11052_v9 = vpop.f32.mrf.mxu1 }
 0x491   : > { %5620 = vmatpush.xpose.msrb.mxu2 %v4309_v8  ;;  %5640 = vmatpush.xpose.msrb.mxu3 %v4310_v39  ;;  %13016 = vst [vmem:[#allocation33_spill] sm:$0xff] %v11050_v11  ;;  %v4278_v8 = vld [vmem:[%s12749_s3 + $0x338] sm:$0xff]  ;;  %v4407_v39 = vld [vmem:[%s12749_s3 + $0x740] sm:$0xff]  ;;  %v4409_v11 = vld [vmem:[%s12749_s3 + $0x750] sm:$0xff] }
 0x492   : > { %13017 = vst [vmem:[#allocation45_spill] sm:$0xff] %v11052_v9  ;;  %5654 = vmatpush.xpose.msrb.mxu0 %v4407_v39  ;;  %v4245_v39 = vld [vmem:[%s12749_s3 + $0x230] sm:$0xff] }
 0x493   : > { %2623 = vmatmul.f32.gmra.mxu0 %v6605_v19  ;;  %2736 = vmatmul.f32.gmra.mxu1 %v6606_v13  ;;  %v4262_v19 = vld [vmem:[%s12749_s3 + $0x2b8] sm:$0xff] }
 0x495   : > { %5621 = vmatpush.xpose.msrb.mxu2 %v4293_v43  ;;  %5641 = vmatpush.xpose.msrb.mxu3 %v4294_v52  ;;  %v4408_v43 = vld [vmem:[%s12749_s3 + $0x748] sm:$0xff]  ;;  %v4261_v52 = vld [vmem:[%s12749_s3 + $0x2b0] sm:$0xff] }
 0x496   : > { %5674 = vmatpush.xpose.msrb.mxu1 %v4408_v43  ;;  %v4246_v43 = vld [vmem:[%s12749_s3 + $0x238] sm:$0xff]  ;;  %5655 = vmatpush.xpose.msrb.mxu0 %v4391_v5 }
 0x498   : > { %v11078_v13 = vpop.f32.mrf.mxu0  ;;  %v11080_v26 = vpop.f32.mrf.mxu1 }
 0x499   : > { %5622 = vmatpush.xpose.msrb.mxu2 %v4277_v31  ;;  %5642 = vmatpush.xpose.msrb.mxu3 %v4278_v8  ;;  %13018 = vst [vmem:[#allocation60_spill] sm:$0xff] %v11078_v13  ;;  %v6607_v31 = vld [vmem:[%s12747_s1 + $0x290] sm:$0xff]  ;;  %v6608_v8 = vld [vmem:[%s12747_s1 + $0x298] sm:$0xff] }
 0x49a   : > { %13019 = vst [vmem:[#allocation23_spill] sm:$0xff] %v11080_v26  ;;  %v4198_v26 = vld [vmem:[%s12749_s3 + $0xb8] sm:$0xff]  ;;  %v6611_v13 = vld [vmem:[%s12747_s1 + $0x2f0] sm:$0xff] }
 0x49b   : > { %2626 = vmatmul.f32.gmra.mxu0 %v6607_v31  ;;  %2739 = vmatmul.f32.gmra.mxu1 %v6608_v8 }
 0x49d   : > { %5623 = vmatpush.xpose.msrb.mxu2 %v4261_v52  ;;  %5643 = vmatpush.xpose.msrb.mxu3 %v4262_v19  ;;  %v4229_v52 = vld [vmem:[%s12749_s3 + $0x1b0] sm:$0xff]  ;;  %v4230_v19 = vld [vmem:[%s12749_s3 + $0x1b8] sm:$0xff] }
 0x4a0   : > { %v11100_v31 = vpop.f32.mrf.mxu0  ;;  %v11102_v8 = vpop.f32.mrf.mxu1 }
 0x4a1   : > { %5624 = vmatpush.xpose.msrb.mxu2 %v4245_v39  ;;  %5644 = vmatpush.xpose.msrb.mxu3 %v4246_v43  ;;  %13020 = vst [vmem:[#allocation35_spill] sm:$0xff] %v11100_v31  ;;  %v4392_v39 = vld [vmem:[%s12749_s3 + $0x6c8] sm:$0xff]  ;;  %v6609_v43 = vld [vmem:[%s12747_s1 + $0x2c0] sm:$0xff] }
 0x4a2   : > { %13021 = vst [vmem:[#allocation50_spill] sm:$0xff] %v11102_v8  ;;  %v6610_v31 = vld [vmem:[%s12747_s1 + $0x2c8] sm:$0xff]  ;;  %5675 = vmatpush.xpose.msrb.mxu1 %v4392_v39  ;;  %v4375_v8 = vld [vmem:[%s12749_s3 + $0x640] sm:$0xff] }
 0x4a3   : > { %2629 = vmatmul.f32.gmra.mxu0 %v6609_v43  ;;  %2742 = vmatmul.f32.gmra.mxu1 %v6610_v31  ;;  %v4376_v43 = vld [vmem:[%s12749_s3 + $0x648] sm:$0xff]  ;;  %v4197_v31 = vld [vmem:[%s12749_s3 + $0xb0] sm:$0xff] }
 0x4a4   : > { %5656 = vmatpush.xpose.msrb.mxu0 %v4375_v8  ;;  %v6612_v8 = vld [vmem:[%s12747_s1 + $0x2f8] sm:$0xff] }
 0x4a5   : > { %5625 = vmatpush.xpose.msrb.mxu2 %v4229_v52  ;;  %5645 = vmatpush.xpose.msrb.mxu3 %v4230_v19  ;;  %v4213_v52 = vld [vmem:[%s12749_s3 + $0x130] sm:$0xff]  ;;  %v4214_v19 = vld [vmem:[%s12749_s3 + $0x138] sm:$0xff] }
 0x4a6   : > { %5676 = vmatpush.xpose.msrb.mxu1 %v4376_v43  ;;  %v4182_v43 = vld [vmem:[%s12749_s3 + $0x38] sm:$0xff] }
 0x4a8   : > { %v11134_v5 = vpop.f32.mrf.mxu0  ;;  %v11136_v39 = vpop.f32.mrf.mxu1 }
 0x4a9   : > { %5626 = vmatpush.xpose.msrb.mxu2 %v4213_v52  ;;  %5646 = vmatpush.xpose.msrb.mxu3 %v4214_v19  ;;  %13022 = vst [vmem:[#allocation40_spill] sm:$0xff] %v11134_v5  ;;  %v4359_v52 = vld [vmem:[%s12749_s3 + $0x5c0] sm:$0xff]  ;;  %v4360_v19 = vld [vmem:[%s12749_s3 + $0x5c8] sm:$0xff] }
 0x4aa   : > { %13023 = vst [vmem:[#allocation55_spill] sm:$0xff] %v11136_v39  ;;  %5657 = vmatpush.xpose.msrb.mxu0 %v4359_v52  ;;  %5677 = vmatpush.xpose.msrb.mxu1 %v4360_v19  ;;  %v4344_v39 = vld [vmem:[%s12749_s3 + $0x548] sm:$0xff]  ;;  %v4410_v52 = vld [vmem:[%s12749_s3 + $0x758] sm:$0xff]  ;;  %v11174_v19 = vpop.f32.mrf.mxu2 }
 0x4ab   : > { %2632 = vmatmul.f32.gmra.mxu0 %v6611_v13  ;;  %2745 = vmatmul.f32.gmra.mxu1 %v6612_v8  ;;  %v4426_v13 = vld [vmem:[%s12749_s3 + $0x7d8] sm:$0xff]  ;;  %v4343_v8 = vld [vmem:[%s12749_s3 + $0x540] sm:$0xff] }
 0x4ad   : > { %5627 = vmatpush.xpose.msrb.mxu2 %v4197_v31  ;;  %5647 = vmatpush.xpose.msrb.mxu3 %v4198_v26  ;;  %v4181_v26 = vld [vmem:[%s12749_s3 + $0x30] sm:$0xff] }
 0x4ae   : > { %v4425_v31 = vld [vmem:[%s12749_s3 + $0x7d0] sm:$0xff]  ;;  %5658 = vmatpush.xpose.msrb.mxu0 %v4343_v8  ;;  %5678 = vmatpush.xpose.msrb.mxu1 %v4344_v39  ;;  %v4328_v39 = vld [vmem:[%s12749_s3 + $0x4c8] sm:$0xff] }
 0x4af   : > { %v4312_v8 = vld [vmem:[%s12749_s3 + $0x448] sm:$0xff] }
 0x4b0   : > { %v2588_v5 = vpop.f32.mrf.mxu0  ;;  %v2701_v9 = vpop.f32.mrf.mxu1 }
 0x4b1   : > { %5628 = vmatpush.xpose.msrb.mxu2 %v4181_v26  ;;  %5648 = vmatpush.xpose.msrb.mxu3 %v4182_v43  ;;  %v2589_v26 = vadd.f32 %v2588_v5, %v9562_v2  ;;  %v4327_v43 = vld [vmem:[%s12749_s3 + $0x4c0] sm:$0xff]  ;;  %v6614_v2 = vld [vmem:[%s12747_s1 + $0x328] sm:$0xff]  ;;  %v4393_v5 = vld [vmem:[%s12749_s3 + $0x6d0] sm:$0xff] }
 0x4b2   : > { %5659 = vmatpush.xpose.msrb.mxu0 %v4327_v43  ;;  %5679 = vmatpush.xpose.msrb.mxu1 %v4328_v39  ;;  %v4378_v43 = vld [vmem:[%s12749_s3 + $0x658] sm:$0xff] }
 0x4b3   : > { %2748 = vmatmul.f32.gmra.mxu1 %v6614_v2  ;;  %v4296_v2 = vld [vmem:[%s12749_s3 + $0x3c8] sm:$0xff] }
 0x4b4   : > { %5629 = vmatmul.f32.vlgmr.msrb.gmra.mxu2 %v9560_v40  ;;  %5649 = vmatmul.f32.vlgmr.msrb.gmra.mxu3 %v9871_v1  ;;  %v4429_v40 = vld [vmem:[%s12749_s3 + $0x7f0] sm:$0xff] }
 0x4b5   : > { %5693 = vmatpush.xpose.msra.mxu2 %v4425_v31  ;;  %5713 = vmatpush.xpose.msra.mxu3 %v4426_v13  ;;  %v2702_v31 = vadd.f32 %v2701_v9, %v2589_v26  ;;  %v6613_v13 = vld [vmem:[%s12747_s1 + $0x320] sm:$0xff]  ;;  %v4394_v9 = vld [vmem:[%s12749_s3 + $0x6d8] sm:$0xff] }
 0x4b6   : > { %2635 = vmatmul.f32.gmra.mxu0 %v6613_v13  ;;  %v4377_v13 = vld [vmem:[%s12749_s3 + $0x650] sm:$0xff]  ;;  %5680 = vmatpush.xpose.msrb.mxu1 %v4312_v8  ;;  %v4362_v8 = vld [vmem:[%s12749_s3 + $0x5d8] sm:$0xff] }
 0x4b7   : > { %2800 = vst.msk [vmem:[%s7551_s16 + $0x10] sm:$0xff] %vm2799_vm0, %v2702_v31  ;;  %v4295_v31 = vld [vmem:[%s12749_s3 + $0x3c0] sm:$0xff] }
 0x4b8   : > { %v2704_v26 = vpop.f32.mrf.mxu1 }
 0x4b9   : > { %5694 = vmatpush.xpose.msra.mxu2 %v4409_v11  ;;  %5714 = vmatpush.xpose.msra.mxu3 %v4410_v52  ;;  %v4311_v11 = vld [vmem:[%s12749_s3 + $0x440] sm:$0xff]  ;;  %v2591_v52 = vpop.f32.mrf.mxu0 }
 0x4ba   : > { %v2592_v39 = vadd.f32 %v2591_v52, %v9599_v58  ;;  %5660 = vmatpush.xpose.msrb.mxu0 %v4311_v11  ;;  %v6616_v58 = vld [vmem:[%s12747_s1 + $0x358] sm:$0xff]  ;;  %v4361_v11 = vld [vmem:[%s12749_s3 + $0x5d0] sm:$0xff]  ;;  %5681 = vmatpush.xpose.msrb.mxu1 %v4296_v2  ;;  %v4279_v52 = vld [vmem:[%s12749_s3 + $0x340] sm:$0xff] }
 0x4bb   : > { %2751 = vmatmul.f32.gmra.mxu1 %v6616_v58 }
 0x4bd   : > { %5695 = vmatpush.xpose.msra.mxu2 %v4393_v5  ;;  %5715 = vmatpush.xpose.msra.mxu3 %v4394_v9  ;;  %v2705_v5 = vadd.f32 %v2704_v26, %v2592_v39  ;;  %v6615_v9 = vld [vmem:[%s12747_s1 + $0x350] sm:$0xff]  ;;  %v4280_v26 = vld [vmem:[%s12749_s3 + $0x348] sm:$0xff] }
 0x4be   : > { %2638 = vmatmul.f32.gmra.mxu0 %v6615_v9  ;;  %v4345_v39 = vld [vmem:[%s12749_s3 + $0x550] sm:$0xff]  ;;  %5682 = vmatpush.xpose.msrb.mxu1 %v4280_v26  ;;  %v4264_v9 = vld [vmem:[%s12749_s3 + $0x2c8] sm:$0xff]  ;;  %v4247_v26 = vld [vmem:[%s12749_s3 + $0x240] sm:$0xff] }
 0x4bf   : > { %2803 = vst.msk [vmem:[%s7551_s16 + $0x28] sm:$0xff] %vm2799_vm0, %v2705_v5  ;;  %5661 = vmatpush.xpose.msrb.mxu0 %v4295_v31  ;;  %v4346_v31 = vld [vmem:[%s12749_s3 + $0x558] sm:$0xff]  ;;  %v4263_v5 = vld [vmem:[%s12749_s3 + $0x2c0] sm:$0xff] }
 0x4c1   : > { %5696 = vmatpush.xpose.msra.mxu2 %v4377_v13  ;;  %5716 = vmatpush.xpose.msra.mxu3 %v4378_v43  ;;  %v2594_v13 = vpop.f32.mrf.mxu0  ;;  %v2707_v43 = vpop.f32.mrf.mxu1 }
 0x4c2   : > { %v2595_v2 = vadd.f32 %v2594_v13, %v9645_v51  ;;  %v6618_v51 = vld [vmem:[%s12747_s1 + $0x388] sm:$0xff]  ;;  %5683 = vmatpush.xpose.msrb.mxu1 %v4264_v9  ;;  %v4231_v9 = vld [vmem:[%s12749_s3 + $0x1c0] sm:$0xff] }
 0x4c3   : > { %5662 = vmatpush.xpose.msrb.mxu0 %v4279_v52  ;;  %2754 = vmatmul.f32.gmra.mxu1 %v6618_v51  ;;  %v4330_v52 = vld [vmem:[%s12749_s3 + $0x4d8] sm:$0xff]  ;;  %v4248_v13 = vld [vmem:[%s12749_s3 + $0x248] sm:$0xff]  ;;  %v6619_v51 = vld [vmem:[%s12747_s1 + $0x3b0] sm:$0xff] }
 0x4c4   : > { %v2708_v58 = vadd.f32 %v2707_v43, %v2595_v2  ;;  %v4314_v2 = vld [vmem:[%s12749_s3 + $0x458] sm:$0xff] }
 0x4c5   : > { %5697 = vmatpush.xpose.msra.mxu2 %v4361_v11  ;;  %5717 = vmatpush.xpose.msra.mxu3 %v4362_v8  ;;  %v6617_v11 = vld [vmem:[%s12747_s1 + $0x380] sm:$0xff]  ;;  %v4329_v8 = vld [vmem:[%s12749_s3 + $0x4d0] sm:$0xff] }
 0x4c6   : > { %2641 = vmatmul.f32.gmra.mxu0 %v6617_v11  ;;  %2806 = vst.msk [vmem:[%s7551_s16 + $0x40] sm:$0xff] %vm2799_vm0, %v2708_v58  ;;  %5684 = vmatpush.xpose.msrb.mxu1 %v4248_v13  ;;  %v4232_v58 = vld [vmem:[%s12749_s3 + $0x1c8] sm:$0xff] }
 0x4c7   : > { %5663 = vmatpush.xpose.msrb.mxu0 %v4263_v5  ;;  %v4216_v13 = vld [vmem:[%s12749_s3 + $0x148] sm:$0xff] }
 0x4c9   : > { %5698 = vmatpush.xpose.msra.mxu2 %v4345_v39  ;;  %5718 = vmatpush.xpose.msra.mxu3 %v4346_v31  ;;  %v2597_v43 = vpop.f32.mrf.mxu0  ;;  %v2710_v39 = vpop.f32.mrf.mxu1  ;;  %v4313_v31 = vld [vmem:[%s12749_s3 + $0x450] sm:$0xff] }
 0x4ca   : > { %v2598_v5 = vadd.f32 %v2597_v43, %v9687_v16  ;;  %v6620_v16 = vld [vmem:[%s12747_s1 + $0x3b8] sm:$0xff]  ;;  %5685 = vmatpush.xpose.msrb.mxu1 %v4232_v58  ;;  %v4200_v58 = vld [vmem:[%s12749_s3 + $0xc8] sm:$0xff] }
 0x4cb   : > { %5664 = vmatpush.xpose.msrb.mxu0 %v4247_v26  ;;  %2757 = vmatmul.f32.gmra.mxu1 %v6620_v16  ;;  %v4215_v26 = vld [vmem:[%s12749_s3 + $0x140] sm:$0xff]  ;;  %v4265_v16 = vld [vmem:[%s12749_s3 + $0x2d0] sm:$0xff] }
 0x4cc   : > { %v2711_v11 = vadd.f32 %v2710_v39, %v2598_v5 }
 0x4cd   : > { %5699 = vmatpush.xpose.msra.mxu2 %v4329_v8  ;;  %5719 = vmatpush.xpose.msra.mxu3 %v4330_v52  ;;  %v4297_v8 = vld [vmem:[%s12749_s3 + $0x3d0] sm:$0xff]  ;;  %v4298_v52 = vld [vmem:[%s12749_s3 + $0x3d8] sm:$0xff] }
 0x4ce   : > { %2644 = vmatmul.f32.gmra.mxu0 %v6619_v51  ;;  %2809 = vst.msk [vmem:[%s7551_s16 + $0x58] sm:$0xff] %vm2799_vm0, %v2711_v11  ;;  %5686 = vmatpush.xpose.msrb.mxu1 %v4216_v13  ;;  %v6621_v51 = vld [vmem:[%s12747_s1 + $0x3e0] sm:$0xff] }
 0x4cf   : > { %5665 = vmatpush.xpose.msrb.mxu0 %v4231_v9  ;;  %v4199_v9 = vld [vmem:[%s12749_s3 + $0xc0] sm:$0xff] }
 0x4d0   : > { %v4427_v13 = vld [vmem:[%s12749_s3 + $0x7e0] sm:$0xff] }
 0x4d1   : > { %5700 = vmatpush.xpose.msra.mxu2 %v4313_v31  ;;  %5720 = vmatpush.xpose.msra.mxu3 %v4314_v2  ;;  %v2600_v43 = vpop.f32.mrf.mxu0  ;;  %v2713_v39 = vpop.f32.mrf.mxu1  ;;  %v4281_v31 = vld [vmem:[%s12749_s3 + $0x350] sm:$0xff]  ;;  %v4282_v2 = vld [vmem:[%s12749_s3 + $0x358] sm:$0xff] }
 0x4d2   : > { %v2601_v5 = vadd.f32 %v2600_v43, %v9743_v23  ;;  %v6622_v23 = vld [vmem:[%s12747_s1 + $0x3e8] sm:$0xff]  ;;  %5687 = vmatpush.xpose.msrb.mxu1 %v4200_v58 }
 0x4d3   : > { %5666 = vmatpush.xpose.msrb.mxu0 %v4215_v26  ;;  %2760 = vmatmul.f32.gmra.mxu1 %v6622_v23  ;;  %v4184_v26 = vld [vmem:[%s12749_s3 + $0x48] sm:$0xff]  ;;  %v6624_v23 = vld [vmem:[%s12747_s1 + $0x418] sm:$0xff] }
 0x4d4   : > { %v2714_v11 = vadd.f32 %v2713_v39, %v2601_v5  ;;  %v4428_v43 = vld [vmem:[%s12749_s3 + $0x7e8] sm:$0xff]  ;;  %v4250_v5 = vld [vmem:[%s12749_s3 + $0x258] sm:$0xff] }
 0x4d5   : > { %5701 = vmatpush.xpose.msra.mxu2 %v4297_v8  ;;  %5721 = vmatpush.xpose.msra.mxu3 %v4298_v52  ;;  %v4266_v8 = vld [vmem:[%s12749_s3 + $0x2d8] sm:$0xff]  ;;  %v4183_v52 = vld [vmem:[%s12749_s3 + $0x40] sm:$0xff] }
 0x4d6   : > { %2647 = vmatmul.f32.gmra.mxu0 %v6621_v51  ;;  %2812 = vst.msk [vmem:[%s7551_s16 + $0x70] sm:$0xff] %vm2799_vm0, %v2714_v11  ;;  %5688 = vmatpush.xpose.msrb.mxu1 %v4184_v26  ;;  %v4411_v11 = vld [vmem:[%s12749_s3 + $0x760] sm:$0xff]  ;;  %v4412_v51 = vld [vmem:[%s12749_s3 + $0x768] sm:$0xff] }
 0x4d7   : > { %5667 = vmatpush.xpose.msrb.mxu0 %v4199_v9  ;;  %v4395_v26 = vld [vmem:[%s12749_s3 + $0x6e0] sm:$0xff] }
 0x4d9   : > { %5702 = vmatpush.xpose.msra.mxu2 %v4281_v31  ;;  %5722 = vmatpush.xpose.msra.mxu3 %v4282_v2  ;;  %v2603_v39 = vpop.f32.mrf.mxu0  ;;  %v2716_v31 = vpop.f32.mrf.mxu1  ;;  %v4249_v2 = vld [vmem:[%s12749_s3 + $0x250] sm:$0xff] }
 0x4da   : > { %v2604_v9 = vadd.f32 %v2603_v39, %v9815_v46  ;;  %5753 = vmatpush.xpose.msra.mxu1 %v4428_v43  ;;  %v6623_v46 = vld [vmem:[%s12747_s1 + $0x410] sm:$0xff] }
 0x4db   : > { %5668 = vmatpush.xpose.msrb.mxu0 %v4183_v52  ;;  %2763 = vmatmul.f32.gmra.mxu1 %v6624_v23  ;;  %v11372_v52 = vpop.xlane.xlu2 %3857 }
 0x4dc   : > { %v2717_v58 = vadd.f32 %v2716_v31, %v2604_v9  ;;  %v4217_v31 = vld [vmem:[%s12749_s3 + $0x150] sm:$0xff]  ;;  %v11388_v9 = vpop.xlane.xlu0 %3899 }
 0x4dd   : > { %5703 = vmatpush.xpose.msra.mxu2 %v4265_v16  ;;  %5723 = vmatpush.xpose.msra.mxu3 %v4266_v8  ;;  %v4233_v16 = vld [vmem:[%s12749_s3 + $0x1d0] sm:$0xff]  ;;  %v4234_v8 = vld [vmem:[%s12749_s3 + $0x1d8] sm:$0xff] }
 0x4de   : > { %2650 = vmatmul.f32.gmra.mxu0 %v6623_v46  ;;  %2815 = vst.msk [vmem:[%s7551_s16 + $0x88] sm:$0xff] %vm2799_vm0, %v2717_v58  ;;  %5754 = vmatpush.xpose.msra.mxu1 %v4412_v51  ;;  %v13024_v58 = vld [vmem:[#allocation99_spill] sm:$0xff]  ;;  %v4109_v51 = vmul.f32 0.015625, %v10575_v6  ;;  %v11392_v46 = vpop.xlane.xlu1 %3902  ;;  %v6625_v6 = vld [vmem:[%s12747_s1 + $0x440] sm:$0xff] }
 0x4df   : > { %5733 = vmatpush.xpose.msra.mxu0 %v4427_v13  ;;  %v4396_v13 = vld [vmem:[%s12749_s3 + $0x6e8] sm:$0xff] }
 0x4e1   : > { %5704 = vmatpush.xpose.msra.mxu2 %v4249_v2  ;;  %5724 = vmatpush.xpose.msra.mxu3 %v4250_v5  ;;  %v2606_v43 = vpop.f32.mrf.mxu0  ;;  %v2719_v39 = vpop.f32.mrf.mxu1  ;;  %v4218_v2 = vld [vmem:[%s12749_s3 + $0x158] sm:$0xff] }
 0x4e2   : > { %v11386_v5 = vpop.f32.mrf.mxu2  ;;  %5755 = vmatpush.xpose.msra.mxu1 %v4396_v13  ;;  %v4201_v13 = vld [vmem:[%s12749_s3 + $0xd0] sm:$0xff] }
 0x4e3   : > { %5734 = vmatpush.xpose.msra.mxu0 %v4411_v11  ;;  %v2607_v11 = vadd.f32 %v2606_v43, %v13024_v58  ;;  %v4202_v43 = vld [vmem:[%s12749_s3 + $0xd8] sm:$0xff]  ;;  %v5344_v58 = vperm.slane %v4109_v51, %v9226_v56  ;;  %v4185_v51 = vld [vmem:[%s12749_s3 + $0x50] sm:$0xff] }
 0x4e5   : > { %5705 = vmatpush.xpose.msra.mxu2 %v4233_v16  ;;  %5725 = vmatpush.xpose.msra.mxu3 %v4234_v8  ;;  %v2720_v23 = vadd.f32 %v2719_v39, %v2607_v11  ;;  %v4379_v16 = vld [vmem:[%s12749_s3 + $0x660] sm:$0xff]  ;;  %v4380_v8 = vld [vmem:[%s12749_s3 + $0x668] sm:$0xff]  ;;  %v11417_v11 = vpop.f32.mrf.mxu3  ;;  %v5345_v42 = vsel %vm5001_vm14, %v5344_v58, %v10495_v62 }
 0x4e6   : > { %2653 = vmatmul.f32.gmra.mxu0 %v6625_v6  ;;  %v13025_v39 = vld [vmem:[#allocation7_spill] sm:$0xff]  ;;  %5756 = vmatpush.xpose.msra.mxu1 %v4380_v8  ;;  %v4363_v6 = vld [vmem:[%s12749_s3 + $0x5e0] sm:$0xff]  ;;  %v11454_v62 = vpop.xlane.xlu1 %3863 }
 0x4e7   : > { %5735 = vmatpush.xpose.msra.mxu0 %v4395_v26  ;;  %v6626_v26 = vld [vmem:[%s12747_s1 + $0x448] sm:$0xff]  ;;  %2818 = vst.msk [vmem:[%s7551_s16 + $0xa0] sm:$0xff] %vm2799_vm0, %v2720_v23  ;;  %v4186_v23 = vld [vmem:[%s12749_s3 + $0x58] sm:$0xff] }
 0x4e8   : > { %2766 = vmatmul.f32.gmra.mxu1 %v6626_v26  ;;  %v4364_v26 = vld [vmem:[%s12749_s3 + $0x5e8] sm:$0xff] }
 0x4e9   : > { %5706 = vmatpush.xpose.msra.mxu2 %v4217_v31  ;;  %5726 = vmatpush.xpose.msra.mxu3 %v4218_v2  ;;  %v4094_v31 = vmul.f32 0.015625, %v13025_v39  ;;  %v4110_v2 = vmul.f32 0.015625, %v10687_v22  ;;  %v2609_v39 = vpop.f32.mrf.mxu0  ;;  %v2722_v22 = vpop.f32.mrf.mxu1 }
 0x4ea   : > { %5757 = vmatpush.xpose.msra.mxu1 %v4364_v26  ;;  %v4414_v26 = vld [vmem:[%s12749_s3 + $0x778] sm:$0xff] }
 0x4eb   : > { %5736 = vmatpush.xpose.msra.mxu0 %v4379_v16  ;;  %v5315_v16 = vperm.slane %v4094_v31, %v9521_v60  ;;  %v5346_v8 = vperm.slane %v4110_v2, %v9521_v60  ;;  %v11444_v31 = vpop.f32.mrf.mxu2  ;;  %v11446_v2 = vpop.xlane.xlu0 %3860 }
 0x4ed   : > { %5707 = vmatpush.xpose.msra.mxu2 %v4201_v13  ;;  %5727 = vmatpush.xpose.msra.mxu3 %v4202_v43  ;;  %v11433_v13 = vpop.xlane.xlu2 %3800  ;;  %v13026_v43 = vld [vmem:[#allocation3_spill] sm:$0xff] }
 0x4ee   : > { %v2610_v1 = vadd.f32 %v2609_v39, %v13026_v43  ;;  %v4347_v39 = vld [vmem:[%s12749_s3 + $0x560] sm:$0xff]  ;;  %v4348_v43 = vld [vmem:[%s12749_s3 + $0x568] sm:$0xff] }
 0x4ef   : > { %5737 = vmatpush.xpose.msra.mxu0 %v4363_v6  ;;  %v11469_v6 = vsel %vm5005_vm15, %v5346_v8, %v5345_v42  ;;  %5758 = vmatpush.xpose.msra.mxu1 %v4348_v43  ;;  %v4331_v42 = vld [vmem:[%s12749_s3 + $0x4e0] sm:$0xff]  ;;  %v13030_v8 = vld [vmem:[#allocation9_spill] sm:$0xff] }
 0x4f0   : > { %v2723_v49 = vadd.f32 %v2722_v22, %v2610_v1  ;;  %v6627_v1 = vld [vmem:[%s12747_s1 + $0x470] sm:$0xff]  ;;  %13029 = vst [vmem:[#allocation63_spill] sm:$0xff] %v11469_v6  ;;  %v4398_v43 = vld [vmem:[%s12749_s3 + $0x6f8] sm:$0xff] }
 0x4f1   : > { %5708 = vmatpush.xpose.msra.mxu2 %v4185_v51  ;;  %5728 = vmatpush.xpose.msra.mxu3 %v4186_v23  ;;  %v2612_v22 = vpop.f32.mrf.mxu0  ;;  %v2725_v51 = vpop.f32.mrf.mxu1  ;;  %v4332_v23 = vld [vmem:[%s12749_s3 + $0x4e8] sm:$0xff] }
 0x4f2   : > { %2821 = vst.msk [vmem:[%s7551_s16 + $0xb8] sm:$0xff] %vm2799_vm0, %v2723_v49  ;;  %2656 = vmatmul.f32.gmra.mxu0 %v6627_v1  ;;  %v4413_v49 = vld [vmem:[%s12749_s3 + $0x770] sm:$0xff]  ;;  %v2613_v1 = vadd.f32 %v2612_v22, %v13030_v8 }
 0x4f3   : > { %5738 = vmatpush.xpose.msra.mxu0 %v4347_v39  ;;  %v4397_v39 = vld [vmem:[%s12749_s3 + $0x6f0] sm:$0xff]  ;;  %5759 = vmatpush.xpose.msra.mxu1 %v4332_v23  ;;  %v11502_v22 = vpop.f32.mrf.mxu2  ;;  %v11504_v8 = vpop.xlane.xlu0 %3803 }
 0x4f4   : > { %5729 = vmatmul.f32.vlgmr.msra.gmra.mxu3 %v11469_v6  ;;  %v4381_v23 = vld [vmem:[%s12749_s3 + $0x670] sm:$0xff] }
 0x4f5   : > { %5773 = vmatpush.xpose.msrb.mxu2 %v4429_v40  ;;  %5793 = vmatpush.xpose.msrb.mxu3 %v4430_v28  ;;  %v6628_v40 = vld [vmem:[%s12747_s1 + $0x478] sm:$0xff]  ;;  %v13031_v6 = vld [vmem:[#allocation12_spill] sm:$0xff] }
 0x4f6   : > { %2769 = vmatmul.f32.gmra.mxu1 %v6628_v40  ;;  %v13027_v28 = vld [vmem:[#allocation5_spill] sm:$0xff]  ;;  %v11494_v40 = vpop.xlane.xlu2 %3761 }
 0x4f7   : > { %v11466_v58 = vsel %vm5005_vm15, %v5315_v16, %v13027_v28  ;;  %v11485_v16 = vpop.f32.mrf.mxu3  ;;  %v2726_v28 = vadd.f32 %v2725_v51, %v2613_v1  ;;  %5739 = vmatpush.xpose.msra.mxu0 %v4331_v42  ;;  %v6629_v51 = vld [vmem:[%s12747_s1 + $0x4a0] sm:$0xff]  ;;  %v6630_v42 = vld [vmem:[%s12747_s1 + $0x4a8] sm:$0xff]  ;;  %v4382_v1 = vld [vmem:[%s12749_s3 + $0x678] sm:$0xff] }
 0x4f8   : > { %13028 = vst [vmem:[#allocation28_spill] sm:$0xff] %v11466_v58  ;;  %5709 = vmatmul.f32.vlgmr.msra.gmra.mxu2 %v11466_v58  ;;  %v13032_v58 = vld [vmem:[#allocation2_spill] sm:$0xff] }
 0x4f9   : > { %5774 = vmatpush.xpose.msrb.mxu2 %v4413_v49  ;;  %5794 = vmatpush.xpose.msrb.mxu3 %v4414_v26  ;;  %v4315_v49 = vld [vmem:[%s12749_s3 + $0x460] sm:$0xff]  ;;  %v4316_v26 = vld [vmem:[%s12749_s3 + $0x468] sm:$0xff]  ;;  %2824 = vst.msk [vmem:[%s7551_s16 + $0xd0] sm:$0xff] %vm2799_vm0, %v2726_v28  ;;  %v2728_v28 = vpop.f32.mrf.mxu1  ;;  %v2280_v17 = vadd.f32 %v13032_v58, %v13031_v6 }
 0x4fa   : > { %2659 = vmatmul.f32.gmra.mxu0 %v6629_v51  ;;  %5760 = vmatpush.xpose.msra.mxu1 %v4316_v26  ;;  %v4299_v51 = vld [vmem:[%s12749_s3 + $0x3e0] sm:$0xff]  ;;  %v4366_v26 = vld [vmem:[%s12749_s3 + $0x5f8] sm:$0xff]  ;;  %v4284_v58 = vld [vmem:[%s12749_s3 + $0x368] sm:$0xff] }
 0x4fb   : > { %5740 = vmatpush.xpose.msra.mxu0 %v4315_v49  ;;  %v4365_v49 = vld [vmem:[%s12749_s3 + $0x5f0] sm:$0xff] }
 0x4fd   : > { %5775 = vmatpush.xpose.msrb.mxu2 %v4397_v39  ;;  %5795 = vmatpush.xpose.msrb.mxu3 %v4398_v43  ;;  %v11520_v39 = vpop.xlane.xlu1 %3806  ;;  %v2615_v43 = vpop.f32.mrf.mxu0 }
 0x4fe   : > { %2772 = vmatmul.f32.gmra.mxu1 %v6630_v42  ;;  %v4300_v42 = vld [vmem:[%s12749_s3 + $0x3e8] sm:$0xff]  ;;  %v2616_v50 = vadd.f32 %v2615_v43, %v13033_v4  ;;  %v4283_v4 = vld [vmem:[%s12749_s3 + $0x360] sm:$0xff]  ;;  %v11546_v6 = vpop.xlane.xlu2 %3905  ;;  %v4350_v43 = vld [vmem:[%s12749_s3 + $0x578] sm:$0xff] }
 0x4ff   : > { %5741 = vmatpush.xpose.msra.mxu0 %v4299_v51  ;;  %5761 = vmatpush.xpose.msra.mxu1 %v4300_v42  ;;  %v11565_v51 = vpop.xlane.xlu0 %3764 }
 0x500   : > { %v2729_v54 = vadd.f32 %v2728_v28, %v2616_v50  ;;  %v6631_v50 = vld [vmem:[%s12747_s1 + $0x4d0] sm:$0xff]  ;;  %v11563_v28 = vpop.f32.mrf.mxu2 }
 0x501   : > { %5776 = vmatpush.xpose.msrb.mxu2 %v4381_v23  ;;  %5796 = vmatpush.xpose.msrb.mxu3 %v4382_v1  ;;  %v2393_v23 = vadd.f32 %v10966_v61, %v2280_v17  ;;  %v11538_v1 = vpop.f32.mrf.mxu3  ;;  %v6632_v61 = vld [vmem:[%s12747_s1 + $0x4d8] sm:$0xff]  ;;  %v4349_v17 = vld [vmem:[%s12749_s3 + $0x570] sm:$0xff] }
 0x502   : > { %2827 = vst.msk [vmem:[%s7551_s16 + $0xe8] sm:$0xff] %vm2799_vm0, %v2729_v54  ;;  %2662 = vmatmul.f32.gmra.mxu0 %v6631_v50  ;;  %v4268_v50 = vld [vmem:[%s12749_s3 + $0x2e8] sm:$0xff] }
 0x503   : > { %v2506_v54 = vadd.f32 %v10968_v18, %v2393_v23  ;;  %5742 = vmatpush.xpose.msra.mxu0 %v4283_v4  ;;  %5762 = vmatpush.xpose.msra.mxu1 %v4284_v58  ;;  %v13034_v18 = vld [vmem:[#allocation103_spill] sm:$0xff]  ;;  %v13035_v23 = vld [vmem:[#allocation4_spill] sm:$0xff] }
 0x504   : > { %v4333_v58 = vld [vmem:[%s12749_s3 + $0x4f0] sm:$0xff] }
 0x505   : > { %5777 = vmatpush.xpose.msrb.mxu2 %v4365_v49  ;;  %5797 = vmatpush.xpose.msrb.mxu3 %v4366_v26  ;;  %v2618_v42 = vpop.f32.mrf.mxu0  ;;  %v2731_v49 = vpop.f32.mrf.mxu1  ;;  %v4267_v26 = vld [vmem:[%s12749_s3 + $0x2e0] sm:$0xff] }
 0x506   : > { %2775 = vmatmul.f32.gmra.mxu1 %v6632_v61  ;;  %v2283_v61 = vadd.f32 %v13035_v23, %v13034_v18  ;;  %v11575_v21 = vpop.xlane.xlu1 %3767  ;;  %v2619_v4 = vadd.f32 %v2618_v42, %v2506_v54  ;;  %v4251_v18 = vld [vmem:[%s12749_s3 + $0x260] sm:$0xff]  ;;  %v4252_v54 = vld [vmem:[%s12749_s3 + $0x268] sm:$0xff]  ;;  %v11607_v23 = vpop.xlane.xlu2 %3866 }
 0x507   : > { %5743 = vmatpush.xpose.msra.mxu0 %v4267_v26  ;;  %5763 = vmatpush.xpose.msra.mxu1 %v4268_v50  ;;  %v4317_v26 = vld [vmem:[%s12749_s3 + $0x470] sm:$0xff]  ;;  %v4318_v50 = vld [vmem:[%s12749_s3 + $0x478] sm:$0xff] }
 0x508   : > { %v2732_v12 = vadd.f32 %v2731_v49, %v2619_v4  ;;  %v6634_v49 = vld [vmem:[%s12747_s1 + $0x508] sm:$0xff] }
 0x509   : > { %5778 = vmatpush.xpose.msrb.mxu2 %v4349_v17  ;;  %5798 = vmatpush.xpose.msrb.mxu3 %v4350_v43  ;;  %v4334_v17 = vld [vmem:[%s12749_s3 + $0x4f8] sm:$0xff]  ;;  %v2396_v43 = vadd.f32 %v11174_v19, %v2283_v61  ;;  %v11590_v42 = vpop.f32.mrf.mxu3  ;;  %v6633_v19 = vld [vmem:[%s12747_s1 + $0x500] sm:$0xff] }
 0x50a   : > { %2830 = vst.msk [vmem:[%s7551_s16 + $0x100] sm:$0xff] %vm2799_vm0, %v2732_v12  ;;  %2665 = vmatmul.f32.gmra.mxu0 %v6633_v19  ;;  %v13036_v19 = vld [vmem:[#allocation102_spill] sm:$0xff] }
 0x50b   : > { %v2509_v12 = vadd.f32 %v11176_v37, %v2396_v43  ;;  %5744 = vmatpush.xpose.msra.mxu0 %v4251_v18  ;;  %5764 = vmatpush.xpose.msra.mxu1 %v4252_v54  ;;  %v11617_v43 = vpop.f32.mrf.mxu2  ;;  %v4301_v54 = vld [vmem:[%s12749_s3 + $0x3f0] sm:$0xff] }
 0x50d   : > { %5779 = vmatpush.xpose.msrb.mxu2 %v4333_v58  ;;  %5799 = vmatpush.xpose.msrb.mxu3 %v4334_v17  ;;  %v2621_v61 = vpop.f32.mrf.mxu0  ;;  %v2734_v4 = vpop.f32.mrf.mxu1  ;;  %v4235_v58 = vld [vmem:[%s12749_s3 + $0x1e0] sm:$0xff]  ;;  %v4236_v17 = vld [vmem:[%s12749_s3 + $0x1e8] sm:$0xff] }
 0x50e   : > { %2778 = vmatmul.f32.gmra.mxu1 %v6634_v49  ;;  %v13037_v49 = vld [vmem:[#allocation15_spill] sm:$0xff]  ;;  %v2622_v18 = vadd.f32 %v2621_v61, %v2509_v12  ;;  %v11628_v14 = vpop.xlane.xlu1 %3911  ;;  %v4219_v12 = vld [vmem:[%s12749_s3 + $0x160] sm:$0xff] }
 0x50f   : > { %v2286_v37 = vadd.f32 %v13037_v49, %v13036_v19  ;;  %5745 = vmatpush.xpose.msra.mxu0 %v4235_v58  ;;  %5765 = vmatpush.xpose.msra.mxu1 %v4236_v17  ;;  %v4220_v61 = vld [vmem:[%s12749_s3 + $0x168] sm:$0xff]  ;;  %v4285_v58 = vld [vmem:[%s12749_s3 + $0x370] sm:$0xff]  ;;  %v4286_v17 = vld [vmem:[%s12749_s3 + $0x378] sm:$0xff]  ;;  %v4168_v49 = vmul.f32 0.015625, %v11388_v9 }
 0x510   : > { %v2735_v29 = vadd.f32 %v2734_v4, %v2622_v18  ;;  %v6636_v4 = vld [vmem:[%s12747_s1 + $0x538] sm:$0xff]  ;;  %v4269_v9 = vld [vmem:[%s12749_s3 + $0x2f0] sm:$0xff] }
 0x511   : > { %5780 = vmatpush.xpose.msrb.mxu2 %v4317_v26  ;;  %5800 = vmatpush.xpose.msrb.mxu3 %v4318_v50  ;;  %v4302_v26 = vld [vmem:[%s12749_s3 + $0x3f8] sm:$0xff]  ;;  %v11625_v50 = vpop.xlane.xlu0 %3908  ;;  %v2399_v20 = vadd.f32 %v11386_v5, %v2286_v37  ;;  %v6635_v5 = vld [vmem:[%s12747_s1 + $0x530] sm:$0xff]  ;;  %v11651_v19 = vpop.f32.mrf.mxu3 }
 0x512   : > { %2833 = vst.msk [vmem:[%s7551_s16 + $0x118] sm:$0xff] %vm2799_vm0, %v2735_v29  ;;  %2668 = vmatmul.f32.gmra.mxu0 %v6635_v5  ;;  %v13038_v5 = vld [vmem:[#allocation10_spill] sm:$0xff] }
 0x513   : > { %v2512_v29 = vadd.f32 %v11417_v11, %v2399_v20  ;;  %5746 = vmatpush.xpose.msra.mxu0 %v4219_v12  ;;  %5766 = vmatpush.xpose.msra.mxu1 %v4220_v61  ;;  %v13039_v20 = vld [vmem:[#allocation14_spill] sm:$0xff]  ;;  %v4270_v12 = vld [vmem:[%s12749_s3 + $0x2f8] sm:$0xff]  ;;  %v11668_v61 = vpop.xlane.xlu2 %3809 }
 0x514   : > { %v2289_v11 = vadd.f32 %v13039_v20, %v13038_v5  ;;  %v4169_v5 = vmul.f32 0.015625, %v11392_v46  ;;  %v6637_v46 = vld [vmem:[%s12747_s1 + $0x560] sm:$0xff] }
 0x515   : > { %5781 = vmatpush.xpose.msrb.mxu2 %v4301_v54  ;;  %5801 = vmatpush.xpose.msrb.mxu3 %v4302_v26  ;;  %v2624_v37 = vpop.f32.mrf.mxu0  ;;  %v2737_v18 = vpop.f32.mrf.mxu1  ;;  %v4203_v54 = vld [vmem:[%s12749_s3 + $0xe0] sm:$0xff]  ;;  %v4204_v26 = vld [vmem:[%s12749_s3 + $0xe8] sm:$0xff] }
 0x516   : > { %2781 = vmatmul.f32.gmra.mxu1 %v6636_v4  ;;  %v2625_v4 = vadd.f32 %v2624_v37, %v2512_v29  ;;  %v5458_v37 = vperm.slane %v4168_v49, %v9015_v25  ;;  %v3915_v55 = vpop.xlane.xlu1 %3914  ;;  %v6638_v49 = vld [vmem:[%s12747_s1 + $0x568] sm:$0xff] }
 0x517   : > { %5747 = vmatpush.xpose.msra.mxu0 %v4203_v54  ;;  %5767 = vmatpush.xpose.msra.mxu1 %v4204_v26  ;;  %v4254_v54 = vld [vmem:[%s12749_s3 + $0x278] sm:$0xff]  ;;  %v4154_v26 = vmul.f32 0.015625, %v11372_v52  ;;  %v2292_v52 = vadd.f32 %v10450_v10, %v10448_v32 }
 0x518   : > { %v2738_v29 = vadd.f32 %v2737_v18, %v2625_v4  ;;  %v4253_v18 = vld [vmem:[%s12749_s3 + $0x270] sm:$0xff] }
 0x519   : > { %5782 = vmatpush.xpose.msrb.mxu2 %v4285_v58  ;;  %5802 = vmatpush.xpose.msrb.mxu3 %v4286_v17  ;;  %v2402_v58 = vadd.f32 %v11444_v31, %v2289_v11  ;;  %v11671_v17 = vpop.f32.mrf.mxu2  ;;  %v11676_v20 = vpop.xlane.xlu0 %3869  ;;  %v4188_v31 = vld [vmem:[%s12749_s3 + $0x68] sm:$0xff]  ;;  %v4170_v11 = vmul.f32 0.015625, %v11546_v6  ;;  %v4155_v6 = vmul.f32 0.015625, %v11446_v2  ;;  %v2405_v10 = vadd.f32 %v11502_v22, %v2292_v52 }
 0x51a   : > { %2836 = vst.msk [vmem:[%s7551_s16 + $0x130] sm:$0xff] %vm2799_vm0, %v2738_v29  ;;  %2671 = vmatmul.f32.gmra.mxu0 %v6637_v46  ;;  %v5459_v29 = vsel %vm4981_vm9, %v5458_v37, %v10850_v59  ;;  %v11715_v59 = vpop.f32.mrf.mxu3  ;;  %v4157_v52 = vmul.f32 0.015625, %v11607_v23  ;;  %v4205_v23 = vld [vmem:[%s12749_s3 + $0xf0] sm:$0xff] }
 0x51b   : > { %v2515_v4 = vadd.f32 %v11485_v16, %v2402_v58  ;;  %5748 = vmatpush.xpose.msra.mxu0 %v4187_v0  ;;  %5768 = vmatpush.xpose.msra.mxu1 %v4188_v31  ;;  %v4171_v16 = vmul.f32 0.015625, %v11625_v50  ;;  %v4237_v0 = vld [vmem:[%s12749_s3 + $0x1f0] sm:$0xff]  ;;  %v5462_v32 = vperm.slane %v4170_v11, %v9012_v33  ;;  %v4156_v31 = vmul.f32 0.015625, %v11454_v62 }
 0x51c   : > { %v5433_v22 = vperm.slane %v4155_v6, %v9052_v38  ;;  %v4221_v62 = vld [vmem:[%s12749_s3 + $0x170] sm:$0xff]  ;;  %v4173_v6 = vmul.f32 0.015625, %v3915_v55  ;;  %v4136_v55 = vmul.f32 0.015625, %v11504_v8  ;;  %v4137_v8 = vmul.f32 0.015625, %v11520_v39  ;;  %v4190_v39 = vld [vmem:[%s12749_s3 + $0x78] sm:$0xff] }
 0x51d   : > { %5783 = vmatpush.xpose.msrb.mxu2 %v4269_v9  ;;  %5803 = vmatpush.xpose.msrb.mxu3 %v4270_v12  ;;  %v5429_v9 = vperm.slane %v4153_v45, %v8999_v63  ;;  %v5460_v12 = vperm.slane %v4169_v5, %v8999_v63  ;;  %v2627_v46 = vpop.f32.mrf.mxu0  ;;  %v4238_v45 = vld [vmem:[%s12749_s3 + $0x1f8] sm:$0xff]  ;;  %v5431_v5 = vperm.slane %v4154_v26, %v9012_v33 }
 0x51e   : > { %2784 = vmatmul.f32.gmra.mxu1 %v6638_v49  ;;  %v2740_v49 = vpop.f32.mrf.mxu1  ;;  %v2628_v58 = vadd.f32 %v2627_v46, %v2515_v4  ;;  %v5464_v11 = vperm.slane %v4171_v16, %v9052_v38  ;;  %v2518_v46 = vadd.f32 %v11538_v1, %v2405_v10  ;;  %v3918_v16 = vpop.xlane.xlu1 %3917  ;;  %v4158_v10 = vmul.f32 0.015625, %v11676_v20  ;;  %v4189_v20 = vld [vmem:[%s12749_s3 + $0x70] sm:$0xff] }
 0x51f   : > { %v5430_v2 = vsel %vm4985_vm10, %v5429_v9, %v10759_v30  ;;  %v5461_v50 = vsel %vm4985_vm10, %v5460_v12, %v5459_v29  ;;  %v6639_v30 = vld [vmem:[%s12747_s1 + $0x590] sm:$0xff]  ;;  %v4222_v9 = vld [vmem:[%s12749_s3 + $0x178] sm:$0xff] }
 0x520   : > { %v2741_v37 = vadd.f32 %v2740_v49, %v2628_v58  ;;  %v5432_v12 = vsel %vm4989_vm11, %v5431_v5, %v5430_v2  ;;  %v5463_v29 = vsel %vm4989_vm11, %v5462_v32, %v5461_v50  ;;  %v4135_v49 = vmul.f32 0.015625, %v11433_v13 }
 0x521   : > { %5784 = vmatpush.xpose.msrb.mxu2 %v4253_v18  ;;  %5804 = vmatpush.xpose.msrb.mxu3 %v4254_v54  ;;  %v11724_v18 = vpop.xlane.xlu2 %3770  ;;  %v4172_v54 = vmul.f32 0.015625, %v11628_v14  ;;  %v11727_v4 = vpop.xlane.xlu0 %3812  ;;  %v6640_v14 = vld [vmem:[%s12747_s1 + $0x598] sm:$0xff]  ;;  %v2295_v58 = vadd.f32 %v10508_v3, %v10506_v44  ;;  %v5434_v32 = vsel %vm4993_vm12, %v5433_v22, %v5432_v12  ;;  %v5465_v1 = vsel %vm4993_vm12, %v5464_v11, %v5463_v29 }
 0x522   : > { %v11729_v26 = vpop.f32.mrf.mxu2  ;;  %2839 = vst.msk [vmem:[%s7551_s16 + $0x148] sm:$0xff] %vm2799_vm0, %v2741_v37  ;;  %2674 = vmatmul.f32.gmra.mxu0 %v6639_v30  ;;  %v4206_v44 = vld [vmem:[%s12749_s3 + $0xf8] sm:$0xff]  ;;  %v4174_v50 = vmul.f32 0.015625, %v3918_v16  ;;  %v5394_v37 = vperm.slane %v4135_v49, %v8972_v15  ;;  %v11770_v11 = vpop.f32.mrf.mxu3  ;;  %v6641_v15 = vld [vmem:[%s12747_s1 + $0x5c0] sm:$0xff]  ;;  %v4673_v49 = vld [vmem:[%s12749_s3 + $0xf90] sm:$0xff] }
 0x523   : > { %v2408_v3 = vadd.f32 %v11563_v28, %v2295_v58  ;;  %v6642_v28 = vld [vmem:[%s12747_s1 + $0x5c8] sm:$0xff] }
 0x524   : > { %v5470_v29 = vperm.slane %v4174_v50, %v9521_v60  ;;  %v6644_v50 = vld [vmem:[%s12747_s1 + $0x5f8] sm:$0xff] }
 0x525   : > { %5785 = vmatpush.xpose.msrb.mxu2 %v4237_v0  ;;  %5805 = vmatpush.xpose.msrb.mxu3 %v4238_v45  ;;  %v5435_v0 = vperm.slane %v4156_v31, %v9038_v36  ;;  %v5466_v45 = vperm.slane %v4172_v54, %v9038_v36  ;;  %v2630_v5 = vpop.f32.mrf.mxu0  ;;  %v5437_v31 = vperm.slane %v4157_v52, %v9226_v56  ;;  %v4674_v52 = vld [vmem:[%s12749_s3 + $0xf98] sm:$0xff] }
 0x526   : > { %2787 = vmatmul.f32.gmra.mxu1 %v6640_v14  ;;  %v2743_v2 = vpop.f32.mrf.mxu1  ;;  %v2631_v13 = vadd.f32 %v2630_v5, %v2518_v46  ;;  %v5468_v54 = vperm.slane %v4173_v6, %v9226_v56  ;;  %v2521_v6 = vadd.f32 %v11590_v42, %v2408_v3  ;;  %v4138_v5 = vmul.f32 0.015625, %v11668_v61 }
 0x527   : > { %v5436_v30 = vsel %vm4997_vm13, %v5435_v0, %v5434_v32  ;;  %v5467_v14 = vsel %vm4997_vm13, %v5466_v45, %v5465_v1  ;;  %v4122_v45 = vmul.f32 0.015625, %v11494_v40  ;;  %v5398_v1 = vperm.slane %v4137_v8, %v8999_v63 }
 0x528   : > { %v2744_v22 = vadd.f32 %v2743_v2, %v2631_v13  ;;  %v5438_v58 = vsel %vm5001_vm14, %v5437_v31, %v5436_v30  ;;  %v5469_v0 = vsel %vm5001_vm14, %v5468_v54, %v5467_v14  ;;  %v4123_v61 = vmul.f32 0.015625, %v11565_v51  ;;  %v4641_v30 = vld [vmem:[%s12749_s3 + $0xe90] sm:$0xff]  ;;  %v4642_v14 = vld [vmem:[%s12749_s3 + $0xe98] sm:$0xff] }
 0x529   : > { %5786 = vmatpush.xpose.msrb.mxu2 %v4221_v62  ;;  %5806 = vmatpush.xpose.msrb.mxu3 %v4222_v9  ;;  %v5396_v62 = vperm.slane %v4136_v55, %v9015_v25  ;;  %v5439_v9 = vperm.slane %v4158_v10, %v9521_v60  ;;  %v11791_v12 = vpop.xlane.xlu2 %3773  ;;  %v3816_v46 = vpop.xlane.xlu0 %3815  ;;  %v5395_v25 = vsel %vm4977_vm8, %v5394_v37, %v10893_v7  ;;  %v6643_v10 = vld [vmem:[%s12747_s1 + $0x5f0] sm:$0xff] }
 0x52a   : > { %2842 = vst.msk [vmem:[%s7551_s16 + $0x160] sm:$0xff] %vm2799_vm0, %v2744_v22  ;;  %2677 = vmatmul.f32.gmra.mxu0 %v6641_v15  ;;  %v11801_v16 = vpop.f32.mrf.mxu2  ;;  %v2298_v7 = vadd.f32 %v10561_v24, %v10559_v47  ;;  %v11817_v40 = vsel %vm5005_vm15, %v5470_v29, %v5469_v0  ;;  %v4657_v24 = vld [vmem:[%s12749_s3 + $0xf10] sm:$0xff]  ;;  %v4658_v47 = vld [vmem:[%s12749_s3 + $0xf18] sm:$0xff]  ;;  %v5369_v55 = vperm.slane %v4122_v45, %v9012_v33  ;;  %v11841_v37 = vpop.f32.mrf.mxu3  ;;  %v4140_v31 = vmul.f32 0.015625, %v3816_v46 }
 0x52b   : > { %v5397_v13 = vsel %vm4981_vm9, %v5396_v62, %v5395_v25  ;;  %v5400_v51 = vperm.slane %v4138_v5, %v9012_v33  ;;  %v5371_v54 = vperm.slane %v4123_v61, %v9052_v38  ;;  %v4626_v0 = vld [vmem:[%s12749_s3 + $0xe18] sm:$0xff]  ;;  %v4609_v61 = vld [vmem:[%s12749_s3 + $0xd90] sm:$0xff] }
 0x52c   : > { %v2411_v3 = vadd.f32 %v11617_v43, %v2298_v7  ;;  %v4124_v43 = vmul.f32 0.015625, %v11575_v21  ;;  %v5370_v21 = vsel %vm4989_vm11, %v5369_v55, %v10940_v34  ;;  %v4639_v55 = vld [vmem:[%s12749_s3 + $0xe80] sm:$0xff] }
 0x52d   : > { %5787 = vmatpush.xpose.msrb.mxu2 %v4205_v23  ;;  %5807 = vmatpush.xpose.msrb.mxu3 %v4206_v44  ;;  %v2633_v2 = vpop.f32.mrf.mxu0  ;;  %v11814_v23 = vsel %vm5005_vm15, %v5439_v9, %v5438_v58  ;;  %v4139_v44 = vmul.f32 0.015625, %v11727_v4  ;;  %v5399_v4 = vsel %vm4985_vm10, %v5398_v1, %v5397_v13  ;;  %v4625_v58 = vld [vmem:[%s12749_s3 + $0xe10] sm:$0xff] }
 0x52e   : > { %2790 = vmatmul.f32.gmra.mxu1 %v6642_v28  ;;  %v2746_v32 = vpop.f32.mrf.mxu1  ;;  %v2634_v42 = vadd.f32 %v2633_v2, %v2521_v6  ;;  %v2524_v8 = vadd.f32 %v11651_v19, %v2411_v3  ;;  %v5401_v15 = vsel %vm4989_vm11, %v5400_v51, %v5399_v4  ;;  %v5373_v46 = vperm.slane %v4124_v43, %v9038_v36  ;;  %v13040_v2 = vld [vmem:[#allocation6_spill] sm:$0xff]  ;;  %v4640_v51 = vld [vmem:[%s12749_s3 + $0xe88] sm:$0xff]  ;;  %v4593_v43 = vld [vmem:[%s12749_s3 + $0xd10] sm:$0xff] }
 0x52f   : > { %v5402_v22 = vperm.slane %v4139_v44, %v9052_v38  ;;  %v4125_v38 = vmul.f32 0.015625, %v11724_v18  ;;  %v5404_v19 = vperm.slane %v4140_v31, %v9038_v36  ;;  %v4126_v36 = vmul.f32 0.015625, %v11791_v12  ;;  %v4610_v44 = vld [vmem:[%s12749_s3 + $0xd98] sm:$0xff] }
 0x530   : > { %v2747_v63 = vadd.f32 %v2746_v32, %v2634_v42  ;;  %v4655_v32 = vld [vmem:[%s12749_s3 + $0xf00] sm:$0xff]  ;;  %v2304_v3 = vadd.f32 %v10675_v53, %v10673_v57  ;;  %v4594_v31 = vld [vmem:[%s12749_s3 + $0xd18] sm:$0xff] }
 0x531   : > { %5788 = vmatpush.xpose.msrb.mxu2 %v4189_v20  ;;  %5808 = vmatpush.xpose.msrb.mxu3 %v4190_v39  ;;  %v3819_v33 = vpop.xlane.xlu2 %3818  ;;  %v3822_v28 = vpop.xlane.xlu0 %3821  ;;  %v2301_v20 = vadd.f32 %v10626_v27, %v10624_v48  ;;  %v4671_v48 = vld [vmem:[%s12749_s3 + $0xf80] sm:$0xff]  ;;  %v4672_v27 = vld [vmem:[%s12749_s3 + $0xf88] sm:$0xff]  ;;  %v5375_v45 = vperm.slane %v4125_v38, %v9226_v56  ;;  %v5377_v7 = vperm.slane %v4126_v36, %v9521_v60  ;;  %v13043_v36 = vld [vmem:[#allocation13_spill] sm:$0xff] }
 0x532   : > { %2845 = vst.msk [vmem:[%s7551_s16 + $0x178] sm:$0xff] %vm2799_vm0, %v2747_v63  ;;  %2680 = vmatmul.f32.gmra.mxu0 %v6643_v10  ;;  %v4141_v39 = vmul.f32 0.015625, %v3819_v33  ;;  %v11859_v29 = vpop.f32.mrf.mxu2  ;;  %v4142_v6 = vmul.f32 0.015625, %v3822_v28  ;;  %v11894_v42 = vpop.f32.mrf.mxu3  ;;  %v2417_v4 = vadd.f32 %v11729_v26, %v2304_v3  ;;  %v4623_v26 = vld [vmem:[%s12749_s3 + $0xe00] sm:$0xff]  ;;  %v4624_v33 = vld [vmem:[%s12749_s3 + $0xe08] sm:$0xff] }
 0x533   : > { %v2414_v18 = vadd.f32 %v11671_v17, %v2301_v20  ;;  %v4608_v38 = vld [vmem:[%s12749_s3 + $0xd88] sm:$0xff] }
 0x534   : > { %5789 = vmatmul.f32.vlgmr.msrb.gmra.mxu2 %v11814_v23  ;;  %5809 = vmatmul.f32.vlgmr.msrb.gmra.mxu3 %v11817_v40  ;;  %v5406_v5 = vperm.slane %v4141_v39, %v9226_v56  ;;  %v4656_v56 = vld [vmem:[%s12749_s3 + $0xf08] sm:$0xff]  ;;  %v5408_v13 = vperm.slane %v4142_v6, %v9521_v60 }
 0x535   : > { %5853 = vmatpush.xpose.msra.mxu2 %v4673_v49  ;;  %5873 = vmatpush.xpose.msra.mxu3 %v4674_v52  ;;  %v2636_v62 = vpop.f32.mrf.mxu0  ;;  %v5372_v49 = vsel %vm4993_vm12, %v5371_v54, %v5370_v21  ;;  %v5403_v52 = vsel %vm4993_vm12, %v5402_v22, %v5401_v15  ;;  %v2527_v1 = vadd.f32 %v11715_v59, %v2414_v18  ;;  %v4577_v22 = vld [vmem:[%s12749_s3 + $0xc90] sm:$0xff]  ;;  %v13042_v18 = vld [vmem:[#allocation17_spill] sm:$0xff]  ;;  %v4544_v3 = vld [vmem:[%s12749_s3 + $0xb88] sm:$0xff] }
 0x536   : > { %2793 = vmatmul.f32.gmra.mxu1 %v6644_v50  ;;  %v2749_v9 = vpop.f32.mrf.mxu1  ;;  %v2637_v34 = vadd.f32 %v2636_v62, %v2524_v8  ;;  %v5374_v17 = vsel %vm4997_vm13, %v5373_v46, %v5372_v49  ;;  %v5405_v12 = vsel %vm4997_vm13, %v5404_v19, %v5403_v52  ;;  %v2530_v54 = vadd.f32 %v11770_v11, %v2417_v4  ;;  %v13041_v21 = vld [vmem:[#allocation8_spill] sm:$0xff]  ;;  %v4607_v11 = vld [vmem:[%s12749_s3 + $0xd80] sm:$0xff]  ;;  %v4592_v19 = vld [vmem:[%s12749_s3 + $0xd08] sm:$0xff] }
 0x537   : > { %v5376_v63 = vsel %vm5001_vm14, %v5375_v45, %v5374_v17  ;;  %v2307_v15 = vadd.f32 %v13041_v21, %v10718_v41  ;;  %v4561_v41 = vld [vmem:[%s12749_s3 + $0xc10] sm:$0xff]  ;;  %v4546_v52 = vld [vmem:[%s12749_s3 + $0xb98] sm:$0xff]  ;;  %v2310_v6 = vadd.f32 %v13043_v36, %v13042_v18  ;;  %v13049_v18 = vld [vmem:[#allocation34_spill] sm:$0xff] }
 0x538   : > { %v2750_v25 = vadd.f32 %v2749_v9, %v2637_v34  ;;  %v11918_v57 = vsel %vm5005_vm15, %v5377_v7, %v5376_v63  ;;  %v4562_v9 = vld [vmem:[%s12749_s3 + $0xc18] sm:$0xff]  ;;  %v4545_v49 = vld [vmem:[%s12749_s3 + $0xb90] sm:$0xff]  ;;  %v13044_v63 = vld [vmem:[#allocation22_spill] sm:$0xff] }
 0x539   : > { %5854 = vmatpush.xpose.msra.mxu2 %v4657_v24  ;;  %5874 = vmatpush.xpose.msra.mxu3 %v4658_v47  ;;  %v5407_v24 = vsel %vm5001_vm14, %v5406_v5, %v5405_v12  ;;  %v2420_v39 = vadd.f32 %v11801_v16, %v2307_v15  ;;  %v4591_v16 = vld [vmem:[%s12749_s3 + $0xd00] sm:$0xff]  ;;  %v4529_v17 = vld [vmem:[%s12749_s3 + $0xb10] sm:$0xff]  ;;  %v4530_v12 = vld [vmem:[%s12749_s3 + $0xb18] sm:$0xff] }
 0x53a   : > { %5669 = vmatmul.f32.vlgmr.msrb.gmra.mxu0 %v13040_v2  ;;  %2848 = vst.msk [vmem:[%s7551_s16 + $0x190] sm:$0xff] %vm2799_vm0, %v2750_v25  ;;  %v11915_v10 = vpop.f32.mrf.mxu2  ;;  %v11921_v53 = vsel %vm5005_vm15, %v5408_v13, %v5407_v24  ;;  %v11948_v28 = vpop.f32.mrf.mxu3  ;;  %v4513_v7 = vld [vmem:[%s12749_s3 + $0xa90] sm:$0xff]  ;;  %v4514_v13 = vld [vmem:[%s12749_s3 + $0xa98] sm:$0xff]  ;;  %v13045_v24 = vld [vmem:[#allocation11_spill] sm:$0xff] }
 0x53b   : > { %5813 = vmatpush.xpose.msrb.mxu0 %v4671_v48  ;;  %v2533_v34 = vadd.f32 %v11841_v37, %v2420_v39  ;;  %v4575_v37 = vld [vmem:[%s12749_s3 + $0xc80] sm:$0xff]  ;;  %v4498_v4 = vld [vmem:[%s12749_s3 + $0xa18] sm:$0xff]  ;;  %v4465_v39 = vld [vmem:[%s12749_s3 + $0x910] sm:$0xff] }
 0x53d   : > { %5855 = vmatpush.xpose.msra.mxu2 %v4641_v30  ;;  %5875 = vmatpush.xpose.msra.mxu3 %v4642_v14  ;;  %v2639_v47 = vpop.f32.mrf.mxu0  ;;  %v4578_v30 = vld [vmem:[%s12749_s3 + $0xc98] sm:$0xff] }
 0x53e   : > { %5689 = vmatmul.f32.vlgmr.msrb.gmra.mxu1 %v10714_v35  ;;  %v2752_v59 = vpop.f32.mrf.mxu1  ;;  %v2640_v60 = vadd.f32 %v2639_v47, %v2527_v1  ;;  %v2313_v47 = vadd.f32 %v13045_v24, %v13044_v63  ;;  %v13052_v24 = vld [vmem:[#allocation21_spill] sm:$0xff] }
 0x53f   : > { %5833 = vmatpush.xpose.msrb.mxu1 %v4672_v27  ;;  %5814 = vmatpush.xpose.msrb.mxu0 %v4655_v32  ;;  %v4560_v32 = vld [vmem:[%s12749_s3 + $0xc08] sm:$0xff] }
 0x540   : > { %v2753_v50 = vadd.f32 %v2752_v59, %v2640_v60  ;;  %v2426_v60 = vadd.f32 %v11915_v10, %v2313_v47  ;;  %v4527_v10 = vld [vmem:[%s12749_s3 + $0xb00] sm:$0xff]  ;;  %v13053_v47 = vld [vmem:[#allocation25_spill] sm:$0xff] }
 0x541   : > { %5856 = vmatpush.xpose.msra.mxu2 %v4625_v58  ;;  %5876 = vmatpush.xpose.msra.mxu3 %v4626_v0  ;;  %v4576_v58 = vld [vmem:[%s12749_s3 + $0xc88] sm:$0xff]  ;;  %v2423_v0 = vadd.f32 %v11859_v29, %v2310_v6  ;;  %v4559_v29 = vld [vmem:[%s12749_s3 + $0xc00] sm:$0xff] }
 0x542   : > { %5749 = vmatmul.f32.vlgmr.msra.gmra.mxu0 %v11918_v57  ;;  %2851 = vst.msk [vmem:[%s7551_s16 + $0x1a8] sm:$0xff] %vm2799_vm0, %v2753_v50  ;;  %v11963_v46 = vpop.f32.mrf.mxu2  ;;  %v2541_v45 = vpop.f32.mrf.mxu3  ;;  %v4479_v6 = vld [vmem:[%s12749_s3 + $0x980] sm:$0xff] }
 0x543   : > { %5834 = vmatpush.xpose.msrb.mxu1 %v4656_v56  ;;  %5815 = vmatpush.xpose.msrb.mxu0 %v4639_v55  ;;  %v2536_v56 = vadd.f32 %v11894_v42, %v2423_v0  ;;  %v4543_v42 = vld [vmem:[%s12749_s3 + $0xb80] sm:$0xff]  ;;  %v4434_v0 = vld [vmem:[%s12749_s3 + $0x818] sm:$0xff] }
 0x545   : > { %5857 = vmatpush.xpose.msra.mxu2 %v4609_v61  ;;  %5877 = vmatpush.xpose.msra.mxu3 %v4610_v44  ;;  %v2642_v14 = vpop.f32.mrf.mxu0 }
 0x546   : > { %5769 = vmatmul.f32.vlgmr.msra.gmra.mxu1 %v11921_v53  ;;  %v2755_v8 = vpop.f32.mrf.mxu1  ;;  %v2643_v20 = vadd.f32 %v2642_v14, %v2530_v54  ;;  %v13047_v14 = vld [vmem:[#allocation30_spill] sm:$0xff] }
 0x547   : > { %5835 = vmatpush.xpose.msrb.mxu1 %v4640_v51  ;;  %5816 = vmatpush.xpose.msrb.mxu0 %v4623_v26  ;;  %v4497_v51 = vld [vmem:[%s12749_s3 + $0xa10] sm:$0xff] }
 0x548   : > { %v2756_v62 = vadd.f32 %v2755_v8, %v2643_v20  ;;  %v4481_v26 = vld [vmem:[%s12749_s3 + $0x990] sm:$0xff]  ;;  %v4512_v20 = vld [vmem:[%s12749_s3 + $0xa88] sm:$0xff] }
 0x549   : > { %5858 = vmatpush.xpose.msra.mxu2 %v4593_v43  ;;  %5878 = vmatpush.xpose.msra.mxu3 %v4594_v31  ;;  %v4528_v43 = vld [vmem:[%s12749_s3 + $0xb08] sm:$0xff]  ;;  %v2539_v31 = vadd.f32 %v11948_v28, %v2426_v60  ;;  %v4511_v28 = vld [vmem:[%s12749_s3 + $0xa80] sm:$0xff] }
 0x54a   : > { %2854 = vst.msk [vmem:[%s7551_s16 + $0x1c0] sm:$0xff] %vm2799_vm0, %v2756_v62  ;;  %v12004_v1 = vpop.f32.mrf.mxu2  ;;  %v12027_v50 = vpop.f32.mrf.mxu3  ;;  %v4466_v62 = vld [vmem:[%s12749_s3 + $0x918] sm:$0xff]  ;;  %v4447_v60 = vld [vmem:[%s12749_s3 + $0x880] sm:$0xff] }
 0x54b   : > { %5836 = vmatpush.xpose.msrb.mxu1 %v4624_v33  ;;  %5817 = vmatpush.xpose.msrb.mxu0 %v4607_v11  ;;  %v4482_v33 = vld [vmem:[%s12749_s3 + $0x998] sm:$0xff] }
 0x54d   : > { %5859 = vmatpush.xpose.msra.mxu2 %v4577_v22  ;;  %5879 = vmatpush.xpose.msra.mxu3 %v4578_v30  ;;  %v2645_v48 = vpop.f32.mrf.mxu0  ;;  %v13046_v30 = vld [vmem:[#allocation20_spill] sm:$0xff] }
 0x54e   : > { %v2758_v27 = vpop.f32.mrf.mxu1  ;;  %v2646_v25 = vadd.f32 %v2645_v48, %v2533_v34  ;;  %v2316_v8 = vadd.f32 %v13047_v14, %v13046_v30  ;;  %v4450_v34 = vld [vmem:[%s12749_s3 + $0x898] sm:$0xff] }
 0x54f   : > { %5837 = vmatpush.xpose.msrb.mxu1 %v4608_v38  ;;  %5818 = vmatpush.xpose.msrb.mxu0 %v4591_v16 }
 0x550   : > { %v2759_v5 = vadd.f32 %v2758_v27, %v2646_v25  ;;  %v2429_v11 = vadd.f32 %v11963_v46, %v2316_v8  ;;  %v13048_v27 = vld [vmem:[#allocation29_spill] sm:$0xff]  ;;  %v4480_v25 = vld [vmem:[%s12749_s3 + $0x988] sm:$0xff]  ;;  %v4629_v8 = vld [vmem:[%s12749_s3 + $0xe30] sm:$0xff] }
 0x551   : > { %5860 = vmatpush.xpose.msra.mxu2 %v4561_v41  ;;  %5880 = vmatpush.xpose.msra.mxu3 %v4562_v9  ;;  %v4495_v41 = vld [vmem:[%s12749_s3 + $0xa00] sm:$0xff]  ;;  %v4496_v9 = vld [vmem:[%s12749_s3 + $0xa08] sm:$0xff]  ;;  %v2319_v36 = vadd.f32 %v13049_v18, %v13048_v27 }
 0x552   : > { %2857 = vst.msk [vmem:[%s7551_s16 + $0x1d8] sm:$0xff] %vm2799_vm0, %v2759_v5  ;;  %v2434_v15 = vpop.f32.mrf.mxu2  ;;  %v2542_v46 = vadd.f32 %v2541_v45, %v2429_v11  ;;  %v2547_v16 = vpop.f32.mrf.mxu3  ;;  %v4644_v27 = vld [vmem:[%s12749_s3 + $0xea8] sm:$0xff] }
 0x553   : > { %5838 = vmatpush.xpose.msrb.mxu1 %v4592_v19  ;;  %5819 = vmatpush.xpose.msrb.mxu0 %v4575_v37  ;;  %v4449_v19 = vld [vmem:[%s12749_s3 + $0x890] sm:$0xff]  ;;  %v2432_v45 = vadd.f32 %v12004_v1, %v2319_v36 }
 0x554   : > { %v4661_v1 = vld [vmem:[%s12749_s3 + $0xf30] sm:$0xff] }
 0x555   : > { %5861 = vmatpush.xpose.msra.mxu2 %v4545_v49  ;;  %5881 = vmatpush.xpose.msra.mxu3 %v4546_v52  ;;  %v2648_v61 = vpop.f32.mrf.mxu0 }
 0x556   : > { %v2761_v44 = vpop.f32.mrf.mxu1  ;;  %v2649_v59 = vadd.f32 %v2648_v61, %v2536_v56  ;;  %v2545_v56 = vadd.f32 %v12027_v50, %v2432_v45  ;;  %v13051_v61 = vld [vmem:[#allocation27_spill] sm:$0xff]  ;;  %v4645_v50 = vld [vmem:[%s12749_s3 + $0xeb0] sm:$0xff] }
 0x557   : > { %5839 = vmatpush.xpose.msrb.mxu1 %v4576_v58  ;;  %5820 = vmatpush.xpose.msrb.mxu0 %v4559_v29  ;;  %v4433_v58 = vld [vmem:[%s12749_s3 + $0x810] sm:$0xff]  ;;  %v4463_v29 = vld [vmem:[%s12749_s3 + $0x900] sm:$0xff] }
 0x558   : > { %v2762_v55 = vadd.f32 %v2761_v44, %v2649_v59  ;;  %v2322_v59 = vadd.f32 %v13053_v47, %v13052_v24  ;;  %v4565_v24 = vld [vmem:[%s12749_s3 + $0xc30] sm:$0xff]  ;;  %v4566_v47 = vld [vmem:[%s12749_s3 + $0xc38] sm:$0xff] }
 0x559   : > { %5862 = vmatpush.xpose.msra.mxu2 %v4529_v17  ;;  %5882 = vmatpush.xpose.msra.mxu3 %v4530_v12  ;;  %v4677_v17 = vld [vmem:[%s12749_s3 + $0xfb0] sm:$0xff]  ;;  %v4678_v12 = vld [vmem:[%s12749_s3 + $0xfb8] sm:$0xff] }
 0x55a   : > { %2860 = vst.msk [vmem:[%s7551_s16 + $0x1f0] sm:$0xff] %vm2799_vm0, %v2762_v55  ;;  %v2437_v5 = vpop.f32.mrf.mxu2  ;;  %v4448_v55 = vld [vmem:[%s12749_s3 + $0x888] sm:$0xff] }
 0x55b   : > { %5840 = vmatpush.xpose.msrb.mxu1 %v4560_v32  ;;  %5821 = vmatpush.xpose.msrb.mxu0 %v4543_v42  ;;  %v4464_v32 = vld [vmem:[%s12749_s3 + $0x908] sm:$0xff]  ;;  %v2550_v42 = vpop.f32.mrf.mxu3 }
 0x55d   : > { %5863 = vmatpush.xpose.msra.mxu2 %v4513_v7  ;;  %5883 = vmatpush.xpose.msra.mxu3 %v4514_v13  ;;  %v2651_v54 = vpop.f32.mrf.mxu0  ;;  %v4662_v7 = vld [vmem:[%s12749_s3 + $0xf38] sm:$0xff]  ;;  %v13050_v13 = vld [vmem:[#allocation18_spill] sm:$0xff] }
 0x55e   : > { %v2764_v22 = vpop.f32.mrf.mxu1  ;;  %v2652_v21 = vadd.f32 %v2651_v54, %v2539_v31  ;;  %v4431_v31 = vld [vmem:[%s12749_s3 + $0x800] sm:$0xff] }
 0x55f   : > { %5841 = vmatpush.xpose.msrb.mxu1 %v4544_v3  ;;  %5822 = vmatpush.xpose.msrb.mxu0 %v4527_v10  ;;  %v4646_v10 = vld [vmem:[%s12749_s3 + $0xeb8] sm:$0xff]  ;;  %v4675_v54 = vld [vmem:[%s12749_s3 + $0xfa0] sm:$0xff] }
 0x560   : > { %v2765_v38 = vadd.f32 %v2764_v22, %v2652_v21  ;;  %v4676_v22 = vld [vmem:[%s12749_s3 + $0xfa8] sm:$0xff]  ;;  %v4630_v21 = vld [vmem:[%s12749_s3 + $0xe38] sm:$0xff] }
 0x561   : > { %5864 = vmatpush.xpose.msra.mxu2 %v4497_v51  ;;  %5884 = vmatpush.xpose.msra.mxu3 %v4498_v4  ;;  %v2435_v51 = vadd.f32 %v2434_v15, %v2322_v59  ;;  %v13054_v15 = vld [vmem:[#allocation49_spill] sm:$0xff] }
 0x562   : > { %2863 = vst.msk [vmem:[%s7551_s16 + $0x208] sm:$0xff] %vm2799_vm0, %v2765_v38  ;;  %v13060_v59 = vld [vmem:[#allocation37_spill] sm:$0xff] }
 0x563   : > { %5842 = vmatpush.xpose.msrb.mxu1 %v4528_v43  ;;  %5823 = vmatpush.xpose.msrb.mxu0 %v4511_v28  ;;  %v2440_v43 = vpop.f32.mrf.mxu2  ;;  %v13055_v28 = vld [vmem:[#allocation57_spill] sm:$0xff] }
 0x565   : > { %5865 = vmatpush.xpose.msra.mxu2 %v4481_v26  ;;  %5885 = vmatpush.xpose.msra.mxu3 %v4482_v33  ;;  %v2654_v49 = vpop.f32.mrf.mxu0  ;;  %v4432_v26 = vld [vmem:[%s12749_s3 + $0x808] sm:$0xff]  ;;  %v2548_v33 = vadd.f32 %v2547_v16, %v2435_v51 }
 0x566   : > { %v2767_v52 = vpop.f32.mrf.mxu1  ;;  %v2655_v48 = vadd.f32 %v2654_v49, %v2542_v46  ;;  %v13056_v46 = vld [vmem:[#allocation24_spill] sm:$0xff]  ;;  %v13057_v16 = vld [vmem:[#allocation19_spill] sm:$0xff] }
 0x567   : > { %5843 = vmatpush.xpose.msrb.mxu1 %v4512_v20  ;;  %5824 = vmatpush.xpose.msrb.mxu0 %v4495_v41  ;;  %v2325_v20 = vadd.f32 %v13055_v28, %v13054_v15  ;;  %v4659_v41 = vld [vmem:[%s12749_s3 + $0xf20] sm:$0xff]  ;;  %v13062_v15 = vld [vmem:[#allocation33_spill] sm:$0xff] }
 0x568   : > { %v2768_v37 = vadd.f32 %v2767_v52, %v2655_v48  ;;  %v4643_v48 = vld [vmem:[%s12749_s3 + $0xea0] sm:$0xff]  ;;  %v13063_v28 = vld [vmem:[#allocation45_spill] sm:$0xff] }
 0x569   : > { %5866 = vmatpush.xpose.msra.mxu2 %v4465_v39  ;;  %5886 = vmatpush.xpose.msra.mxu3 %v4466_v62  ;;  %v2438_v38 = vadd.f32 %v2437_v5, %v2325_v20  ;;  %v2553_v39 = vpop.f32.mrf.mxu3  ;;  %v2334_v20 = vadd.f32 %v13063_v28, %v13062_v15 }
 0x56a   : > { %2866 = vst.msk [vmem:[%s7551_s16 + $0x220] sm:$0xff] %vm2799_vm0, %v2768_v37  ;;  %v13058_v37 = vld [vmem:[#allocation32_spill] sm:$0xff] }
 0x56b   : > { %5844 = vmatpush.xpose.msrb.mxu1 %v4496_v9  ;;  %5825 = vmatpush.xpose.msrb.mxu0 %v4479_v6  ;;  %v4660_v9 = vld [vmem:[%s12749_s3 + $0xf28] sm:$0xff]  ;;  %v2551_v49 = vadd.f32 %v2550_v42, %v2438_v38  ;;  %v2443_v52 = vpop.f32.mrf.mxu2  ;;  %v4597_v6 = vld [vmem:[%s12749_s3 + $0xd30] sm:$0xff] }
 0x56c   : > { %v13061_v42 = vld [vmem:[#allocation52_spill] sm:$0xff] }
 0x56d   : > { %5867 = vmatpush.xpose.msra.mxu2 %v4449_v19  ;;  %5887 = vmatpush.xpose.msra.mxu3 %v4450_v34  ;;  %v4613_v19 = vld [vmem:[%s12749_s3 + $0xdb0] sm:$0xff]  ;;  %v4614_v34 = vld [vmem:[%s12749_s3 + $0xdb8] sm:$0xff] }
 0x56f   : > { %5845 = vmatpush.xpose.msrb.mxu1 %v4480_v25  ;;  %v2657_v44 = vpop.f32.mrf.mxu0  ;;  %5826 = vmatpush.xpose.msrb.mxu0 %v4463_v29  ;;  %v4598_v25 = vld [vmem:[%s12749_s3 + $0xd38] sm:$0xff]  ;;  %v4628_v29 = vld [vmem:[%s12749_s3 + $0xe28] sm:$0xff] }
 0x570   : > { %v2658_v3 = vadd.f32 %v2657_v44, %v2545_v56  ;;  %v4582_v56 = vld [vmem:[%s12749_s3 + $0xcb8] sm:$0xff] }
 0x571   : > { %5868 = vmatpush.xpose.msra.mxu2 %v4433_v58  ;;  %5888 = vmatpush.xpose.msra.mxu3 %v4434_v0  ;;  %v13059_v58 = vld [vmem:[#allocation47_spill] sm:$0xff] }
 0x572   : > { %v2328_v0 = vadd.f32 %v13059_v58, %v13058_v37 }
 0x573   : > { %v2770_v63 = vpop.f32.mrf.mxu1  ;;  %5846 = vmatpush.xpose.msrb.mxu1 %v4464_v32  ;;  %5827 = vmatpush.xpose.msrb.mxu0 %v4447_v60  ;;  %v4581_v32 = vld [vmem:[%s12749_s3 + $0xcb0] sm:$0xff]  ;;  %v2446_v60 = vpop.f32.mrf.mxu2 }
 0x574   : > { %5869 = vmatmul.f32.vlgmr.msra.gmra.mxu2 %v13050_v13  ;;  %5889 = vmatmul.f32.vlgmr.msra.gmra.mxu3 %v13051_v61  ;;  %v2771_v4 = vadd.f32 %v2770_v63, %v2658_v3  ;;  %v2441_v5 = vadd.f32 %v2440_v43, %v2328_v0  ;;  %v4611_v13 = vld [vmem:[%s12749_s3 + $0xda0] sm:$0xff]  ;;  %v4612_v61 = vld [vmem:[%s12749_s3 + $0xda8] sm:$0xff]  ;;  %v2331_v3 = vadd.f32 %v13061_v42, %v13060_v59  ;;  %v4549_v43 = vld [vmem:[%s12749_s3 + $0xbb0] sm:$0xff] }
 0x575   : > { %5933 = vmatpush.xpose.msrb.mxu2 %v4677_v17  ;;  %5953 = vmatpush.xpose.msrb.mxu3 %v4678_v12  ;;  %v4627_v12 = vld [vmem:[%s12749_s3 + $0xe20] sm:$0xff]  ;;  %v2447_v38 = vadd.f32 %v2446_v60, %v2334_v20  ;;  %v4681_v20 = vld [vmem:[%s12749_s3 + $0xfd0] sm:$0xff] }
 0x576   : > { %2869 = vst.msk [vmem:[%s7551_s16 + $0x238] sm:$0xff] %vm2799_vm0, %v2771_v4  ;;  %v2444_v51 = vadd.f32 %v2443_v52, %v2331_v3 }
 0x577   : > { %5847 = vmatpush.xpose.msrb.mxu1 %v4448_v55  ;;  %v2660_v30 = vpop.f32.mrf.mxu0  ;;  %5828 = vmatpush.xpose.msrb.mxu0 %v4431_v31  ;;  %v4550_v31 = vld [vmem:[%s12749_s3 + $0xbb8] sm:$0xff] }
 0x578   : > { %v2661_v11 = vadd.f32 %v2660_v30, %v2548_v33 }
 0x579   : > { %5934 = vmatpush.xpose.msrb.mxu2 %v4661_v1  ;;  %5954 = vmatpush.xpose.msrb.mxu3 %v4662_v7  ;;  %v2556_v1 = vpop.f32.mrf.mxu3  ;;  %v2554_v7 = vadd.f32 %v2553_v39, %v2441_v5  ;;  %v4531_v5 = vld [vmem:[%s12749_s3 + $0xb20] sm:$0xff] }
 0x57a   : > { %5829 = vmatmul.f32.vlgmr.msrb.gmra.mxu0 %v13056_v46  ;;  %v4517_v46 = vld [vmem:[%s12749_s3 + $0xab0] sm:$0xff] }
 0x57b   : > { %v2773_v14 = vpop.f32.mrf.mxu1  ;;  %5848 = vmatpush.xpose.msrb.mxu1 %v4432_v26  ;;  %5893 = vmatpush.xpose.msra.mxu0 %v4675_v54  ;;  %v2557_v26 = vadd.f32 %v2556_v1, %v2444_v51  ;;  %v4579_v54 = vld [vmem:[%s12749_s3 + $0xca0] sm:$0xff]  ;;  %v2449_v39 = vpop.f32.mrf.mxu2  ;;  %v4500_v51 = vld [vmem:[%s12749_s3 + $0xa28] sm:$0xff] }
 0x57c   : > { %v2774_v62 = vadd.f32 %v2773_v14, %v2661_v11  ;;  %v4515_v1 = vld [vmem:[%s12749_s3 + $0xaa0] sm:$0xff] }
 0x57d   : > { %5935 = vmatpush.xpose.msrb.mxu2 %v4645_v50  ;;  %5955 = vmatpush.xpose.msrb.mxu3 %v4646_v10  ;;  %v4595_v50 = vld [vmem:[%s12749_s3 + $0xd20] sm:$0xff]  ;;  %v4596_v10 = vld [vmem:[%s12749_s3 + $0xd28] sm:$0xff] }
 0x57e   : > { %5849 = vmatmul.f32.vlgmr.msrb.gmra.mxu1 %v13057_v16  ;;  %2872 = vst.msk [vmem:[%s7551_s16 + $0x250] sm:$0xff] %vm2799_vm0, %v2774_v62  ;;  %v4518_v16 = vld [vmem:[%s12749_s3 + $0xab8] sm:$0xff] }
 0x57f   : > { %5913 = vmatpush.xpose.msra.mxu1 %v4676_v22  ;;  %5894 = vmatpush.xpose.msra.mxu0 %v4659_v41  ;;  %v2663_v18 = vpop.f32.mrf.mxu0  ;;  %v4580_v22 = vld [vmem:[%s12749_s3 + $0xca8] sm:$0xff]  ;;  %v4563_v41 = vld [vmem:[%s12749_s3 + $0xc20] sm:$0xff] }
 0x580   : > { %v2664_v45 = vadd.f32 %v2663_v18, %v2551_v49  ;;  %v4548_v49 = vld [vmem:[%s12749_s3 + $0xba8] sm:$0xff]  ;;  %v4502_v18 = vld [vmem:[%s12749_s3 + $0xa38] sm:$0xff] }
 0x581   : > { %5936 = vmatpush.xpose.msrb.mxu2 %v4629_v8  ;;  %5956 = vmatpush.xpose.msrb.mxu3 %v4630_v21  ;;  %v2559_v33 = vpop.f32.mrf.mxu3  ;;  %v4533_v8 = vld [vmem:[%s12749_s3 + $0xb30] sm:$0xff]  ;;  %v4534_v21 = vld [vmem:[%s12749_s3 + $0xb38] sm:$0xff] }
 0x583   : > { %5914 = vmatpush.xpose.msra.mxu1 %v4660_v9  ;;  %v2776_v36 = vpop.f32.mrf.mxu1  ;;  %5895 = vmatpush.xpose.msra.mxu0 %v4643_v48  ;;  %v4564_v9 = vld [vmem:[%s12749_s3 + $0xc28] sm:$0xff] }
 0x584   : > { %v2777_v17 = vadd.f32 %v2776_v36, %v2664_v45  ;;  %v13064_v36 = vld [vmem:[#allocation60_spill] sm:$0xff] }
 0x585   : > { %5937 = vmatpush.xpose.msrb.mxu2 %v4613_v19  ;;  %5957 = vmatpush.xpose.msrb.mxu3 %v4614_v34  ;;  %v2560_v19 = vadd.f32 %v2559_v33, %v2447_v38  ;;  %v4547_v34 = vld [vmem:[%s12749_s3 + $0xba0] sm:$0xff]  ;;  %v4484_v33 = vld [vmem:[%s12749_s3 + $0x9a8] sm:$0xff] }
 0x586   : > { %2875 = vst.msk [vmem:[%s7551_s16 + $0x268] sm:$0xff] %vm2799_vm0, %v2777_v17  ;;  %v4532_v17 = vld [vmem:[%s12749_s3 + $0xb28] sm:$0xff] }
 0x587   : > { %5915 = vmatpush.xpose.msra.mxu1 %v4644_v27  ;;  %5896 = vmatpush.xpose.msra.mxu0 %v4627_v12  ;;  %v2666_v44 = vpop.f32.mrf.mxu0  ;;  %v4501_v27 = vld [vmem:[%s12749_s3 + $0xa30] sm:$0xff] }
 0x588   : > { %v2667_v55 = vadd.f32 %v2666_v44, %v2554_v7  ;;  %v4485_v12 = vld [vmem:[%s12749_s3 + $0x9b0] sm:$0xff]  ;;  %v4516_v7 = vld [vmem:[%s12749_s3 + $0xaa8] sm:$0xff] }
 0x589   : > { %5938 = vmatpush.xpose.msrb.mxu2 %v4597_v6  ;;  %5958 = vmatpush.xpose.msrb.mxu3 %v4598_v25  ;;  %v13065_v6 = vld [vmem:[#allocation23_spill] sm:$0xff]  ;;  %v2562_v58 = vpop.f32.mrf.mxu3  ;;  %v4469_v44 = vld [vmem:[%s12749_s3 + $0x930] sm:$0xff] }
 0x58a   : > { %v2337_v25 = vadd.f32 %v13065_v6, %v13064_v36  ;;  %v4649_v36 = vld [vmem:[%s12749_s3 + $0xed0] sm:$0xff]  ;;  %v4650_v6 = vld [vmem:[%s12749_s3 + $0xed8] sm:$0xff] }
 0x58b   : > { %5916 = vmatpush.xpose.msra.mxu1 %v4628_v29  ;;  %v2779_v63 = vpop.f32.mrf.mxu1  ;;  %5897 = vmatpush.xpose.msra.mxu0 %v4611_v13  ;;  %v4486_v29 = vld [vmem:[%s12749_s3 + $0x9b8] sm:$0xff] }
 0x58c   : > { %v2780_v4 = vadd.f32 %v2779_v63, %v2667_v55  ;;  %v2450_v0 = vadd.f32 %v2449_v39, %v2337_v25  ;;  %v4470_v63 = vld [vmem:[%s12749_s3 + $0x938] sm:$0xff]  ;;  %v4499_v55 = vld [vmem:[%s12749_s3 + $0xa20] sm:$0xff] }
 0x58d   : > { %5939 = vmatpush.xpose.msrb.mxu2 %v4581_v32  ;;  %5959 = vmatpush.xpose.msrb.mxu3 %v4582_v56  ;;  %v2452_v32 = vpop.f32.mrf.mxu2 }
 0x58e   : > { %2878 = vst.msk [vmem:[%s7551_s16 + $0x280] sm:$0xff] %vm2799_vm0, %v2780_v4  ;;  %v2563_v56 = vadd.f32 %v2562_v58, %v2450_v0  ;;  %v4435_v58 = vld [vmem:[%s12749_s3 + $0x820] sm:$0xff]  ;;  %v4436_v0 = vld [vmem:[%s12749_s3 + $0x828] sm:$0xff] }
 0x58f   : > { %5917 = vmatpush.xpose.msra.mxu1 %v4612_v61  ;;  %5898 = vmatpush.xpose.msra.mxu0 %v4595_v50  ;;  %v2669_v30 = vpop.f32.mrf.mxu0  ;;  %v4453_v50 = vld [vmem:[%s12749_s3 + $0x8b0] sm:$0xff] }
 0x590   : > { %v2670_v11 = vadd.f32 %v2669_v30, %v2557_v26  ;;  %v4483_v26 = vld [vmem:[%s12749_s3 + $0x9a0] sm:$0xff]  ;;  %v4437_v30 = vld [vmem:[%s12749_s3 + $0x830] sm:$0xff] }
 0x591   : > { %5940 = vmatpush.xpose.msrb.mxu2 %v4565_v24  ;;  %5960 = vmatpush.xpose.msrb.mxu3 %v4566_v47  ;;  %v13066_v24 = vld [vmem:[#allocation35_spill] sm:$0xff]  ;;  %v13067_v47 = vld [vmem:[#allocation50_spill] sm:$0xff]  ;;  %v2565_v4 = vpop.f32.mrf.mxu3 }
 0x592   : > { %v2340_v59 = vadd.f32 %v13067_v47, %v13066_v24  ;;  %v4602_v24 = vld [vmem:[%s12749_s3 + $0xd58] sm:$0xff]  ;;  %v4631_v47 = vld [vmem:[%s12749_s3 + $0xe40] sm:$0xff] }
 0x593   : > { %5918 = vmatpush.xpose.msra.mxu1 %v4596_v10  ;;  %v2782_v14 = vpop.f32.mrf.mxu1  ;;  %5899 = vmatpush.xpose.msra.mxu0 %v4579_v54  ;;  %v4454_v10 = vld [vmem:[%s12749_s3 + $0x8b8] sm:$0xff] }
 0x594   : > { %v2783_v62 = vadd.f32 %v2782_v14, %v2670_v11  ;;  %v2453_v3 = vadd.f32 %v2452_v32, %v2340_v59  ;;  %v4438_v14 = vld [vmem:[%s12749_s3 + $0x838] sm:$0xff]  ;;  %v4664_v32 = vld [vmem:[%s12749_s3 + $0xf48] sm:$0xff] }
 0x595   : > { %5941 = vmatpush.xpose.msrb.mxu2 %v4549_v43  ;;  %5961 = vmatpush.xpose.msrb.mxu3 %v4550_v31  ;;  %v2455_v31 = vpop.f32.mrf.mxu2  ;;  %v4682_v11 = vld [vmem:[%s12749_s3 + $0xfd8] sm:$0xff]  ;;  %v4632_v59 = vld [vmem:[%s12749_s3 + $0xe48] sm:$0xff] }
 0x596   : > { %2881 = vst.msk [vmem:[%s7551_s16 + $0x298] sm:$0xff] %vm2799_vm0, %v2783_v62  ;;  %v2566_v43 = vadd.f32 %v2565_v4, %v2453_v3  ;;  %v4467_v62 = vld [vmem:[%s12749_s3 + $0x920] sm:$0xff]  ;;  %v4586_v3 = vld [vmem:[%s12749_s3 + $0xcd8] sm:$0xff] }
 0x597   : > { %5919 = vmatpush.xpose.msra.mxu1 %v4580_v22  ;;  %5900 = vmatpush.xpose.msra.mxu0 %v4563_v41  ;;  %v2672_v52 = vpop.f32.mrf.mxu0  ;;  %v4468_v41 = vld [vmem:[%s12749_s3 + $0x928] sm:$0xff]  ;;  %v4570_v4 = vld [vmem:[%s12749_s3 + $0xc58] sm:$0xff] }
 0x598   : > { %v2673_v37 = vadd.f32 %v2672_v52, %v2560_v19  ;;  %v13070_v19 = vld [vmem:[#allocation100_spill] sm:$0xff] }
 0x599   : > { %5942 = vmatpush.xpose.msrb.mxu2 %v4533_v8  ;;  %5962 = vmatpush.xpose.msrb.mxu3 %v4534_v21  ;;  %v13068_v8 = vld [vmem:[#allocation40_spill] sm:$0xff]  ;;  %v13069_v21 = vld [vmem:[#allocation55_spill] sm:$0xff] }
 0x59a   : > { %v2343_v15 = vadd.f32 %v13069_v21, %v13068_v8  ;;  %v4521_v8 = vld [vmem:[%s12749_s3 + $0xad0] sm:$0xff]  ;;  %v4522_v21 = vld [vmem:[%s12749_s3 + $0xad8] sm:$0xff] }
 0x59b   : > { %5920 = vmatpush.xpose.msra.mxu1 %v4564_v9  ;;  %v2785_v48 = vpop.f32.mrf.mxu1  ;;  %5901 = vmatpush.xpose.msra.mxu0 %v4547_v34  ;;  %v4665_v9 = vld [vmem:[%s12749_s3 + $0xf50] sm:$0xff]  ;;  %v13071_v34 = vld [vmem:[#allocation98_spill] sm:$0xff] }
 0x59c   : > { %v2786_v45 = vadd.f32 %v2785_v48, %v2673_v37  ;;  %v2456_v38 = vadd.f32 %v2455_v31, %v2343_v15  ;;  %v4451_v48 = vld [vmem:[%s12749_s3 + $0x8a0] sm:$0xff]  ;;  %v4554_v31 = vld [vmem:[%s12749_s3 + $0xbd8] sm:$0xff] }
 0x59d   : > { %5943 = vmatpush.xpose.msrb.mxu2 %v4517_v46  ;;  %5963 = vmatpush.xpose.msrb.mxu3 %v4518_v16  ;;  %v4666_v46 = vld [vmem:[%s12749_s3 + $0xf58] sm:$0xff]  ;;  %v2568_v16 = vpop.f32.mrf.mxu3  ;;  %v4551_v15 = vld [vmem:[%s12749_s3 + $0xbc0] sm:$0xff] }
 0x59e   : > { %2884 = vst.msk [vmem:[%s7551_s16 + $0x2b0] sm:$0xff] %vm2799_vm0, %v2786_v45  ;;  %v4679_v45 = vld [vmem:[%s12749_s3 + $0xfc0] sm:$0xff] }
 0x59f   : > { %5921 = vmatpush.xpose.msra.mxu1 %v4548_v49  ;;  %5902 = vmatpush.xpose.msra.mxu0 %v4531_v5  ;;  %v2675_v13 = vpop.f32.mrf.mxu0  ;;  %v2569_v49 = vadd.f32 %v2568_v16, %v2456_v38  ;;  %v4680_v5 = vld [vmem:[%s12749_s3 + $0xfc8] sm:$0xff]  ;;  %v4535_v38 = vld [vmem:[%s12749_s3 + $0xb40] sm:$0xff]  ;;  %v4473_v16 = vld [vmem:[%s12749_s3 + $0x950] sm:$0xff] }
 0x5a0   : > { %v2676_v42 = vadd.f32 %v2675_v13, %v2563_v56  ;;  %v13072_v56 = vld [vmem:[#allocation16_spill] sm:$0xff]  ;;  %v4618_v13 = vld [vmem:[%s12749_s3 + $0xdd8] sm:$0xff] }
 0x5a1   : > { %5944 = vmatpush.xpose.msrb.mxu2 %v4501_v27  ;;  %5964 = vmatpush.xpose.msrb.mxu3 %v4502_v18  ;;  %v4452_v27 = vld [vmem:[%s12749_s3 + $0x8a8] sm:$0xff] }
 0x5a3   : > { %5922 = vmatpush.xpose.msra.mxu1 %v4532_v17  ;;  %v2788_v61 = vpop.f32.mrf.mxu1  ;;  %5903 = vmatpush.xpose.msra.mxu0 %v4515_v1  ;;  %v4633_v17 = vld [vmem:[%s12749_s3 + $0xe50] sm:$0xff]  ;;  %v13073_v1 = vld [vmem:[#allocation42_spill] sm:$0xff] }
 0x5a4   : > { %v2789_v60 = vadd.f32 %v2788_v61, %v2676_v42  ;;  %v4647_v61 = vld [vmem:[%s12749_s3 + $0xec0] sm:$0xff]  ;;  %v4585_v42 = vld [vmem:[%s12749_s3 + $0xcd0] sm:$0xff] }
 0x5a5   : > { %5945 = vmatpush.xpose.msrb.mxu2 %v4485_v12  ;;  %5965 = vmatpush.xpose.msrb.mxu3 %v4486_v29  ;;  %v4634_v12 = vld [vmem:[%s12749_s3 + $0xe58] sm:$0xff]  ;;  %v4663_v29 = vld [vmem:[%s12749_s3 + $0xf40] sm:$0xff] }
 0x5a6   : > { %2887 = vst.msk [vmem:[%s7551_s16 + $0x2c8] sm:$0xff] %vm2799_vm0, %v2789_v60  ;;  %v4615_v60 = vld [vmem:[%s12749_s3 + $0xdc0] sm:$0xff] }
 0x5a7   : > { %5923 = vmatpush.xpose.msra.mxu1 %v4516_v7  ;;  %5904 = vmatpush.xpose.msra.mxu0 %v4499_v55  ;;  %v2678_v54 = vpop.f32.mrf.mxu0  ;;  %v4617_v7 = vld [vmem:[%s12749_s3 + $0xdd0] sm:$0xff]  ;;  %v4616_v55 = vld [vmem:[%s12749_s3 + $0xdc8] sm:$0xff] }
 0x5a8   : > { %v2679_v28 = vadd.f32 %v2678_v54, %v2566_v43  ;;  %v4553_v43 = vld [vmem:[%s12749_s3 + $0xbd0] sm:$0xff] }
 0x5a9   : > { %5946 = vmatpush.xpose.msrb.mxu2 %v4469_v44  ;;  %5966 = vmatpush.xpose.msrb.mxu3 %v4470_v63  ;;  %v4648_v44 = vld [vmem:[%s12749_s3 + $0xec8] sm:$0xff]  ;;  %v4601_v63 = vld [vmem:[%s12749_s3 + $0xd50] sm:$0xff] }
 0x5aa   : > { %v4537_v54 = vld [vmem:[%s12749_s3 + $0xb50] sm:$0xff] }
 0x5ab   : > { %5924 = vmatpush.xpose.msra.mxu1 %v4500_v51  ;;  %v2791_v22 = vpop.f32.mrf.mxu1  ;;  %5905 = vmatpush.xpose.msra.mxu0 %v4483_v26  ;;  %v4569_v51 = vld [vmem:[%s12749_s3 + $0xc50] sm:$0xff]  ;;  %v4583_v26 = vld [vmem:[%s12749_s3 + $0xcc0] sm:$0xff] }
 0x5ac   : > { %v2792_v39 = vadd.f32 %v2791_v22, %v2679_v28  ;;  %v4538_v22 = vld [vmem:[%s12749_s3 + $0xb58] sm:$0xff]  ;;  %v4552_v28 = vld [vmem:[%s12749_s3 + $0xbc8] sm:$0xff] }
 0x5ad   : > { %5947 = vmatpush.xpose.msrb.mxu2 %v4453_v50  ;;  %5967 = vmatpush.xpose.msrb.mxu3 %v4454_v10  ;;  %v4599_v50 = vld [vmem:[%s12749_s3 + $0xd40] sm:$0xff]  ;;  %v4600_v10 = vld [vmem:[%s12749_s3 + $0xd48] sm:$0xff] }
 0x5ae   : > { %2890 = vst.msk [vmem:[%s7551_s16 + $0x2e0] sm:$0xff] %vm2799_vm0, %v2792_v39  ;;  %v4536_v39 = vld [vmem:[%s12749_s3 + $0xb48] sm:$0xff] }
 0x5af   : > { %5925 = vmatpush.xpose.msra.mxu1 %v4484_v33  ;;  %5906 = vmatpush.xpose.msra.mxu0 %v4467_v62  ;;  %v2681_v52 = vpop.f32.mrf.mxu0  ;;  %v4584_v33 = vld [vmem:[%s12749_s3 + $0xcc8] sm:$0xff]  ;;  %v4489_v62 = vld [vmem:[%s12749_s3 + $0x9d0] sm:$0xff] }
 0x5b0   : > { %v2682_v18 = vadd.f32 %v2681_v52, %v2569_v49  ;;  %v4504_v49 = vld [vmem:[%s12749_s3 + $0xa48] sm:$0xff]  ;;  %v4457_v52 = vld [vmem:[%s12749_s3 + $0x8d0] sm:$0xff] }
 0x5b1   : > { %5948 = vmatpush.xpose.msrb.mxu2 %v4437_v30  ;;  %5968 = vmatpush.xpose.msrb.mxu3 %v4438_v14  ;;  %v4567_v30 = vld [vmem:[%s12749_s3 + $0xc40] sm:$0xff]  ;;  %v4568_v14 = vld [vmem:[%s12749_s3 + $0xc48] sm:$0xff] }
 0x5b3   : > { %5926 = vmatpush.xpose.msra.mxu1 %v4468_v41  ;;  %v2794_v25 = vpop.f32.mrf.mxu1  ;;  %5907 = vmatpush.xpose.msra.mxu0 %v4451_v48  ;;  %v4490_v41 = vld [vmem:[%s12749_s3 + $0x9d8] sm:$0xff] }
 0x5b4   : > { %5949 = vmatmul.f32.vlgmr.msrb.gmra.mxu2 %v13070_v19  ;;  %5969 = vmatmul.f32.vlgmr.msrb.gmra.mxu3 %v13071_v34  ;;  %v2795_v37 = vadd.f32 %v2794_v25, %v2682_v18  ;;  %v4474_v19 = vld [vmem:[%s12749_s3 + $0x958] sm:$0xff]  ;;  %v4503_v34 = vld [vmem:[%s12749_s3 + $0xa40] sm:$0xff]  ;;  %v4488_v18 = vld [vmem:[%s12749_s3 + $0x9c8] sm:$0xff] }
 0x5b5   : > { %6013 = vmatpush.xpose.msra.mxu2 %v4681_v20  ;;  %6033 = vmatpush.xpose.msra.mxu3 %v4682_v11  ;;  %v4505_v20 = vld [vmem:[%s12749_s3 + $0xa50] sm:$0xff]  ;;  %v4506_v11 = vld [vmem:[%s12749_s3 + $0xa58] sm:$0xff] }
 0x5b6   : > { %2893 = vst.msk [vmem:[%s7551_s16 + $0x2f8] sm:$0xff] %vm2799_vm0, %v2795_v37  ;;  %v4458_v48 = vld [vmem:[%s12749_s3 + $0x8d8] sm:$0xff]  ;;  %v4685_v25 = vld [vmem:[%s12749_s3 + $0xff0] sm:$0xff] }
 0x5b7   : > { %5927 = vmatpush.xpose.msra.mxu1 %v4452_v27  ;;  %5908 = vmatpush.xpose.msra.mxu0 %v4435_v58  ;;  %v4487_v27 = vld [vmem:[%s12749_s3 + $0x9c0] sm:$0xff]  ;;  %v4686_v37 = vld [vmem:[%s12749_s3 + $0xff8] sm:$0xff] }
 0x5b8   : > { %v4471_v58 = vld [vmem:[%s12749_s3 + $0x940] sm:$0xff] }
 0x5b9   : > { %6014 = vmatpush.xpose.msra.mxu2 %v4665_v9  ;;  %6034 = vmatpush.xpose.msra.mxu3 %v4666_v46  ;;  %v4519_v9 = vld [vmem:[%s12749_s3 + $0xac0] sm:$0xff]  ;;  %v4520_v46 = vld [vmem:[%s12749_s3 + $0xac8] sm:$0xff] }
 0x5ba   : > { %5909 = vmatmul.f32.vlgmr.msra.gmra.mxu0 %v13072_v56  ;;  %v4653_v56 = vld [vmem:[%s12749_s3 + $0xef0] sm:$0xff] }
 0x5bb   : > { %5928 = vmatpush.xpose.msra.mxu1 %v4436_v0  ;;  %5973 = vmatpush.xpose.msrb.mxu0 %v4679_v45  ;;  %v4472_v0 = vld [vmem:[%s12749_s3 + $0x948] sm:$0xff]  ;;  %v4669_v45 = vld [vmem:[%s12749_s3 + $0xf70] sm:$0xff] }
 0x5bd   : > { %6015 = vmatpush.xpose.msra.mxu2 %v4649_v36  ;;  %6035 = vmatpush.xpose.msra.mxu3 %v4650_v6  ;;  %v4441_v36 = vld [vmem:[%s12749_s3 + $0x850] sm:$0xff]  ;;  %v4442_v6 = vld [vmem:[%s12749_s3 + $0x858] sm:$0xff] }
 0x5be   : > { %5929 = vmatmul.f32.vlgmr.msra.gmra.mxu1 %v13073_v1  ;;  %v4654_v1 = vld [vmem:[%s12749_s3 + $0xef8] sm:$0xff] }
 0x5bf   : > { %5993 = vmatpush.xpose.msrb.mxu1 %v4680_v5  ;;  %5974 = vmatpush.xpose.msrb.mxu0 %v4663_v29  ;;  %v4670_v5 = vld [vmem:[%s12749_s3 + $0xf78] sm:$0xff]  ;;  %v4455_v29 = vld [vmem:[%s12749_s3 + $0x8c0] sm:$0xff] }
 0x5c1   : > { %6016 = vmatpush.xpose.msra.mxu2 %v4633_v17  ;;  %6036 = vmatpush.xpose.msra.mxu3 %v4634_v12  ;;  %v13074_v17 = vld [vmem:[#allocation28_spill] sm:$0xff]  ;;  %v13075_v12 = vld [vmem:[#allocation63_spill] sm:$0xff] }
 0x5c3   : > { %5994 = vmatpush.xpose.msrb.mxu1 %v4664_v32  ;;  %5975 = vmatpush.xpose.msrb.mxu0 %v4647_v61  ;;  %v4456_v32 = vld [vmem:[%s12749_s3 + $0x8c8] sm:$0xff]  ;;  %v4683_v61 = vld [vmem:[%s12749_s3 + $0xfe0] sm:$0xff] }
 0x5c5   : > { %6017 = vmatpush.xpose.msra.mxu2 %v4617_v7  ;;  %6037 = vmatpush.xpose.msra.mxu3 %v4618_v13  ;;  %v4439_v7 = vld [vmem:[%s12749_s3 + $0x840] sm:$0xff]  ;;  %v4440_v13 = vld [vmem:[%s12749_s3 + $0x848] sm:$0xff] }
 0x5c7   : > { %5995 = vmatpush.xpose.msrb.mxu1 %v4648_v44  ;;  %5976 = vmatpush.xpose.msrb.mxu0 %v4631_v47  ;;  %v4684_v44 = vld [vmem:[%s12749_s3 + $0xfe8] sm:$0xff]  ;;  %v4667_v47 = vld [vmem:[%s12749_s3 + $0xf60] sm:$0xff] }
 0x5c9   : > { %6018 = vmatpush.xpose.msra.mxu2 %v4601_v63  ;;  %6038 = vmatpush.xpose.msra.mxu3 %v4602_v24  ;;  %v4637_v63 = vld [vmem:[%s12749_s3 + $0xe70] sm:$0xff]  ;;  %v4638_v24 = vld [vmem:[%s12749_s3 + $0xe78] sm:$0xff] }
 0x5cb   : > { %5996 = vmatpush.xpose.msrb.mxu1 %v4632_v59  ;;  %5977 = vmatpush.xpose.msrb.mxu0 %v4615_v60  ;;  %v4668_v59 = vld [vmem:[%s12749_s3 + $0xf68] sm:$0xff]  ;;  %v4651_v60 = vld [vmem:[%s12749_s3 + $0xee0] sm:$0xff] }
 0x5cd   : > { %6019 = vmatpush.xpose.msra.mxu2 %v4585_v42  ;;  %6039 = vmatpush.xpose.msra.mxu3 %v4586_v3  ;;  %v4621_v42 = vld [vmem:[%s12749_s3 + $0xdf0] sm:$0xff]  ;;  %v4622_v3 = vld [vmem:[%s12749_s3 + $0xdf8] sm:$0xff] }
 0x5cf   : > { %5997 = vmatpush.xpose.msrb.mxu1 %v4616_v55  ;;  %5978 = vmatpush.xpose.msrb.mxu0 %v4599_v50  ;;  %v4606_v55 = vld [vmem:[%s12749_s3 + $0xd78] sm:$0xff]  ;;  %v4589_v50 = vld [vmem:[%s12749_s3 + $0xcf0] sm:$0xff] }
 0x5d1   : > { %6020 = vmatpush.xpose.msra.mxu2 %v4569_v51  ;;  %6040 = vmatpush.xpose.msra.mxu3 %v4570_v4  ;;  %v4635_v51 = vld [vmem:[%s12749_s3 + $0xe60] sm:$0xff]  ;;  %v4636_v4 = vld [vmem:[%s12749_s3 + $0xe68] sm:$0xff] }
 0x5d3   : > { %5998 = vmatpush.xpose.msrb.mxu1 %v4600_v10  ;;  %5979 = vmatpush.xpose.msrb.mxu0 %v4583_v26  ;;  %v4590_v10 = vld [vmem:[%s12749_s3 + $0xcf8] sm:$0xff]  ;;  %v4573_v26 = vld [vmem:[%s12749_s3 + $0xc70] sm:$0xff] }
 0x5d5   : > { %6021 = vmatpush.xpose.msra.mxu2 %v4553_v43  ;;  %6041 = vmatpush.xpose.msra.mxu3 %v4554_v31  ;;  %v4619_v43 = vld [vmem:[%s12749_s3 + $0xde0] sm:$0xff]  ;;  %v4620_v31 = vld [vmem:[%s12749_s3 + $0xde8] sm:$0xff] }
 0x5d7   : > { %5999 = vmatpush.xpose.msrb.mxu1 %v4584_v33  ;;  %5980 = vmatpush.xpose.msrb.mxu0 %v4567_v30  ;;  %v4574_v33 = vld [vmem:[%s12749_s3 + $0xc78] sm:$0xff]  ;;  %v4557_v30 = vld [vmem:[%s12749_s3 + $0xbf0] sm:$0xff] }
 0x5d9   : > { %6022 = vmatpush.xpose.msra.mxu2 %v4537_v54  ;;  %6042 = vmatpush.xpose.msra.mxu3 %v4538_v22  ;;  %v4603_v54 = vld [vmem:[%s12749_s3 + $0xd60] sm:$0xff]  ;;  %v4604_v22 = vld [vmem:[%s12749_s3 + $0xd68] sm:$0xff] }
 0x5db   : > { %6000 = vmatpush.xpose.msrb.mxu1 %v4568_v14  ;;  %5981 = vmatpush.xpose.msrb.mxu0 %v4551_v15  ;;  %v4558_v14 = vld [vmem:[%s12749_s3 + $0xbf8] sm:$0xff]  ;;  %v4541_v15 = vld [vmem:[%s12749_s3 + $0xb70] sm:$0xff] }
 0x5dd   : > { %6023 = vmatpush.xpose.msra.mxu2 %v4521_v8  ;;  %6043 = vmatpush.xpose.msra.mxu3 %v4522_v21  ;;  %v4587_v8 = vld [vmem:[%s12749_s3 + $0xce0] sm:$0xff]  ;;  %v4588_v21 = vld [vmem:[%s12749_s3 + $0xce8] sm:$0xff] }
 0x5df   : > { %6001 = vmatpush.xpose.msrb.mxu1 %v4552_v28  ;;  %5982 = vmatpush.xpose.msrb.mxu0 %v4535_v38  ;;  %v4542_v28 = vld [vmem:[%s12749_s3 + $0xb78] sm:$0xff]  ;;  %v4525_v38 = vld [vmem:[%s12749_s3 + $0xaf0] sm:$0xff] }
 0x5e1   : > { %6024 = vmatpush.xpose.msra.mxu2 %v4505_v20  ;;  %6044 = vmatpush.xpose.msra.mxu3 %v4506_v11  ;;  %v4571_v20 = vld [vmem:[%s12749_s3 + $0xc60] sm:$0xff]  ;;  %v4572_v11 = vld [vmem:[%s12749_s3 + $0xc68] sm:$0xff] }
 0x5e3   : > { %6002 = vmatpush.xpose.msrb.mxu1 %v4536_v39  ;;  %5983 = vmatpush.xpose.msrb.mxu0 %v4519_v9  ;;  %v4526_v39 = vld [vmem:[%s12749_s3 + $0xaf8] sm:$0xff]  ;;  %v4509_v9 = vld [vmem:[%s12749_s3 + $0xa70] sm:$0xff] }
 0x5e5   : > { %6025 = vmatpush.xpose.msra.mxu2 %v4489_v62  ;;  %6045 = vmatpush.xpose.msra.mxu3 %v4490_v41  ;;  %v4555_v62 = vld [vmem:[%s12749_s3 + $0xbe0] sm:$0xff]  ;;  %v4556_v41 = vld [vmem:[%s12749_s3 + $0xbe8] sm:$0xff] }
 0x5e7   : > { %6003 = vmatpush.xpose.msrb.mxu1 %v4520_v46  ;;  %5984 = vmatpush.xpose.msrb.mxu0 %v4503_v34  ;;  %v4510_v46 = vld [vmem:[%s12749_s3 + $0xa78] sm:$0xff]  ;;  %v4493_v34 = vld [vmem:[%s12749_s3 + $0x9f0] sm:$0xff] }
 0x5e9   : > { %6026 = vmatpush.xpose.msra.mxu2 %v4473_v16  ;;  %6046 = vmatpush.xpose.msra.mxu3 %v4474_v19  ;;  %v4539_v16 = vld [vmem:[%s12749_s3 + $0xb60] sm:$0xff]  ;;  %v4540_v19 = vld [vmem:[%s12749_s3 + $0xb68] sm:$0xff] }
 0x5eb   : > { %6004 = vmatpush.xpose.msrb.mxu1 %v4504_v49  ;;  %5985 = vmatpush.xpose.msrb.mxu0 %v4487_v27  ;;  %v4494_v49 = vld [vmem:[%s12749_s3 + $0x9f8] sm:$0xff]  ;;  %v4477_v27 = vld [vmem:[%s12749_s3 + $0x970] sm:$0xff] }
 0x5ed   : > { %6027 = vmatpush.xpose.msra.mxu2 %v4457_v52  ;;  %6047 = vmatpush.xpose.msra.mxu3 %v4458_v48  ;;  %v4523_v52 = vld [vmem:[%s12749_s3 + $0xae0] sm:$0xff]  ;;  %v4524_v48 = vld [vmem:[%s12749_s3 + $0xae8] sm:$0xff] }
 0x5ef   : > { %6005 = vmatpush.xpose.msrb.mxu1 %v4488_v18  ;;  %5986 = vmatpush.xpose.msrb.mxu0 %v4471_v58  ;;  %v4478_v18 = vld [vmem:[%s12749_s3 + $0x978] sm:$0xff]  ;;  %v4491_v58 = vld [vmem:[%s12749_s3 + $0x9e0] sm:$0xff] }
 0x5f1   : > { %6028 = vmatpush.xpose.msra.mxu2 %v4441_v36  ;;  %6048 = vmatpush.xpose.msra.mxu3 %v4442_v6  ;;  %v4507_v36 = vld [vmem:[%s12749_s3 + $0xa60] sm:$0xff]  ;;  %v4508_v6 = vld [vmem:[%s12749_s3 + $0xa68] sm:$0xff] }
 0x5f3   : > { %6006 = vmatpush.xpose.msrb.mxu1 %v4472_v0  ;;  %5987 = vmatpush.xpose.msrb.mxu0 %v4455_v29  ;;  %v4492_v0 = vld [vmem:[%s12749_s3 + $0x9e8] sm:$0xff]  ;;  %v4459_v29 = vld [vmem:[%s12749_s3 + $0x8e0] sm:$0xff] }
 0x5f4   : > { %6029 = vmatmul.f32.vlgmr.msra.gmra.mxu2 %v13074_v17  ;;  %6049 = vmatmul.f32.vlgmr.msra.gmra.mxu3 %v13075_v12  ;;  %v4475_v17 = vld [vmem:[%s12749_s3 + $0x960] sm:$0xff]  ;;  %v4476_v12 = vld [vmem:[%s12749_s3 + $0x968] sm:$0xff] }
 0x5f5   : > { %6093 = vmatpush.xpose.msrb.mxu2 %v4685_v25  ;;  %6113 = vmatpush.xpose.msrb.mxu3 %v4686_v37  ;;  %v4461_v25 = vld [vmem:[%s12749_s3 + $0x8f0] sm:$0xff]  ;;  %v4462_v37 = vld [vmem:[%s12749_s3 + $0x8f8] sm:$0xff] }
 0x5f7   : > { %6007 = vmatpush.xpose.msrb.mxu1 %v4456_v32  ;;  %5988 = vmatpush.xpose.msrb.mxu0 %v4439_v7  ;;  %v4460_v32 = vld [vmem:[%s12749_s3 + $0x8e8] sm:$0xff] }
 0x5f9   : > { %6094 = vmatpush.xpose.msrb.mxu2 %v4669_v45  ;;  %6114 = vmatpush.xpose.msrb.mxu3 %v4670_v5  ;;  %v4445_v45 = vld [vmem:[%s12749_s3 + $0x870] sm:$0xff]  ;;  %v4446_v5 = vld [vmem:[%s12749_s3 + $0x878] sm:$0xff] }
 0x5fa   : > { %5989 = vmatmul.f32.vlgmr.msrb.gmra.mxu0 %v13040_v2  ;;  %v4605_v2 = vld [vmem:[%s12749_s3 + $0xd70] sm:$0xff] }
 0x5fb   : > { %6008 = vmatpush.xpose.msrb.mxu1 %v4440_v13  ;;  %6053 = vmatpush.xpose.msra.mxu0 %v4683_v61 }
 0x5fd   : > { %6095 = vmatpush.xpose.msrb.mxu2 %v4653_v56  ;;  %6115 = vmatpush.xpose.msrb.mxu3 %v4654_v1  ;;  %v4443_v56 = vld [vmem:[%s12749_s3 + $0x860] sm:$0xff]  ;;  %v5530_v1 = vpop.f32.mrf.mxu3 }
 0x5fe   : > { %6009 = vmatmul.f32.vlgmr.msrb.gmra.mxu1 %v10714_v35  ;;  %v4652_v35 = vld [vmem:[%s12749_s3 + $0xee8] sm:$0xff] }
 0x5ff   : > { %6073 = vmatpush.xpose.msra.mxu1 %v4684_v44  ;;  %6054 = vmatpush.xpose.msra.mxu0 %v4667_v47  ;;  %v5690_v47 = vpop.f32.mrf.mxu1 }
 0x601   : > { %6096 = vmatpush.xpose.msrb.mxu2 %v4637_v63  ;;  %6116 = vmatpush.xpose.msrb.mxu3 %v4638_v24  ;;  %v5670_v63 = vpop.f32.mrf.mxu0 }
 0x603   : > { %6074 = vmatpush.xpose.msra.mxu1 %v4668_v59  ;;  %6055 = vmatpush.xpose.msra.mxu0 %v4651_v60 }
 0x605   : > { %6097 = vmatpush.xpose.msrb.mxu2 %v4621_v42  ;;  %6117 = vmatpush.xpose.msrb.mxu3 %v4622_v3  ;;  %v5570_v13 = vpop.f32.mrf.mxu3  ;;  %v4687_v3 = vld [vmem:[%s12750_s4] sm:$0x3] }
 0x607   : > { %6075 = vmatpush.xpose.msra.mxu1 %v4652_v35  ;;  %6056 = vmatpush.xpose.msra.mxu0 %v4635_v51  ;;  %v5489_v35 = vperm.slane %v4687_v3, 0 }
 0x609   : > { %6098 = vmatpush.xpose.msrb.mxu2 %v4605_v2  ;;  %6118 = vmatpush.xpose.msrb.mxu3 %v4606_v55  ;;  %v5750_v42 = vpop.f32.mrf.mxu0  ;;  %v5770_v2 = vpop.f32.mrf.mxu1 }
 0x60b   : > { %6076 = vmatpush.xpose.msra.mxu1 %v4636_v4  ;;  %6057 = vmatpush.xpose.msra.mxu0 %v4619_v43 }
 0x60d   : > { %6099 = vmatpush.xpose.msrb.mxu2 %v4589_v50  ;;  %6119 = vmatpush.xpose.msrb.mxu3 %v4590_v10  ;;  %v5610_v44 = vpop.f32.mrf.mxu3 }
 0x60f   : > { %6077 = vmatpush.xpose.msra.mxu1 %v4620_v31  ;;  %6058 = vmatpush.xpose.msra.mxu0 %v4603_v54 }
 0x611   : > { %6100 = vmatpush.xpose.msrb.mxu2 %v4573_v26  ;;  %6120 = vmatpush.xpose.msrb.mxu3 %v4574_v33  ;;  %v5830_v55 = vpop.f32.mrf.mxu0  ;;  %v5850_v31 = vpop.f32.mrf.mxu1 }
 0x613   : > { %6078 = vmatpush.xpose.msra.mxu1 %v4604_v22  ;;  %6059 = vmatpush.xpose.msra.mxu0 %v4587_v8 }
 0x615   : > { %6101 = vmatpush.xpose.msrb.mxu2 %v4557_v30  ;;  %6121 = vmatpush.xpose.msrb.mxu3 %v4558_v14  ;;  %v5650_v59 = vpop.f32.mrf.mxu3 }
 0x617   : > { %6079 = vmatpush.xpose.msra.mxu1 %v4588_v21  ;;  %6060 = vmatpush.xpose.msra.mxu0 %v4571_v20 }
 0x619   : > { %6102 = vmatpush.xpose.msrb.mxu2 %v4541_v15  ;;  %6122 = vmatpush.xpose.msrb.mxu3 %v4542_v28 }
 0x61b   : > { %6080 = vmatpush.xpose.msra.mxu1 %v4572_v11  ;;  %6061 = vmatpush.xpose.msra.mxu0 %v4555_v62 }
 0x61d   : > { %6103 = vmatpush.xpose.msrb.mxu2 %v4525_v38  ;;  %6123 = vmatpush.xpose.msrb.mxu3 %v4526_v39 }
 0x61f   : > { %6081 = vmatpush.xpose.msra.mxu1 %v4556_v41  ;;  %6062 = vmatpush.xpose.msra.mxu0 %v4539_v16 }
 0x621   : > { %6104 = vmatpush.xpose.msrb.mxu2 %v4509_v9  ;;  %6124 = vmatpush.xpose.msrb.mxu3 %v4510_v46 }
 0x623   : > { %6082 = vmatpush.xpose.msra.mxu1 %v4540_v19  ;;  %6063 = vmatpush.xpose.msra.mxu0 %v4523_v52 }
 0x625   : > { %6105 = vmatpush.xpose.msrb.mxu2 %v4493_v34  ;;  %6125 = vmatpush.xpose.msrb.mxu3 %v4494_v49 }
 0x627   : > { %6083 = vmatpush.xpose.msra.mxu1 %v4524_v48  ;;  %6064 = vmatpush.xpose.msra.mxu0 %v4507_v36 }
 0x629   : > { %6106 = vmatpush.xpose.msrb.mxu2 %v4477_v27  ;;  %6126 = vmatpush.xpose.msrb.mxu3 %v4478_v18 }
 0x62b   : > { %6084 = vmatpush.xpose.msra.mxu1 %v4508_v6  ;;  %6065 = vmatpush.xpose.msra.mxu0 %v4491_v58 }
 0x62d   : > { %6107 = vmatpush.xpose.msrb.mxu2 %v4461_v25  ;;  %6127 = vmatpush.xpose.msrb.mxu3 %v4462_v37 }
 0x62f   : > { %6085 = vmatpush.xpose.msra.mxu1 %v4492_v0  ;;  %6066 = vmatpush.xpose.msra.mxu0 %v4475_v17 }
 0x631   : > { %6108 = vmatpush.xpose.msrb.mxu2 %v4445_v45  ;;  %6128 = vmatpush.xpose.msrb.mxu3 %v4446_v5 }
 0x633   : > { %6086 = vmatpush.xpose.msra.mxu1 %v4476_v12  ;;  %6067 = vmatpush.xpose.msra.mxu0 %v4459_v29 }
 0x634   : > { %6109 = vmatmul.f32.vlgmr.msrb.gmra.mxu2 %v11814_v23  ;;  %6129 = vmatmul.f32.vlgmr.msrb.gmra.mxu3 %v11817_v40  ;;  %v4444_v23 = vld [vmem:[%s12749_s3 + $0x868] sm:$0xff]  ;;  %v5510_v40 = vpop.f32.mrf.mxu2 }
 0x635   : > { %v5511_v51 = vadd.f32 %v5510_v40, %v5489_v35 }
 0x637   : > { %6087 = vmatpush.xpose.msra.mxu1 %v4460_v32  ;;  %6068 = vmatpush.xpose.msra.mxu0 %v4443_v56  ;;  %v5531_v10 = vadd.f32 %v5530_v1, %v5511_v51  ;;  %v5910_v21 = vpop.f32.mrf.mxu0 }
 0x63a   : > { %6069 = vmatmul.f32.vlgmr.msra.gmra.mxu0 %v11918_v57  ;;  %v5730_v57 = vpop.f32.mrf.mxu3 }
 0x63b   : > { %6088 = vmatpush.xpose.msra.mxu1 %v4444_v23  ;;  %v5930_v38 = vpop.f32.mrf.mxu1 }
 0x63c   : > { %v5550_v7 = vpop.f32.mrf.mxu2 }
 0x63d   : > { %v5551_v26 = vadd.f32 %v5550_v7, %v5531_v10 }
 0x63e   : > { %6089 = vmatmul.f32.vlgmr.msra.gmra.mxu1 %v11921_v53  ;;  %v5490_v53 = vperm.slane %v4687_v3, 1 }
 0x63f   : > { %v5571_v22 = vadd.f32 %v5570_v13, %v5551_v26 }
 0x640   : > { %v5831_v50 = vadd.f32 %v5830_v55, %v5490_v53 }
 0x642   : > { %v5810_v43 = vpop.f32.mrf.mxu3  ;;  %v5851_v33 = vadd.f32 %v5850_v31, %v5831_v50 }
 0x644   : > { %v5590_v61 = vpop.f32.mrf.mxu2 }
 0x645   : > { %v5591_v14 = vadd.f32 %v5590_v61, %v5571_v22  ;;  %v13076_v61 = vlaneseq }
 0x647   : > { %v5611_v28 = vadd.f32 %v5610_v44, %v5591_v14  ;;  %vm6141_vm2 = vcmp.lt.s32.totalorder %v13076_v61, 256 }
 0x64a   : > { %v5890_v8 = vpop.f32.mrf.mxu3 }
 0x64c   : > { %v5630_v24 = vpop.f32.mrf.mxu2 }
 0x64d   : > { %v5631_v11 = vadd.f32 %v5630_v24, %v5611_v28 }
 0x64f   : > { %v5651_v62 = vadd.f32 %v5650_v59, %v5631_v11 }
 0x651   : > { %v5671_v9 = vadd.f32 %v5670_v63, %v5651_v62 }
 0x652   : > { %v5970_v16 = vpop.f32.mrf.mxu3 }
 0x653   : > { %v5691_v34 = vadd.f32 %v5690_v47, %v5671_v9 }
 0x654   : > { %v5710_v60 = vpop.f32.mrf.mxu2 }
 0x655   : > { %v5711_v48 = vadd.f32 %v5710_v60, %v5691_v34 }
 0x657   : > { %v5731_v36 = vadd.f32 %v5730_v57, %v5711_v48 }
 0x659   : > { %v5751_v37 = vadd.f32 %v5750_v42, %v5731_v36 }
 0x65b   : > { %v5771_v5 = vadd.f32 %v5770_v2, %v5751_v37 }
 0x65c   : > { %v5790_v4 = vpop.f32.mrf.mxu2 }
 0x65d   : > { %v5791_v56 = vadd.f32 %v5790_v4, %v5771_v5 }
 0x65f   : > { %v5811_v7 = vadd.f32 %v5810_v43, %v5791_v56 }
 0x664   : > { %v5870_v54 = vpop.f32.mrf.mxu2 }
 0x665   : > { %v5871_v30 = vadd.f32 %v5870_v54, %v5851_v33 }
 0x667   : > { %v5891_v15 = vadd.f32 %v5890_v8, %v5871_v30 }
 0x669   : > { %v5911_v20 = vadd.f32 %v5910_v21, %v5891_v15 }
 0x66b   : > { %v5931_v39 = vadd.f32 %v5930_v38, %v5911_v20 }
 0x66c   : > { %v5950_v41 = vpop.f32.mrf.mxu2 }
 0x66d   : > { %v5951_v46 = vadd.f32 %v5950_v41, %v5931_v39 }
 0x66f   : > { %v5971_v49 = vadd.f32 %v5970_v16, %v5951_v46 }
 0x677   : > { %v5990_v19 = vpop.f32.mrf.mxu0  ;;  %v6030_v6 = vpop.f32.mrf.mxu2 }
 0x678   : > { %v5991_v52 = vadd.f32 %v5990_v19, %v5971_v49  ;;  %v6050_v58 = vpop.f32.mrf.mxu3 }
 0x67b   : > { %v6010_v27 = vpop.f32.mrf.mxu1 }
 0x67c   : > { %v6011_v18 = vadd.f32 %v6010_v27, %v5991_v52 }
 0x67e   : > { %v6031_v25 = vadd.f32 %v6030_v6, %v6011_v18 }
 0x680   : > { %v6051_v0 = vadd.f32 %v6050_v58, %v6031_v25 }
 0x6b7   : > { %v6070_v45 = vpop.f32.mrf.mxu0  ;;  %v6110_v32 = vpop.f32.mrf.mxu2 }
 0x6b8   : > { %v6071_v17 = vadd.f32 %v6070_v45, %v6051_v0  ;;  %v6130_v40 = vpop.f32.mrf.mxu3 }
 0x6bb   : > { %v6090_v12 = vpop.f32.mrf.mxu1 }
 0x6bc   : > { %v6091_v29 = vadd.f32 %v6090_v12, %v6071_v17 }
 0x6be   : > { %v6111_v23 = vadd.f32 %v6110_v32, %v6091_v29 }
 0x6c0   : > { %v6131_v1 = vadd.f32 %v6130_v40, %v6111_v23 }
 0x6c2   : > { %v6135_v13 = vrot.slane %v6131_v1, 7 }
 0x6c4   : > { %v6137_v44 = vsel %vm6136_vm1, %v5811_v7, %v6135_v13 }
 0x6c5   : > { %6143 = vst.msk [vmem:[%s282_s8] sm:$0x3] %vm6141_vm2, %v6137_v44 }
 0x6c6 PF: > { %s17_s21 = sadd.s32 1, %s6651_s21  }
 0x6c7   : > { %p14_p4 = scmp.ge.s32.totalorder %s17_s21, 4  }
 0x6c9   :  { %16 = sbr.rel (!%p14_p4) target bundleno = 1 (0x1), region = 85 }

</bundles_post_ra>
